<compile_context>
chip_gen: v7x
topology: tpu7x:2x2x1
jax: 0.10.0
libtpu: 0.0.40
codegen_flags: <defaults>
</compile_context>

<pallas_src>
import math

import jax
import jax.numpy as jnp
from jax.experimental import pallas as pl
from jax.experimental.pallas import tpu as pltpu

# Small-but-consistent hyperparameters (module defaults scaled down).
INPUT_DIM = 3
EMBED_DIM = 32
SEQ_LENGTH = 8
NUM_HEADS = 4
NUM_LAYERS = 2
NUM_CLASSES = 5
LN_EPS = 1e-5
DIN_PAD = 8            # input channels zero-padded to a sublane-friendly width
BATCH_TILE = 8         # sequences processed per grid step
FF_DIM = 4 * EMBED_DIM  # 128 == padded logits lane width


# ----------------------------------------------------------------------------- kernel
def _make_kernel(TB, T, E, H, L, Dp):
    Dh = E // H
    N = TB * T
    E3 = 3 * E
    F = 4 * E

    def layernorm(y, w, b):
        mu = jnp.mean(y, axis=-1, keepdims=True)
        var = jnp.mean((y - mu) ** 2, axis=-1, keepdims=True)
        return (y - mu) * jax.lax.rsqrt(var + LN_EPS) * w + b

    def split_heads(z):
        # (N, E) -> (TB*H, T, Dh): single relayout, everything downstream is batched.
        return z.reshape(TB, T, H, Dh).transpose(0, 2, 1, 3).reshape(TB * H, T, Dh)

    def kernel(x_ref, misc_ref, biasw_ref, vecs_ref,
               qkvw_ref, opw_ref, l1w_ref, l2w_ref, out_ref):
        misc = misc_ref[...]                      # (Dp+T, E)
        biasw = biasw_ref[...]                    # (8, F)
        emb_w = misc[0:Dp, :]                     # (Dp, E)
        posb = misc[Dp:Dp + T, :]                 # (T, E)  (pos emb + folded emb bias)

        # ---- input embedding + positional embedding -------------------------------
        x = x_ref[...].reshape(N, Dp)             # (TB*T, Dp)
        h = jnp.dot(x, emb_w, preferred_element_type=jnp.float32)     # (N, E)
        h = (h.reshape(TB, T, E) + posb[None]).reshape(N, E)

        # ---- transformer encoder layers (post-norm, ReLU feed-forward) ------------
        for l in range(L):
            wv = vecs_ref[l]                      # (8, E): opb,n1w,n1b,n2w,n2b,l2b,_,_

            qkv = jnp.dot(h, qkvw_ref[l], preferred_element_type=jnp.float32)
            qkv = qkv + biasw[2 * l:2 * l + 1, 0:E3]                  # (N, 3E)

            q = split_heads(qkv[:, 0:E])          # q already pre-scaled by 1/sqrt(Dh)
            k = split_heads(qkv[:, E:2 * E])
            v = split_heads(qkv[:, 2 * E:E3])

            # Batched attention over all (batch, head) pairs: one contraction each.
            s = jnp.einsum("ntd,nsd->nts", q, k,
                           preferred_element_type=jnp.float32)        # (TB*H, T, T)
            s = s - jnp.max(s, axis=-1, keepdims=True)
            p = jnp.exp(s)
            p = p * pl.reciprocal(jnp.sum(p, axis=-1, keepdims=True), approx=True)
            o = jnp.einsum("nts,nsd->ntd", p, v,
                           preferred_element_type=jnp.float32)        # (TB*H, T, Dh)
            attn = o.reshape(TB, H, T, Dh).transpose(0, 2, 1, 3).reshape(N, E)

            attn = jnp.dot(attn, opw_ref[l],
                           preferred_element_type=jnp.float32) + wv[0:1]
            h = layernorm(h + attn, wv[1:2], wv[2:3])

            ff = jnp.dot(h, l1w_ref[l], preferred_element_type=jnp.float32)
            ff = jnp.maximum(ff + biasw[2 * l + 1:2 * l + 2, :], 0.0)  # (N, 4E)
            ff = jnp.dot(ff, l2w_ref[l], preferred_element_type=jnp.float32) + wv[5:6]
            h = layernorm(h + ff, wv[3:4], wv[4:5])

        # ---- temporal mean pooling + classification head (dense (TB, 128) store) --
        feat = jnp.sum(h.reshape(TB, T, E), axis=1) * (1.0 / T)       # (TB, E)
        logits = jnp.dot(feat, l1w_ref[L], preferred_element_type=jnp.float32)
        out_ref[...] = logits + biasw[2 * L:2 * L + 1, :]              # (TB, 128)

    return kernel


# ----------------------------------------------------------------------------- params
def init_params(key):
    E, Din, L, C, S = EMBED_DIM, INPUT_DIM, NUM_LAYERS, NUM_CLASSES, SEQ_LENGTH
    keys = iter(jax.random.split(key, 32))

    def nrm(shape, scale=0.05):
        return (scale * jax.random.normal(next(keys), shape)).astype(jnp.float32)

    params = {
        "emb_w": nrm((E, Din)),            # PyTorch Linear weight layout (out, in)
        "emb_b": nrm((E,)),
        "pos_emb": nrm((S, E)),            # nn.Embedding(seq_length, embed_dim)
        "head_w": nrm((C, E)),
        "head_b": nrm((C,)),
        "layers": [],
    }
    for _ in range(L):
        params["layers"].append({
            "in_proj_w": nrm((3 * E, E)),
            "in_proj_b": nrm((3 * E,)),
            "out_proj_w": nrm((E, E)),
            "out_proj_b": nrm((E,)),
            "norm1_w": jnp.ones((E,), jnp.float32),
            "norm1_b": jnp.zeros((E,), jnp.float32),
            "norm2_w": jnp.ones((E,), jnp.float32),
            "norm2_b": jnp.zeros((E,), jnp.float32),
            "lin1_w": nrm((4 * E, E)),
            "lin1_b": nrm((4 * E,)),
            "lin2_w": nrm((E, 4 * E)),
            "lin2_b": nrm((E,)),
        })
    return params


# ----------------------------------------------------------------------------- wrapper
def imu_transformer_forward(x, params):
    B, T, Din = x.shape
    E, H, L, C = EMBED_DIM, NUM_HEADS, NUM_LAYERS, NUM_CLASSES
    Dp, TB, F = DIN_PAD, BATCH_TILE, FF_DIM
    Dh = E // H
    scale = 1.0 / math.sqrt(Dh)
    assert T <= SEQ_LENGTH and E % H == 0

    # Pad batch to a multiple of the batch tile; padded rows are discarded at the end.
    Bp = ((B + TB - 1) // TB) * TB
    num_blocks = Bp // TB

    # Zero-pad the channel dim so the embedding GEMM operand is not 3 lanes wide.
    x_pad = jnp.zeros((Bp, T, Dp), jnp.float32)
    x_pad = x_pad.at[:B, :, :Din].set(x.astype(jnp.float32))

    # --- consolidated weight slabs (host-side layout work, done once) --------------
    # misc (Dp+T, E): [emb_w^T (zero-padded rows) ; pos table with folded emb bias]
    emb_wT = jnp.zeros((Dp, E), jnp.float32).at[:Din, :].set(params["emb_w"].T)
    posb = (params["pos_emb"][:T] + params["emb_b"][None, :]).astype(jnp.float32)
    misc = jnp.concatenate([emb_wT, posb], axis=0)                      # (Dp+T, E)

    ls = params["layers"]

    # qkv weights (L, E, 3E) with the softmax scale folded into the q columns.
    def _qkvw(lp):
        w = lp["in_proj_w"].T.astype(jnp.float32)                       # (E, 3E)
        return w.at[:, :E].multiply(scale)
    qkvw = jnp.stack([_qkvw(lp) for lp in ls])                          # (L, E, 3E)
    opw = jnp.stack([lp["out_proj_w"].T for lp in ls]).astype(jnp.float32)   # (L, E, E)
    l2w = jnp.stack([lp["lin2_w"].T for lp in ls]).astype(jnp.float32)       # (L, 4E, E)

    # lin1 weights + head weight share the (E, 128) shape -> one stack (L+1, E, 4E).
    head_w_pad = jnp.zeros((E, F), jnp.float32).at[:, :C].set(params["head_w"].T)
    l1w = jnp.stack([lp["lin1_w"].T.astype(jnp.float32) for lp in ls] + [head_w_pad])

    # biasw (8, 128): rows [qkv_b(l0), lin1_b(l0), qkv_b(l1), lin1_b(l1), head_b, 0, 0, 0]
    rows = []
    for lp in ls:
        qb = lp["in_proj_b"].astype(jnp.float32).at[:E].multiply(scale)
        rows.append(jnp.zeros((F,), jnp.float32).at[:3 * E].set(qb))
        rows.append(lp["lin1_b"].astype(jnp.float32))
    rows.append(jnp.zeros((F,), jnp.float32).at[:C].set(params["head_b"]))
    while len(rows) < 8:
        rows.append(jnp.zeros((F,), jnp.float32))
    biasw = jnp.stack(rows)                                             # (8, F)

    # vecs (L, 8, E): per-layer rows [opb, n1w, n1b, n2w, n2b, l2b, 0, 0]
    zE = jnp.zeros((E,), jnp.float32)
    vecs = jnp.stack([
        jnp.stack([lp["out_proj_b"], lp["norm1_w"], lp["norm1_b"],
                   lp["norm2_w"], lp["norm2_b"], lp["lin2_b"], zE, zE]).astype(jnp.float32)
        for lp in ls])                                                  # (L, 8, E)

    resident_inputs = (misc, biasw, vecs, qkvw, opw, l1w, l2w)

    # Weights / tables: full-array blocks, constant index_map -> resident across the grid.
    def resident(arr):
        zeros = (0,) * arr.ndim
        return pl.BlockSpec(arr.shape, lambda b, _z=zeros: _z)

    in_specs = [pl.BlockSpec((TB, T, Dp), lambda b: (b, 0, 0))]
    in_specs += [resident(a) for a in resident_inputs]
    out_spec = pl.BlockSpec((TB, F), lambda b: (b, 0))

    # Rough cost estimate so XLA schedules/overlaps this small kernel sensibly.
    flops_per_seq = (2 * T * Dp * E
                     + L * (2 * T * E * 3 * E       # qkv projection
                            + 4 * H * T * T * Dh    # scores + attn*V
                            + 2 * T * E * E         # out projection
                            + 4 * T * E * 4 * E)    # feed-forward
                     + 2 * E * F)
    weight_bytes = sum(int(a.size) * 4 for a in resident_inputs)
    cost = pl.CostEstimate(
        flops=int(Bp * flops_per_seq),
        transcendentals=int(Bp * L * (H * T * T + H * T)),
        bytes_accessed=int(x_pad.size) * 4 + weight_bytes + Bp * F * 4)

    kernel = _make_kernel(TB, T, E, H, L, Dp)
    out = pl.pallas_call(
        kernel,
        grid=(num_blocks,),
        out_shape=jax.ShapeDtypeStruct((Bp, F), jnp.float32),
        in_specs=in_specs,
        out_specs=out_spec,
        compiler_params=pltpu.CompilerParams(
            dimension_semantics=("parallel",),      # megacore / v7x TC sharding
            vmem_limit_bytes=32 * 1024 * 1024),
        cost_estimate=cost,
    )(x_pad, *resident_inputs)
    return out[:B, :C]


# ----------------------------------------------------------------------------- reference
def _ln(y, w, b):
    mu = jnp.mean(y, axis=-1, keepdims=True)
    var = jnp.mean((y - mu) ** 2, axis=-1, keepdims=True)
    return (y - mu) * jax.lax.rsqrt(var + LN_EPS) * w + b


def reference_forward(x, params):
    B, T, _ = x.shape
    E, H = EMBED_DIM, NUM_HEADS
    Dh = E // H
    h = x.astype(jnp.float32) @ params["emb_w"].T + params["emb_b"]
    h = h + params["pos_emb"][:T][None]
    for lp in params["layers"]:
        qkv = h @ lp["in_proj_w"].T + lp["in_proj_b"]
        q, k, v = qkv[..., :E], qkv[..., E:2 * E], qkv[..., 2 * E:]
        qh = q.reshape(B, T, H, Dh).transpose(0, 2, 1, 3) / math.sqrt(Dh)
        kh = k.reshape(B, T, H, Dh).transpose(0, 2, 1, 3)
        vh = v.reshape(B, T, H, Dh).transpose(0, 2, 1, 3)
        s = jnp.einsum("bhtd,bhsd->bhts", qh, kh)
        p = jax.nn.softmax(s, axis=-1)
        o = jnp.einsum("bhts,bhsd->bhtd", p, vh).transpose(0, 2, 1, 3).reshape(B, T, E)
        o = o @ lp["out_proj_w"].T + lp["out_proj_b"]
        h = _ln(h + o, lp["norm1_w"], lp["norm1_b"])
        ff = jax.nn.relu(h @ lp["lin1_w"].T + lp["lin1_b"]) @ lp["lin2_w"].T + lp["lin2_b"]
        h = _ln(h + ff, lp["norm2_w"], lp["norm2_b"])
    feat = h.mean(axis=1)
    return feat @ params["head_w"].T + params["head_b"]


# ----------------------------------------------------------------------------- main
if __name__ == "__main__":
    key = jax.random.PRNGKey(0)
    pkey, xkey = jax.random.split(key)
    params = init_params(pkey)

    # B=12 exercises both the batch-tile padding path (12 -> 16) and a 2-block grid.
    B, T = 12, SEQ_LENGTH
    x = jax.random.normal(xkey, (B, T, INPUT_DIM), dtype=jnp.float32)

    out = imu_transformer_forward(x, params)
    jax.block_until_ready(out)

    ref = reference_forward(x, params)
    assert out.shape == (B, NUM_CLASSES)
    # Tolerance slightly relaxed vs. pure-f32 (softmax uses EUP approx reciprocal).
    assert jnp.allclose(out, ref, atol=2e-3, rtol=2e-3), (out, ref)
    print("KERNEL_OK")
</pallas_src>

<mosaic_0001>
module attributes {stable_mosaic.version = 11 : i64} {
  func.func @kernel(%arg0: i32, %arg1: memref<8x8x8xf32, #tpu.memory_space<vmem>>, %arg2: memref<16x32xf32, #tpu.memory_space<vmem>>, %arg3: memref<8x128xf32, #tpu.memory_space<vmem>>, %arg4: memref<2x8x32xf32, #tpu.memory_space<vmem>>, %arg5: memref<2x32x96xf32, #tpu.memory_space<vmem>>, %arg6: memref<2x32x32xf32, #tpu.memory_space<vmem>>, %arg7: memref<3x32x128xf32, #tpu.memory_space<vmem>>, %arg8: memref<2x128x32xf32, #tpu.memory_space<vmem>>, %arg9: memref<8x128xf32, #tpu.memory_space<vmem>>) attributes {dimension_semantics = [#tpu.dimension_semantics<parallel>], iteration_bounds = array<i64: 2>, scalar_prefetch = 0 : i64, scratch_operands = 0 : i64, tpu.core_type = #tpu.core_type<tc>, window_params = [{transform_indices = @transform_0, window_bounds = array<i64: 8, 8, 8>}, {pipeline_mode = #tpu.pipeline_mode<synchronous>, transform_indices = @transform_1, window_bounds = array<i64: 16, 32>}, {pipeline_mode = #tpu.pipeline_mode<synchronous>, transform_indices = @transform_2, window_bounds = array<i64: 8, 128>}, {pipeline_mode = #tpu.pipeline_mode<synchronous>, transform_indices = @transform_3, window_bounds = array<i64: 2, 8, 32>}, {pipeline_mode = #tpu.pipeline_mode<synchronous>, transform_indices = @transform_4, window_bounds = array<i64: 2, 32, 96>}, {pipeline_mode = #tpu.pipeline_mode<synchronous>, transform_indices = @transform_5, window_bounds = array<i64: 2, 32, 32>}, {pipeline_mode = #tpu.pipeline_mode<synchronous>, transform_indices = @transform_6, window_bounds = array<i64: 3, 32, 128>}, {pipeline_mode = #tpu.pipeline_mode<synchronous>, transform_indices = @transform_7, window_bounds = array<i64: 2, 128, 32>}, {transform_indices = @transform_8, window_bounds = array<i64: 8, 128>}]} {
    %c0 = arith.constant 0 : index
    %c0_0 = arith.constant 0 : index
    %0 = vector.load %arg2[%c0, %c0_0] : memref<16x32xf32, #tpu.memory_space<vmem>>, vector<16x32xf32>
    %c0_1 = arith.constant 0 : index
    %c0_2 = arith.constant 0 : index
    %1 = vector.load %arg3[%c0_1, %c0_2] : memref<8x128xf32, #tpu.memory_space<vmem>>, vector<8x128xf32>
    %2 = vector.extract_strided_slice %0 {offsets = [0, 0], sizes = [8, 32], strides = [1, 1]} : vector<16x32xf32> to vector<8x32xf32>
    %3 = vector.extract_strided_slice %0 {offsets = [8, 0], sizes = [8, 32], strides = [1, 1]} : vector<16x32xf32> to vector<8x32xf32>
    %c0_3 = arith.constant 0 : index
    %c0_4 = arith.constant 0 : index
    %c0_5 = arith.constant 0 : index
    %4 = vector.load %arg1[%c0_3, %c0_4, %c0_5] : memref<8x8x8xf32, #tpu.memory_space<vmem>>, vector<8x8x8xf32>
    %5 = vector.shape_cast %4 : vector<8x8x8xf32> to vector<64x8xf32>
    %cst = arith.constant dense<0.000000e+00> : vector<64x32xf32>
    %6 = tpu.matmul %5, %2, %cst {dimension_numbers = #tpu.dot_dimension_numbers<[1], [0], [0], [1], [0, 0, 1, 1], [], []>} : vector<64x8xf32>, vector<8x32xf32>, vector<64x32xf32> -> vector<64x32xf32>
    %7 = vector.shape_cast %6 : vector<64x32xf32> to vector<8x8x32xf32>
    %8 = vector.shape_cast %3 : vector<8x32xf32> to vector<1x8x32xf32>
    %9 = vector.broadcast %8 : vector<1x8x32xf32> to vector<8x8x32xf32>
    %10 = arith.addf %7, %9 : vector<8x8x32xf32>
    %11 = vector.shape_cast %10 : vector<8x8x32xf32> to vector<64x32xf32>
    %c0_6 = arith.constant 0 : index
    %c0_7 = arith.constant 0 : index
    %c0_8 = arith.constant 0 : index
    %12 = vector.load %arg4[%c0_6, %c0_7, %c0_8] : memref<2x8x32xf32, #tpu.memory_space<vmem>>, vector<1x8x32xf32>
    %13 = vector.shape_cast %12 : vector<1x8x32xf32> to vector<8x32xf32>
    %c0_9 = arith.constant 0 : index
    %c0_10 = arith.constant 0 : index
    %c0_11 = arith.constant 0 : index
    %14 = vector.load %arg5[%c0_9, %c0_10, %c0_11] : memref<2x32x96xf32, #tpu.memory_space<vmem>>, vector<1x32x96xf32>
    %15 = vector.shape_cast %14 : vector<1x32x96xf32> to vector<32x96xf32>
    %cst_12 = arith.constant dense<0.000000e+00> : vector<64x96xf32>
    %16 = tpu.matmul %11, %15, %cst_12 {dimension_numbers = #tpu.dot_dimension_numbers<[1], [0], [0], [1], [0, 0, 1, 1], [], []>} : vector<64x32xf32>, vector<32x96xf32>, vector<64x96xf32> -> vector<64x96xf32>
    %17 = vector.extract_strided_slice %1 {offsets = [0, 0], sizes = [1, 96], strides = [1, 1]} : vector<8x128xf32> to vector<1x96xf32>
    %18 = vector.broadcast %17 : vector<1x96xf32> to vector<64x96xf32>
    %19 = arith.addf %16, %18 : vector<64x96xf32>
    %20 = vector.extract_strided_slice %19 {offsets = [0, 0], sizes = [64, 32], strides = [1, 1]} : vector<64x96xf32> to vector<64x32xf32>
    %21 = vector.shape_cast %20 : vector<64x32xf32> to vector<8x8x4x8xf32>
    %22 = tpu.transpose %21, [0, 2, 1, 3] : vector<8x8x4x8xf32> -> vector<8x4x8x8xf32>
    %23 = vector.shape_cast %22 : vector<8x4x8x8xf32> to vector<32x8x8xf32>
    %24 = vector.extract_strided_slice %19 {offsets = [0, 32], sizes = [64, 32], strides = [1, 1]} : vector<64x96xf32> to vector<64x32xf32>
    %25 = vector.shape_cast %24 : vector<64x32xf32> to vector<8x8x4x8xf32>
    %26 = tpu.transpose %25, [0, 2, 1, 3] : vector<8x8x4x8xf32> -> vector<8x4x8x8xf32>
    %27 = vector.shape_cast %26 : vector<8x4x8x8xf32> to vector<32x8x8xf32>
    %28 = vector.extract_strided_slice %19 {offsets = [0, 64], sizes = [64, 32], strides = [1, 1]} : vector<64x96xf32> to vector<64x32xf32>
    %29 = vector.shape_cast %28 : vector<64x32xf32> to vector<8x8x4x8xf32>
    %30 = tpu.transpose %29, [0, 2, 1, 3] : vector<8x8x4x8xf32> -> vector<8x4x8x8xf32>
    %31 = vector.shape_cast %30 : vector<8x4x8x8xf32> to vector<32x8x8xf32>
    "tpu.trace_start"() <{level = 10 : i32, message = "ntd,nsd->nts"}> : () -> ()
    %cst_13 = arith.constant dense<0.000000e+00> : vector<32x8x8xf32>
    %32 = tpu.matmul %23, %27, %cst_13 {dimension_numbers = #tpu.dot_dimension_numbers<[2], [2], [1], [1], [0, 0, 0, 1, 1, 1], [0], [0]>} : vector<32x8x8xf32>, vector<32x8x8xf32>, vector<32x8x8xf32> -> vector<32x8x8xf32>
    "tpu.trace_stop"() : () -> ()
    %cst_14 = arith.constant dense<0xFF800000> : vector<32x8xf32>
    %33 = vector.multi_reduction <maximumf>, %32, %cst_14 [2] : vector<32x8x8xf32> to vector<32x8xf32>
    %34 = vector.shape_cast %33 : vector<32x8xf32> to vector<32x8x1xf32>
    %35 = vector.broadcast %34 : vector<32x8x1xf32> to vector<32x8x8xf32>
    %36 = arith.subf %32, %35 : vector<32x8x8xf32>
    %37 = math.exp %36 : vector<32x8x8xf32>
    %cst_15 = arith.constant dense<0.000000e+00> : vector<32x8xf32>
    %38 = vector.multi_reduction <add>, %37, %cst_15 [2] : vector<32x8x8xf32> to vector<32x8xf32>
    %39 = vector.shape_cast %38 : vector<32x8xf32> to vector<32x8x1xf32>
    %40 = tpu.reciprocal %39 {approx = true} : vector<32x8x1xf32> -> vector<32x8x1xf32>
    %41 = vector.broadcast %40 : vector<32x8x1xf32> to vector<32x8x8xf32>
    %42 = arith.mulf %37, %41 : vector<32x8x8xf32>
    "tpu.trace_start"() <{level = 10 : i32, message = "nts,nsd->ntd"}> : () -> ()
    %cst_16 = arith.constant dense<0.000000e+00> : vector<32x8x8xf32>
    %43 = tpu.matmul %42, %31, %cst_16 {dimension_numbers = #tpu.dot_dimension_numbers<[2], [1], [1], [2], [0, 0, 0, 1, 1, 2], [0], [0]>} : vector<32x8x8xf32>, vector<32x8x8xf32>, vector<32x8x8xf32> -> vector<32x8x8xf32>
    "tpu.trace_stop"() : () -> ()
    %44 = vector.shape_cast %43 : vector<32x8x8xf32> to vector<8x4x8x8xf32>
    %45 = tpu.transpose %44, [0, 2, 1, 3] : vector<8x4x8x8xf32> -> vector<8x8x4x8xf32>
    %46 = vector.shape_cast %45 : vector<8x8x4x8xf32> to vector<64x32xf32>
    %c0_17 = arith.constant 0 : index
    %c0_18 = arith.constant 0 : index
    %c0_19 = arith.constant 0 : index
    %47 = vector.load %arg6[%c0_17, %c0_18, %c0_19] : memref<2x32x32xf32, #tpu.memory_space<vmem>>, vector<1x32x32xf32>
    %48 = vector.shape_cast %47 : vector<1x32x32xf32> to vector<32x32xf32>
    %cst_20 = arith.constant dense<0.000000e+00> : vector<64x32xf32>
    %49 = tpu.matmul %46, %48, %cst_20 {dimension_numbers = #tpu.dot_dimension_numbers<[1], [0], [0], [1], [0, 0, 1, 1], [], []>} : vector<64x32xf32>, vector<32x32xf32>, vector<64x32xf32> -> vector<64x32xf32>
    %50 = vector.extract_strided_slice %13 {offsets = [0, 0], sizes = [1, 32], strides = [1, 1]} : vector<8x32xf32> to vector<1x32xf32>
    %51 = vector.broadcast %50 : vector<1x32xf32> to vector<64x32xf32>
    %52 = arith.addf %49, %51 : vector<64x32xf32>
    %53 = arith.addf %11, %52 : vector<64x32xf32>
    %54 = vector.extract_strided_slice %13 {offsets = [1, 0], sizes = [1, 32], strides = [1, 1]} : vector<8x32xf32> to vector<1x32xf32>
    %55 = vector.extract_strided_slice %13 {offsets = [2, 0], sizes = [1, 32], strides = [1, 1]} : vector<8x32xf32> to vector<1x32xf32>
    %cst_21 = arith.constant dense<0.000000e+00> : vector<64xf32>
    %56 = vector.multi_reduction <add>, %53, %cst_21 [1] : vector<64x32xf32> to vector<64xf32>
    %57 = vector.shape_cast %56 : vector<64xf32> to vector<64x1xf32>
    %cst_22 = arith.constant 3.200000e+01 : f32
    %58 = vector.broadcast %cst_22 : f32 to vector<64x1xf32>
    %59 = arith.divf %57, %58 : vector<64x1xf32>
    %60 = vector.broadcast %59 : vector<64x1xf32> to vector<64x32xf32>
    %61 = arith.subf %53, %60 : vector<64x32xf32>
    %62 = arith.mulf %61, %61 : vector<64x32xf32>
    %cst_23 = arith.constant dense<0.000000e+00> : vector<64xf32>
    %63 = vector.multi_reduction <add>, %62, %cst_23 [1] : vector<64x32xf32> to vector<64xf32>
    %64 = vector.shape_cast %63 : vector<64xf32> to vector<64x1xf32>
    %cst_24 = arith.constant 3.200000e+01 : f32
    %65 = vector.broadcast %cst_24 : f32 to vector<64x1xf32>
    %66 = arith.divf %64, %65 : vector<64x1xf32>
    %67 = vector.broadcast %59 : vector<64x1xf32> to vector<64x32xf32>
    %68 = arith.subf %53, %67 : vector<64x32xf32>
    %cst_25 = arith.constant 9.99999974E-6 : f32
    %69 = vector.broadcast %cst_25 : f32 to vector<64x1xf32>
    %70 = arith.addf %66, %69 : vector<64x1xf32>
    %71 = math.rsqrt %70 : vector<64x1xf32>
    %72 = vector.broadcast %71 : vector<64x1xf32> to vector<64x32xf32>
    %73 = arith.mulf %68, %72 : vector<64x32xf32>
    %74 = vector.broadcast %54 : vector<1x32xf32> to vector<64x32xf32>
    %75 = arith.mulf %73, %74 : vector<64x32xf32>
    %76 = vector.broadcast %55 : vector<1x32xf32> to vector<64x32xf32>
    %77 = arith.addf %75, %76 : vector<64x32xf32>
    %c0_26 = arith.constant 0 : index
    %c0_27 = arith.constant 0 : index
    %c0_28 = arith.constant 0 : index
    %78 = vector.load %arg7[%c0_26, %c0_27, %c0_28] : memref<3x32x128xf32, #tpu.memory_space<vmem>>, vector<1x32x128xf32>
    %79 = vector.shape_cast %78 : vector<1x32x128xf32> to vector<32x128xf32>
    %cst_29 = arith.constant dense<0.000000e+00> : vector<64x128xf32>
    %80 = tpu.matmul %77, %79, %cst_29 {dimension_numbers = #tpu.dot_dimension_numbers<[1], [0], [0], [1], [0, 0, 1, 1], [], []>} : vector<64x32xf32>, vector<32x128xf32>, vector<64x128xf32> -> vector<64x128xf32>
    %81 = vector.extract_strided_slice %1 {offsets = [1, 0], sizes = [1, 128], strides = [1, 1]} : vector<8x128xf32> to vector<1x128xf32>
    %82 = vector.broadcast %81 : vector<1x128xf32> to vector<64x128xf32>
    %83 = arith.addf %80, %82 : vector<64x128xf32>
    %cst_30 = arith.constant 0.000000e+00 : f32
    %84 = vector.broadcast %cst_30 : f32 to vector<64x128xf32>
    %85 = arith.maximumf %83, %84 : vector<64x128xf32>
    %c0_31 = arith.constant 0 : index
    %c0_32 = arith.constant 0 : index
    %c0_33 = arith.constant 0 : index
    %86 = vector.load %arg8[%c0_31, %c0_32, %c0_33] : memref<2x128x32xf32, #tpu.memory_space<vmem>>, vector<1x128x32xf32>
    %87 = vector.shape_cast %86 : vector<1x128x32xf32> to vector<128x32xf32>
    %cst_34 = arith.constant dense<0.000000e+00> : vector<64x32xf32>
    %88 = tpu.matmul %85, %87, %cst_34 {dimension_numbers = #tpu.dot_dimension_numbers<[1], [0], [0], [1], [0, 0, 1, 1], [], []>} : vector<64x128xf32>, vector<128x32xf32>, vector<64x32xf32> -> vector<64x32xf32>
    %89 = vector.extract_strided_slice %13 {offsets = [5, 0], sizes = [1, 32], strides = [1, 1]} : vector<8x32xf32> to vector<1x32xf32>
    %90 = vector.broadcast %89 : vector<1x32xf32> to vector<64x32xf32>
    %91 = arith.addf %88, %90 : vector<64x32xf32>
    %92 = arith.addf %77, %91 : vector<64x32xf32>
    %93 = vector.extract_strided_slice %13 {offsets = [3, 0], sizes = [1, 32], strides = [1, 1]} : vector<8x32xf32> to vector<1x32xf32>
    %94 = vector.extract_strided_slice %13 {offsets = [4, 0], sizes = [1, 32], strides = [1, 1]} : vector<8x32xf32> to vector<1x32xf32>
    %cst_35 = arith.constant dense<0.000000e+00> : vector<64xf32>
    %95 = vector.multi_reduction <add>, %92, %cst_35 [1] : vector<64x32xf32> to vector<64xf32>
    %96 = vector.shape_cast %95 : vector<64xf32> to vector<64x1xf32>
    %cst_36 = arith.constant 3.200000e+01 : f32
    %97 = vector.broadcast %cst_36 : f32 to vector<64x1xf32>
    %98 = arith.divf %96, %97 : vector<64x1xf32>
    %99 = vector.broadcast %98 : vector<64x1xf32> to vector<64x32xf32>
    %100 = arith.subf %92, %99 : vector<64x32xf32>
    %101 = arith.mulf %100, %100 : vector<64x32xf32>
    %cst_37 = arith.constant dense<0.000000e+00> : vector<64xf32>
    %102 = vector.multi_reduction <add>, %101, %cst_37 [1] : vector<64x32xf32> to vector<64xf32>
    %103 = vector.shape_cast %102 : vector<64xf32> to vector<64x1xf32>
    %cst_38 = arith.constant 3.200000e+01 : f32
    %104 = vector.broadcast %cst_38 : f32 to vector<64x1xf32>
    %105 = arith.divf %103, %104 : vector<64x1xf32>
    %106 = vector.broadcast %98 : vector<64x1xf32> to vector<64x32xf32>
    %107 = arith.subf %92, %106 : vector<64x32xf32>
    %cst_39 = arith.constant 9.99999974E-6 : f32
    %108 = vector.broadcast %cst_39 : f32 to vector<64x1xf32>
    %109 = arith.addf %105, %108 : vector<64x1xf32>
    %110 = math.rsqrt %109 : vector<64x1xf32>
    %111 = vector.broadcast %110 : vector<64x1xf32> to vector<64x32xf32>
    %112 = arith.mulf %107, %111 : vector<64x32xf32>
    %113 = vector.broadcast %93 : vector<1x32xf32> to vector<64x32xf32>
    %114 = arith.mulf %112, %113 : vector<64x32xf32>
    %115 = vector.broadcast %94 : vector<1x32xf32> to vector<64x32xf32>
    %116 = arith.addf %114, %115 : vector<64x32xf32>
    %c1 = arith.constant 1 : index
    %c0_40 = arith.constant 0 : index
    %c0_41 = arith.constant 0 : index
    %117 = vector.load %arg4[%c1, %c0_40, %c0_41] : memref<2x8x32xf32, #tpu.memory_space<vmem>>, vector<1x8x32xf32>
    %118 = vector.shape_cast %117 : vector<1x8x32xf32> to vector<8x32xf32>
    %c1_42 = arith.constant 1 : index
    %c0_43 = arith.constant 0 : index
    %c0_44 = arith.constant 0 : index
    %119 = vector.load %arg5[%c1_42, %c0_43, %c0_44] : memref<2x32x96xf32, #tpu.memory_space<vmem>>, vector<1x32x96xf32>
    %120 = vector.shape_cast %119 : vector<1x32x96xf32> to vector<32x96xf32>
    %cst_45 = arith.constant dense<0.000000e+00> : vector<64x96xf32>
    %121 = tpu.matmul %116, %120, %cst_45 {dimension_numbers = #tpu.dot_dimension_numbers<[1], [0], [0], [1], [0, 0, 1, 1], [], []>} : vector<64x32xf32>, vector<32x96xf32>, vector<64x96xf32> -> vector<64x96xf32>
    %122 = vector.extract_strided_slice %1 {offsets = [2, 0], sizes = [1, 96], strides = [1, 1]} : vector<8x128xf32> to vector<1x96xf32>
    %123 = vector.broadcast %122 : vector<1x96xf32> to vector<64x96xf32>
    %124 = arith.addf %121, %123 : vector<64x96xf32>
    %125 = vector.extract_strided_slice %124 {offsets = [0, 0], sizes = [64, 32], strides = [1, 1]} : vector<64x96xf32> to vector<64x32xf32>
    %126 = vector.shape_cast %125 : vector<64x32xf32> to vector<8x8x4x8xf32>
    %127 = tpu.transpose %126, [0, 2, 1, 3] : vector<8x8x4x8xf32> -> vector<8x4x8x8xf32>
    %128 = vector.shape_cast %127 : vector<8x4x8x8xf32> to vector<32x8x8xf32>
    %129 = vector.extract_strided_slice %124 {offsets = [0, 32], sizes = [64, 32], strides = [1, 1]} : vector<64x96xf32> to vector<64x32xf32>
    %130 = vector.shape_cast %129 : vector<64x32xf32> to vector<8x8x4x8xf32>
    %131 = tpu.transpose %130, [0, 2, 1, 3] : vector<8x8x4x8xf32> -> vector<8x4x8x8xf32>
    %132 = vector.shape_cast %131 : vector<8x4x8x8xf32> to vector<32x8x8xf32>
    %133 = vector.extract_strided_slice %124 {offsets = [0, 64], sizes = [64, 32], strides = [1, 1]} : vector<64x96xf32> to vector<64x32xf32>
    %134 = vector.shape_cast %133 : vector<64x32xf32> to vector<8x8x4x8xf32>
    %135 = tpu.transpose %134, [0, 2, 1, 3] : vector<8x8x4x8xf32> -> vector<8x4x8x8xf32>
    %136 = vector.shape_cast %135 : vector<8x4x8x8xf32> to vector<32x8x8xf32>
    "tpu.trace_start"() <{level = 10 : i32, message = "ntd,nsd->nts"}> : () -> ()
    %cst_46 = arith.constant dense<0.000000e+00> : vector<32x8x8xf32>
    %137 = tpu.matmul %128, %132, %cst_46 {dimension_numbers = #tpu.dot_dimension_numbers<[2], [2], [1], [1], [0, 0, 0, 1, 1, 1], [0], [0]>} : vector<32x8x8xf32>, vector<32x8x8xf32>, vector<32x8x8xf32> -> vector<32x8x8xf32>
    "tpu.trace_stop"() : () -> ()
    %cst_47 = arith.constant dense<0xFF800000> : vector<32x8xf32>
    %138 = vector.multi_reduction <maximumf>, %137, %cst_47 [2] : vector<32x8x8xf32> to vector<32x8xf32>
    %139 = vector.shape_cast %138 : vector<32x8xf32> to vector<32x8x1xf32>
    %140 = vector.broadcast %139 : vector<32x8x1xf32> to vector<32x8x8xf32>
    %141 = arith.subf %137, %140 : vector<32x8x8xf32>
    %142 = math.exp %141 : vector<32x8x8xf32>
    %cst_48 = arith.constant dense<0.000000e+00> : vector<32x8xf32>
    %143 = vector.multi_reduction <add>, %142, %cst_48 [2] : vector<32x8x8xf32> to vector<32x8xf32>
    %144 = vector.shape_cast %143 : vector<32x8xf32> to vector<32x8x1xf32>
    %145 = tpu.reciprocal %144 {approx = true} : vector<32x8x1xf32> -> vector<32x8x1xf32>
    %146 = vector.broadcast %145 : vector<32x8x1xf32> to vector<32x8x8xf32>
    %147 = arith.mulf %142, %146 : vector<32x8x8xf32>
    "tpu.trace_start"() <{level = 10 : i32, message = "nts,nsd->ntd"}> : () -> ()
    %cst_49 = arith.constant dense<0.000000e+00> : vector<32x8x8xf32>
    %148 = tpu.matmul %147, %136, %cst_49 {dimension_numbers = #tpu.dot_dimension_numbers<[2], [1], [1], [2], [0, 0, 0, 1, 1, 2], [0], [0]>} : vector<32x8x8xf32>, vector<32x8x8xf32>, vector<32x8x8xf32> -> vector<32x8x8xf32>
    "tpu.trace_stop"() : () -> ()
    %149 = vector.shape_cast %148 : vector<32x8x8xf32> to vector<8x4x8x8xf32>
    %150 = tpu.transpose %149, [0, 2, 1, 3] : vector<8x4x8x8xf32> -> vector<8x8x4x8xf32>
    %151 = vector.shape_cast %150 : vector<8x8x4x8xf32> to vector<64x32xf32>
    %c1_50 = arith.constant 1 : index
    %c0_51 = arith.constant 0 : index
    %c0_52 = arith.constant 0 : index
    %152 = vector.load %arg6[%c1_50, %c0_51, %c0_52] : memref<2x32x32xf32, #tpu.memory_space<vmem>>, vector<1x32x32xf32>
    %153 = vector.shape_cast %152 : vector<1x32x32xf32> to vector<32x32xf32>
    %cst_53 = arith.constant dense<0.000000e+00> : vector<64x32xf32>
    %154 = tpu.matmul %151, %153, %cst_53 {dimension_numbers = #tpu.dot_dimension_numbers<[1], [0], [0], [1], [0, 0, 1, 1], [], []>} : vector<64x32xf32>, vector<32x32xf32>, vector<64x32xf32> -> vector<64x32xf32>
    %155 = vector.extract_strided_slice %118 {offsets = [0, 0], sizes = [1, 32], strides = [1, 1]} : vector<8x32xf32> to vector<1x32xf32>
    %156 = vector.broadcast %155 : vector<1x32xf32> to vector<64x32xf32>
    %157 = arith.addf %154, %156 : vector<64x32xf32>
    %158 = arith.addf %116, %157 : vector<64x32xf32>
    %159 = vector.extract_strided_slice %118 {offsets = [1, 0], sizes = [1, 32], strides = [1, 1]} : vector<8x32xf32> to vector<1x32xf32>
    %160 = vector.extract_strided_slice %118 {offsets = [2, 0], sizes = [1, 32], strides = [1, 1]} : vector<8x32xf32> to vector<1x32xf32>
    %cst_54 = arith.constant dense<0.000000e+00> : vector<64xf32>
    %161 = vector.multi_reduction <add>, %158, %cst_54 [1] : vector<64x32xf32> to vector<64xf32>
    %162 = vector.shape_cast %161 : vector<64xf32> to vector<64x1xf32>
    %cst_55 = arith.constant 3.200000e+01 : f32
    %163 = vector.broadcast %cst_55 : f32 to vector<64x1xf32>
    %164 = arith.divf %162, %163 : vector<64x1xf32>
    %165 = vector.broadcast %164 : vector<64x1xf32> to vector<64x32xf32>
    %166 = arith.subf %158, %165 : vector<64x32xf32>
    %167 = arith.mulf %166, %166 : vector<64x32xf32>
    %cst_56 = arith.constant dense<0.000000e+00> : vector<64xf32>
    %168 = vector.multi_reduction <add>, %167, %cst_56 [1] : vector<64x32xf32> to vector<64xf32>
    %169 = vector.shape_cast %168 : vector<64xf32> to vector<64x1xf32>
    %cst_57 = arith.constant 3.200000e+01 : f32
    %170 = vector.broadcast %cst_57 : f32 to vector<64x1xf32>
    %171 = arith.divf %169, %170 : vector<64x1xf32>
    %172 = vector.broadcast %164 : vector<64x1xf32> to vector<64x32xf32>
    %173 = arith.subf %158, %172 : vector<64x32xf32>
    %cst_58 = arith.constant 9.99999974E-6 : f32
    %174 = vector.broadcast %cst_58 : f32 to vector<64x1xf32>
    %175 = arith.addf %171, %174 : vector<64x1xf32>
    %176 = math.rsqrt %175 : vector<64x1xf32>
    %177 = vector.broadcast %176 : vector<64x1xf32> to vector<64x32xf32>
    %178 = arith.mulf %173, %177 : vector<64x32xf32>
    %179 = vector.broadcast %159 : vector<1x32xf32> to vector<64x32xf32>
    %180 = arith.mulf %178, %179 : vector<64x32xf32>
    %181 = vector.broadcast %160 : vector<1x32xf32> to vector<64x32xf32>
    %182 = arith.addf %180, %181 : vector<64x32xf32>
    %c1_59 = arith.constant 1 : index
    %c0_60 = arith.constant 0 : index
    %c0_61 = arith.constant 0 : index
    %183 = vector.load %arg7[%c1_59, %c0_60, %c0_61] : memref<3x32x128xf32, #tpu.memory_space<vmem>>, vector<1x32x128xf32>
    %184 = vector.shape_cast %183 : vector<1x32x128xf32> to vector<32x128xf32>
    %cst_62 = arith.constant dense<0.000000e+00> : vector<64x128xf32>
    %185 = tpu.matmul %182, %184, %cst_62 {dimension_numbers = #tpu.dot_dimension_numbers<[1], [0], [0], [1], [0, 0, 1, 1], [], []>} : vector<64x32xf32>, vector<32x128xf32>, vector<64x128xf32> -> vector<64x128xf32>
    %186 = vector.extract_strided_slice %1 {offsets = [3, 0], sizes = [1, 128], strides = [1, 1]} : vector<8x128xf32> to vector<1x128xf32>
    %187 = vector.broadcast %186 : vector<1x128xf32> to vector<64x128xf32>
    %188 = arith.addf %185, %187 : vector<64x128xf32>
    %cst_63 = arith.constant 0.000000e+00 : f32
    %189 = vector.broadcast %cst_63 : f32 to vector<64x128xf32>
    %190 = arith.maximumf %188, %189 : vector<64x128xf32>
    %c1_64 = arith.constant 1 : index
    %c0_65 = arith.constant 0 : index
    %c0_66 = arith.constant 0 : index
    %191 = vector.load %arg8[%c1_64, %c0_65, %c0_66] : memref<2x128x32xf32, #tpu.memory_space<vmem>>, vector<1x128x32xf32>
    %192 = vector.shape_cast %191 : vector<1x128x32xf32> to vector<128x32xf32>
    %cst_67 = arith.constant dense<0.000000e+00> : vector<64x32xf32>
    %193 = tpu.matmul %190, %192, %cst_67 {dimension_numbers = #tpu.dot_dimension_numbers<[1], [0], [0], [1], [0, 0, 1, 1], [], []>} : vector<64x128xf32>, vector<128x32xf32>, vector<64x32xf32> -> vector<64x32xf32>
    %194 = vector.extract_strided_slice %118 {offsets = [5, 0], sizes = [1, 32], strides = [1, 1]} : vector<8x32xf32> to vector<1x32xf32>
    %195 = vector.broadcast %194 : vector<1x32xf32> to vector<64x32xf32>
    %196 = arith.addf %193, %195 : vector<64x32xf32>
    %197 = arith.addf %182, %196 : vector<64x32xf32>
    %198 = vector.extract_strided_slice %118 {offsets = [3, 0], sizes = [1, 32], strides = [1, 1]} : vector<8x32xf32> to vector<1x32xf32>
    %199 = vector.extract_strided_slice %118 {offsets = [4, 0], sizes = [1, 32], strides = [1, 1]} : vector<8x32xf32> to vector<1x32xf32>
    %cst_68 = arith.constant dense<0.000000e+00> : vector<64xf32>
    %200 = vector.multi_reduction <add>, %197, %cst_68 [1] : vector<64x32xf32> to vector<64xf32>
    %201 = vector.shape_cast %200 : vector<64xf32> to vector<64x1xf32>
    %cst_69 = arith.constant 3.200000e+01 : f32
    %202 = vector.broadcast %cst_69 : f32 to vector<64x1xf32>
    %203 = arith.divf %201, %202 : vector<64x1xf32>
    %204 = vector.broadcast %203 : vector<64x1xf32> to vector<64x32xf32>
    %205 = arith.subf %197, %204 : vector<64x32xf32>
    %206 = arith.mulf %205, %205 : vector<64x32xf32>
    %cst_70 = arith.constant dense<0.000000e+00> : vector<64xf32>
    %207 = vector.multi_reduction <add>, %206, %cst_70 [1] : vector<64x32xf32> to vector<64xf32>
    %208 = vector.shape_cast %207 : vector<64xf32> to vector<64x1xf32>
    %cst_71 = arith.constant 3.200000e+01 : f32
    %209 = vector.broadcast %cst_71 : f32 to vector<64x1xf32>
    %210 = arith.divf %208, %209 : vector<64x1xf32>
    %211 = vector.broadcast %203 : vector<64x1xf32> to vector<64x32xf32>
    %212 = arith.subf %197, %211 : vector<64x32xf32>
    %cst_72 = arith.constant 9.99999974E-6 : f32
    %213 = vector.broadcast %cst_72 : f32 to vector<64x1xf32>
    %214 = arith.addf %210, %213 : vector<64x1xf32>
    %215 = math.rsqrt %214 : vector<64x1xf32>
    %216 = vector.broadcast %215 : vector<64x1xf32> to vector<64x32xf32>
    %217 = arith.mulf %212, %216 : vector<64x32xf32>
    %218 = vector.broadcast %198 : vector<1x32xf32> to vector<64x32xf32>
    %219 = arith.mulf %217, %218 : vector<64x32xf32>
    %220 = vector.broadcast %199 : vector<1x32xf32> to vector<64x32xf32>
    %221 = arith.addf %219, %220 : vector<64x32xf32>
    %222 = vector.shape_cast %221 : vector<64x32xf32> to vector<8x8x32xf32>
    %cst_73 = arith.constant dense<0.000000e+00> : vector<8x32xf32>
    %223 = vector.multi_reduction <add>, %222, %cst_73 [1] : vector<8x8x32xf32> to vector<8x32xf32>
    %cst_74 = arith.constant 1.250000e-01 : f32
    %224 = vector.broadcast %cst_74 : f32 to vector<8x32xf32>
    %225 = arith.mulf %223, %224 : vector<8x32xf32>
    %c2 = arith.constant 2 : index
    %c0_75 = arith.constant 0 : index
    %c0_76 = arith.constant 0 : index
    %226 = vector.load %arg7[%c2, %c0_75, %c0_76] : memref<3x32x128xf32, #tpu.memory_space<vmem>>, vector<1x32x128xf32>
    %227 = vector.shape_cast %226 : vector<1x32x128xf32> to vector<32x128xf32>
    %cst_77 = arith.constant dense<0.000000e+00> : vector<8x128xf32>
    %228 = tpu.matmul %225, %227, %cst_77 {dimension_numbers = #tpu.dot_dimension_numbers<[1], [0], [0], [1], [0, 0, 1, 1], [], []>} : vector<8x32xf32>, vector<32x128xf32>, vector<8x128xf32> -> vector<8x128xf32>
    %229 = vector.extract_strided_slice %1 {offsets = [4, 0], sizes = [1, 128], strides = [1, 1]} : vector<8x128xf32> to vector<1x128xf32>
    %230 = vector.broadcast %229 : vector<1x128xf32> to vector<8x128xf32>
    %231 = arith.addf %228, %230 : vector<8x128xf32>
    %c0_78 = arith.constant 0 : index
    %c0_79 = arith.constant 0 : index
    %232 = vector.load %arg9[%c0_78, %c0_79] : memref<8x128xf32, #tpu.memory_space<vmem>>, vector<8x128xf32>
    tpu.vector_store %arg9[%c0_78, %c0_79], %231 {strides = array<i32>} : memref<8x128xf32, #tpu.memory_space<vmem>>, vector<8x128xf32>,
    return
  }
  func.func @transform_0(%arg0: i32) -> (i32, i32, i32) {
    %c0_i32 = arith.constant 0 : i32
    %c0_i32_0 = arith.constant 0 : i32
    %c0_i32_1 = arith.constant 0 : i32
    return %arg0, %c0_i32, %c0_i32_0 : i32, i32, i32
  }
  func.func @transform_1(%arg0: i32) -> (i32, i32) {
    %c0_i32 = arith.constant 0 : i32
    %c0_i32_0 = arith.constant 0 : i32
    %c0_i32_1 = arith.constant 0 : i32
    return %c0_i32, %c0_i32_0 : i32, i32
  }
  func.func @transform_2(%arg0: i32) -> (i32, i32) {
    %c0_i32 = arith.constant 0 : i32
    %c0_i32_0 = arith.constant 0 : i32
    %c0_i32_1 = arith.constant 0 : i32
    return %c0_i32, %c0_i32_0 : i32, i32
  }
  func.func @transform_3(%arg0: i32) -> (i32, i32, i32) {
    %c0_i32 = arith.constant 0 : i32
    %c0_i32_0 = arith.constant 0 : i32
    %c0_i32_1 = arith.constant 0 : i32
    %c0_i32_2 = arith.constant 0 : i32
    return %c0_i32, %c0_i32_0, %c0_i32_1 : i32, i32, i32
  }
  func.func @transform_4(%arg0: i32) -> (i32, i32, i32) {
    %c0_i32 = arith.constant 0 : i32
    %c0_i32_0 = arith.constant 0 : i32
    %c0_i32_1 = arith.constant 0 : i32
    %c0_i32_2 = arith.constant 0 : i32
    return %c0_i32, %c0_i32_0, %c0_i32_1 : i32, i32, i32
  }
  func.func @transform_5(%arg0: i32) -> (i32, i32, i32) {
    %c0_i32 = arith.constant 0 : i32
    %c0_i32_0 = arith.constant 0 : i32
    %c0_i32_1 = arith.constant 0 : i32
    %c0_i32_2 = arith.constant 0 : i32
    return %c0_i32, %c0_i32_0, %c0_i32_1 : i32, i32, i32
  }
  func.func @transform_6(%arg0: i32) -> (i32, i32, i32) {
    %c0_i32 = arith.constant 0 : i32
    %c0_i32_0 = arith.constant 0 : i32
    %c0_i32_1 = arith.constant 0 : i32
    %c0_i32_2 = arith.constant 0 : i32
    return %c0_i32, %c0_i32_0, %c0_i32_1 : i32, i32, i32
  }
  func.func @transform_7(%arg0: i32) -> (i32, i32, i32) {
    %c0_i32 = arith.constant 0 : i32
    %c0_i32_0 = arith.constant 0 : i32
    %c0_i32_1 = arith.constant 0 : i32
    %c0_i32_2 = arith.constant 0 : i32
    return %c0_i32, %c0_i32_0, %c0_i32_1 : i32, i32, i32
  }
  func.func @transform_8(%arg0: i32) -> (i32, i32) {
    %c0_i32 = arith.constant 0 : i32
    %c0_i32_0 = arith.constant 0 : i32
    return %arg0, %c0_i32 : i32, i32
  }
}

</mosaic_0001>

<bundles_post_ra>
// kernel: tpu_custom_call.1
= control target key start
LH: loop header
LB: loop body
LE: loop exit
PB: predicated region body
PF: predicated region fallthrough
CT: control target
= control target key end

     0   :  { %13 = vsyncpa [#allocation3], 0  ;;  %s29488_s0 = inlined_call_operand.vmem [shape: f32[16,8,8], index: 0, kind: input, shape index: {}]   ;;  %s29489_s1 = inlined_call_operand.vmem [shape: f32[16,32], index: 1, kind: input, shape index: {}]   ;;  %s29490_s2 = inlined_call_operand.vmem [shape: f32[8,128], index: 2, kind: input, shape index: {}]   ;;  %s29491_s3 = inlined_call_operand.vmem [shape: f32[2,8,32], index: 3, kind: input, shape index: {}]   ;;  %s29492_s4 = inlined_call_operand.vmem [shape: f32[2,32,96], index: 4, kind: input, shape index: {}]   ;;  %s29493_s5 = inlined_call_operand.vmem [shape: f32[2,32,32], index: 5, kind: input, shape index: {}]   ;;  %s29494_s6 = inlined_call_operand.vmem [shape: f32[3,32,128], index: 6, kind: input, shape index: {}]   ;;  %s29495_s7 = inlined_call_operand.vmem [shape: f32[2,128,32], index: 7, kind: input, shape index: {}]   ;;  %s29496_s8 = inlined_call_operand.hbm [shape: f32[16,128], index: 8, kind: output, shape index: {}]  }
   0x1   :  { %15 = vsyncpa [#allocation3 + $0x1], 0  ;;  %s24370_s27 = smov 0   ;;  %s24372_s28 = smov 0  }
   0x2   :  { %s24374_s29 = smov 0   ;;  %s24376_s30 = smov 0  }
   0x3 LB: > { %s24391_s9 = sadd.s32 4294967295, %s24309_s30   ;;  %s22067_s10 = sadd.s32 4294967294, %s24309_s30   ;;  %s24309_s30 = sphi %s24376_s30, %s29891_s30   ;;  %s24305_s29 = sphi %s24374_s29, %s29890_s29   ;;  %s24301_s28 = sphi %s24372_s28, %s29889_s28   ;;  %s24297_s27 = sphi %s24370_s27, %s29888_s27  }
   0x4   : > { %s24395_s11 = sadd.s32 1, %s24309_s30   ;;  %s201_s12 = sadd.s32 1, %s24305_s29 }
   0x5   : > { %s198_s13 = ssub.s32 %s24309_s30, %s24395_s11  ;;  %p211_p0 = scmp.ne.s32.totalorder %s24305_s29, %s24301_s28 }
   0x6   : > { %p199_p1 = scmp.eq.s32.totalorder %s198_s13, 0  ;;  %p212_p2 = scmp.eq.s32.totalorder %s24391_s9, 1 }
   0x7   : > { %p217_p3 = scmp.ne.s32.totalorder %s24301_s28, %s24297_s27  ;;  %p218_p4 = scmp.eq.s32.totalorder %s22067_s10, 1 }
   0x8   : > { %s24406_s14 = scalar_select %p199_p1, %s24305_s29, %s201_s12  }
   0x9   : > { %p24408_p5 = por %p212_p2, %p211_p0  ;;  %p24412_p6 = por %p218_p4, %p217_p3 }
   0xa   : > { %p22070_p7 = scmp.ge.s32.totalorder %s24309_s30, 1  ;;  %p266_p8 = scmp.lt.s32.totalorder %s24309_s30, 3 }
   0xc   : > { %p267_p9 = pnand %p22070_p7, %p266_p8 }
   0xe   : > { %270 = sbr.rel (%p267_p9) target bundleno = 5936 (0x1730), region = 52 }
  0x15   : > { %v306_v0 = vld [vmem:[%s29489_s1] sm:$0xff]  ;;  %s22072_s19 = sshll.u32 %s24391_s9, 3  ;;  %v457_v2 = vld [vmem:[%s29492_s4 + $0x8] sm:$0xff]  ;;  %v458_v4 = vld [vmem:[%s29492_s4 + $0x10] sm:$0xff]  ;;  %vm317_vm0 = vcmask 64512   ;;  %vm464_vm1 = vcmask 261120   ;;  %v460_v32 = vlaneseq }
  0x16   : > { %v456_v1 = vld [vmem:[%s29492_s4] sm:$0xff]  ;;  %22878 = vmatprep.subr.mxu0 %v306_v0  ;;  %p301_p10 = scmp.lt.s32.totalorder %s22072_s19, 15  ;;  %v459_v5 = vld [vmem:[%s29492_s4 + $0x18] sm:$0xff]  ;;  %v307_v15 = vld [vmem:[%s29489_s1 + $0x8] sm:$0xff]  ;;  %s24311_s23 = smov 104   ;;  %vm24316_vm2 = vmmov 0  }
  0x17   : > { %v23751_v3 = vpack.c.bf16 %v457_v2, %v456_v1  ;;  %22879 = vmatpush3.msra.mxu0 %v306_v0  ;;  %v23755_v6 = vpack.c.bf16 %v459_v5, %v458_v4  ;;  %v24480_v33 = vshrl.u32 %v460_v32, 7  ;;  %v308_v35 = vld [vmem:[%s29490_s2] sm:$0xff]  ;;  %s24312_s24 = smov 120   ;;  %s24313_s25 = smov 112   ;;  %v29497_v0 = vmov 0.0  }
  0x18   : > { %s29893_s19 = smov (!%p301_p10, %s22072_s19), 15  ;;  %s29573_s26 = smov 96   ;;  %vm10442_vm3 = vcmask 130048   ;;  %vm10451_vm4 = vcmask 195584   ;;  %vm21907_vm5 = vcmask 1041409   ;;  %vm21909_vm6 = vcmask 1042434  }
  0x19   : > { %23752 = vmatprep.subr.bf16.mxu0 %v23751_v3  ;;  %23869 = vmatprep.subr.bf16.mxu1 %v23751_v3  ;;  %s22073_s12 = sshll.u32 %s29893_s19, 3  ;;  %29644 = vst [vmem:[#allocation13_spill] sm:$0xff] %v24480_v33  ;;  %v24483_v34 = vsub.s32 0, %v24480_v33  ;;  %s29571_s10 = smov 64   ;;  %vm21911_vm7 = vcmask 1043459   ;;  %vm21913_vm8 = vcmask 1044484  }
  0x1a   : > { %23871 = vmatpush3.bf16.msra.mxu1 %v23751_v3  ;;  %s304_s18 = scalar_lea.vmem %s29488_s0, %s22073_s12  ;;  %s29569_s19 = smov 8   ;;  %vm21915_vm9 = vcmask 1045509   ;;  %vm21917_vm10 = vcmask 1046534   ;;  %vm21919_vm11 = vcmask 1047559  }
  0x1b   : > { %23870 = vmatprep.subr.bf16.mxu1 %v23755_v6  ;;  %v309_v7 = vld [vmem:[%s304_s18] sm:$0xff]  ;;  %v310_v8 = vld [vmem:[%s304_s18 + $0x8] sm:$0xff]  ;;  %v311_v9 = vld [vmem:[%s304_s18 + $0x10] sm:$0xff]  ;;  %29645 = vst [vmem:[#allocation14_spill] sm:$0xff] %v24483_v34  ;;  %v463_v36 = vrot.slane %v308_v35, %v24483_v34  ;;  %s29567_s13 = smov 16   ;;  %s29565_s17 = smov 24  }
  0x1c   : > { %22880 = vmatprep.mubr.msk.f32.mxu0 %vm317_vm0, %v309_v7  ;;  %v312_v10 = vld [vmem:[%s304_s18 + $0x18] sm:$0xff]  ;;  %v313_v11 = vld [vmem:[%s304_s18 + $0x20] sm:$0xff]  ;;  %v314_v12 = vld [vmem:[%s304_s18 + $0x28] sm:$0xff]  ;;  %s29870_s12 = smov 8  }
  0x1d   : > { %22881 = vmatmul.mubr.msk.f32.vlgmr.msra.gmra.mrb[0].mxu0 %vm317_vm0, %v310_v8  ;;  %v315_v13 = vld [vmem:[%s304_s18 + $0x30] sm:$0xff]  ;;  %v316_v14 = vld [vmem:[%s304_s18 + $0x38] sm:$0xff] }
  0x1e   : > { %23872 = vmatpush3.bf16.msra.mxu1 %v23755_v6  ;;  %22883 = vmatprep.mubr.msk.f32.mxu0 %vm317_vm0, %v311_v9 }
  0x1f   : > { %23754 = vmatpush3.bf16.msra.mxu0 %v23751_v3  ;;  %22922 = vmatprep.subr.mxu1 %v29497_v0 }
  0x20   : > { %23756 = vmatprep.subr.bf16.mxu0 %v23755_v6 }
  0x21   : > { %22884 = vmatmul.mubr.msk.f32.gmra.mrb[2].mxu0 %vm317_vm0, %v312_v10 }
  0x22   : > { %22886 = vmatprep.mubr.msk.f32.mxu0 %vm317_vm0, %v313_v11  ;;  %v24317_v11 = vmov 1983009808  }
  0x23   : > { %23758 = vmatpush3.bf16.msra.mxu0 %v23755_v6 }
  0x24   : > { %22912 = vmatprep.subr.mxu0 %v29497_v0 }
  0x25   : > { %22887 = vmatmul.mubr.msk.f32.gmra.mrb[4].mxu0 %vm317_vm0, %v314_v12  ;;  %v677_v12 = vunpack.c.l.s4 %v24317_v11 }
  0x26   : > { %22889 = vmatprep.mubr.msk.f32.mxu0 %vm317_vm0, %v315_v13 }
  0x29   : > { %22890 = vmatmul.mubr.msk.f32.gmra.mrb[6].mxu0 %vm317_vm0, %v316_v14 }
  0xf0   : > { %v22882_v16 = vpop.f32.mrb[0].mxu0 }
  0xf1   : > { %v408_v17 = vpop.f32.mrb[1].mxu0  ;;  %v24450_v19 = vadd.f32 %v22882_v16, %v307_v15  ;;  %v24318_v16 = vmov 1934713408  }
  0xf2   : > { %v24448_v18 = vadd.f32 %v408_v17, %v307_v15  ;;  %v709_v17 = vunpack.c.l.s4 %v24318_v16 }
  0xf3   : > { %29637 = vst [vmem:[#allocation6_spill] sm:$0xff] %v24450_v19 }
  0xf4   : > { %29636 = vst [vmem:[#allocation5_spill] sm:$0xff] %v24448_v18  ;;  %22900 = vmatprep.mubr.msk.f32.mxu0 %vm464_vm1, %v24448_v18  ;;  %v22885_v20 = vpop.f32.mrb[2].mxu0 }
  0xf5   : > { %22901 = vmatmul.mubr.msk.f32.vlgmr.msra.gmra.mrb[8].mxu0 %vm464_vm1, %v24450_v19  ;;  %v24456_v21 = vadd.f32 %v22885_v20, %v307_v15  ;;  %v418_v22 = vpop.f32.mrb[3].mxu0 }
  0xf6   : > { %v24458_v23 = vadd.f32 %v418_v22, %v307_v15 }
  0xf7   : > { %29638 = vst [vmem:[#allocation7_spill] sm:$0xff] %v24456_v21 }
  0xf8   : > { %29639 = vst [vmem:[#allocation8_spill] sm:$0xff] %v24458_v23  ;;  %22903 = vmatprep.mubr.msk.f32.mxu0 %vm464_vm1, %v24458_v23  ;;  %v22888_v24 = vpop.f32.mrb[4].mxu0 }
  0xf9   : > { %22904 = vmatmul.mubr.msk.f32.gmra.mrb[10].mxu0 %vm464_vm1, %v24456_v21  ;;  %v24464_v25 = vadd.f32 %v22888_v24, %v307_v15  ;;  %v428_v26 = vpop.f32.mrb[5].mxu0 }
  0xfa   : > { %v24466_v27 = vadd.f32 %v428_v26, %v307_v15 }
  0xfb   : > { %29640 = vst [vmem:[#allocation9_spill] sm:$0xff] %v24464_v25 }
  0xfc   : > { %29641 = vst [vmem:[#allocation10_spill] sm:$0xff] %v24466_v27  ;;  %22906 = vmatprep.mubr.msk.f32.mxu0 %vm464_vm1, %v24466_v27  ;;  %v22891_v28 = vpop.f32.mrb[6].mxu0 }
  0xfd   : > { %22907 = vmatmul.mubr.msk.f32.gmra.mrb[12].mxu0 %vm464_vm1, %v24464_v25  ;;  %v24472_v29 = vadd.f32 %v22891_v28, %v307_v15  ;;  %v438_v30 = vpop.f32.mrb[7].mxu0 }
  0xfe   : > { %v24474_v31 = vadd.f32 %v438_v30, %v307_v15  ;;  %22914 = vmatprep.mubr.msk.f32.mxu0 %vm24316_vm2, %v29497_v0  ;;  %v678_v15 = vunpack.c.0.s8 %v677_v12  ;;  %v710_v30 = vunpack.c.0.s8 %v709_v17 }
  0xff   : > { %29642 = vst [vmem:[#allocation11_spill] sm:$0xff] %v24472_v29 }
 0x100   : > { %29643 = vst [vmem:[#allocation12_spill] sm:$0xff] %v24474_v31  ;;  %22909 = vmatprep.mubr.msk.f32.mxu1 %vm464_vm1, %v24474_v31  ;;  %v24670_v24 = vsub.s32 %v678_v15, %v24480_v33 }
 0x101   : > { %22910 = vmatmul.mubr.msk.f32.vlgmr.msra.gmra.mrb[0].mxu1 %vm464_vm1, %v24472_v29 }
 0x102   : > { %22924 = vmatprep.mubr.msk.f32.mxu1 %vm24316_vm2, %v29497_v0 }
 0x1c8   : > { %v22902_v37 = vpop.f32.mrb[8].mxu0 }
 0x1c9   : > { %v555_v38 = vpop.f32.mrb[9].mxu0  ;;  %v24495_v42 = vadd.f32 %v22902_v37, %v463_v36 }
 0x1ca   : > { %v24489_v39 = vadd.f32 %v555_v38, %v463_v36  ;;  %v24681_v38 = vsub.s32 %v710_v30, %v24480_v33 }
 0x1cc   : > { %650 = vrot.lane.b32.xlu1 %v24489_v39, %s24311_s23  ;;  %602 = vrot.lane.b32.xlu0 %v24489_v39, %s24312_s24  ;;  %v22905_v40 = vpop.f32.mrb[10].mxu0 }
 0x1cd   : > { %v565_v41 = vpop.f32.mrb[11].mxu0  ;;  %v24501_v45 = vadd.f32 %v22905_v40, %v463_v36 }
 0x1ce   : > { %v24507_v46 = vadd.f32 %v565_v41, %v463_v36 }
 0x1d0   : > { %604 = vrot.lane.b32.xlu1 %v24495_v42, %s24312_s24  ;;  %626 = vrot.lane.b32.xlu0 %v24489_v39, %s24313_s25  ;;  %v22908_v43 = vpop.f32.mrb[12].mxu0 }
 0x1d1   : > { %v575_v44 = vpop.f32.mrb[13].mxu0  ;;  %v24521_v49 = vadd.f32 %v22908_v43, %v463_v36 }
 0x1d2   : > { %v24527_v50 = vadd.f32 %v575_v44, %v463_v36 }
 0x1d3   : > { %29646 = vst [vmem:[#allocation15_spill] sm:$0xff] %v24521_v49 }
 0x1d4   : > { %652 = vrot.lane.b32.xlu1 %v24495_v42, %s24311_s23  ;;  %628 = vrot.lane.b32.xlu0 %v24495_v42, %s24313_s25  ;;  %v22911_v47 = vpop.f32.mrb[0].mxu1  ;;  %29647 = vst [vmem:[#allocation16_spill] sm:$0xff] %v24527_v50 }
 0x1d5   : > { %v585_v48 = vpop.f32.mrb[1].mxu1  ;;  %v24537_v51 = vadd.f32 %v22911_v47, %v463_v36 }
 0x1d6   : > { %v24543_v52 = vadd.f32 %v585_v48, %v463_v36 }
 0x1d7   : > { %29648 = vst [vmem:[#allocation17_spill] sm:$0xff] %v24537_v51 }
 0x1d8   : > { %608 = vrot.lane.b32.xlu1 %v24501_v45, %s24312_s24  ;;  %606 = vrot.lane.b32.xlu0 %v24507_v46, %s24312_s24  ;;  %29649 = vst [vmem:[#allocation18_spill] sm:$0xff] %v24543_v52 }
 0x1dc   : > { %630 = vrot.lane.b32.xlu1 %v24507_v46, %s24313_s25  ;;  %654 = vrot.lane.b32.xlu0 %v24507_v46, %s24311_s23 }
 0x1e0   : > { %656 = vrot.lane.b32.xlu1 %v24501_v45, %s24311_s23  ;;  %632 = vrot.lane.b32.xlu0 %v24501_v45, %s24313_s25 }
 0x1e4   : > { %612 = vrot.lane.b32.xlu1 %v24521_v49, %s24312_s24  ;;  %636 = vrot.lane.b32.xlu0 %v24521_v49, %s24313_s25 }
 0x1e8   : > { %660 = vrot.lane.b32.xlu1 %v24521_v49, %s24311_s23  ;;  %610 = vrot.lane.b32.xlu0 %v24527_v50, %s24312_s24 }
 0x1ec   : > { %634 = vrot.lane.b32.xlu1 %v24527_v50, %s24313_s25  ;;  %658 = vrot.lane.b32.xlu0 %v24527_v50, %s24311_s23 }
 0x1f0   : > { %1762 = vrot.lane.b32.xlu0 %v24489_v39, %s29573_s26  ;;  %616 = vrot.lane.b32.xlu1 %v24537_v51, %s24312_s24 }
 0x1f4   : > { %638 = vrot.lane.b32.xlu1 %v24543_v52, %s24313_s25  ;;  %614 = vrot.lane.b32.xlu0 %v24543_v52, %s24312_s24 }
 0x1f8   : > { %662 = vrot.lane.b32.xlu0 %v24543_v52, %s24311_s23 }
 0x23e   : > { %v24551_v53 = vpop.permute.xlu1 %650  ;;  %v24553_v54 = vpop.permute.xlu0 %602 }
 0x23f   : > { %1778 = vrot.lane.b32.xlu1 %v24553_v54, %s29573_s26  ;;  %v690_v26 = vcombine.low %v24553_v54, %v24551_v53  ;;  %v691_v28 = vcombine.high %v24553_v54, %v24551_v53 }
 0x241   : > { %v698_v36 = vrot.slane %v690_v26, %v24670_v24  ;;  %v705_v37 = vrot.slane %v691_v28, %v24670_v24 }
 0x242   : > { %v24557_v55 = vpop.permute.xlu1 %604  ;;  %v24559_v56 = vpop.permute.xlu0 %626 }
 0x243   : > { %1810 = vrot.lane.b32.xlu1 %v24551_v53, %s29573_s26  ;;  %1794 = vrot.lane.b32.xlu0 %v24559_v56, %s29573_s26  ;;  %v674_v20 = vcombine.low %v24489_v39, %v24559_v56  ;;  %v675_v22 = vcombine.high %v24489_v39, %v24559_v56 }
 0x245   : > { %v682_v32 = vrot.slane %v674_v20, %v24670_v24  ;;  %v689_v35 = vrot.slane %v675_v22, %v24670_v24 }
 0x246   : > { %v24565_v57 = vpop.permute.xlu1 %652  ;;  %v24567_v58 = vpop.permute.xlu0 %628 }
 0x247   : > { %664 = vrot.lane.b32.xlu1 %v24537_v51, %s24311_s23  ;;  %640 = vrot.lane.b32.xlu0 %v24537_v51, %s24313_s25  ;;  %v706_v40 = vcombine.low %v682_v32, %v698_v36  ;;  %v707_v41 = vcombine.high %v682_v32, %v698_v36  ;;  %v722_v43 = vcombine.low %v689_v35, %v705_v37 }
 0x248   : > { %v723_v44 = vcombine.high %v689_v35, %v705_v37  ;;  %v758_v47 = vcombine.low %v24557_v55, %v24565_v57  ;;  %v759_v48 = vcombine.high %v24557_v55, %v24565_v57  ;;  %v742_v11 = vcombine.low %v24495_v42, %v24567_v58 }
 0x249   : > { %v743_v12 = vcombine.high %v24495_v42, %v24567_v58  ;;  %v714_v15 = vrot.slane %v706_v40, %v24681_v38  ;;  %v721_v16 = vrot.slane %v707_v41, %v24681_v38  ;;  %v730_v17 = vrot.slane %v722_v43, %v24681_v38 }
 0x24a   : > { %v24573_v59 = vpop.permute.xlu1 %608  ;;  %v24575_v60 = vpop.permute.xlu0 %606  ;;  %v737_v20 = vrot.slane %v723_v44, %v24681_v38  ;;  %v766_v22 = vrot.slane %v758_v47, %v24670_v24  ;;  %v773_v26 = vrot.slane %v759_v48, %v24670_v24  ;;  %v750_v28 = vrot.slane %v742_v11, %v24670_v24 }
 0x24b   : > { %1780 = vrot.lane.b32.xlu1 %v24557_v55, %s29573_s26  ;;  %1764 = vrot.lane.b32.xlu0 %v24495_v42, %s29573_s26  ;;  %v757_v30 = vrot.slane %v743_v12, %v24670_v24  ;;  %v1218_v32 = vcombine.low %v714_v15, %v721_v16  ;;  %v22090_v35 = vcombine.high %v714_v15, %v721_v16 }
 0x24c   : > { %v1234_v36 = vcombine.low %v730_v17, %v737_v20  ;;  %v22091_v37 = vcombine.high %v730_v17, %v737_v20  ;;  %v774_v43 = vcombine.low %v750_v28, %v766_v22  ;;  %v775_v44 = vcombine.high %v750_v28, %v766_v22 }
 0x24d   : > { %v790_v0 = vcombine.low %v757_v30, %v773_v26  ;;  %v24704_v47 = vrot.slane %v1218_v32, %v24670_v24  ;;  %v24707_v48 = vrot.slane %v22090_v35, %v24670_v24  ;;  %v791_v15 = vcombine.high %v757_v30, %v773_v26 }
 0x24e   : > { %v24581_v61 = vpop.permute.xlu0 %654  ;;  %v24583_v62 = vpop.permute.xlu1 %630  ;;  %v24710_v11 = vrot.slane %v1234_v36, %v24670_v24  ;;  %v24713_v12 = vrot.slane %v22091_v37, %v24670_v24  ;;  %v24726_v35 = vrot.slane %v774_v43, %v24681_v38 }
 0x24f   : > { %1812 = vrot.lane.b32.xlu1 %v24565_v57, %s29573_s26  ;;  %1796 = vrot.lane.b32.xlu0 %v24567_v58, %s29573_s26  ;;  %v810_v40 = vcombine.low %v24507_v46, %v24583_v62  ;;  %v826_v41 = vcombine.low %v24575_v60, %v24581_v61  ;;  %v811_v16 = vcombine.high %v24507_v46, %v24583_v62 }
 0x250   : > { %v827_v17 = vcombine.high %v24575_v60, %v24581_v61  ;;  %v1250_v36 = vcombine.low %v24704_v47, %v24707_v48  ;;  %v1266_v37 = vcombine.low %v24710_v11, %v24713_v12  ;;  %v24743_v43 = vrot.slane %v791_v15, %v24681_v38 }
 0x251   : > { %v818_v20 = vrot.slane %v810_v40, %v24670_v24  ;;  %v834_v22 = vrot.slane %v826_v41, %v24670_v24  ;;  %v24737_v40 = vrot.slane %v775_v44, %v24681_v38  ;;  %v24740_v41 = vrot.slane %v790_v0, %v24681_v38 }
 0x252   : > { %v24589_v63 = vpop.permute.xlu0 %632  ;;  %v24596_v1 = vpop.permute.xlu1 %656  ;;  %v825_v33 = vrot.slane %v811_v16, %v24670_v24  ;;  %v841_v31 = vrot.slane %v827_v17, %v24670_v24 }
 0x253   : > { %29650 = vst [vmem:[#allocation19_spill] sm:$0xff] %v24589_v63  ;;  %1782 = vrot.lane.b32.xlu1 %v24575_v60, %s29573_s26  ;;  %1766 = vrot.lane.b32.xlu0 %v24507_v46, %s29573_s26  ;;  %29651 = vst [vmem:[#allocation20_spill] sm:$0xff] %v24596_v1  ;;  %v894_v28 = vcombine.low %v24573_v59, %v24596_v1  ;;  %v878_v32 = vcombine.low %v24501_v45, %v24589_v63 }
 0x254   : > { %v895_v26 = vcombine.high %v24573_v59, %v24596_v1  ;;  %v879_v30 = vcombine.high %v24501_v45, %v24589_v63  ;;  %v842_v27 = vcombine.low %v818_v20, %v834_v22  ;;  %v843_v0 = vcombine.high %v818_v20, %v834_v22 }
 0x255   : > { %v902_v25 = vrot.slane %v894_v28, %v24670_v24  ;;  %v886_v21 = vrot.slane %v878_v32, %v24670_v24  ;;  %v1286_v17 = vcombine.low %v24726_v35, %v24737_v40  ;;  %v24762_v28 = vrot.slane %v1250_v36, %v24681_v38 }
 0x256   : > { %v24603_v2 = vpop.permute.xlu0 %636  ;;  %v24609_v3 = vpop.permute.xlu1 %612  ;;  %v909_v23 = vrot.slane %v895_v26, %v24670_v24  ;;  %v893_v15 = vrot.slane %v879_v30, %v24670_v24  ;;  %v24765_v32 = vrot.slane %v1266_v37, %v24681_v38  ;;  %v22092_v20 = vcombine.high %v24726_v35, %v24737_v40 }
 0x257   : > { %1814 = vrot.lane.b32.xlu1 %v24581_v61, %s29573_s26  ;;  %29652 = vst [vmem:[#allocation21_spill] sm:$0xff] %v24603_v2  ;;  %1798 = vrot.lane.b32.xlu0 %v24583_v62, %s29573_s26  ;;  %v1014_v16 = vcombine.low %v24521_v49, %v24603_v2  ;;  %v1015_v18 = vcombine.high %v24521_v49, %v24603_v2 }
 0x258   : > { %v858_v22 = vcombine.low %v825_v33, %v841_v31  ;;  %v859_v26 = vcombine.high %v825_v33, %v841_v31  ;;  %v24771_v19 = vrot.slane %v842_v27, %v24681_v38  ;;  %v910_v34 = vcombine.low %v886_v21, %v902_v25 }
 0x259   : > { %v857_v36 = vrot.slane %v843_v0, %v24681_v38  ;;  %v1022_v37 = vrot.slane %v1014_v16, %v24670_v24  ;;  %v1302_v35 = vcombine.low %v24740_v41, %v24743_v43  ;;  %v22093_v31 = vcombine.high %v24740_v41, %v24743_v43 }
 0x25a   : > { %v24615_v4 = vpop.permute.xlu0 %610  ;;  %v24621_v5 = vpop.permute.xlu1 %660 }
 0x25b   : > { %1784 = vrot.lane.b32.xlu1 %v24573_v59, %s29573_s26  ;;  %1768 = vrot.lane.b32.xlu0 %v24501_v45, %s29573_s26  ;;  %29653 = vst [vmem:[#allocation22_spill] sm:$0xff] %v24621_v5  ;;  %v1030_v29 = vcombine.low %v24609_v3, %v24621_v5  ;;  %v1031_v44 = vcombine.high %v24609_v3, %v24621_v5 }
 0x25c   : > { %v1354_v41 = vcombine.low %v24771_v19, %v857_v36 }
 0x25d   : > { %v1038_v30 = vrot.slane %v1030_v29, %v24670_v24  ;;  %v1029_v29 = vrot.slane %v1015_v18, %v24670_v24  ;;  %v22094_v18 = vcombine.high %v24771_v19, %v857_v36 }
 0x25e   : > { %v24625_v6 = vpop.permute.xlu0 %658  ;;  %v24629_v7 = vpop.permute.xlu1 %634 }
 0x25f   : > { %1816 = vrot.lane.b32.xlu1 %v24596_v1, %s29573_s26  ;;  %1800 = vrot.lane.b32.xlu0 %v24589_v63, %s29573_s26  ;;  %29654 = vst [vmem:[#allocation23_spill] sm:$0xff] %v24625_v6  ;;  %29655 = vst [vmem:[#allocation24_spill] sm:$0xff] %v24629_v7  ;;  %v1046_v33 = vcombine.low %v1022_v37, %v1038_v30  ;;  %v1047_v40 = vcombine.high %v1022_v37, %v1038_v30 }
 0x262   : > { %v24635_v8 = vpop.permute.xlu0 %1762  ;;  %v24647_v10 = vpop.permute.xlu1 %616 }
 0x263   : > { %1786 = vrot.lane.b32.xlu1 %v24615_v4, %s29573_s26  ;;  %1770 = vrot.lane.b32.xlu0 %v24527_v50, %s29573_s26  ;;  %29656 = vst [vmem:[#allocation25_spill] sm:$0xff] %v24647_v10 }
 0x266   : > { %v24643_v9 = vpop.permute.xlu0 %614  ;;  %v24655_v14 = vpop.permute.xlu1 %638 }
 0x267   : > { %1818 = vrot.lane.b32.xlu1 %v24625_v6, %s29573_s26  ;;  %1802 = vrot.lane.b32.xlu0 %v24629_v7, %s29573_s26  ;;  %29658 = vst [vmem:[#allocation27_spill] sm:$0xff] %v24655_v14 }
 0x26a   : > { %v24653_v13 = vpop.permute.xlu0 %662 }
 0x26b   : > { %1788 = vrot.lane.b32.xlu1 %v24609_v3, %s29573_s26  ;;  %1772 = vrot.lane.b32.xlu0 %v24521_v49, %s29573_s26  ;;  %29657 = vst [vmem:[#allocation26_spill] sm:$0xff] %v24653_v13 }
 0x26f   : > { %1820 = vrot.lane.b32.xlu1 %v24621_v5, %s29573_s26  ;;  %1804 = vrot.lane.b32.xlu0 %v24603_v2, %s29573_s26  ;;  %v926_v5 = vcombine.low %v893_v15, %v909_v23  ;;  %v927_v2 = vcombine.high %v893_v15, %v909_v23  ;;  %v24786_v23 = vrot.slane %v910_v34, %v24681_v38 }
 0x270   : > { %v947_v34 = vcombine.high %v24527_v50, %v24629_v7 }
 0x271   : > { %v24794_v43 = vrot.slane %v926_v5, %v24681_v38  ;;  %v24797_v16 = vrot.slane %v927_v2, %v24681_v38  ;;  %v24808_v5 = vrot.slane %v1046_v33, %v24681_v38  ;;  %v24811_v2 = vrot.slane %v1047_v40, %v24681_v38 }
 0x272   : > { %v1251_v33 = vcombine.high %v24704_v47, %v24707_v48  ;;  %v1267_v40 = vcombine.high %v24710_v11, %v24713_v12  ;;  %v1293_v48 = vrot.slane %v1286_v17, %v24670_v24  ;;  %v1309_v47 = vrot.slane %v1302_v35, %v24670_v24 }
 0x273   : > { %1790 = vrot.lane.b32.xlu1 %v24643_v9, %s29573_s26  ;;  %1774 = vrot.lane.b32.xlu0 %v24543_v52, %s29573_s26  ;;  %v1317_v17 = vrot.slane %v22093_v31, %v24670_v24  ;;  %v1083_v12 = vcombine.high %v24543_v52, %v24655_v14  ;;  %v1369_v35 = vrot.slane %v22094_v18, %v24670_v24 }
 0x277   : > { %1822 = vrot.lane.b32.xlu1 %v24653_v13, %s29573_s26  ;;  %1806 = vrot.lane.b32.xlu0 %v24655_v14, %s29573_s26 }
 0x27b   : > { %1792 = vrot.lane.b32.xlu1 %v24647_v10, %s29573_s26  ;;  %1776 = vrot.lane.b32.xlu0 %v24537_v51, %s29573_s26  ;;  %v911_v51 = vcombine.high %v886_v21, %v902_v25  ;;  %v1045_v10 = vrot.slane %v1031_v44, %v24670_v24  ;;  %v866_v21 = vrot.slane %v858_v22, %v24681_v38 }
 0x27c   : > { %v873_v25 = vrot.slane %v859_v26, %v24681_v38  ;;  %v946_v22 = vcombine.low %v24527_v50, %v24629_v7 }
 0x27d   : > { %v24789_v44 = vrot.slane %v911_v51, %v24681_v38  ;;  %v1062_v0 = vcombine.low %v1029_v29, %v1045_v10  ;;  %v1063_v15 = vcombine.high %v1029_v29, %v1045_v10  ;;  %v962_v51 = vcombine.low %v24615_v4, %v24625_v6 }
 0x27e   : > { %v963_v10 = vcombine.high %v24615_v4, %v24625_v6  ;;  %v1370_v26 = vcombine.low %v866_v21, %v873_v25  ;;  %v22095_v19 = vcombine.high %v866_v21, %v873_v25  ;;  %v954_v27 = vrot.slane %v946_v22, %v24670_v24 }
 0x27f   : > { %v24818_v37 = vrot.slane %v1062_v0, %v24681_v38  ;;  %v24821_v29 = vrot.slane %v1063_v15, %v24681_v38  ;;  %v961_v0 = vrot.slane %v947_v34, %v24670_v24  ;;  %v970_v36 = vrot.slane %v962_v51, %v24670_v24 }
 0x280   : > { %v977_v15 = vrot.slane %v963_v10, %v24670_v24  ;;  %v1098_v25 = vcombine.low %v24643_v9, %v24653_v13  ;;  %v1099_v34 = vcombine.high %v24643_v9, %v24653_v13  ;;  %v1082_v51 = vcombine.low %v24543_v52, %v24655_v14 }
 0x281   : > { %v1301_v10 = vrot.slane %v22092_v20, %v24670_v24  ;;  %v978_v21 = vcombine.low %v954_v27, %v970_v36  ;;  %v979_v11 = vcombine.high %v954_v27, %v970_v36  ;;  %v24859_v13 = vrot.slane %v1251_v33, %v24681_v38 }
 0x282   : > { %v994_v30 = vcombine.low %v961_v0, %v977_v15  ;;  %v995_v49 = vcombine.high %v961_v0, %v977_v15  ;;  %v1106_v22 = vrot.slane %v1098_v25, %v24670_v24  ;;  %v1361_v6 = vrot.slane %v1354_v41, %v24670_v24 }
 0x283   : > { %v1113_v20 = vrot.slane %v1099_v34, %v24670_v24  ;;  %v1377_v31 = vrot.slane %v1370_v26, %v24670_v24  ;;  %v1385_v27 = vrot.slane %v22095_v19, %v24670_v24  ;;  %v1090_v36 = vrot.slane %v1082_v51, %v24670_v24 }
 0x284   : > { %v24868_v14 = vrot.slane %v1267_v40, %v24681_v38  ;;  %v1318_v0 = vcombine.low %v1293_v48, %v1301_v10  ;;  %v1334_v25 = vcombine.low %v1309_v47, %v1317_v17  ;;  %v986_v33 = vrot.slane %v978_v21, %v24681_v38 }
 0x285   : > { %v1097_v15 = vrot.slane %v1083_v12, %v24670_v24  ;;  %v1319_v41 = vcombine.high %v1293_v48, %v1301_v10  ;;  %v1335_v52 = vcombine.high %v1309_v47, %v1317_v17  ;;  %v993_v34 = vrot.slane %v979_v11, %v24681_v38 }
 0x286   : > { %v1002_v18 = vrot.slane %v994_v30, %v24681_v38  ;;  %v1114_v26 = vcombine.low %v1090_v36, %v1106_v22  ;;  %v1115_v7 = vcombine.high %v1090_v36, %v1106_v22  ;;  %v1386_v51 = vcombine.low %v1361_v6, %v1369_v35 }
 0x287   : > { %v1130_v19 = vcombine.low %v1097_v15, %v1113_v20  ;;  %v1131_v50 = vcombine.high %v1097_v15, %v1113_v20  ;;  %v1402_v1 = vcombine.low %v1377_v31, %v1385_v27  ;;  %v1009_v40 = vrot.slane %v995_v49, %v24681_v38 }
 0x288   : > { %v24878_v21 = vrot.slane %v1318_v0, %v24681_v38  ;;  %v24881_v47 = vrot.slane %v1334_v25, %v24681_v38  ;;  %v24884_v48 = vrot.slane %v1319_v41, %v24681_v38  ;;  %v24887_v30 = vrot.slane %v1335_v52, %v24681_v38 }
 0x289   : > { %v1387_v11 = vcombine.high %v1361_v6, %v1369_v35  ;;  %v1403_v12 = vcombine.high %v1377_v31, %v1385_v27  ;;  %v1490_v22 = vcombine.low %v986_v33, %v993_v34  ;;  %v24890_v49 = vrot.slane %v1114_v26, %v24681_v38 }
 0x28a   : > { %v24893_v10 = vrot.slane %v1115_v7, %v24681_v38  ;;  %v24898_v20 = vrot.slane %v1130_v19, %v24681_v38  ;;  %v24901_v36 = vrot.slane %v1131_v50, %v24681_v38  ;;  %v24904_v6 = vrot.slane %v1386_v51, %v24681_v38 }
 0x28b   : > { %29659 = vst [vmem:[#allocation28_spill] sm:$0xff] %v24890_v49  ;;  %v24907_v35 = vrot.slane %v1402_v1, %v24681_v38  ;;  %v22098_v31 = vcombine.high %v986_v33, %v993_v34  ;;  %v1506_v27 = vcombine.low %v1002_v18, %v1009_v40  ;;  %v22099_v7 = vcombine.high %v1002_v18, %v1009_v40 }
 0x28c   : > { %29660 = vst [vmem:[#allocation29_spill] sm:$0xff] %v24893_v10  ;;  %29661 = vst [vmem:[#allocation30_spill] sm:$0xff] %v24898_v20  ;;  %v24916_v15 = vrot.slane %v1387_v11, %v24681_v38  ;;  %v24919_v41 = vrot.slane %v1403_v12, %v24681_v38  ;;  %v29664_v18 = vcombine.low %v24786_v23, %v24789_v44 }
 0x28d   : > { %29662 = vst [vmem:[#allocation31_spill] sm:$0xff] %v24901_v36  ;;  %v29665_v51 = vcombine.high %v24786_v23, %v24789_v44  ;;  %v29666_v12 = vcombine.low %v24794_v43, %v24797_v16  ;;  %v1497_v44 = vrot.slane %v1490_v22, %v24670_v24  ;;  %v1521_v17 = vrot.slane %v22099_v7, %v24670_v24 }
 0x28e   : > { %29663 = vst [vmem:[#allocation32_spill] sm:$0xff] %v24919_v41  ;;  %v1429_v26 = vrot.slane %v29664_v18, %v24670_v24 }
 0x28f   : > { %v1437_v25 = vrot.slane %v29665_v51, %v24670_v24  ;;  %v1445_v0 = vrot.slane %v29666_v12, %v24670_v24  ;;  %v1505_v51 = vrot.slane %v22098_v31, %v24670_v24  ;;  %v1513_v12 = vrot.slane %v1506_v27, %v24670_v24 }
 0x290   : > { %v29670_v27 = vcombine.low %v24808_v5, %v24811_v2 }
 0x291   : > { %v1454_v31 = vcombine.low %v1429_v26, %v1437_v25  ;;  %v1522_v22 = vcombine.low %v1497_v44, %v1505_v51 }
 0x292   : > { %v24977_v7 = vrot.slane %v29670_v27, %v24670_v24 }
 0x2b1   : > { %v1779_v52 = vpop.permute.xlu1 %1778 }
 0x2b5   : > { %v1811_v40 = vpop.permute.xlu1 %1810  ;;  %v1795_v11 = vpop.permute.xlu0 %1794 }
 0x2b6   : > { %v1874_v1 = vcombine.low %v1779_v52, %v1811_v40  ;;  %v1875_v34 = vcombine.high %v1779_v52, %v1811_v40  ;;  %v1858_v50 = vcombine.low %v24635_v8, %v1795_v11  ;;  %v1859_v18 = vcombine.high %v24635_v8, %v1795_v11 }
 0x2b7   : > { %v29667_v52 = vcombine.high %v24794_v43, %v24797_v16 }
 0x2b8   : > { %v1882_v8 = vrot.slane %v1874_v1, %v24670_v24  ;;  %v1889_v11 = vrot.slane %v1875_v34, %v24670_v24  ;;  %v1866_v19 = vrot.slane %v1858_v50, %v24670_v24  ;;  %v1873_v33 = vrot.slane %v1859_v18, %v24670_v24 }
 0x2b9   : > { %v1453_v40 = vrot.slane %v29667_v52, %v24670_v24  ;;  %v24959_v23 = vpop.permute.xlu1 %664  ;;  %v24965_v63 = vpop.permute.xlu0 %640 }
 0x2ba   : > { %29668 = vst [vmem:[#allocation33_spill] sm:$0xff] %v24959_v23  ;;  %v1890_v43 = vcombine.low %v1866_v19, %v1882_v8  ;;  %v1891_v16 = vcombine.high %v1866_v19, %v1882_v8  ;;  %v1906_v52 = vcombine.low %v1873_v33, %v1889_v11  ;;  %v1907_v1 = vcombine.high %v1873_v33, %v1889_v11 }
 0x2bb   : > { %29669 = vst [vmem:[#allocation34_spill] sm:$0xff] %v24965_v63  ;;  %1824 = vrot.lane.b32.xlu1 %v24959_v23, %s29573_s26  ;;  %1808 = vrot.lane.b32.xlu0 %v24965_v63, %s29573_s26  ;;  %v1470_v50 = vcombine.low %v1445_v0, %v1453_v40  ;;  %v1455_v11 = vcombine.high %v1429_v26, %v1437_v25 }
 0x2bc   : > { %v1898_v33 = vrot.slane %v1890_v43, %v24681_v38  ;;  %v1905_v34 = vrot.slane %v1891_v16, %v24681_v38  ;;  %v1914_v19 = vrot.slane %v1906_v52, %v24681_v38  ;;  %v1921_v18 = vrot.slane %v1907_v1, %v24681_v38 }
 0x2bd   : > { %v1781_v8 = vpop.permute.xlu1 %1780  ;;  %v1471_v63 = vcombine.high %v1445_v0, %v1453_v40  ;;  %v1538_v23 = vcombine.low %v1513_v12, %v1521_v17  ;;  %v1765_v41 = vpop.permute.xlu0 %1764  ;;  %v24988_v43 = vrot.slane %v1454_v31, %v24681_v38  ;;  %v24991_v25 = vrot.slane %v1470_v50, %v24681_v38 }
 0x2be   : > { %v2402_v36 = vcombine.low %v1898_v33, %v1905_v34  ;;  %v22106_v20 = vcombine.high %v1898_v33, %v1905_v34  ;;  %v2418_v10 = vcombine.low %v1914_v19, %v1921_v18  ;;  %v22107_v49 = vcombine.high %v1914_v19, %v1921_v18 }
 0x2bf   : > { %2946 = vrot.lane.b32.xlu1 %v24489_v39, %s29571_s10  ;;  %2962 = vrot.lane.b32.xlu0 %v24553_v54, %s29571_s10  ;;  %v1523_v0 = vcombine.high %v1497_v44, %v1505_v51  ;;  %v1539_v26 = vcombine.high %v1513_v12, %v1521_v17  ;;  %v24998_v27 = vrot.slane %v1455_v11, %v24681_v38 }
 0x2c0   : > { %v2409_v40 = vrot.slane %v2402_v36, %v24670_v24  ;;  %v2417_v16 = vrot.slane %v22106_v20, %v24670_v24  ;;  %v2425_v52 = vrot.slane %v2418_v10, %v24670_v24  ;;  %v2433_v1 = vrot.slane %v22107_v49, %v24670_v24 }
 0x2c1   : > { %v1813_v39 = vpop.permute.xlu1 %1812  ;;  %v25001_v54 = vrot.slane %v1471_v63, %v24681_v38  ;;  %v25004_v31 = vrot.slane %v1522_v22, %v24681_v38  ;;  %v25007_v17 = vrot.slane %v1538_v23, %v24681_v38  ;;  %v1797_v10 = vpop.permute.xlu0 %1796  ;;  %v1486_v63 = vcombine.low %v24988_v43, %v24991_v25 }
 0x2c2   : > { %v2434_v36 = vcombine.low %v2409_v40, %v2417_v16  ;;  %v2435_v44 = vcombine.high %v2409_v40, %v2417_v16  ;;  %v2450_v20 = vcombine.low %v2425_v52, %v2433_v1  ;;  %v2451_v51 = vcombine.high %v2425_v52, %v2433_v1 }
 0x2c3   : > { %2978 = vrot.lane.b32.xlu1 %v24559_v56, %s29571_s10  ;;  %2964 = vrot.lane.b32.xlu0 %v24557_v55, %s29571_s10  ;;  %v1487_v49 = vcombine.high %v24988_v43, %v24991_v25  ;;  %v25018_v23 = vrot.slane %v1523_v0, %v24681_v38  ;;  %v25021_v12 = vrot.slane %v1539_v26, %v24681_v38 }
 0x2c4   : > { %v1942_v22 = vcombine.low %v1781_v8, %v1813_v39  ;;  %v1943_v50 = vcombine.high %v1781_v8, %v1813_v39  ;;  %v1926_v33 = vcombine.low %v1765_v41, %v1797_v10  ;;  %v1927_v34 = vcombine.high %v1765_v41, %v1797_v10 }
 0x2c5   : > { %v1783_v56 = vpop.permute.xlu1 %1782  ;;  %v2442_v19 = vrot.slane %v2434_v36, %v24681_v38  ;;  %v2458_v55 = vrot.slane %v2450_v20, %v24681_v38  ;;  %v25026_v18 = vrot.slane %v2435_v44, %v24681_v38  ;;  %v25029_v11 = vrot.slane %v2451_v51, %v24681_v38  ;;  %v1767_v41 = vpop.permute.xlu0 %1766 }
 0x2c6   : > { %v1950_v0 = vrot.slane %v1942_v22, %v24670_v24  ;;  %v1957_v26 = vrot.slane %v1943_v50, %v24670_v24  ;;  %v1934_v40 = vrot.slane %v1926_v33, %v24670_v24  ;;  %v1941_v8 = vrot.slane %v1927_v34, %v24670_v24 }
 0x2c7   : > { %2994 = vrot.lane.b32.xlu1 %v24551_v53, %s29571_s10  ;;  %2966 = vrot.lane.b32.xlu0 %v24575_v60, %s29571_s10  ;;  %v2466_v16 = vcombine.low %v2442_v19, %v2458_v55  ;;  %v2468_v52 = vcombine.low %v25026_v18, %v25029_v11  ;;  %v1488_v1 = vcombine.low %v24998_v27, %v25001_v54 }
 0x2c8   : > { %v1489_v39 = vcombine.high %v24998_v27, %v25001_v54  ;;  %v1958_v36 = vcombine.low %v1934_v40, %v1950_v0  ;;  %v1959_v44 = vcombine.high %v1934_v40, %v1950_v0  ;;  %v1974_v20 = vcombine.low %v1941_v8, %v1957_v26 }
 0x2c9   : > { %v1975_v51 = vcombine.high %v1941_v8, %v1957_v26  ;;  %22913 = vmatpush3.xpose.msk.msra.mxu0 %vm317_vm0, %v2466_v16  ;;  %22923 = vmatpush3.xpose.msk.msra.mxu1 %vm317_vm0, %v2468_v52  ;;  %v1815_v53 = vpop.permute.xlu1 %1814  ;;  %v2467_v60 = vcombine.high %v2442_v19, %v2458_v55  ;;  %v1799_v26 = vpop.permute.xlu0 %1798 }
 0x2ca   : > { %v1966_v50 = vrot.slane %v1958_v36, %v24681_v38  ;;  %v1973_v33 = vrot.slane %v1959_v44, %v24681_v38  ;;  %v1982_v34 = vrot.slane %v1974_v20, %v24681_v38  ;;  %v2010_v40 = vcombine.low %v1783_v56, %v1815_v53 }
 0x2cb   : > { %v1989_v0 = vrot.slane %v1975_v51, %v24681_v38  ;;  %2948 = vrot.lane.b32.xlu1 %v24495_v42, %s29571_s10  ;;  %v2011_v19 = vcombine.high %v1783_v56, %v1815_v53  ;;  %v1994_v55 = vcombine.low %v1767_v41, %v1799_v26  ;;  %v1995_v8 = vcombine.high %v1767_v41, %v1799_v26 }
 0x2cc   : > { %2968 = vrot.lane.b32.xlu0 %v24573_v59, %s29571_s10  ;;  %v2470_v16 = vcombine.low %v1966_v50, %v1973_v33  ;;  %v22108_v52 = vcombine.high %v1966_v50, %v1973_v33  ;;  %v29671_v44 = vcombine.low %v24762_v28, %v24765_v32  ;;  %v2018_v20 = vrot.slane %v2010_v40, %v24670_v24 }
 0x2cd   : > { %v2486_v36 = vcombine.low %v1982_v34, %v1989_v0  ;;  %v22109_v22 = vcombine.high %v1982_v34, %v1989_v0  ;;  %v2025_v42 = vrot.slane %v2011_v19, %v24670_v24  ;;  %v2002_v56 = vrot.slane %v1994_v55, %v24670_v24  ;;  %v1785_v59 = vpop.permute.xlu1 %1784  ;;  %v1769_v26 = vpop.permute.xlu0 %1768 }
 0x2ce   : > { %22915 = vmatmul.mubr.msk.f32.vlgmr.msra.gmra.mrb[14].mxu0 %vm317_vm0, %v29671_v44  ;;  %v2009_v41 = vrot.slane %v1995_v8, %v24670_v24  ;;  %v29672_v51 = vmov 0.0   ;;  %v25069_v53 = vrot.slane %v2470_v16, %v24670_v24  ;;  %v25072_v50 = vrot.slane %v22108_v52, %v24670_v24 }
 0x2cf   : > { %22917 = vmatprep.subr.mxu0 %v29672_v51  ;;  %v25075_v33 = vrot.slane %v2486_v36, %v24670_v24  ;;  %v25078_v34 = vrot.slane %v22109_v22, %v24670_v24  ;;  %v29673_v0 = vcombine.low %v24859_v13, %v24868_v14  ;;  %v2026_v40 = vcombine.low %v2002_v56, %v2018_v20 }
 0x2d0   : > { %v2027_v19 = vcombine.high %v2002_v56, %v2018_v20  ;;  %v2042_v55 = vcombine.low %v2009_v41, %v2025_v42  ;;  %v2043_v8 = vcombine.high %v2009_v41, %v2025_v42  ;;  %22918 = vmatpush3.xpose.msk.msra.mxu0 %vm317_vm0, %v2467_v60  ;;  %v2502_v16 = vcombine.low %v25069_v53, %v25072_v50 }
 0x2d1   : > { %22925 = vmatmul.mubr.msk.f32.vlgmr.msra.gmra.mrb[2].mxu1 %vm317_vm0, %v29673_v0  ;;  %2980 = vrot.lane.b32.xlu1 %v24567_v58, %s29571_s10  ;;  %v2469_v22 = vcombine.high %v25026_v18, %v25029_v11  ;;  %v2034_v44 = vrot.slane %v2026_v40, %v24681_v38  ;;  %v1817_v58 = vpop.permute.xlu1 %1816  ;;  %v2518_v18 = vcombine.low %v25075_v33, %v25078_v34  ;;  %v1801_v0 = vpop.permute.xlu0 %1800 }
 0x2d2   : > { %v2041_v20 = vrot.slane %v2027_v19, %v24681_v38  ;;  %v2050_v60 = vrot.slane %v2042_v55, %v24681_v38  ;;  %v2057_v42 = vrot.slane %v2043_v8, %v24681_v38  ;;  %22919 = vmatprep.mubr.msk.f32.mxu0 %vm24316_vm2, %v29672_v51  ;;  %2970 = vrot.lane.b32.xlu0 %v24615_v4, %s29571_s10 }
 0x2d3   : > { %v29674_v11 = vcombine.high %v24762_v28, %v24765_v32  ;;  %v2078_v56 = vcombine.low %v1785_v59, %v1817_v58  ;;  %v2079_v41 = vcombine.high %v1785_v59, %v1817_v58  ;;  %22927 = vmatprep.subr.mxu0 %v29672_v51  ;;  %v2062_v52 = vcombine.low %v1769_v26, %v1801_v0 }
 0x2d4   : > { %v2538_v40 = vcombine.low %v2034_v44, %v2041_v20  ;;  %v22110_v19 = vcombine.high %v2034_v44, %v2041_v20  ;;  %v2554_v55 = vcombine.low %v2050_v60, %v2057_v42  ;;  %v22111_v8 = vcombine.high %v2050_v60, %v2057_v42  ;;  %22932 = vmatprep.subr.mxu1 %v29672_v51 }
 0x2d5   : > { %22920 = vmatmul.mubr.msk.f32.vlgmr.msra.gmra.mrb[16].mxu0 %vm317_vm0, %v29674_v11  ;;  %v2086_v36 = vrot.slane %v2078_v56, %v24670_v24  ;;  %v2093_v4 = vrot.slane %v2079_v41, %v24670_v24  ;;  %v2063_v10 = vcombine.high %v1769_v26, %v1801_v0  ;;  %v2503_v28 = vcombine.high %v25069_v53, %v25072_v50  ;;  %v1787_v44 = vpop.permute.xlu1 %1786  ;;  %v1771_v53 = vpop.permute.xlu0 %1770 }
 0x2d6   : > { %22928 = vmatpush3.xpose.msk.msra.mxu0 %vm317_vm0, %v2469_v22  ;;  %v2519_v32 = vcombine.high %v25075_v33, %v25078_v34  ;;  %2996 = vrot.lane.b32.xlu1 %v24565_v57, %s29571_s10  ;;  %v2510_v59 = vrot.slane %v2502_v16, %v24681_v38  ;;  %v29675_v22 = vcombine.high %v24808_v5, %v24811_v2 }
 0x2d7   : > { %v2070_v26 = vrot.slane %v2062_v52, %v24670_v24  ;;  %v2077_v60 = vrot.slane %v2063_v10, %v24670_v24  ;;  %22929 = vmatprep.mubr.msk.f32.mxu0 %vm24316_vm2, %v29672_v51  ;;  %2972 = vrot.lane.b32.xlu0 %v24609_v3, %s29571_s10  ;;  %v2526_v57 = vrot.slane %v2518_v18, %v24681_v38 }
 0x2d8   : > { %v25124_v20 = vrot.slane %v29675_v22, %v24670_v24  ;;  %v25134_v50 = vrot.slane %v2538_v40, %v24670_v24  ;;  %v25137_v5 = vrot.slane %v22110_v19, %v24670_v24  ;;  %v25140_v2 = vrot.slane %v2554_v55, %v24670_v24  ;;  %22937 = vmatprep.subr.mxu0 %v29672_v51 }
 0x2d9   : > { %v25143_v10 = vrot.slane %v22111_v8, %v24670_v24  ;;  %v29676_v33 = vcombine.high %v24859_v13, %v24868_v14  ;;  %v2094_v3 = vcombine.low %v2070_v26, %v2086_v36  ;;  %v2095_v34 = vcombine.high %v2070_v26, %v2086_v36  ;;  %v1819_v11 = vpop.permute.xlu1 %1818  ;;  %22934 = vmatprep.mubr.msk.f32.mxu1 %vm24316_vm2, %v29672_v51  ;;  %v1803_v41 = vpop.permute.xlu0 %1802 }
 0x2da   : > { %v2110_v16 = vcombine.low %v2077_v60, %v2093_v4  ;;  %v2111_v52 = vcombine.high %v2077_v60, %v2093_v4  ;;  %v2534_v42 = vcombine.low %v2510_v59, %v2526_v57  ;;  %v2535_v58 = vcombine.high %v2510_v59, %v2526_v57  ;;  %2950 = vrot.lane.b32.xlu1 %v24507_v46, %s29571_s10 }
 0x2db   : > { %22930 = vmatmul.mubr.msk.f32.vlgmr.msra.gmra.mrb[18].mxu0 %vm317_vm0, %v29676_v33  ;;  %v2517_v18 = vrot.slane %v2503_v28, %v24681_v38  ;;  %v2102_v13 = vrot.slane %v2094_v3, %v24681_v38  ;;  %v2109_v14 = vrot.slane %v2095_v34, %v24681_v38  ;;  %v2533_v46 = vrot.slane %v2519_v32, %v24681_v38 }
 0x2dc   : > { %v2118_v36 = vrot.slane %v2110_v16, %v24681_v38  ;;  %v2125_v56 = vrot.slane %v2111_v52, %v24681_v38  ;;  %22933 = vmatpush3.xpose.msk.msra.mxu1 %vm317_vm0, %v2534_v42  ;;  %22938 = vmatpush3.xpose.msk.msra.mxu0 %vm317_vm0, %v2535_v58  ;;  %v2146_v0 = vcombine.low %v1787_v44, %v1819_v11 }
 0x2dd   : > { %v2147_v40 = vcombine.high %v1787_v44, %v1819_v11  ;;  %v2606_v19 = vcombine.low %v2102_v13, %v2109_v14  ;;  %v22112_v55 = vcombine.high %v2102_v13, %v2109_v14  ;;  %22939 = vmatprep.mubr.msk.f32.mxu0 %vm24316_vm2, %v29672_v51  ;;  %v29677_v4 = vcombine.low %v24818_v37, %v24821_v29  ;;  %v25180_v22 = vpop.permute.xlu1 %1788 }
 0x2de   : > { %v2622_v8 = vcombine.low %v2118_v36, %v2125_v56  ;;  %v2570_v59 = vcombine.low %v25134_v50, %v25137_v5  ;;  %v2571_v32 = vcombine.high %v25134_v50, %v25137_v5  ;;  %v2586_v44 = vcombine.low %v25140_v2, %v25143_v10  ;;  %2974 = vrot.lane.b32.xlu0 %v24643_v9, %s29571_s10  ;;  %v25187_v5 = vpop.permute.xlu0 %1772 }
 0x2df   : > { %v25169_v28 = vrot.slane %v29677_v4, %v24670_v24  ;;  %22942 = vmatprep.subr.mxu1 %v29672_v51  ;;  %v22113_v26 = vcombine.high %v2118_v36, %v2125_v56  ;;  %v29678_v60 = vcombine.low %v24878_v21, %v24881_v47  ;;  %v2536_v57 = vcombine.low %v2517_v18, %v2533_v46 }
 0x2e0   : > { %v2537_v33 = vcombine.high %v2517_v18, %v2533_v46  ;;  %v2154_v50 = vrot.slane %v2146_v0, %v24670_v24  ;;  %v29679_v3 = vcombine.high %v24878_v21, %v24881_v47  ;;  %22947 = vmatprep.subr.mxu0 %v29672_v51  ;;  %v2161_v9 = vrot.slane %v2147_v40, %v24670_v24 }
 0x2e1   : > { %22935 = vmatmul.mubr.msk.f32.vlgmr.msra.gmra.mrb[4].mxu1 %vm317_vm0, %v29678_v60  ;;  %v2130_v34 = vcombine.low %v1771_v53, %v1803_v41  ;;  %v2131_v16 = vcombine.high %v1771_v53, %v1803_v41  ;;  %v2587_v52 = vcombine.high %v25140_v2, %v25143_v10  ;;  %v25198_v42 = vrot.slane %v2606_v19, %v24670_v24  ;;  %v1821_v13 = vpop.permute.xlu1 %1820 }
 0x2e2   : > { %22940 = vmatmul.mubr.msk.f32.vlgmr.msra.gmra.mrb[20].mxu0 %vm317_vm0, %v29679_v3  ;;  %v25201_v58 = vrot.slane %v22112_v55, %v24670_v24  ;;  %v25204_v18 = vrot.slane %v2622_v8, %v24670_v24  ;;  %22943 = vmatpush3.xpose.msk.msra.mxu1 %vm317_vm0, %v2536_v57  ;;  %v2578_v53 = vrot.slane %v2570_v59, %v24681_v38  ;;  %v1805_v55 = vpop.permute.xlu0 %1804 }
 0x2e3   : > { %22948 = vmatpush3.xpose.msk.msra.mxu0 %vm317_vm0, %v2537_v33  ;;  %v2138_v21 = vrot.slane %v2130_v34, %v24670_v24  ;;  %v2145_v47 = vrot.slane %v2131_v16, %v24670_v24  ;;  %2982 = vrot.lane.b32.xlu1 %v24583_v62, %s29571_s10  ;;  %v25214_v2 = vrot.slane %v22113_v26, %v24670_v24 }
 0x2e4   : > { %22944 = vmatprep.mubr.msk.f32.mxu1 %vm24316_vm2, %v29672_v51  ;;  %22949 = vmatprep.mubr.msk.f32.mxu0 %vm24316_vm2, %v29672_v51  ;;  %v2594_v10 = vrot.slane %v2586_v44, %v24681_v38  ;;  %v2585_v11 = vrot.slane %v2571_v32, %v24681_v38  ;;  %v29680_v41 = vcombine.low %v24884_v48, %v24887_v30 }
 0x2e5   : > { %v2162_v14 = vcombine.low %v2138_v21, %v2154_v50  ;;  %v2163_v36 = vcombine.high %v2138_v21, %v2154_v50  ;;  %v2178_v56 = vcombine.low %v2145_v47, %v2161_v9  ;;  %v2179_v62 = vcombine.high %v2145_v47, %v2161_v9  ;;  %22952 = vmatprep.subr.mxu1 %v29672_v51  ;;  %v25255_v9 = vpop.permute.xlu1 %1790 }
 0x2e6   : > { %22945 = vmatmul.mubr.msk.f32.vlgmr.msra.gmra.mrb[6].mxu1 %vm317_vm0, %v29680_v41  ;;  %v29681_v46 = vcombine.high %v24884_v48, %v24887_v30  ;;  %v2602_v0 = vcombine.low %v2578_v53, %v2594_v10  ;;  %v2603_v40 = vcombine.high %v2578_v53, %v2594_v10  ;;  %v2601_v19 = vrot.slane %v2587_v52, %v24681_v38  ;;  %v25271_v53 = vpop.permute.xlu0 %1774 }
 0x2e7   : > { %v2170_v8 = vrot.slane %v2162_v14, %v24681_v38  ;;  %v2177_v4 = vrot.slane %v2163_v36, %v24681_v38  ;;  %v2186_v59 = vrot.slane %v2178_v56, %v24681_v38  ;;  %v2193_v32 = vrot.slane %v2179_v62, %v24681_v38  ;;  %22957 = vmatprep.subr.mxu0 %v29672_v51 }
 0x2e8   : > { %22950 = vmatmul.mubr.msk.f32.vlgmr.msra.gmra.mrb[22].mxu0 %vm317_vm0, %v29681_v46  ;;  %v2638_v48 = vcombine.low %v25198_v42, %v25201_v58  ;;  %22953 = vmatpush3.xpose.msk.msra.mxu1 %vm317_vm0, %v2602_v0  ;;  %v2214_v30 = vcombine.low %v25180_v22, %v1821_v13  ;;  %v2215_v44 = vcombine.high %v25180_v22, %v1821_v13 }
 0x2e9   : > { %22958 = vmatpush3.xpose.msk.msra.mxu0 %vm317_vm0, %v2603_v40  ;;  %v2639_v26 = vcombine.high %v25198_v42, %v25201_v58  ;;  %v2674_v60 = vcombine.low %v2170_v8, %v2177_v4  ;;  %v22114_v57 = vcombine.high %v2170_v8, %v2177_v4  ;;  %v2690_v33 = vcombine.low %v2186_v59, %v2193_v32  ;;  %v1823_v40 = vpop.permute.xlu1 %1822 }
 0x2ea   : > { %2998 = vrot.lane.b32.xlu1 %v24581_v61, %s29571_s10  ;;  %v2654_v50 = vcombine.low %v25204_v18, %v25214_v2  ;;  %22954 = vmatprep.mubr.msk.f32.mxu1 %vm24316_vm2, %v29672_v51  ;;  %v2222_v22 = vrot.slane %v2214_v30, %v24670_v24  ;;  %v2198_v3 = vcombine.low %v25187_v5, %v1805_v55 }
 0x2eb   : > { %22959 = vmatprep.mubr.msk.f32.mxu0 %vm24316_vm2, %v29672_v51  ;;  %v2655_v34 = vcombine.high %v25204_v18, %v25214_v2  ;;  %v22115_v16 = vcombine.high %v2186_v59, %v2193_v32  ;;  %v29682_v61 = vcombine.low %v24904_v6, %v24907_v35  ;;  %v2604_v52 = vcombine.low %v2585_v11, %v2601_v19 }
 0x2ec   : > { %v2605_v42 = vcombine.high %v2585_v11, %v2601_v19  ;;  %v29683_v58 = vcombine.high %v24904_v6, %v24907_v35  ;;  %22962 = vmatprep.subr.mxu1 %v29672_v51  ;;  %v2229_v21 = vrot.slane %v2215_v44, %v24670_v24  ;;  %v2199_v47 = vcombine.high %v25187_v5, %v1805_v55  ;;  %v29684_v19 = vld [vmem:[#allocation32_spill] sm:$0xff] }
 0x2ed   : > { %22955 = vmatmul.mubr.msk.f32.vlgmr.msra.gmra.mrb[8].mxu1 %vm317_vm0, %v29682_v61  ;;  %v2206_v18 = vrot.slane %v2198_v3, %v24670_v24  ;;  %v25274_v2 = vrot.slane %v2674_v60, %v24670_v24  ;;  %v25277_v10 = vrot.slane %v22114_v57, %v24670_v24  ;;  %v25280_v6 = vrot.slane %v2690_v33, %v24670_v24 }
 0x2ee   : > { %22960 = vmatmul.mubr.msk.f32.vlgmr.msra.gmra.mrb[24].mxu0 %vm317_vm0, %v29683_v58  ;;  %22967 = vmatprep.subr.mxu0 %v29672_v51  ;;  %v2646_v35 = vrot.slane %v2638_v48, %v24681_v38  ;;  %v2213_v5 = vrot.slane %v2199_v47, %v24670_v24  ;;  %v25288_v14 = vrot.slane %v22115_v16, %v24670_v24 }
 0x2ef   : > { %22963 = vmatpush3.xpose.msk.msra.mxu1 %vm317_vm0, %v2604_v52  ;;  %22968 = vmatpush3.xpose.msk.msra.mxu0 %vm317_vm0, %v2605_v42  ;;  %v2230_v11 = vcombine.low %v2206_v18, %v2222_v22  ;;  %v2231_v13 = vcombine.high %v2206_v18, %v2222_v22  ;;  %v2662_v36 = vrot.slane %v2654_v50, %v24681_v38 }
 0x2f0   : > { %2952 = vrot.lane.b32.xlu1 %v24501_v45, %s29571_s10  ;;  %22964 = vmatprep.mubr.msk.f32.mxu1 %vm24316_vm2, %v29672_v51  ;;  %v2653_v56 = vrot.slane %v2639_v26, %v24681_v38  ;;  %v2246_v46 = vcombine.low %v2213_v5, %v2229_v21  ;;  %v2247_v0 = vcombine.high %v2213_v5, %v2229_v21  ;;  %v1807_v26 = vpop.permute.xlu0 %1806  ;;  %v29688_v5 = vld [vmem:[#allocation20_spill] sm:$0xff] }
 0x2f1   : > { %v2238_v62 = vrot.slane %v2230_v11, %v24681_v38  ;;  %v2245_v41 = vrot.slane %v2231_v13, %v24681_v38  ;;  %22969 = vmatprep.mubr.msk.f32.mxu0 %vm24316_vm2, %v29672_v51  ;;  %v29685_v45 = vcombine.low %v24916_v15, %v29684_v19  ;;  %v29686_v55 = vcombine.high %v24916_v15, %v29684_v19 }
 0x2f2   : > { %v2670_v8 = vcombine.low %v2646_v35, %v2662_v36  ;;  %v2671_v4 = vcombine.high %v2646_v35, %v2662_v36  ;;  %v2669_v59 = vrot.slane %v2655_v34, %v24681_v38  ;;  %v2254_v32 = vrot.slane %v2246_v46, %v24681_v38  ;;  %22972 = vmatprep.subr.mxu1 %v29672_v51  ;;  %v29687_v34 = vld [vmem:[#allocation19_spill] sm:$0xff] }
 0x2f3   : > { %22965 = vmatmul.mubr.msk.f32.vlgmr.msra.gmra.mrb[10].mxu1 %vm317_vm0, %v29685_v45  ;;  %22970 = vmatmul.mubr.msk.f32.vlgmr.msra.gmra.mrb[26].mxu0 %vm317_vm0, %v29686_v55  ;;  %v2261_v48 = vrot.slane %v2247_v0, %v24681_v38  ;;  %v2742_v30 = vcombine.low %v2238_v62, %v2245_v41  ;;  %v22116_v44 = vcombine.high %v2238_v62, %v2245_v41 }
 0x2f4   : > { %v2706_v60 = vcombine.low %v25274_v2, %v25277_v10  ;;  %22977 = vmatprep.subr.mxu0 %v29672_v51  ;;  %22973 = vmatpush3.xpose.msk.msra.mxu1 %vm317_vm0, %v2670_v8  ;;  %v2282_v15 = vcombine.low %v25255_v9, %v1823_v40  ;;  %v2283_v57 = vcombine.high %v25255_v9, %v1823_v40 }
 0x2f5   : > { %v2707_v33 = vcombine.high %v25274_v2, %v25277_v10  ;;  %v2722_v50 = vcombine.low %v25280_v6, %v25288_v14  ;;  %v2758_v22 = vcombine.low %v2254_v32, %v2261_v48  ;;  %v22117_v3 = vcombine.high %v2254_v32, %v2261_v48  ;;  %22978 = vmatpush3.xpose.msk.msra.mxu0 %vm317_vm0, %v2671_v4 }
 0x2f6   : > { %2984 = vrot.lane.b32.xlu1 %v29687_v34, %s29571_s10  ;;  %22974 = vmatprep.mubr.msk.f32.mxu1 %vm24316_vm2, %v29672_v51  ;;  %v2672_v16 = vcombine.low %v2653_v56, %v2669_v59  ;;  %v2290_v61 = vrot.slane %v2282_v15, %v24670_v24  ;;  %v2266_v9 = vcombine.low %v25271_v53, %v1807_v26 }
 0x2f7   : > { %v25330_v52 = vrot.slane %v2742_v30, %v24670_v24  ;;  %v25333_v42 = vrot.slane %v22116_v44, %v24670_v24  ;;  %22979 = vmatprep.mubr.msk.f32.mxu0 %vm24316_vm2, %v29672_v51  ;;  %v2673_v58 = vcombine.high %v2653_v56, %v2669_v59  ;;  %v2297_v21 = vrot.slane %v2283_v57, %v24670_v24  ;;  %v29694_v30 = vld [vmem:[#allocation16_spill] sm:$0xff] }
 0x2f8   : > { %22975 = vmatmul.mubr.msk.f32.vlgmr.msra.gmra.mrb[12].mxu1 %vm317_vm0, %v1486_v63  ;;  %22980 = vmatmul.mubr.msk.f32.vlgmr.msra.gmra.mrb[28].mxu0 %vm317_vm0, %v1487_v49  ;;  %v2267_v47 = vcombine.high %v25271_v53, %v1807_v26  ;;  %v2274_v18 = vrot.slane %v2266_v9, %v24670_v24  ;;  %v2714_v2 = vrot.slane %v2706_v60, %v24681_v38  ;;  %v29698_v9 = vld [vmem:[#allocation31_spill] sm:$0xff] }
 0x2f9   : > { %v25350_v10 = vrot.slane %v2758_v22, %v24670_v24  ;;  %v25353_v35 = vrot.slane %v22117_v3, %v24670_v24  ;;  %22982 = vmatprep.subr.mxu1 %v29672_v51  ;;  %22987 = vmatprep.subr.mxu0 %v29672_v51  ;;  %v2730_v43 = vrot.slane %v2722_v50, %v24681_v38 }
 0x2fa   : > { %22983 = vmatpush3.xpose.msk.msra.mxu1 %vm317_vm0, %v2672_v16  ;;  %22988 = vmatpush3.xpose.msk.msra.mxu0 %vm317_vm0, %v2673_v58  ;;  %v2281_v25 = vrot.slane %v2267_v47, %v24670_v24  ;;  %v2298_v63 = vcombine.low %v2274_v18, %v2290_v61  ;;  %v2299_v49 = vcombine.high %v2274_v18, %v2290_v61  ;;  %v29697_v61 = vld [vmem:[#allocation30_spill] sm:$0xff] }
 0x2fb   : > { %v2723_v53 = vcombine.high %v25280_v6, %v25288_v14  ;;  %3000 = vrot.lane.b32.xlu1 %v29688_v5, %s29571_s10  ;;  %22984 = vmatprep.mubr.msk.f32.mxu1 %vm24316_vm2, %v29672_v51  ;;  %v2738_v11 = vcombine.low %v2714_v2, %v2730_v43  ;;  %v2739_v13 = vcombine.high %v2714_v2, %v2730_v43  ;;  %v29701_v43 = vld [vmem:[#allocation24_spill] sm:$0xff] }
 0x2fc   : > { %v2306_v36 = vrot.slane %v2298_v63, %v24681_v38  ;;  %v2313_v56 = vrot.slane %v2299_v49, %v24681_v38  ;;  %v2314_v62 = vcombine.low %v2281_v25, %v2297_v21  ;;  %v2315_v41 = vcombine.high %v2281_v25, %v2297_v21  ;;  %22989 = vmatprep.mubr.msk.f32.mxu0 %vm24316_vm2, %v29672_v51 }
 0x2fd   : > { %v2774_v6 = vcombine.low %v25330_v52, %v25333_v42  ;;  %v2790_v14 = vcombine.low %v25350_v10, %v25353_v35  ;;  %22985 = vmatmul.mubr.msk.f32.vlgmr.msra.gmra.mrb[14].mxu1 %vm317_vm0, %v1488_v1  ;;  %22990 = vmatmul.mubr.msk.f32.vlgmr.msra.gmra.mrb[30].mxu0 %vm317_vm0, %v1489_v39  ;;  %v29689_v46 = vcombine.high %v24818_v37, %v24821_v29  ;;  %v29690_v37 = vld [vmem:[#allocation28_spill] sm:$0xff]  ;;  %v29691_v29 = vld [vmem:[#allocation29_spill] sm:$0xff] }
 0x2fe   : > { %v2322_v40 = vrot.slane %v2314_v62, %v24681_v38  ;;  %v2329_v19 = vrot.slane %v2315_v41, %v24681_v38  ;;  %v2810_v45 = vcombine.low %v2306_v36, %v2313_v56  ;;  %v22118_v55 = vcombine.high %v2306_v36, %v2313_v56  ;;  %22992 = vmatprep.subr.mxu1 %v29672_v51 }
 0x2ff   : > { %v25387_v0 = vrot.slane %v29689_v46, %v24670_v24  ;;  %22997 = vmatprep.subr.mxu0 %v29672_v51  ;;  %22993 = vmatpush3.xpose.msk.msra.mxu1 %vm317_vm0, %v2738_v11  ;;  %v2721_v27 = vrot.slane %v2707_v33, %v24681_v38  ;;  %v2737_v54 = vrot.slane %v2723_v53, %v24681_v38 }
 0x300   : > { %v29692_v1 = vcombine.low %v29690_v37, %v29691_v29  ;;  %v2826_v8 = vcombine.low %v2322_v40, %v2329_v19  ;;  %v22119_v4 = vcombine.high %v2322_v40, %v2329_v19  ;;  %22998 = vmatpush3.xpose.msk.msra.mxu0 %vm317_vm0, %v2739_v13  ;;  %v1590_v59 = vcombine.low %v24977_v7, %v25124_v20 }
 0x301   : > { %v29693_v32 = vcombine.high %v29690_v37, %v29691_v29  ;;  %2954 = vrot.lane.b32.xlu1 %v29694_v30, %s29571_s10  ;;  %22994 = vmatprep.mubr.msk.f32.mxu1 %vm24316_vm2, %v29672_v51  ;;  %v2782_v44 = vrot.slane %v2774_v6, %v24681_v38  ;;  %v2798_v26 = vrot.slane %v2790_v14, %v24681_v38 }
 0x302   : > { %v25400_v39 = vrot.slane %v29692_v1, %v24670_v24  ;;  %v1606_v60 = vcombine.low %v25169_v28, %v25387_v0  ;;  %v25420_v15 = vrot.slane %v2810_v45, %v24670_v24  ;;  %v25423_v57 = vrot.slane %v22118_v55, %v24670_v24  ;;  %22999 = vmatprep.mubr.msk.f32.mxu0 %vm24316_vm2, %v29672_v51  ;;  %v29705_v55 = vld [vmem:[#allocation15_spill] sm:$0xff] }
 0x303   : > { %v25409_v48 = vrot.slane %v29693_v32, %v24670_v24  ;;  %v25426_v33 = vrot.slane %v2826_v8, %v24670_v24  ;;  %v25429_v50 = vrot.slane %v22119_v4, %v24670_v24  ;;  %v29695_v22 = vcombine.low %v25004_v31, %v25007_v17  ;;  %23002 = vmatprep.subr.mxu1 %v29672_v51 }
 0x304   : > { %v29696_v3 = vcombine.high %v25004_v31, %v25007_v17  ;;  %v2740_v34 = vcombine.low %v2721_v27, %v2737_v54  ;;  %v2741_v16 = vcombine.high %v2721_v27, %v2737_v54  ;;  %v29699_v58 = vcombine.low %v29697_v61, %v29698_v9  ;;  %23007 = vmatprep.subr.mxu0 %v29672_v51 }
 0x305   : > { %22995 = vmatmul.mubr.msk.f32.vlgmr.msra.gmra.mrb[16].mxu1 %vm317_vm0, %v29695_v22  ;;  %v2775_v47 = vcombine.high %v25330_v52, %v25333_v42  ;;  %v2791_v18 = vcombine.high %v25350_v10, %v25353_v35  ;;  %v29700_v31 = vcombine.high %v29697_v61, %v29698_v9  ;;  %v2806_v2 = vcombine.low %v2782_v44, %v2798_v26  ;;  %v29710_v22 = vld [vmem:[#allocation25_spill] sm:$0xff] }
 0x306   : > { %23000 = vmatmul.mubr.msk.f32.vlgmr.msra.gmra.mrb[32].mxu0 %vm317_vm0, %v29696_v3  ;;  %v25445_v21 = vrot.slane %v29699_v58, %v24670_v24  ;;  %23003 = vmatpush3.xpose.msk.msra.mxu1 %vm317_vm0, %v2740_v34  ;;  %v1598_v52 = vrot.slane %v1590_v59, %v24681_v38  ;;  %v1614_v42 = vrot.slane %v1606_v60, %v24681_v38  ;;  %v29706_v59 = vld [vmem:[#allocation21_spill] sm:$0xff]  ;;  %v29707_v60 = vld [vmem:[#allocation22_spill] sm:$0xff] }
 0x307   : > { %v25457_v17 = vrot.slane %v29700_v31, %v24670_v24  ;;  %23008 = vmatpush3.xpose.msk.msra.mxu0 %vm317_vm0, %v2741_v16  ;;  %v2842_v10 = vcombine.low %v25420_v15, %v25423_v57  ;;  %v2858_v35 = vcombine.low %v25426_v33, %v25429_v50  ;;  %2986 = vrot.lane.b32.xlu1 %v29701_v43, %s29571_s10  ;;  %v29711_v34 = vld [vmem:[#allocation34_spill] sm:$0xff]  ;;  %v29712_v16 = vld [vmem:[#allocation17_spill] sm:$0xff] }
 0x308   : > { %23004 = vmatprep.mubr.msk.f32.mxu1 %vm24316_vm2, %v29672_v51  ;;  %v2807_v25 = vcombine.high %v2782_v44, %v2798_v26  ;;  %23009 = vmatprep.mubr.msk.f32.mxu0 %vm24316_vm2, %v29672_v51  ;;  %v1591_v63 = vcombine.high %v24977_v7, %v25124_v20  ;;  %v1607_v49 = vcombine.high %v25169_v28, %v25387_v0 }
 0x309   : > { %23012 = vmatprep.subr.mxu1 %v29672_v51  ;;  %v29702_v53 = vcombine.low %v25018_v23, %v25021_v12  ;;  %v29703_v5 = vcombine.high %v25018_v23, %v25021_v12  ;;  %v2789_v11 = vrot.slane %v2775_v47, %v24681_v38  ;;  %v2805_v13 = vrot.slane %v2791_v18, %v24681_v38  ;;  %v29704_v23 = vld [vmem:[#allocation23_spill] sm:$0xff] }
 0x30a   : > { %23017 = vmatprep.subr.mxu0 %v29672_v51  ;;  %v1658_v7 = vcombine.low %v25400_v39, %v25409_v48  ;;  %v1674_v20 = vcombine.low %v25445_v21, %v25457_v17  ;;  %v1622_v12 = vcombine.low %v1598_v52, %v1614_v42  ;;  %v2850_v28 = vrot.slane %v2842_v10, %v24681_v38 }
 0x30b   : > { %23005 = vmatmul.mubr.msk.f32.vlgmr.msra.gmra.mrb[18].mxu1 %vm317_vm0, %v29702_v53  ;;  %23010 = vmatmul.mubr.msk.f32.vlgmr.msra.gmra.mrb[34].mxu0 %vm317_vm0, %v29703_v5  ;;  %v2866_v36 = vrot.slane %v2858_v35, %v24681_v38  ;;  %v1623_v56 = vcombine.high %v1598_v52, %v1614_v42  ;;  %v1605_v62 = vrot.slane %v1591_v63, %v24681_v38  ;;  %v1793_v53 = vpop.permute.xlu1 %1792  ;;  %v1777_v5 = vpop.permute.xlu0 %1776 }
 0x30c   : > { %23013 = vmatpush3.xpose.msk.msra.mxu1 %vm317_vm0, %v2806_v2  ;;  %23018 = vmatpush3.xpose.msk.msra.mxu0 %vm317_vm0, %v2807_v25  ;;  %v1621_v41 = vrot.slane %v1607_v49, %v24681_v38  ;;  %v2808_v6 = vcombine.low %v2789_v11, %v2805_v13  ;;  %v2809_v14 = vcombine.high %v2789_v11, %v2805_v13  ;;  %v29714_v2 = vld [vmem:[#allocation26_spill] sm:$0xff] }
 0x30d   : > { %3002 = vrot.lane.b32.xlu1 %v29704_v23, %s29571_s10  ;;  %23014 = vmatprep.mubr.msk.f32.mxu1 %vm24316_vm2, %v29672_v51  ;;  %v2843_v46 = vcombine.high %v25420_v15, %v25423_v57  ;;  %v2859_v0 = vcombine.high %v25426_v33, %v25429_v50  ;;  %v2874_v40 = vcombine.low %v2850_v28, %v2866_v36  ;;  %v29708_v33 = vld [vmem:[#allocation18_spill] sm:$0xff]  ;;  %v29709_v50 = vld [vmem:[#allocation33_spill] sm:$0xff] }
 0x30e   : > { %23019 = vmatprep.mubr.msk.f32.mxu0 %vm24316_vm2, %v29672_v51  ;;  %23022 = vmatprep.subr.mxu1 %v29672_v51  ;;  %v1666_v19 = vrot.slane %v1658_v7, %v24681_v38  ;;  %v1682_v45 = vrot.slane %v1674_v20, %v24681_v38  ;;  %v1624_v27 = vcombine.low %v1605_v62, %v1621_v41 }
 0x30f   : > { %23015 = vmatmul.mubr.msk.f32.vlgmr.msra.gmra.mrb[20].mxu1 %vm317_vm0, %v1622_v12  ;;  %23020 = vmatmul.mubr.msk.f32.vlgmr.msra.gmra.mrb[36].mxu0 %vm317_vm0, %v1623_v56  ;;  %v1625_v54 = vcombine.high %v1605_v62, %v1621_v41  ;;  %v2875_v37 = vcombine.high %v2850_v28, %v2866_v36  ;;  %v1659_v29 = vcombine.high %v25400_v39, %v25409_v48 }
 0x310   : > { %23027 = vmatprep.subr.mxu0 %v29672_v51  ;;  %23023 = vmatpush3.xpose.msk.msra.mxu1 %vm317_vm0, %v2808_v6  ;;  %v1675_v1 = vcombine.high %v25445_v21, %v25457_v17  ;;  %v2857_v8 = vrot.slane %v2843_v46, %v24681_v38  ;;  %v2873_v4 = vrot.slane %v2859_v0, %v24681_v38  ;;  %v29713_v21 = vld [vmem:[#allocation27_spill] sm:$0xff] }
 0x311   : > { %23028 = vmatpush3.xpose.msk.msra.mxu0 %vm317_vm0, %v2809_v14  ;;  %2956 = vrot.lane.b32.xlu1 %v29705_v55, %s29571_s10  ;;  %v1690_v39 = vcombine.low %v1666_v19, %v1682_v45  ;;  %v1691_v32 = vcombine.high %v1666_v19, %v1682_v45  ;;  %v1673_v48 = vrot.slane %v1659_v29, %v24681_v38 }
 0x312   : > { %23024 = vmatprep.mubr.msk.f32.mxu1 %vm24316_vm2, %v29672_v51  ;;  %23029 = vmatprep.mubr.msk.f32.mxu0 %vm24316_vm2, %v29672_v51  ;;  %v1689_v30 = vrot.slane %v1675_v1, %v24681_v38  ;;  %v2876_v44 = vcombine.low %v2857_v8, %v2873_v4  ;;  %v2877_v26 = vcombine.high %v2857_v8, %v2873_v4 }
 0x313   : > { %23032 = vmatprep.subr.mxu1 %v29672_v51  ;;  %23025 = vmatmul.mubr.msk.f32.vlgmr.msra.gmra.mrb[22].mxu1 %vm317_vm0, %v1624_v27  ;;  %v1166_v3 = vcombine.low %v29710_v22, %v29709_v50  ;;  %v1150_v61 = vcombine.low %v29712_v16, %v29711_v34  ;;  %v1167_v9 = vcombine.high %v29710_v22, %v29709_v50 }
 0x314   : > { %23030 = vmatmul.mubr.msk.f32.vlgmr.msra.gmra.mrb[38].mxu0 %vm317_vm0, %v1625_v54  ;;  %23037 = vmatprep.subr.mxu0 %v29672_v51  ;;  %v1692_v15 = vcombine.low %v1673_v48, %v1689_v30  ;;  %v1693_v57 = vcombine.high %v1673_v48, %v1689_v30  ;;  %v1151_v58 = vcombine.high %v29712_v16, %v29711_v34 }
 0x315   : > { %23033 = vmatpush3.xpose.msk.msra.mxu1 %vm317_vm0, %v2874_v40  ;;  %23038 = vmatpush3.xpose.msk.msra.mxu0 %vm317_vm0, %v2875_v37  ;;  %v1174_v47 = vrot.slane %v1166_v3, %v24670_v24  ;;  %v1158_v18 = vrot.slane %v1150_v61, %v24670_v24  ;;  %v1181_v31 = vrot.slane %v1167_v9, %v24670_v24 }
 0x316   : > { %2988 = vrot.lane.b32.xlu1 %v29706_v59, %s29571_s10  ;;  %23034 = vmatprep.mubr.msk.f32.mxu1 %vm24316_vm2, %v29672_v51  ;;  %v1165_v17 = vrot.slane %v1151_v58, %v24670_v24 }
 0x317   : > { %23039 = vmatprep.mubr.msk.f32.mxu0 %vm24316_vm2, %v29672_v51  ;;  %23042 = vmatprep.subr.mxu1 %v29672_v51  ;;  %v1182_v52 = vcombine.low %v1158_v18, %v1174_v47  ;;  %v1183_v42 = vcombine.high %v1158_v18, %v1174_v47 }
 0x318   : > { %23035 = vmatmul.mubr.msk.f32.vlgmr.msra.gmra.mrb[24].mxu1 %vm317_vm0, %v1690_v39  ;;  %23040 = vmatmul.mubr.msk.f32.vlgmr.msra.gmra.mrb[40].mxu0 %vm317_vm0, %v1691_v32  ;;  %v1198_v10 = vcombine.low %v1165_v17, %v1181_v31  ;;  %v1199_v35 = vcombine.high %v1165_v17, %v1181_v31 }
 0x319   : > { %23047 = vmatprep.subr.mxu0 %v29672_v51  ;;  %23043 = vmatpush3.xpose.msk.msra.mxu1 %vm317_vm0, %v2876_v44  ;;  %v1190_v43 = vrot.slane %v1182_v52, %v24681_v38  ;;  %v1197_v25 = vrot.slane %v1183_v42, %v24681_v38 }
 0x31a   : > { %23048 = vmatpush3.xpose.msk.msra.mxu0 %vm317_vm0, %v2877_v26  ;;  %3004 = vrot.lane.b32.xlu1 %v29707_v60, %s29571_s10  ;;  %v1206_v63 = vrot.slane %v1198_v10, %v24681_v38  ;;  %v1213_v49 = vrot.slane %v1199_v35, %v24681_v38 }
 0x31b   : > { %23044 = vmatprep.mubr.msk.f32.mxu1 %vm24316_vm2, %v29672_v51  ;;  %23049 = vmatprep.mubr.msk.f32.mxu0 %vm24316_vm2, %v29672_v51  ;;  %v1694_v11 = vcombine.low %v1190_v43, %v1197_v25  ;;  %v22104_v13 = vcombine.high %v1190_v43, %v1197_v25 }
 0x31c   : > { %23052 = vmatprep.subr.mxu1 %v29672_v51  ;;  %23045 = vmatmul.mubr.msk.f32.vlgmr.msra.gmra.mrb[26].mxu1 %vm317_vm0, %v1692_v15  ;;  %v1710_v7 = vcombine.low %v1206_v63, %v1213_v49  ;;  %v22105_v20 = vcombine.high %v1206_v63, %v1213_v49 }
 0x31d   : > { %23050 = vmatmul.mubr.msk.f32.vlgmr.msra.gmra.mrb[42].mxu0 %vm317_vm0, %v1693_v57  ;;  %23057 = vmatprep.subr.mxu0 %v29672_v51  ;;  %v25586_v41 = vrot.slane %v1694_v11, %v24670_v24  ;;  %v25589_v6 = vrot.slane %v22104_v13, %v24670_v24 }
 0x31e   : > { %23054 = vmatprep.mubr.msk.f32.mxu1 %vm24316_vm2, %v29672_v51  ;;  %2958 = vrot.lane.b32.xlu1 %v29708_v33, %s29571_s10  ;;  %v1717_v0 = vrot.slane %v1710_v7, %v24670_v24  ;;  %v1725_v40 = vrot.slane %v22105_v20, %v24670_v24 }
 0x31f   : > { %23059 = vmatprep.mubr.msk.f32.mxu0 %vm24316_vm2, %v29672_v51  ;;  %v1726_v1 = vcombine.low %v25586_v41, %v25589_v6 }
 0x320   : > { %v1742_v8 = vcombine.low %v1717_v0, %v1725_v40  ;;  %v1743_v13 = vcombine.high %v1717_v0, %v1725_v40 }
 0x321   : > { %v1734_v33 = vrot.slane %v1726_v1, %v24681_v38 }
 0x322   : > { %2990 = vrot.lane.b32.xlu1 %v29713_v21, %s29571_s10  ;;  %v1750_v3 = vrot.slane %v1742_v8, %v24681_v38 }
 0x324   : > { %v1758_v11 = vcombine.low %v1734_v33, %v1750_v3  ;;  %v1759_v0 = vcombine.high %v1734_v33, %v1750_v3 }
 0x326   : > { %3006 = vrot.lane.b32.xlu1 %v29714_v2, %s29571_s10  ;;  %v1727_v2 = vcombine.high %v25586_v41, %v25589_v6 }
 0x328   : > { %v1741_v40 = vrot.slane %v1727_v2, %v24681_v38 }
 0x32d   : > { %v1825_v23 = vpop.permute.xlu1 %1824  ;;  %v1809_v36 = vpop.permute.xlu0 %1808 }
 0x32e   : > { %v2350_v12 = vcombine.low %v1793_v53, %v1825_v23  ;;  %v2351_v28 = vcombine.high %v1793_v53, %v1825_v23  ;;  %v2334_v56 = vcombine.low %v1777_v5, %v1809_v36  ;;  %v2335_v62 = vcombine.high %v1777_v5, %v1809_v36 }
 0x330   : > { %v2358_v14 = vrot.slane %v2350_v12, %v24670_v24  ;;  %v2365_v46 = vrot.slane %v2351_v28, %v24670_v24  ;;  %v2342_v19 = vrot.slane %v2334_v56, %v24670_v24  ;;  %v2349_v45 = vrot.slane %v2335_v62, %v24670_v24 }
 0x331   : > { %v2947_v55 = vpop.permute.xlu1 %2946  ;;  %v2963_v47 = vpop.permute.xlu0 %2962 }
 0x332   : > { %v2366_v27 = vcombine.low %v2342_v19, %v2358_v14  ;;  %v2367_v54 = vcombine.high %v2342_v19, %v2358_v14  ;;  %v2382_v37 = vcombine.low %v2349_v45, %v2365_v46  ;;  %v2383_v29 = vcombine.high %v2349_v45, %v2365_v46 }
 0x333   : > { %v1757_v19 = vrot.slane %v1743_v13, %v24681_v38 }
 0x334   : > { %v2374_v4 = vrot.slane %v2366_v27, %v24681_v38  ;;  %v2381_v59 = vrot.slane %v2367_v54, %v24681_v38  ;;  %v2390_v39 = vrot.slane %v2382_v37, %v24681_v38  ;;  %v2397_v32 = vrot.slane %v2383_v29, %v24681_v38 }
 0x335   : > { %v2979_v48 = vpop.permute.xlu1 %2978 }
 0x336   : > { %v2878_v30 = vcombine.low %v2374_v4, %v2381_v59  ;;  %v22120_v44 = vcombine.high %v2374_v4, %v2381_v59  ;;  %v2894_v26 = vcombine.low %v2390_v39, %v2397_v32  ;;  %v22121_v60 = vcombine.high %v2390_v39, %v2397_v32 }
 0x337   : > { %v3042_v15 = vcombine.low %v2947_v55, %v2979_v48  ;;  %v3043_v57 = vcombine.high %v2947_v55, %v2979_v48  ;;  %v1760_v39 = vcombine.low %v1741_v40, %v1757_v19  ;;  %v1761_v32 = vcombine.high %v1741_v40, %v1757_v19 }
 0x338   : > { %v2885_v61 = vrot.slane %v2878_v30, %v24670_v24  ;;  %v2893_v9 = vrot.slane %v22120_v44, %v24670_v24  ;;  %v2901_v58 = vrot.slane %v2894_v26, %v24670_v24  ;;  %v2909_v21 = vrot.slane %v22121_v60, %v24670_v24 }
 0x339   : > { %v2995_v18 = vpop.permute.xlu1 %2994  ;;  %v3050_v43 = vrot.slane %v3042_v15, %v24670_v24  ;;  %v3057_v25 = vrot.slane %v3043_v57, %v24670_v24 }
 0x33a   : > { %v3058_v31 = vcombine.low %v2963_v47, %v2995_v18  ;;  %v3059_v17 = vcombine.high %v2963_v47, %v2995_v18  ;;  %v2910_v52 = vcombine.low %v2885_v61, %v2893_v9  ;;  %v2911_v42 = vcombine.high %v2885_v61, %v2893_v9 }
 0x33b   : > { %v2926_v10 = vcombine.low %v2901_v58, %v2909_v21  ;;  %v2927_v35 = vcombine.high %v2901_v58, %v2909_v21 }
 0x33c   : > { %v3066_v63 = vrot.slane %v3058_v31, %v24670_v24  ;;  %v3073_v49 = vrot.slane %v3059_v17, %v24670_v24  ;;  %v2918_v53 = vrot.slane %v2910_v52, %v24681_v38  ;;  %v2925_v56 = vrot.slane %v2911_v42, %v24681_v38 }
 0x33d   : > { %v2934_v5 = vrot.slane %v2926_v10, %v24681_v38  ;;  %v2941_v62 = vrot.slane %v2927_v35, %v24681_v38 }
 0x33e   : > { %v3074_v7 = vcombine.low %v3050_v43, %v3066_v63  ;;  %v3075_v20 = vcombine.high %v3050_v43, %v3066_v63  ;;  %v3090_v23 = vcombine.low %v3057_v25, %v3073_v49  ;;  %v3091_v12 = vcombine.high %v3057_v25, %v3073_v49 }
 0x33f   : > { %v2942_v28 = vcombine.low %v2918_v53, %v2934_v5  ;;  %v2943_v36 = vcombine.high %v2918_v53, %v2934_v5  ;;  %v2944_v37 = vcombine.low %v2925_v56, %v2941_v62  ;;  %v2945_v29 = vcombine.high %v2925_v56, %v2941_v62 }
 0x340   : > { %v3082_v41 = vrot.slane %v3074_v7, %v24681_v38  ;;  %v3089_v6 = vrot.slane %v3075_v20, %v24681_v38  ;;  %v3098_v14 = vrot.slane %v3090_v23, %v24681_v38  ;;  %v3105_v46 = vrot.slane %v3091_v12, %v24681_v38 }
 0x341   : > { %23053 = vmatpush3.xpose.msk.msra.mxu1 %vm317_vm0, %v2942_v28  ;;  %23058 = vmatpush3.xpose.msk.msra.mxu0 %vm317_vm0, %v2943_v36 }
 0x342   : > { %v3586_v45 = vcombine.low %v3082_v41, %v3089_v6  ;;  %v22122_v55 = vcombine.high %v3082_v41, %v3089_v6  ;;  %v3602_v27 = vcombine.low %v3098_v14, %v3105_v46  ;;  %v22123_v54 = vcombine.high %v3098_v14, %v3105_v46  ;;  %23062 = vmatprep.subr.mxu1 %v29672_v51 }
 0x343   : > { %23067 = vmatprep.subr.mxu0 %v29672_v51 }
 0x344   : > { %23055 = vmatmul.mubr.msk.f32.vlgmr.msra.gmra.mrb[28].mxu1 %vm317_vm0, %v1758_v11  ;;  %23060 = vmatmul.mubr.msk.f32.vlgmr.msra.gmra.mrb[44].mxu0 %vm317_vm0, %v1759_v0  ;;  %v3593_v1 = vrot.slane %v3586_v45, %v24670_v24  ;;  %v3601_v8 = vrot.slane %v22122_v55, %v24670_v24  ;;  %v3609_v4 = vrot.slane %v3602_v27, %v24670_v24 }
 0x345   : > { %23063 = vmatpush3.xpose.msk.msra.mxu1 %vm317_vm0, %v2944_v37  ;;  %23068 = vmatpush3.xpose.msk.msra.mxu0 %vm317_vm0, %v2945_v29  ;;  %v3617_v59 = vrot.slane %v22123_v54, %v24670_v24  ;;  %v25711_v54 = vpop.permute.xlu1 %2948 }
 0x346   : > { %23064 = vmatprep.mubr.msk.f32.mxu1 %vm24316_vm2, %v29672_v51  ;;  %23069 = vmatprep.mubr.msk.f32.mxu0 %vm24316_vm2, %v29672_v51  ;;  %v3618_v48 = vcombine.low %v3593_v1, %v3601_v8  ;;  %v3619_v44 = vcombine.high %v3593_v1, %v3601_v8 }
 0x347   : > { %23072 = vmatprep.subr.mxu1 %v29672_v51  ;;  %23077 = vmatprep.subr.mxu0 %v29672_v51  ;;  %v3634_v30 = vcombine.low %v3609_v4, %v3617_v59  ;;  %v3635_v26 = vcombine.high %v3609_v4, %v3617_v59 }
 0x348   : > { %23065 = vmatmul.mubr.msk.f32.vlgmr.msra.gmra.mrb[30].mxu1 %vm317_vm0, %v1760_v39  ;;  %23070 = vmatmul.mubr.msk.f32.vlgmr.msra.gmra.mrb[46].mxu0 %vm317_vm0, %v1761_v32  ;;  %v3626_v60 = vrot.slane %v3618_v48, %v24681_v38  ;;  %v25650_v57 = vrot.slane %v3619_v44, %v24681_v38 }
 0x349   : > { %v3642_v15 = vrot.slane %v3634_v30, %v24681_v38  ;;  %23079 = vmatprep.mubr.msk.f32.mxu0 %vm24316_vm2, %v29672_v51  ;;  %v25653_v33 = vrot.slane %v3635_v26, %v24681_v38  ;;  %23074 = vmatprep.mubr.msk.f32.mxu1 %vm24316_vm2, %v29672_v51  ;;  %v25721_v39 = vpop.permute.xlu1 %2980 }
 0x34a   : > { %29715 = vst [vmem:[#allocation32_spill] sm:$0xff] %v25650_v57 }
 0x34b   : > { %29716 = vst [vmem:[#allocation19_spill] sm:$0xff] %v25653_v33  ;;  %v3650_v3 = vcombine.low %v3626_v60, %v3642_v15  ;;  %v3651_v61 = vcombine.high %v3626_v60, %v3642_v15 }
 0x34d   : > { %23073 = vmatpush3.msra.mxu1 %v3650_v3  ;;  %23078 = vmatpush3.msra.mxu0 %v3651_v61  ;;  %v25731_v15 = vpop.permute.xlu1 %2996 }
 0x34e   : > { %23082 = vmatprep.subr.mxu1 %v29672_v51  ;;  %23087 = vmatprep.subr.mxu0 %v29672_v51 }
 0x3a1   : > { %v25663_v21 = vpop.f32.mrb[14].mxu0 }
 0x3a2   : > { %v22916_v47 = vpop.f32.mrb[15].mxu0  ;;  %v6562_v18 = vsel %vm317_vm0, %v25663_v21, -inf }
 0x3a3   : > { %6563 = vmax.xlane.f32.xlu0 %v6562_v18 }
 0x3a4   : > { %v25667_v31 = vpop.f32.mrb[2].mxu1 }
 0x3a5   : > { %v22926_v17 = vpop.f32.mrb[3].mxu1  ;;  %v6568_v2 = vsel %vm317_vm0, %v25667_v31, -inf }
 0x3a7   : > { %6569 = vmax.xlane.f32.xlu0 %v6568_v2 }
 0x3a8   : > { %v25671_v52 = vpop.f32.mrb[16].mxu0 }
 0x3a9   : > { %v22921_v42 = vpop.f32.mrb[17].mxu0  ;;  %v6565_v10 = vsel %vm317_vm0, %v25671_v52, -inf }
 0x3aa   : > { %6566 = vmax.xlane.f32.xlu1 %v6565_v10 }
 0x3ae   : > { %v25675_v35 = vpop.f32.mrb[18].mxu0 }
 0x3af   : > { %v22931_v43 = vpop.f32.mrb[19].mxu0  ;;  %v6571_v25 = vsel %vm317_vm0, %v25675_v35, -inf }
 0x3b0   : > { %6572 = vmax.xlane.f32.xlu0 %v6571_v25 }
 0x3b4   : > { %v25679_v63 = vpop.f32.mrb[4].mxu1 }
 0x3b5   : > { %v25681_v49 = vpop.f32.mrb[20].mxu0  ;;  %v22936_v53 = vpop.f32.mrb[5].mxu1  ;;  %v6574_v5 = vsel %vm317_vm0, %v25679_v63, -inf }
 0x3b6   : > { %v22941_v11 = vpop.f32.mrb[21].mxu0  ;;  %v6577_v13 = vsel %vm317_vm0, %v25681_v49, -inf  ;;  %6575 = vmax.xlane.f32.xlu1 %v6574_v5 }
 0x3b7   : > { %6578 = vmax.xlane.f32.xlu0 %v6577_v13  ;;  %v25749_v11 = vpop.permute.xlu1 %2950 }
 0x3b9   : > { %v25687_v7 = vpop.f32.mrb[6].mxu1 }
 0x3ba   : > { %v22946_v23 = vpop.f32.mrb[7].mxu1  ;;  %v6580_v12 = vsel %vm317_vm0, %v25687_v7, -inf }
 0x3bb   : > { %v25689_v20 = vpop.f32.mrb[22].mxu0  ;;  %6581 = vmax.xlane.f32.xlu1 %v6580_v12 }
 0x3bc   : > { %v22951_v28 = vpop.f32.mrb[23].mxu0  ;;  %v6583_v36 = vsel %vm317_vm0, %v25689_v20, -inf }
 0x3bd   : > { %6584 = vmax.xlane.f32.xlu0 %v6583_v36 }
 0x3c0   : > { %v25695_v56 = vpop.f32.mrb[8].mxu1 }
 0x3c1   : > { %v25697_v62 = vpop.f32.mrb[24].mxu0  ;;  %v22956_v41 = vpop.f32.mrb[9].mxu1  ;;  %v6586_v6 = vsel %vm317_vm0, %v25695_v56, -inf }
 0x3c2   : > { %v22961_v14 = vpop.f32.mrb[25].mxu0  ;;  %v6589_v46 = vsel %vm317_vm0, %v25697_v62, -inf  ;;  %6587 = vmax.xlane.f32.xlu1 %v6586_v6  ;;  %v25759_v6 = vpop.permute.xlu1 %2982 }
 0x3c3   : > { %6590 = vmax.xlane.f32.xlu0 %v6589_v46 }
 0x3c6   : > { %v25703_v0 = vpop.f32.mrb[10].mxu1  ;;  %v25705_v40 = vpop.f32.mrb[26].mxu0 }
 0x3c7   : > { %v22966_v19 = vpop.f32.mrb[11].mxu1  ;;  %v22971_v45 = vpop.f32.mrb[27].mxu0  ;;  %v6595_v55 = vsel %vm317_vm0, %v25705_v40, -inf  ;;  %v6592_v27 = vsel %vm317_vm0, %v25703_v0, -inf }
 0x3c8   : > { %6596 = vmax.xlane.f32.xlu0 %v6595_v55  ;;  %6593 = vmax.xlane.f32.xlu1 %v6592_v27 }
 0x3cb   : > { %v25713_v37 = vpop.f32.mrb[12].mxu1  ;;  %v25715_v29 = vpop.f32.mrb[28].mxu0 }
 0x3cc   : > { %v22976_v1 = vpop.f32.mrb[13].mxu1  ;;  %v22981_v8 = vpop.f32.mrb[29].mxu0  ;;  %v6601_v4 = vsel %vm317_vm0, %v25715_v29, -inf  ;;  %v6598_v59 = vsel %vm317_vm0, %v25713_v37, -inf }
 0x3cd   : > { %6602 = vmax.xlane.f32.xlu0 %v6601_v4  ;;  %6599 = vmax.xlane.f32.xlu1 %v6598_v59 }
 0x3d0   : > { %v25723_v32 = vpop.f32.mrb[14].mxu1  ;;  %v25725_v48 = vpop.f32.mrb[30].mxu0 }
 0x3d1   : > { %v22986_v30 = vpop.f32.mrb[15].mxu1  ;;  %v22991_v44 = vpop.f32.mrb[31].mxu0  ;;  %v6607_v26 = vsel %vm317_vm0, %v25725_v48, -inf  ;;  %v6604_v60 = vsel %vm317_vm0, %v25723_v32, -inf }
 0x3d2   : > { %6608 = vmax.xlane.f32.xlu0 %v6607_v26  ;;  %6605 = vmax.xlane.f32.xlu1 %v6604_v60  ;;  %v25777_v26 = vpop.permute.xlu1 %2998 }
 0x3d8   : > { %v25733_v3 = vpop.f32.mrb[16].mxu1 }
 0x3d9   : > { %v25735_v61 = vpop.f32.mrb[32].mxu0  ;;  %v22996_v47 = vpop.f32.mrb[17].mxu1  ;;  %v6610_v2 = vsel %vm317_vm0, %v25733_v3, -inf }
 0x3da   : > { %v23001_v18 = vpop.f32.mrb[33].mxu0  ;;  %v6613_v17 = vsel %vm317_vm0, %v25735_v61, -inf  ;;  %6611 = vmax.xlane.f32.xlu1 %v6610_v2 }
 0x3db   : > { %6614 = vmax.xlane.f32.xlu0 %v6613_v17 }
 0x3de   : > { %v25741_v42 = vpop.f32.mrb[18].mxu1  ;;  %v25743_v10 = vpop.f32.mrb[34].mxu0 }
 0x3df   : > { %v23006_v43 = vpop.f32.mrb[19].mxu1  ;;  %v23011_v25 = vpop.f32.mrb[35].mxu0  ;;  %v6619_v53 = vsel %vm317_vm0, %v25743_v10, -inf  ;;  %v6616_v5 = vsel %vm317_vm0, %v25741_v42, -inf }
 0x3e0   : > { %6620 = vmax.xlane.f32.xlu0 %v6619_v53  ;;  %6617 = vmax.xlane.f32.xlu1 %v6616_v5  ;;  %v25787_v25 = vpop.permute.xlu1 %2952 }
 0x3e1   : > { %29717 = vst [vmem:[#allocation20_spill] sm:$0xff] %v25787_v25 }
 0x3e2   : > { %v25751_v13 = vpop.f32.mrb[20].mxu1  ;;  %v25753_v23 = vpop.f32.mrb[36].mxu0 }
 0x3e3   : > { %v23016_v12 = vpop.f32.mrb[21].mxu1  ;;  %v6622_v28 = vsel %vm317_vm0, %v25751_v13, -inf  ;;  %v23021_v36 = vpop.f32.mrb[37].mxu0  ;;  %v6625_v41 = vsel %vm317_vm0, %v25753_v23, -inf }
 0x3e4   : > { %6623 = vmax.xlane.f32.xlu1 %v6622_v28  ;;  %6626 = vmax.xlane.f32.xlu0 %v6625_v41  ;;  %v25789_v53 = vpop.permute.xlu1 %2984  ;;  %v25799_v41 = vpop.permute.xlu0 %2964 }
 0x3e6   : > { %v25761_v14 = vpop.f32.mrb[22].mxu1 }
 0x3e7   : > { %v25763_v46 = vpop.f32.mrb[38].mxu0  ;;  %v23026_v19 = vpop.f32.mrb[23].mxu1  ;;  %v6628_v27 = vsel %vm317_vm0, %v25761_v14, -inf }
 0x3e8   : > { %v23031_v45 = vpop.f32.mrb[39].mxu0  ;;  %v6631_v55 = vsel %vm317_vm0, %v25763_v46, -inf  ;;  %6629 = vmax.xlane.f32.xlu1 %v6628_v27  ;;  %v25791_v5 = vpop.permute.xlu1 %3000 }
 0x3e9   : > { %6632 = vmax.xlane.f32.xlu0 %v6631_v55  ;;  %v25803_v45 = vpop.permute.xlu0 %2966 }
 0x3eb   : > { %v25769_v1 = vpop.f32.mrb[24].mxu1  ;;  %v25771_v8 = vpop.f32.mrb[40].mxu0 }
 0x3ec   : > { %v23036_v4 = vpop.f32.mrb[25].mxu1  ;;  %v6634_v59 = vsel %vm317_vm0, %v25769_v1, -inf  ;;  %v23041_v30 = vpop.f32.mrb[41].mxu0  ;;  %v6637_v44 = vsel %vm317_vm0, %v25771_v8, -inf }
 0x3ed   : > { %6635 = vmax.xlane.f32.xlu1 %v6634_v59  ;;  %6638 = vmax.xlane.f32.xlu0 %v6637_v44  ;;  %v25793_v12 = vpop.permute.xlu1 %2954 }
 0x3ee   : > { %29718 = vst [vmem:[#allocation28_spill] sm:$0xff] %v25793_v12 }
 0x3ef   : > { %v25779_v60 = vpop.f32.mrb[26].mxu1 }
 0x3f0   : > { %v25781_v47 = vpop.f32.mrb[42].mxu0  ;;  %v23046_v18 = vpop.f32.mrb[27].mxu1  ;;  %v6640_v43 = vsel %vm317_vm0, %v25779_v60, -inf }
 0x3f1   : > { %v23051_v17 = vpop.f32.mrb[43].mxu0  ;;  %v6643_v2 = vsel %vm317_vm0, %v25781_v47, -inf  ;;  %6641 = vmax.xlane.f32.xlu1 %v6640_v43  ;;  %v25795_v28 = vpop.permute.xlu1 %2986 }
 0x3f2   : > { %6644 = vmax.xlane.f32.xlu0 %v6643_v2  ;;  %29719 = vst [vmem:[#allocation29_spill] sm:$0xff] %v25795_v28  ;;  %v25815_v17 = vpop.permute.xlu0 %2968 }
 0x3f5   : > { %v25797_v36 = vpop.permute.xlu1 %3002 }
 0x3f6   : > { %29720 = vst [vmem:[#allocation16_spill] sm:$0xff] %v25797_v36 }
 0x3f9   : > { %v25801_v19 = vpop.permute.xlu1 %2956 }
 0x3fa   : > { %29721 = vst [vmem:[#allocation30_spill] sm:$0xff] %v25801_v19 }
 0x3fd   : > { %v25813_v18 = vpop.permute.xlu1 %2988 }
 0x3fe   : > { %29722 = vst [vmem:[#allocation31_spill] sm:$0xff] %v25813_v18 }
 0x401   : > { %v25825_v19 = vpop.permute.xlu1 %3004 }
 0x402   : > { %29723 = vst [vmem:[#allocation24_spill] sm:$0xff] %v25825_v19 }
 0x417   : > { %v25805_v55 = vpop.f32.mrb[28].mxu1  ;;  %v25807_v27 = vpop.f32.mrb[44].mxu0 }
 0x418   : > { %v23056_v4 = vpop.f32.mrb[29].mxu1  ;;  %v23061_v59 = vpop.f32.mrb[45].mxu0  ;;  %v6649_v30 = vsel %vm317_vm0, %v25807_v27, -inf  ;;  %v6646_v44 = vsel %vm317_vm0, %v25805_v55, -inf }
 0x419   : > { %6650 = vmax.xlane.f32.xlu0 %v6649_v30  ;;  %6647 = vmax.xlane.f32.xlu1 %v6646_v44  ;;  %v25827_v30 = vpop.permute.xlu0 %2970  ;;  %v25829_v44 = vpop.permute.xlu1 %2958 }
 0x41a   : > { %29724 = vst [vmem:[#allocation23_spill] sm:$0xff] %v25827_v30  ;;  %29725 = vst [vmem:[#allocation15_spill] sm:$0xff] %v25829_v44 }
 0x41b   : > { %v25817_v2 = vpop.f32.mrb[30].mxu1  ;;  %v25819_v43 = vpop.f32.mrb[46].mxu0 }
 0x41c   : > { %v23066_v58 = vpop.f32.mrb[31].mxu1  ;;  %v23071_v9 = vpop.f32.mrb[47].mxu0  ;;  %v6655_v4 = vsel %vm317_vm0, %v25819_v43, -inf  ;;  %v6652_v59 = vsel %vm317_vm0, %v25817_v2, -inf }
 0x41d   : > { %6656 = vmax.xlane.f32.xlu0 %v6655_v4  ;;  %6653 = vmax.xlane.f32.xlu1 %v6652_v59  ;;  %v25831_v18 = vpop.permute.xlu0 %2972  ;;  %v25833_v12 = vpop.permute.xlu1 %2990 }
 0x41e   : > { %29726 = vst [vmem:[#allocation21_spill] sm:$0xff] %v25831_v18  ;;  %29727 = vst [vmem:[#allocation22_spill] sm:$0xff] %v25833_v12 }
 0x421   : > { %v25835_v58 = vpop.permute.xlu0 %2974  ;;  %v25839_v28 = vpop.permute.xlu1 %3006 }
 0x422   : > { %29728 = vst [vmem:[#allocation18_spill] sm:$0xff] %v25835_v58  ;;  %29729 = vst [vmem:[#allocation33_spill] sm:$0xff] %v25839_v28 }
 0x42e   : > { %2960 = vrot.lane.b32.xlu1 %v29712_v16, %s29571_s10 }
 0x430   : > { %v6564_v9 = vpop.xlane.xlu0 %6563 }
 0x431   : > { %v6658_v44 = vsub.f32 %v25663_v21, %v6564_v9 }
 0x433   : > { %v6690_v12 = vmul.f32 1.442695, %v6658_v44 }
 0x434   : > { %v6570_v19 = vpop.xlane.xlu0 %6569 }
 0x435   : > { %v6660_v18 = vsub.f32 %v25667_v31, %v6570_v19 }
 0x437   : > { %v6567_v4 = vpop.xlane.xlu1 %6566  ;;  %v6694_v57 = vmul.f32 1.442695, %v6660_v18 }
 0x438   : > { %v6659_v59 = vsub.f32 %v25671_v52, %v6567_v4 }
 0x43a   : > { %v6692_v36 = vmul.f32 1.442695, %v6659_v59 }
 0x43c   : > { %23925 = vpow2.f32 %v6692_v36 }
 0x43d   : > { %v6573_v30 = vpop.xlane.xlu0 %6572  ;;  %23927 = vpow2.f32 %v6690_v12 }
 0x43e   : > { %v6661_v58 = vsub.f32 %v25675_v35, %v6573_v30 }
 0x440   : > { %v6696_v52 = vmul.f32 1.442695, %v6661_v58 }
 0x443   : > { %v6576_v51 = vpop.xlane.xlu1 %6575 }
 0x444   : > { %v6662_v16 = vsub.f32 %v25679_v63, %v6576_v51  ;;  %v6579_v33 = vpop.xlane.xlu0 %6578 }
 0x445   : > { %v6663_v28 = vsub.f32 %v25681_v49, %v6579_v33 }
 0x446   : > { %v25847_v25 = vpop.eup %23925  ;;  %v6698_v36 = vmul.f32 1.442695, %v6662_v16 }
 0x447   : > { %v6757_v21 = vsel %vm317_vm0, %v25847_v25, 0.0  ;;  %v6700_v35 = vmul.f32 1.442695, %v6663_v28  ;;  %v25854_v30 = vpop.eup %23927 }
 0x448   : > { %23929 = vpow2.f32 %v6698_v36  ;;  %v6582_v31 = vpop.xlane.xlu1 %6581  ;;  %6758 = vadd.xlane.f32.xlu0 %v6757_v21 }
 0x449   : > { %23931 = vpow2.f32 %v6694_v57  ;;  %v6664_v19 = vsub.f32 %v25687_v7, %v6582_v31 }
 0x44a   : > { %v6585_v51 = vpop.xlane.xlu0 %6584  ;;  %23933 = vpow2.f32 %v6696_v52 }
 0x44b   : > { %v6702_v63 = vmul.f32 1.442695, %v6664_v19  ;;  %23935 = vpow2.f32 %v6700_v35  ;;  %v6665_v33 = vsub.f32 %v25689_v20, %v6585_v51  ;;  %v6754_v20 = vsel %vm317_vm0, %v25854_v30, 0.0 }
 0x44d   : > { %23937 = vpow2.f32 %v6702_v63  ;;  %v6704_v28 = vmul.f32 1.442695, %v6665_v33 }
 0x44f   : > { %v6588_v49 = vpop.xlane.xlu1 %6587 }
 0x450   : > { %v6666_v12 = vsub.f32 %v25695_v56, %v6588_v49  ;;  %v6591_v18 = vpop.xlane.xlu0 %6590 }
 0x451   : > { %v6667_v44 = vsub.f32 %v25697_v62, %v6591_v18 }
 0x452   : > { %v6706_v58 = vmul.f32 1.442695, %v6666_v12  ;;  %v25857_v57 = vpop.eup %23929  ;;  %6755 = vadd.xlane.f32.xlu1 %v6754_v20 }
 0x453   : > { %v6708_v7 = vmul.f32 1.442695, %v6667_v44  ;;  %v25859_v9 = vpop.eup %23931  ;;  %v6766_v4 = vsel %vm317_vm0, %v25857_v57, 0.0 }
 0x454   : > { %23939 = vpow2.f32 %v6706_v58  ;;  %v25865_v56 = vpop.eup %23933  ;;  %6767 = vadd.xlane.f32.xlu0 %v6766_v4  ;;  %v6760_v31 = vsel %vm317_vm0, %v25859_v9, 0.0 }
 0x455   : > { %23941 = vpow2.f32 %v6708_v7  ;;  %v6594_v59 = vpop.xlane.xlu1 %6593  ;;  %v6597_v16 = vpop.xlane.xlu0 %6596  ;;  %v6763_v21 = vsel %vm317_vm0, %v25865_v56, 0.0 }
 0x456   : > { %v6668_v62 = vsub.f32 %v25703_v0, %v6594_v59  ;;  %23943 = vpow2.f32 %v6704_v28  ;;  %v25868_v52 = vpop.eup %23935  ;;  %6761 = vadd.xlane.f32.xlu1 %v6760_v31  ;;  %v6669_v19 = vsub.f32 %v25705_v40, %v6597_v16 }
 0x457   : > { %v25874_v35 = vpop.eup %23937  ;;  %v6769_v12 = vsel %vm317_vm0, %v25868_v52, 0.0 }
 0x458   : > { %v6710_v36 = vmul.f32 1.442695, %v6668_v62  ;;  %6764 = vadd.xlane.f32.xlu0 %v6763_v21  ;;  %v6772_v49 = vsel %vm317_vm0, %v25874_v35, 0.0  ;;  %v6712_v40 = vmul.f32 1.442695, %v6669_v19 }
 0x45a   : > { %23945 = vpow2.f32 %v6710_v36  ;;  %v6600_v51 = vpop.xlane.xlu1 %6599  ;;  %v6603_v63 = vpop.xlane.xlu0 %6602  ;;  %6770 = vadd.xlane.f32.xlu1 %v6769_v12 }
 0x45b   : > { %v6670_v0 = vsub.f32 %v25713_v37, %v6600_v51  ;;  %v6671_v33 = vsub.f32 %v25715_v29, %v6603_v63 }
 0x45c   : > { %6773 = vadd.xlane.f32.xlu0 %v6772_v49 }
 0x45d   : > { %v6714_v44 = vmul.f32 1.442695, %v6670_v0  ;;  %v6716_v58 = vmul.f32 1.442695, %v6671_v33 }
 0x45e   : > { %v25883_v18 = vpop.eup %23939 }
 0x45f   : > { %v25885_v28 = vpop.eup %23941  ;;  %23947 = vpow2.f32 %v6714_v44  ;;  %v6606_v7 = vpop.xlane.xlu1 %6605  ;;  %v6778_v29 = vsel %vm317_vm0, %v25883_v18, 0.0 }
 0x460   : > { %v6609_v37 = vpop.xlane.xlu0 %6608  ;;  %v6781_v4 = vsel %vm317_vm0, %v25885_v28, 0.0  ;;  %v25891_v20 = vpop.eup %23943  ;;  %23949 = vpow2.f32 %v6716_v58  ;;  %v6672_v59 = vsub.f32 %v25723_v32, %v6606_v7  ;;  %6779 = vadd.xlane.f32.xlu0 %v6778_v29 }
 0x461   : > { %6782 = vadd.xlane.f32.xlu1 %v6781_v4  ;;  %23951 = vpow2.f32 %v6712_v40  ;;  %v6775_v62 = vsel %vm317_vm0, %v25891_v20, 0.0  ;;  %v6673_v19 = vsub.f32 %v25725_v48, %v6609_v37 }
 0x462   : > { %v6718_v16 = vmul.f32 1.442695, %v6672_v59 }
 0x463   : > { %v6720_v44 = vmul.f32 1.442695, %v6673_v19 }
 0x464   : > { %v25896_v36 = vpop.eup %23945  ;;  %6776 = vadd.xlane.f32.xlu0 %v6775_v62  ;;  %23953 = vpow2.f32 %v6718_v16 }
 0x465   : > { %v6784_v32 = vsel %vm317_vm0, %v25896_v36, 0.0 }
 0x467   : > { %v6612_v21 = vpop.xlane.xlu1 %6611 }
 0x468   : > { %v6615_v31 = vpop.xlane.xlu0 %6614  ;;  %v6674_v51 = vsub.f32 %v25733_v3, %v6612_v21  ;;  %6785 = vadd.xlane.f32.xlu0 %v6784_v32 }
 0x469   : > { %v6675_v63 = vsub.f32 %v25735_v61, %v6615_v31  ;;  %v25903_v49 = vpop.eup %23947 }
 0x46a   : > { %v6722_v0 = vmul.f32 1.442695, %v6674_v51  ;;  %v25905_v12 = vpop.eup %23949  ;;  %v6790_v61 = vsel %vm317_vm0, %v25903_v49, 0.0 }
 0x46b   : > { %v6724_v33 = vmul.f32 1.442695, %v6675_v63  ;;  %v6793_v3 = vsel %vm317_vm0, %v25905_v12, 0.0  ;;  %v25912_v7 = vpop.eup %23951 }
 0x46c   : > { %23955 = vpow2.f32 %v6722_v0  ;;  %6794 = vadd.xlane.f32.xlu1 %v6793_v3  ;;  %6791 = vadd.xlane.f32.xlu0 %v6790_v61  ;;  %v6787_v16 = vsel %vm317_vm0, %v25912_v7, 0.0 }
 0x46d   : > { %v6618_v58 = vpop.xlane.xlu1 %6617  ;;  %v6621_v40 = vpop.xlane.xlu0 %6620  ;;  %23957 = vpow2.f32 %v6724_v33 }
 0x46e   : > { %v6676_v48 = vsub.f32 %v25741_v42, %v6618_v58  ;;  %23959 = vpow2.f32 %v6720_v44  ;;  %v25917_v42 = vpop.eup %23953  ;;  %v6677_v21 = vsub.f32 %v25743_v10, %v6621_v40 }
 0x46f   : > { %v6796_v32 = vsel %vm317_vm0, %v25917_v42, 0.0 }
 0x470   : > { %v6726_v37 = vmul.f32 1.442695, %v6676_v48  ;;  %6788 = vadd.xlane.f32.xlu0 %v6787_v16  ;;  %v6728_v33 = vmul.f32 1.442695, %v6677_v21 }
 0x471   : > { %v6624_v29 = vpop.xlane.xlu1 %6623  ;;  %v6627_v59 = vpop.xlane.xlu0 %6626 }
 0x472   : > { %v6678_v4 = vsub.f32 %v25751_v13, %v6624_v29  ;;  %v6679_v62 = vsub.f32 %v25753_v23, %v6627_v59  ;;  %23961 = vpow2.f32 %v6726_v37 }
 0x474   : > { %v6730_v31 = vmul.f32 1.442695, %v6678_v4  ;;  %v6732_v19 = vmul.f32 1.442695, %v6679_v62  ;;  %6797 = vadd.xlane.f32.xlu0 %v6796_v32 }
 0x475   : > { %v6630_v51 = vpop.xlane.xlu1 %6629 }
 0x476   : > { %v6633_v63 = vpop.xlane.xlu0 %6632  ;;  %v25923_v13 = vpop.eup %23955  ;;  %23963 = vpow2.f32 %v6732_v19  ;;  %v6680_v23 = vsub.f32 %v25761_v14, %v6630_v51 }
 0x477   : > { %v25925_v0 = vpop.eup %23957  ;;  %23965 = vpow2.f32 %v6730_v31  ;;  %v6802_v58 = vsel %vm317_vm0, %v25923_v13, 0.0  ;;  %v6681_v16 = vsub.f32 %v25763_v46, %v6633_v63 }
 0x478   : > { %v6805_v10 = vsel %vm317_vm0, %v25925_v0, 0.0  ;;  %v25932_v40 = vpop.eup %23959  ;;  %6803 = vadd.xlane.f32.xlu0 %v6802_v58  ;;  %23967 = vpow2.f32 %v6728_v33  ;;  %v6734_v61 = vmul.f32 1.442695, %v6680_v23 }
 0x479   : > { %6806 = vadd.xlane.f32.xlu1 %v6805_v10  ;;  %v6799_v14 = vsel %vm317_vm0, %v25932_v40, 0.0  ;;  %v6736_v19 = vmul.f32 1.442695, %v6681_v16 }
 0x47a   : > { %v6636_v44 = vpop.xlane.xlu1 %6635  ;;  %v6639_v48 = vpop.xlane.xlu0 %6638 }
 0x47b   : > { %v6683_v3 = vsub.f32 %v25771_v8, %v6639_v48  ;;  %v6682_v37 = vsub.f32 %v25769_v1, %v6636_v44 }
 0x47c   : > { %v25938_v4 = vpop.eup %23961  ;;  %6800 = vadd.xlane.f32.xlu0 %v6799_v14 }
 0x47d   : > { %v6740_v29 = vmul.f32 1.442695, %v6683_v3  ;;  %v6738_v62 = vmul.f32 1.442695, %v6682_v37  ;;  %v6808_v1 = vsel %vm317_vm0, %v25938_v4, 0.0 }
 0x47e   : > { %v6642_v21 = vpop.xlane.xlu1 %6641 }
 0x47f   : > { %23969 = vpow2.f32 %v6740_v29  ;;  %v6684_v51 = vsub.f32 %v25779_v60, %v6642_v21  ;;  %v6645_v14 = vpop.xlane.xlu0 %6644 }
 0x480   : > { %v25940_v59 = vpop.eup %23963  ;;  %23971 = vpow2.f32 %v6734_v61  ;;  %6809 = vadd.xlane.f32.xlu0 %v6808_v1  ;;  %v6685_v16 = vsub.f32 %v25781_v47, %v6645_v14 }
 0x481   : > { %v6817_v8 = vsel %vm317_vm0, %v25940_v59, 0.0  ;;  %v25947_v31 = vpop.eup %23965  ;;  %23973 = vpow2.f32 %v6738_v62  ;;  %v6742_v63 = vmul.f32 1.442695, %v6684_v51 }
 0x482   : > { %6818 = vadd.xlane.f32.xlu1 %v6817_v8  ;;  %v6814_v32 = vsel %vm317_vm0, %v25947_v31, 0.0  ;;  %v25952_v46 = vpop.eup %23967  ;;  %23975 = vpow2.f32 %v6736_v19  ;;  %v6744_v19 = vmul.f32 1.442695, %v6685_v16 }
 0x483   : > { %v6811_v23 = vsel %vm317_vm0, %v25952_v46, 0.0  ;;  %23977 = vpow2.f32 %v6742_v63 }
 0x484   : > { %6815 = vadd.xlane.f32.xlu0 %v6814_v32 }
 0x488   : > { %6812 = vadd.xlane.f32.xlu0 %v6811_v23 }
 0x489   : > { %v25954_v33 = vpop.eup %23969 }
 0x48a   : > { %v25958_v10 = vpop.eup %23971  ;;  %v6829_v44 = vsel %vm317_vm0, %v25954_v33, 0.0 }
 0x48b   : > { %6830 = vadd.xlane.f32.xlu1 %v6829_v44  ;;  %v6820_v60 = vsel %vm317_vm0, %v25958_v10, 0.0  ;;  %v25964_v58 = vpop.eup %23973 }
 0x48c   : > { %6821 = vadd.xlane.f32.xlu0 %v6820_v60  ;;  %v6826_v48 = vsel %vm317_vm0, %v25964_v58, 0.0  ;;  %v25968_v3 = vpop.eup %23975 }
 0x48d   : > { %v6823_v61 = vsel %vm317_vm0, %v25968_v3, 0.0  ;;  %v25972_v37 = vpop.eup %23977 }
 0x48e   : > { %29730 = vst [vmem:[#allocation25_spill] sm:$0xff] %v25972_v37  ;;  %v6832_v29 = vsel %vm317_vm0, %v25972_v37, 0.0 }
 0x490   : > { %6827 = vadd.xlane.f32.xlu0 %v6826_v48 }
 0x494   : > { %6824 = vadd.xlane.f32.xlu0 %v6823_v61 }
 0x498   : > { %6833 = vadd.xlane.f32.xlu0 %v6832_v29 }
 0x4a6   : > { %v6648_v62 = vpop.xlane.xlu1 %6647  ;;  %v6651_v21 = vpop.xlane.xlu0 %6650 }
 0x4a7   : > { %v6686_v8 = vsub.f32 %v25805_v55, %v6648_v62  ;;  %v6687_v1 = vsub.f32 %v25807_v27, %v6651_v21 }
 0x4a9   : > { %v6746_v51 = vmul.f32 1.442695, %v6686_v8  ;;  %v6748_v32 = vmul.f32 1.442695, %v6687_v1  ;;  %v3126_v8 = vcombine.low %v25799_v41, %v25731_v15  ;;  %v3110_v1 = vcombine.low %v25711_v54, %v25721_v39 }
 0x4aa   : > { %v6654_v63 = vpop.xlane.xlu1 %6653  ;;  %v6657_v23 = vpop.xlane.xlu0 %6656 }
 0x4ab   : > { %23979 = vpow2.f32 %v6746_v51  ;;  %v6688_v44 = vsub.f32 %v25817_v2, %v6654_v63  ;;  %v6689_v48 = vsub.f32 %v25819_v43, %v6657_v23  ;;  %v3111_v51 = vcombine.high %v25711_v54, %v25721_v39 }
 0x4ac   : > { %23981 = vpow2.f32 %v6748_v32  ;;  %v3134_v32 = vrot.slane %v3126_v8, %v24670_v24  ;;  %v3118_v63 = vrot.slane %v3110_v1, %v24670_v24  ;;  %v3178_v54 = vcombine.low %v25749_v11, %v25759_v6 }
 0x4ad   : > { %23983 = vpow2.f32 %v6744_v19  ;;  %v6750_v60 = vmul.f32 1.442695, %v6688_v44  ;;  %v6752_v47 = vmul.f32 1.442695, %v6689_v48  ;;  %v3127_v19 = vcombine.high %v25799_v41, %v25731_v15 }
 0x4ae   : > { %v3142_v44 = vcombine.low %v3118_v63, %v3134_v32  ;;  %v3194_v48 = vcombine.low %v25803_v45, %v25777_v26  ;;  %v3186_v8 = vrot.slane %v3178_v54, %v24670_v24  ;;  %v29737_v54 = vld [vmem:[#allocation20_spill] sm:$0xff] }
 0x4af   : > { %23985 = vpow2.f32 %v6750_v60  ;;  %v3141_v23 = vrot.slane %v3127_v19, %v24670_v24  ;;  %v3143_v60 = vcombine.high %v3118_v63, %v3134_v32  ;;  %v26035_v63 = vpop.permute.xlu1 %2960 }
 0x4b0   : > { %23987 = vpow2.f32 %v6752_v47  ;;  %v3150_v39 = vrot.slane %v3142_v44, %v24681_v38  ;;  %29736 = vst [vmem:[#allocation36_spill] sm:$0xff] %v26035_v63  ;;  %v3262_v44 = vcombine.low %v25815_v17, %v25791_v5 }
 0x4b5   : > { %v25981_v61 = vpop.eup %23979 }
 0x4b6   : > { %29731 = vst [vmem:[#allocation34_spill] sm:$0xff] %v25981_v61  ;;  %v25983_v55 = vpop.eup %23981  ;;  %v6838_v27 = vsel %vm317_vm0, %v25981_v61, 0.0 }
 0x4b7   : > { %29732 = vst [vmem:[#allocation17_spill] sm:$0xff] %v25983_v55  ;;  %v25987_v29 = vpop.eup %23983  ;;  %6839 = vadd.xlane.f32.xlu0 %v6838_v27  ;;  %v6841_v2 = vsel %vm317_vm0, %v25983_v55, 0.0  ;;  %v3157_v27 = vrot.slane %v3143_v60, %v24681_v38 }
 0x4b8   : > { %29733 = vst [vmem:[#allocation27_spill] sm:$0xff] %v25987_v29  ;;  %6842 = vadd.xlane.f32.xlu1 %v6841_v2  ;;  %v6835_v43 = vsel %vm317_vm0, %v25987_v29, 0.0  ;;  %v3179_v2 = vcombine.high %v25749_v11, %v25759_v6 }
 0x4b9   : > { %v25993_v14 = vpop.eup %23985  ;;  %v3654_v19 = vcombine.low %v3150_v39, %v3157_v27 }
 0x4ba   : > { %29734 = vst [vmem:[#allocation26_spill] sm:$0xff] %v25993_v14  ;;  %v6844_v16 = vsel %vm317_vm0, %v25993_v14, 0.0  ;;  %v25997_v62 = vpop.eup %23987 }
 0x4bb   : > { %6836 = vadd.xlane.f32.xlu0 %v6835_v43  ;;  %29735 = vst [vmem:[#allocation35_spill] sm:$0xff] %v25997_v62  ;;  %v6847_v21 = vsel %vm317_vm0, %v25997_v62, 0.0  ;;  %v3202_v43 = vrot.slane %v3194_v48, %v24670_v24  ;;  %v3661_v60 = vrot.slane %v3654_v19, %v24670_v24 }
 0x4bd   : > { %v3211_v32 = vcombine.high %v3186_v8, %v3202_v43 }
 0x4bf   : > { %6845 = vadd.xlane.f32.xlu0 %v6844_v16 }
 0x4c3   : > { %6848 = vadd.xlane.f32.xlu0 %v6847_v21 }
 0x4c9   : > { %2992 = vrot.lane.b32.xlu1 %v29711_v34, %s29571_s10  ;;  %v3125_v34 = vrot.slane %v3111_v51, %v24670_v24  ;;  %v3210_v51 = vcombine.low %v3186_v8, %v3202_v43 }
 0x4cb   : > { %v3158_v15 = vcombine.low %v3125_v34, %v3141_v23  ;;  %v3159_v41 = vcombine.high %v3125_v34, %v3141_v23 }
 0x4cd   : > { %3008 = vrot.lane.b32.xlu1 %v29709_v50, %s29571_s10  ;;  %v3195_v50 = vcombine.high %v25803_v45, %v25777_v26  ;;  %v3166_v16 = vrot.slane %v3158_v15, %v24681_v38  ;;  %v3173_v21 = vrot.slane %v3159_v41, %v24681_v38  ;;  %v22124_v26 = vcombine.high %v3150_v39, %v3157_v27 }
 0x4ce   : > { %v3193_v45 = vrot.slane %v3179_v2, %v24670_v24  ;;  %v3218_v15 = vrot.slane %v3210_v51, %v24681_v38  ;;  %v3263_v41 = vcombine.high %v25815_v17, %v25791_v5  ;;  %v3247_v5 = vcombine.high %v29737_v54, %v25789_v53 }
 0x4cf   : > { %v3209_v1 = vrot.slane %v3195_v50, %v24670_v24  ;;  %v3670_v11 = vcombine.low %v3166_v16, %v3173_v21  ;;  %v22125_v6 = vcombine.high %v3166_v16, %v3173_v21  ;;  %v3246_v50 = vcombine.low %v29737_v54, %v25789_v53 }
 0x4d0   : > { %v3270_v17 = vrot.slane %v3262_v44, %v24670_v24 }
 0x4d1   : > { %v3226_v23 = vcombine.low %v3193_v45, %v3209_v1  ;;  %v3227_v34 = vcombine.high %v3193_v45, %v3209_v1  ;;  %v3677_v43 = vrot.slane %v3670_v11, %v24670_v24  ;;  %v3685_v16 = vrot.slane %v22125_v6, %v24670_v24  ;;  %v29739_v45 = vld [vmem:[#allocation19_spill] sm:$0xff] }
 0x4d2   : > { %v3254_v11 = vrot.slane %v3246_v50, %v24670_v24 }
 0x4d3   : > { %v3234_v21 = vrot.slane %v3226_v23, %v24681_v38  ;;  %v3241_v8 = vrot.slane %v3227_v34, %v24681_v38  ;;  %v3702_v34 = vcombine.low %v3677_v43, %v3685_v16 }
 0x4d4   : > { %v3279_v54 = vcombine.high %v3254_v11, %v3270_v17 }
 0x4d5   : > { %v6759_v47 = vpop.xlane.xlu0 %6758 }
 0x4d6   : > { %23989 = vrcp.f32 %v6759_v47  ;;  %v3669_v47 = vrot.slane %v22124_v26, %v24670_v24  ;;  %v29738_v26 = vld [vmem:[#allocation32_spill] sm:$0xff] }
 0x4d7   : > { %v29740_v51 = vcombine.high %v29738_v26, %v29739_v45 }
 0x4d8   : > { %v3686_v23 = vcombine.low %v3661_v60, %v3669_v47  ;;  %v3687_v44 = vcombine.high %v3661_v60, %v3669_v47  ;;  %v3710_v60 = vrot.slane %v3702_v34, %v24681_v38  ;;  %v3703_v47 = vcombine.high %v3677_v43, %v3685_v16  ;;  %v29745_v34 = vld [vmem:[#allocation28_spill] sm:$0xff] }
 0x4d9   : > { %2976 = vrot.lane.b32.xlu0 %v29710_v22, %s29571_s10  ;;  %v3225_v22 = vrot.slane %v3211_v32, %v24681_v38  ;;  %v29741_v32 = vmov 0.0  }
 0x4da   : > { %v3694_v55 = vrot.slane %v3686_v23, %v24681_v38  ;;  %v29744_v23 = vld [vmem:[#allocation29_spill] sm:$0xff] }
 0x4db   : > { %v3722_v1 = vcombine.low %v3218_v15, %v3225_v22  ;;  %v22126_v19 = vcombine.high %v3218_v15, %v3225_v22  ;;  %v22127_v15 = vcombine.high %v3234_v21, %v3241_v8  ;;  %v3261_v22 = vrot.slane %v3247_v5, %v24670_v24 }
 0x4dd   : > { %v3737_v50 = vrot.slane %v22126_v19, %v24670_v24  ;;  %v3753_v5 = vrot.slane %v22127_v15, %v24670_v24  ;;  %v29742_v19 = vld [vmem:[#allocation16_spill] sm:$0xff]  ;;  %v3719_v15 = vcombine.high %v3694_v55, %v3710_v60 }
 0x4df   : > { %v6756_v27 = vpop.xlane.xlu1 %6755 }
 0x4e0   : > { %v23990_v48 = vpop.eup %23989  ;;  %23991 = vrcp.f32 %v6756_v27 }
 0x4e1   : > { %v6768_v39 = vpop.xlane.xlu0 %6767  ;;  %v6883_v2 = vmul.f32 %v23990_v48, %v25847_v25  ;;  %v3277_v25 = vrot.slane %v3263_v41, %v24670_v24  ;;  %v3738_v48 = vcombine.low %v3234_v21, %v3241_v8  ;;  %v3278_v41 = vcombine.low %v3254_v11, %v3270_v17 }
 0x4e2   : > { %v26070_v21 = vrot.slane %v3687_v44, %v24681_v38  ;;  %v3314_v44 = vcombine.low %v29745_v34, %v29744_v23 }
 0x4e3   : > { %23080 = vmatmul.mubr.msk.f32.vlgmr.msra.gmra.mrb[48].mxu0 %vm317_vm0, %v6883_v2  ;;  %v6762_v53 = vpop.xlane.xlu1 %6761  ;;  %v3294_v27 = vcombine.low %v3261_v22, %v3277_v25  ;;  %v3295_v2 = vcombine.high %v3261_v22, %v3277_v25  ;;  %v3745_v8 = vrot.slane %v3738_v48, %v24670_v24  ;;  %v3286_v17 = vrot.slane %v3278_v41, %v24681_v38 }
 0x4e4   : > { %23088 = vmatpush3.msra.mxu0 %v29740_v51  ;;  %23089 = vmatprep.mubr.msk.f32.mxu0 %vm24316_vm2, %v29741_v32  ;;  %v3729_v51 = vrot.slane %v3722_v1, %v24670_v24  ;;  %v3293_v1 = vrot.slane %v3279_v54, %v24681_v38  ;;  %v26085_v22 = vrot.slane %v3703_v47, %v24681_v38 }
 0x4e5   : > { %v6765_v6 = vpop.xlane.xlu0 %6764  ;;  %23097 = vmatprep.subr.mxu0 %v29741_v32  ;;  %v3302_v11 = vrot.slane %v3294_v27, %v24681_v38  ;;  %v3718_v54 = vcombine.low %v3694_v55, %v3710_v60  ;;  %v3770_v27 = vcombine.low %v3745_v8, %v3753_v5  ;;  %v3771_v61 = vcombine.high %v3745_v8, %v3753_v5 }
 0x4e6   : > { %23993 = vrcp.f32 %v6765_v6  ;;  %v3309_v6 = vrot.slane %v3295_v2, %v24681_v38  ;;  %v3754_v16 = vcombine.low %v3729_v51, %v3737_v50  ;;  %v3790_v2 = vcombine.low %v3286_v17, %v3293_v1 }
 0x4e7   : > { %23995 = vrcp.f32 %v6762_v53  ;;  %v6771_v14 = vpop.xlane.xlu1 %6770  ;;  %v22128_v63 = vcombine.high %v3286_v17, %v3293_v1  ;;  %v26107_v17 = vrot.slane %v3770_v27, %v24681_v38 }
 0x4e8   : > { %23997 = vrcp.f32 %v6768_v39  ;;  %v29743_v39 = vld [vmem:[#allocation23_spill] sm:$0xff]  ;;  %v26094_v47 = vrot.slane %v3754_v16, %v24681_v38  ;;  %v26121_v16 = vrot.slane %v3771_v61, %v24681_v38 }
 0x4e9   : > { %v6774_v62 = vpop.xlane.xlu0 %6773  ;;  %v3330_v25 = vcombine.low %v29743_v39, %v29742_v19  ;;  %23999 = vrcp.f32 %v6771_v14  ;;  %v3331_v43 = vcombine.high %v29743_v39, %v29742_v19  ;;  %v3315_v14 = vcombine.high %v29745_v34, %v29744_v23 }
 0x4ea   : > { %v23992_v53 = vpop.eup %23991  ;;  %24001 = vrcp.f32 %v6774_v62  ;;  %v3755_v39 = vcombine.high %v3729_v51, %v3737_v50  ;;  %v3806_v62 = vcombine.low %v3302_v11, %v3309_v6  ;;  %v22129_v34 = vcombine.high %v3302_v11, %v3309_v6 }
 0x4eb   : > { %v6882_v41 = vmul.f32 %v23992_v53, %v25854_v30  ;;  %v3338_v19 = vrot.slane %v3330_v25, %v24670_v24  ;;  %v3345_v37 = vrot.slane %v3331_v43, %v24670_v24  ;;  %v3322_v30 = vrot.slane %v3314_v44, %v24670_v24 }
 0x4ec   : > { %v29746_v50 = vcombine.low %v29738_v26, %v29739_v45  ;;  %v3329_v8 = vrot.slane %v3315_v14, %v24670_v24  ;;  %v26114_v26 = vrot.slane %v3790_v2, %v24670_v24  ;;  %v3813_v53 = vrot.slane %v3806_v62, %v24670_v24  ;;  %v29748_v62 = vld [vmem:[#allocation21_spill] sm:$0xff] }
 0x4ed   : > { %v6780_v48 = vpop.xlane.xlu0 %6779  ;;  %23075 = vmatmul.mubr.msk.f32.vlgmr.msra.gmra.mrb[32].mxu1 %vm317_vm0, %v6882_v41  ;;  %v3346_v25 = vcombine.low %v3322_v30, %v3338_v19  ;;  %v3821_v44 = vrot.slane %v22129_v34, %v24670_v24  ;;  %v3721_v41 = vcombine.high %v26070_v21, %v26085_v22 }
 0x4ee   : > { %24003 = vrcp.f32 %v6780_v48  ;;  %v6783_v60 = vpop.xlane.xlu1 %6782  ;;  %23083 = vmatpush3.msra.mxu1 %v29746_v50  ;;  %23084 = vmatprep.mubr.msk.f32.mxu1 %vm24316_vm2, %v29741_v32  ;;  %v3362_v45 = vcombine.low %v3329_v8, %v3345_v37  ;;  %v3363_v11 = vcombine.high %v3329_v8, %v3345_v37  ;;  %v3720_v48 = vcombine.low %v26070_v21, %v26085_v22 }
 0x4ef   : > { %23092 = vmatprep.subr.mxu1 %v29741_v32  ;;  %v3354_v61 = vrot.slane %v3346_v25, %v24681_v38  ;;  %v3838_v22 = vcombine.low %v3813_v53, %v3821_v44 }
 0x4f0   : > { %v23994_v29 = vpop.eup %23993 }
 0x4f1   : > { %v23996_v23 = vpop.eup %23995  ;;  %v6777_v55 = vpop.xlane.xlu0 %6776  ;;  %v6885_v51 = vmul.f32 %v23994_v29, %v25865_v56  ;;  %v3347_v56 = vcombine.high %v3322_v30, %v3338_v19  ;;  %v26111_v29 = vrot.slane %v3755_v39, %v24681_v38  ;;  %v3787_v19 = vcombine.high %v26094_v47, %v26107_v17  ;;  %v29747_v39 = vld [vmem:[#allocation24_spill] sm:$0xff] }
 0x4f2   : > { %24005 = vrcp.f32 %v6777_v55  ;;  %v6884_v5 = vmul.f32 %v23996_v23, %v25859_v9  ;;  %v23998_v1 = vpop.eup %23997  ;;  %v3805_v9 = vrot.slane %v22128_v63, %v24670_v24  ;;  %v3398_v23 = vcombine.low %v29748_v62, %v29747_v39 }
 0x4f3   : > { %23090 = vmatmul.mubr.msk.f32.vlgmr.msra.gmra.mrb[50].mxu0 %vm317_vm0, %v6885_v51  ;;  %24007 = vrcp.f32 %v6783_v60  ;;  %v24000_v6 = vpop.eup %23999  ;;  %v6886_v37 = vmul.f32 %v23998_v1, %v25857_v57  ;;  %v3361_v14 = vrot.slane %v3347_v56, %v24681_v38  ;;  %v3370_v57 = vrot.slane %v3362_v45, %v24681_v38  ;;  %v29750_v1 = vld [vmem:[#allocation30_spill] sm:$0xff] }
 0x4f4   : > { %23098 = vmatpush3.msra.mxu0 %v3719_v15  ;;  %23085 = vmatmul.mubr.msk.f32.vlgmr.msra.gmra.mrb[34].mxu1 %vm317_vm0, %v6884_v5  ;;  %v6887_v63 = vmul.f32 %v24000_v6, %v25868_v52  ;;  %v24002_v15 = vpop.eup %24001  ;;  %v3377_v52 = vrot.slane %v3363_v11, %v24681_v38  ;;  %v3822_v27 = vcombine.low %v26114_v26, %v3805_v9 }
 0x4f5   : > { %v6786_v43 = vpop.xlane.xlu0 %6785  ;;  %23093 = vmatpush3.msra.mxu1 %v3718_v54  ;;  %23094 = vmatprep.mubr.msk.f32.mxu1 %vm24316_vm2, %v29741_v32  ;;  %v3786_v54 = vcombine.low %v26094_v47, %v26107_v17  ;;  %v3788_v21 = vcombine.low %v26111_v29, %v26121_v16  ;;  %v6888_v34 = vmul.f32 %v24002_v15, %v25874_v35  ;;  %v29749_v17 = vld [vmem:[#allocation31_spill] sm:$0xff] }
 0x4f6   : > { %24009 = vrcp.f32 %v6786_v43  ;;  %23099 = vmatprep.mubr.msk.f32.mxu0 %vm24316_vm2, %v29741_v32  ;;  %23102 = vmatprep.subr.mxu1 %v29741_v32  ;;  %v3823_v30 = vcombine.high %v26114_v26, %v3805_v9  ;;  %v3858_v60 = vcombine.low %v3354_v61, %v3361_v14  ;;  %v3399_v47 = vcombine.high %v29748_v62, %v29747_v39 }
 0x4f7   : > { %23107 = vmatprep.subr.mxu0 %v29741_v32  ;;  %23100 = vmatmul.mubr.msk.f32.vlgmr.msra.gmra.mrb[52].mxu0 %vm317_vm0, %v6887_v63  ;;  %v3839_v51 = vcombine.high %v3813_v53, %v3821_v44  ;;  %v22130_v8 = vcombine.high %v3354_v61, %v3361_v14  ;;  %v3874_v5 = vcombine.low %v3370_v57, %v3377_v52 }
 0x4f8   : > { %23095 = vmatmul.mubr.msk.f32.vlgmr.msra.gmra.mrb[36].mxu1 %vm317_vm0, %v6886_v37  ;;  %23108 = vmatpush3.msra.mxu0 %v3721_v41  ;;  %v24004_v55 = vpop.eup %24003  ;;  %v3382_v25 = vcombine.low %v29750_v1, %v29749_v17  ;;  %v26164_v35 = vrot.slane %v3822_v27, %v24681_v38  ;;  %v22131_v56 = vcombine.high %v3370_v57, %v3377_v52 }
 0x4f9   : > { %v6792_v2 = vpop.xlane.xlu0 %6791  ;;  %23103 = vmatpush3.msra.mxu1 %v3720_v48  ;;  %23104 = vmatprep.mubr.msk.f32.mxu1 %vm24316_vm2, %v29741_v32  ;;  %v3383_v26 = vcombine.high %v29750_v1, %v29749_v17  ;;  %v6795_v45 = vpop.xlane.xlu1 %6794  ;;  %v3406_v43 = vrot.slane %v3398_v23, %v24670_v24  ;;  %v26174_v53 = vrot.slane %v3838_v22, %v24681_v38  ;;  %v29751_v23 = vld [vmem:[#allocation33_spill] sm:$0xff]  ;;  %v29753_v17 = vld [vmem:[#allocation22_spill] sm:$0xff]  ;;  %v29754_v1 = vld [vmem:[#allocation15_spill] sm:$0xff] }
 0x4fa   : > { %23109 = vmatprep.mubr.msk.f32.mxu0 %vm24316_vm2, %v29741_v32  ;;  %24011 = vrcp.f32 %v6792_v2  ;;  %23112 = vmatprep.subr.mxu1 %v29741_v32  ;;  %v26177_v44 = vrot.slane %v3823_v30, %v24681_v38  ;;  %v3413_v37 = vrot.slane %v3399_v47, %v24670_v24  ;;  %v26183_v63 = vrot.slane %v3839_v51, %v24681_v38 }
 0x4fb   : > { %23117 = vmatprep.subr.mxu0 %v29741_v32  ;;  %v26186_v48 = vrot.slane %v3858_v60, %v24670_v24  ;;  %v3390_v61 = vrot.slane %v3382_v25, %v24670_v24  ;;  %v26192_v14 = vrot.slane %v22130_v8, %v24670_v24  ;;  %v26195_v41 = vrot.slane %v3874_v5, %v24670_v24 }
 0x4fc   : > { %v24006_v50 = vpop.eup %24005  ;;  %23105 = vmatmul.mubr.msk.f32.vlgmr.msra.gmra.mrb[38].mxu1 %vm317_vm0, %v6888_v34  ;;  %v26202_v52 = vrot.slane %v22131_v56, %v24670_v24  ;;  %v3854_v62 = vcombine.low %v26164_v35, %v26174_v53  ;;  %v29752_v34 = vld [vmem:[#allocation18_spill] sm:$0xff]  ;;  %v3450_v25 = vcombine.low %v29754_v1, %v29753_v17 }
 0x4fd   : > { %v6789_v11 = vpop.xlane.xlu0 %6788  ;;  %v6889_v9 = vmul.f32 %v24006_v50, %v25891_v20  ;;  %23113 = vmatpush3.msra.mxu1 %v3786_v54  ;;  %23114 = vmatprep.mubr.msk.f32.mxu1 %vm24316_vm2, %v29741_v32  ;;  %v24008_v6 = vpop.eup %24007  ;;  %v6890_v20 = vmul.f32 %v24004_v55, %v25883_v18  ;;  %v3397_v18 = vrot.slane %v3383_v26, %v24670_v24 }
 0x4fe   : > { %24013 = vrcp.f32 %v6789_v11  ;;  %23122 = vmatprep.subr.mxu1 %v29741_v32  ;;  %v6891_v57 = vmul.f32 %v24008_v6, %v25885_v28  ;;  %v3414_v27 = vcombine.low %v3390_v61, %v3406_v43  ;;  %v3415_v2 = vcombine.high %v3390_v61, %v3406_v43 }
 0x4ff   : > { %23110 = vmatmul.mubr.msk.f32.vlgmr.msra.gmra.mrb[54].mxu0 %vm317_vm0, %v6889_v9  ;;  %24015 = vrcp.f32 %v6795_v45  ;;  %v3430_v22 = vcombine.low %v3397_v18, %v3413_v37  ;;  %v3431_v39 = vcombine.high %v3397_v18, %v3413_v37  ;;  %v3466_v30 = vcombine.low %v29752_v34, %v29751_v23 }
 0x500   : > { %v24010_v15 = vpop.eup %24009  ;;  %23118 = vmatpush3.msra.mxu0 %v3787_v19  ;;  %23119 = vmatprep.mubr.msk.f32.mxu0 %vm24316_vm2, %v29741_v32  ;;  %v3789_v19 = vcombine.high %v26111_v29, %v26121_v16  ;;  %v3855_v29 = vcombine.high %v26164_v35, %v26174_v53  ;;  %v3856_v16 = vcombine.low %v26177_v44, %v26183_v63 }
 0x501   : > { %v6798_v54 = vpop.xlane.xlu0 %6797  ;;  %23127 = vmatprep.subr.mxu0 %v29741_v32  ;;  %23115 = vmatmul.mubr.msk.f32.vlgmr.msra.gmra.mrb[40].mxu1 %vm317_vm0, %v6890_v20  ;;  %v6892_v28 = vmul.f32 %v24010_v15, %v25896_v36  ;;  %v3890_v36 = vcombine.low %v26186_v48, %v26192_v14  ;;  %v3906_v60 = vcombine.low %v26195_v41, %v26202_v52 }
 0x502   : > { %24017 = vrcp.f32 %v6798_v54  ;;  %23123 = vmatpush3.msra.mxu1 %v3788_v21  ;;  %23124 = vmatprep.mubr.msk.f32.mxu1 %vm24316_vm2, %v29741_v32  ;;  %v3422_v47 = vrot.slane %v3414_v27, %v24681_v38  ;;  %v3429_v51 = vrot.slane %v3415_v2, %v24681_v38  ;;  %v3467_v50 = vcombine.high %v29752_v34, %v29751_v23 }
 0x503   : > { %23120 = vmatmul.mubr.msk.f32.vlgmr.msra.gmra.mrb[56].mxu0 %vm317_vm0, %v6891_v57  ;;  %23132 = vmatprep.subr.mxu1 %v29741_v32  ;;  %v3438_v8 = vrot.slane %v3430_v22, %v24681_v38  ;;  %v3445_v5 = vrot.slane %v3431_v39, %v24681_v38  ;;  %v3451_v26 = vcombine.high %v29754_v1, %v29753_v17 }
 0x504   : > { %23128 = vmatpush3.msra.mxu0 %v3789_v19  ;;  %23129 = vmatprep.mubr.msk.f32.mxu0 %vm24316_vm2, %v29741_v32  ;;  %v24012_v21 = vpop.eup %24011  ;;  %v3857_v45 = vcombine.high %v26177_v44, %v26183_v63  ;;  %v3891_v11 = vcombine.high %v26186_v48, %v26192_v14  ;;  %v3907_v9 = vcombine.high %v26195_v41, %v26202_v52 }
 0x505   : > { %v6804_v55 = vpop.xlane.xlu0 %6803  ;;  %23125 = vmatmul.mubr.msk.f32.vlgmr.msra.gmra.mrb[42].mxu1 %vm317_vm0, %v6892_v28  ;;  %23137 = vmatprep.subr.mxu0 %v29741_v32  ;;  %v6894_v35 = vmul.f32 %v24012_v21, %v25903_v49  ;;  %v3474_v6 = vrot.slane %v3466_v30, %v24670_v24  ;;  %v26251_v49 = vrot.slane %v3890_v36, %v24681_v38 }
 0x506   : > { %24019 = vrcp.f32 %v6804_v55  ;;  %23133 = vmatpush3.msra.mxu1 %v3854_v62  ;;  %23134 = vmatprep.mubr.msk.f32.mxu1 %vm24316_vm2, %v29741_v32  ;;  %v6807_v43 = vpop.xlane.xlu1 %6806  ;;  %v26254_v20 = vrot.slane %v3906_v60, %v24681_v38  ;;  %v3926_v63 = vcombine.low %v3422_v47, %v3429_v51  ;;  %v22132_v48 = vcombine.high %v3422_v47, %v3429_v51 }
 0x507   : > { %23142 = vmatprep.subr.mxu1 %v29741_v32  ;;  %v3481_v15 = vrot.slane %v3467_v50, %v24670_v24  ;;  %v3942_v61 = vcombine.low %v3438_v8, %v3445_v5  ;;  %v3458_v14 = vrot.slane %v3450_v25, %v24670_v24  ;;  %v3465_v18 = vrot.slane %v3451_v26, %v24670_v24 }
 0x508   : > { %v24014_v56 = vpop.eup %24013  ;;  %v26266_v54 = vrot.slane %v3891_v11, %v24681_v38  ;;  %v26269_v57 = vrot.slane %v3907_v9, %v24681_v38  ;;  %v3922_v62 = vcombine.low %v26251_v49, %v26254_v20 }
 0x509   : > { %v6801_v53 = vpop.xlane.xlu0 %6800  ;;  %v6893_v37 = vmul.f32 %v24014_v56, %v25912_v7  ;;  %23135 = vmatmul.mubr.msk.f32.vlgmr.msra.gmra.mrb[44].mxu1 %vm317_vm0, %v6894_v35  ;;  %v24016_v44 = vpop.eup %24015  ;;  %v22133_v7 = vcombine.high %v3438_v8, %v3445_v5  ;;  %v3482_v52 = vcombine.low %v3458_v14, %v3474_v6  ;;  %v3483_v27 = vcombine.high %v3458_v14, %v3474_v6 }
 0x50a   : > { %24021 = vrcp.f32 %v6801_v53  ;;  %23143 = vmatpush3.msra.mxu1 %v3856_v16  ;;  %23144 = vmatprep.mubr.msk.f32.mxu1 %vm24316_vm2, %v29741_v32  ;;  %v6895_v19 = vmul.f32 %v24016_v44, %v25905_v12  ;;  %v3498_v39 = vcombine.low %v3465_v18, %v3481_v15  ;;  %v3499_v28 = vcombine.high %v3465_v18, %v3481_v15 }
 0x50b   : > { %23130 = vmatmul.mubr.msk.f32.vlgmr.msra.gmra.mrb[58].mxu0 %vm317_vm0, %v6893_v37  ;;  %23152 = vmatprep.subr.mxu1 %v29741_v32  ;;  %24023 = vrcp.f32 %v6807_v43  ;;  %v3941_v16 = vrot.slane %v22132_v48, %v24670_v24  ;;  %v3949_v21 = vrot.slane %v3942_v61, %v24670_v24  ;;  %v3957_v12 = vrot.slane %v22133_v7, %v24670_v24 }
 0x50c   : > { %v24018_v41 = vpop.eup %24017  ;;  %23138 = vmatpush3.msra.mxu0 %v3855_v29  ;;  %23139 = vmatprep.mubr.msk.f32.mxu0 %vm24316_vm2, %v29741_v32  ;;  %v3933_v29 = vrot.slane %v3926_v63, %v24670_v24  ;;  %v3497_v34 = vrot.slane %v3483_v27, %v24681_v38  ;;  %v3506_v36 = vrot.slane %v3498_v39, %v24681_v38 }
 0x50d   : > { %v6810_v2 = vpop.xlane.xlu0 %6809  ;;  %23147 = vmatprep.subr.mxu0 %v29741_v32  ;;  %v6896_v22 = vmul.f32 %v24018_v41, %v25917_v42  ;;  %v3490_v42 = vrot.slane %v3482_v52, %v24681_v38  ;;  %v3513_v60 = vrot.slane %v3499_v28, %v24681_v38  ;;  %v3924_v47 = vcombine.low %v26266_v54, %v26269_v57 }
 0x50e   : > { %24025 = vrcp.f32 %v6810_v2  ;;  %v3958_v51 = vcombine.low %v3933_v29, %v3941_v16  ;;  %v3974_v50 = vcombine.low %v3949_v21, %v3957_v12  ;;  %v3959_v6 = vcombine.high %v3933_v29, %v3941_v16 }
 0x50f   : > { %23140 = vmatmul.mubr.msk.f32.vlgmr.msra.gmra.mrb[60].mxu0 %vm317_vm0, %v6895_v19  ;;  %23145 = vmatmul.mubr.msk.f32.vlgmr.msra.gmra.mrb[46].mxu1 %vm317_vm0, %v6896_v22  ;;  %v22134_v5 = vcombine.high %v3490_v42, %v3497_v34  ;;  %v6819_v17 = vpop.xlane.xlu1 %6818  ;;  %v4010_v56 = vcombine.low %v3506_v36, %v3513_v60  ;;  %v22135_v26 = vcombine.high %v3506_v36, %v3513_v60 }
 0x510   : > { %v24020_v23 = vpop.eup %24019  ;;  %23148 = vmatpush3.msra.mxu0 %v3857_v45  ;;  %23153 = vmatpush3.msra.mxu1 %v3922_v62  ;;  %v3923_v45 = vcombine.high %v26251_v49, %v26254_v20  ;;  %v3966_v11 = vrot.slane %v3958_v51, %v24681_v38  ;;  %v3982_v9 = vrot.slane %v3974_v50, %v24681_v38 }
 0x511   : > { %v6816_v30 = vpop.xlane.xlu0 %6815  ;;  %23154 = vmatprep.mubr.msk.f32.mxu1 %vm24316_vm2, %v29741_v32  ;;  %23162 = vmatprep.subr.mxu1 %v29741_v32  ;;  %v6898_v55 = vmul.f32 %v24020_v23, %v25923_v13  ;;  %v3994_v13 = vcombine.low %v3490_v42, %v3497_v34  ;;  %v3975_v43 = vcombine.high %v3949_v21, %v3957_v12 }
 0x512   : > { %24027 = vrcp.f32 %v6816_v30  ;;  %23149 = vmatprep.mubr.msk.f32.mxu0 %vm24316_vm2, %v29741_v32  ;;  %23157 = vmatprep.subr.mxu0 %v29741_v32  ;;  %v3925_v49 = vcombine.high %v26266_v54, %v26269_v57  ;;  %v4009_v44 = vrot.slane %v22134_v5, %v24670_v24  ;;  %v4017_v48 = vrot.slane %v4010_v56, %v24670_v24 }
 0x513   : > { %23155 = vmatmul.mubr.msk.f32.vlgmr.msra.gmra.mrb[48].mxu1 %vm317_vm0, %v6898_v55  ;;  %v4001_v20 = vrot.slane %v3994_v13, %v24670_v24  ;;  %v4025_v15 = vrot.slane %v22135_v26, %v24670_v24  ;;  %v3990_v61 = vcombine.low %v3966_v11, %v3982_v9  ;;  %v3973_v7 = vrot.slane %v3959_v6, %v24681_v38  ;;  %v29756_v26 = vld [vmem:[#allocation36_spill] sm:$0xff] }
 0x514   : > { %v24022_v8 = vpop.eup %24021  ;;  %23163 = vmatpush3.msra.mxu1 %v3924_v47  ;;  %23164 = vmatprep.mubr.msk.f32.mxu1 %vm24316_vm2, %v29741_v32 }
 0x515   : > { %v6813_v1 = vpop.xlane.xlu0 %6812  ;;  %v6897_v25 = vmul.f32 %v24022_v8, %v25932_v40  ;;  %23172 = vmatprep.subr.mxu1 %v29741_v32  ;;  %v24024_v35 = vpop.eup %24023  ;;  %v4026_v18 = vcombine.low %v4001_v20, %v4009_v44  ;;  %v4042_v54 = vcombine.low %v4017_v48, %v4025_v15  ;;  %v4027_v22 = vcombine.high %v4001_v20, %v4009_v44  ;;  %v29755_v8 = vld [vmem:[#allocation25_spill] sm:$0xff] }
 0x516   : > { %24029 = vrcp.f32 %v6813_v1  ;;  %v6899_v37 = vmul.f32 %v24024_v35, %v25925_v0  ;;  %v3989_v0 = vrot.slane %v3975_v43, %v24681_v38  ;;  %v4043_v29 = vcombine.high %v4017_v48, %v4025_v15  ;;  %v29757_v43 = vld [vmem:[#allocation27_spill] sm:$0xff] }
 0x517   : > { %23150 = vmatmul.mubr.msk.f32.vlgmr.msra.gmra.mrb[62].mxu0 %vm317_vm0, %v6897_v25  ;;  %24031 = vrcp.f32 %v6819_v17  ;;  %v4034_v28 = vrot.slane %v4026_v18, %v24681_v38  ;;  %v4050_v62 = vrot.slane %v4042_v54, %v24681_v38  ;;  %v4041_v34 = vrot.slane %v4027_v22, %v24681_v38 }
 0x518   : > { %23158 = vmatpush3.msra.mxu0 %v3923_v45  ;;  %23159 = vmatprep.mubr.msk.f32.mxu0 %vm24316_vm2, %v29741_v32  ;;  %v24026_v40 = vpop.eup %24025  ;;  %v3992_v57 = vcombine.low %v3973_v7, %v3989_v0  ;;  %v6831_v27 = vpop.xlane.xlu1 %6830  ;;  %v3993_v23 = vcombine.high %v3973_v7, %v3989_v0  ;;  %v4057_v30 = vrot.slane %v4043_v29, %v24681_v38 }
 0x519   : > { %v6822_v53 = vpop.xlane.xlu0 %6821  ;;  %23167 = vmatprep.subr.mxu0 %v29741_v32  ;;  %v6900_v63 = vmul.f32 %v24026_v40, %v25938_v4  ;;  %v4058_v42 = vcombine.low %v4034_v28, %v4050_v62  ;;  %v4059_v51 = vcombine.high %v4034_v28, %v4050_v62 }
 0x51a   : > { %24033 = vrcp.f32 %v6822_v53  ;;  %v4061_v5 = vcombine.high %v4041_v34, %v4057_v30 }
 0x51b   : > { %23160 = vmatmul.mubr.msk.f32.vlgmr.msra.gmra.mrb[64].mxu0 %vm317_vm0, %v6899_v37  ;;  %23165 = vmatmul.mubr.msk.f32.vlgmr.msra.gmra.mrb[50].mxu1 %vm317_vm0, %v6900_v63 }
 0x51c   : > { %v24028_v14 = vpop.eup %24027  ;;  %23168 = vmatpush3.msra.mxu0 %v3925_v49  ;;  %23173 = vmatpush3.msra.mxu1 %v3990_v61 }
 0x51d   : > { %v6828_v41 = vpop.xlane.xlu0 %6827  ;;  %23174 = vmatprep.mubr.msk.f32.mxu1 %vm24316_vm2, %v29741_v32  ;;  %v6902_v4 = vmul.f32 %v24028_v14, %v25947_v31  ;;  %23182 = vmatprep.subr.mxu1 %v29741_v32  ;;  %v3991_v31 = vcombine.high %v3966_v11, %v3982_v9 }
 0x51e   : > { %24035 = vrcp.f32 %v6828_v41  ;;  %23169 = vmatprep.mubr.msk.f32.mxu0 %vm24316_vm2, %v29741_v32  ;;  %23177 = vmatprep.subr.mxu0 %v29741_v32 }
 0x51f   : > { %23175 = vmatmul.mubr.msk.f32.vlgmr.msra.gmra.mrb[52].mxu1 %vm317_vm0, %v6902_v4 }
 0x520   : > { %v24030_v52 = vpop.eup %24029  ;;  %23183 = vmatpush3.msra.mxu1 %v3992_v57  ;;  %23184 = vmatprep.mubr.msk.f32.mxu1 %vm24316_vm2, %v29741_v32 }
 0x521   : > { %v6825_v2 = vpop.xlane.xlu0 %6824  ;;  %v6901_v19 = vmul.f32 %v24030_v52, %v25952_v46  ;;  %v24032_v39 = vpop.eup %24031  ;;  %23192 = vmatprep.subr.mxu1 %v29741_v32 }
 0x522   : > { %24037 = vrcp.f32 %v6825_v2  ;;  %v6903_v21 = vmul.f32 %v24032_v39, %v25940_v59 }
 0x523   : > { %23170 = vmatmul.mubr.msk.f32.vlgmr.msra.gmra.mrb[66].mxu0 %vm317_vm0, %v6901_v19  ;;  %24039 = vrcp.f32 %v6831_v27 }
 0x524   : > { %v24034_v16 = vpop.eup %24033  ;;  %23178 = vmatpush3.msra.mxu0 %v3991_v31  ;;  %23179 = vmatprep.mubr.msk.f32.mxu0 %vm24316_vm2, %v29741_v32 }
 0x525   : > { %v6834_v46 = vpop.xlane.xlu0 %6833  ;;  %23187 = vmatprep.subr.mxu0 %v29741_v32  ;;  %v6904_v12 = vmul.f32 %v24034_v16, %v25958_v10  ;;  %v4060_v10 = vcombine.low %v4041_v34, %v4057_v30 }
 0x526   : > { %24041 = vrcp.f32 %v6834_v46 }
 0x527   : > { %23180 = vmatmul.mubr.msk.f32.vlgmr.msra.gmra.mrb[68].mxu0 %vm317_vm0, %v6903_v21  ;;  %23185 = vmatmul.mubr.msk.f32.vlgmr.msra.gmra.mrb[54].mxu1 %vm317_vm0, %v6904_v12 }
 0x528   : > { %v24036_v55 = vpop.eup %24035  ;;  %23188 = vmatpush3.msra.mxu0 %v3993_v23  ;;  %23193 = vmatpush3.msra.mxu1 %v4058_v42 }
 0x529   : > { %23194 = vmatprep.mubr.msk.f32.mxu1 %vm24316_vm2, %v29741_v32  ;;  %23202 = vmatprep.subr.mxu1 %v29741_v32  ;;  %v6906_v59 = vmul.f32 %v24036_v55, %v25964_v58 }
 0x52a   : > { %23189 = vmatprep.mubr.msk.f32.mxu0 %vm24316_vm2, %v29741_v32  ;;  %23197 = vmatprep.subr.mxu0 %v29741_v32 }
 0x52b   : > { %23195 = vmatmul.mubr.msk.f32.vlgmr.msra.gmra.mrb[56].mxu1 %vm317_vm0, %v6906_v59  ;;  %v29758_v59 = vld [vmem:[#allocation34_spill] sm:$0xff] }
 0x52c   : > { %v24038_v36 = vpop.eup %24037  ;;  %23203 = vmatpush3.msra.mxu1 %v4060_v10  ;;  %23204 = vmatprep.mubr.msk.f32.mxu1 %vm24316_vm2, %v29741_v32 }
 0x52d   : > { %v6905_v60 = vmul.f32 %v24038_v36, %v25968_v3  ;;  %23212 = vmatprep.subr.mxu1 %v29741_v32  ;;  %v24040_v47 = vpop.eup %24039  ;;  %v29759_v36 = vld [vmem:[#allocation17_spill] sm:$0xff] }
 0x52e   : > { %v6907_v50 = vmul.f32 %v24040_v47, %v25954_v33 }
 0x52f   : > { %23190 = vmatmul.mubr.msk.f32.vlgmr.msra.gmra.mrb[70].mxu0 %vm317_vm0, %v6905_v60 }
 0x530   : > { %v24042_v58 = vpop.eup %24041  ;;  %23198 = vmatpush3.msra.mxu0 %v4059_v51  ;;  %23199 = vmatprep.mubr.msk.f32.mxu0 %vm24316_vm2, %v29741_v32 }
 0x531   : > { %23207 = vmatprep.subr.mxu0 %v29741_v32  ;;  %v6908_v13 = vmul.f32 %v24042_v58, %v29755_v8  ;;  %v29760_v58 = vld [vmem:[#allocation26_spill] sm:$0xff]  ;;  %v29761_v8 = vld [vmem:[#allocation35_spill] sm:$0xff] }
 0x533   : > { %23200 = vmatmul.mubr.msk.f32.vlgmr.msra.gmra.mrb[72].mxu0 %vm317_vm0, %v6907_v50  ;;  %23205 = vmatmul.mubr.msk.f32.vlgmr.msra.gmra.mrb[58].mxu1 %vm317_vm0, %v6908_v13 }
 0x534   : > { %23208 = vmatpush3.msra.mxu0 %v4061_v5  ;;  %23209 = vmatprep.mubr.msk.f32.mxu0 %vm24316_vm2, %v29741_v32 }
 0x535   : > { %23217 = vmatprep.subr.mxu0 %v29741_v32  ;;  %23214 = vmatprep.mubr.msk.f32.mxu1 %vm24316_vm2, %v29741_v32 }
 0x544   : > { %v6840_v3 = vpop.xlane.xlu0 %6839 }
 0x545   : > { %v6843_v17 = vpop.xlane.xlu1 %6842 }
 0x548   : > { %v6837_v1 = vpop.xlane.xlu0 %6836 }
 0x549   : > { %24043 = vrcp.f32 %v6837_v1  ;;  %v2993_v25 = vpop.permute.xlu1 %2992 }
 0x54a   : > { %v3518_v45 = vcombine.low %v29756_v26, %v2993_v25  ;;  %v3519_v11 = vcombine.high %v29756_v26, %v2993_v25  ;;  %24045 = vrcp.f32 %v6840_v3 }
 0x54b   : > { %24047 = vrcp.f32 %v6843_v17 }
 0x54c   : > { %v6846_v33 = vpop.xlane.xlu0 %6845  ;;  %v3526_v49 = vrot.slane %v3518_v45, %v24670_v24  ;;  %v3533_v20 = vrot.slane %v3519_v11, %v24670_v24 }
 0x54d   : > { %v3009_v9 = vpop.permute.xlu1 %3008  ;;  %24049 = vrcp.f32 %v6846_v33 }
 0x550   : > { %v6849_v35 = vpop.xlane.xlu0 %6848 }
 0x551   : > { %24051 = vrcp.f32 %v6849_v35 }
 0x553   : > { %v24044_v56 = vpop.eup %24043 }
 0x554   : > { %v2977_v6 = vpop.permute.xlu0 %2976  ;;  %v6909_v40 = vmul.f32 %v24044_v56, %v29757_v43  ;;  %v24046_v22 = vpop.eup %24045 }
 0x555   : > { %v3534_v53 = vcombine.low %v2977_v6, %v3009_v9  ;;  %v3535_v37 = vcombine.high %v2977_v6, %v3009_v9  ;;  %v24048_v16 = vpop.eup %24047  ;;  %v6910_v10 = vmul.f32 %v24046_v22, %v29758_v59 }
 0x556   : > { %23210 = vmatmul.mubr.msk.f32.vlgmr.msra.gmra.mrb[74].mxu0 %vm317_vm0, %v6909_v40  ;;  %v6911_v60 = vmul.f32 %v24048_v16, %v29759_v36 }
 0x557   : > { %v3542_v44 = vrot.slane %v3534_v53, %v24670_v24  ;;  %v3549_v63 = vrot.slane %v3535_v37, %v24670_v24  ;;  %23219 = vmatprep.mubr.msk.f32.mxu0 %vm24316_vm2, %v29741_v32  ;;  %v24050_v12 = vpop.eup %24049 }
 0x558   : > { %v6912_v50 = vmul.f32 %v24050_v12, %v29760_v58 }
 0x559   : > { %v3550_v48 = vcombine.low %v3526_v49, %v3542_v44  ;;  %v3551_v15 = vcombine.high %v3526_v49, %v3542_v44  ;;  %v3566_v61 = vcombine.low %v3533_v20, %v3549_v63  ;;  %v3567_v7 = vcombine.high %v3533_v20, %v3549_v63 }
 0x55b   : > { %v3558_v0 = vrot.slane %v3550_v48, %v24681_v38  ;;  %v3565_v14 = vrot.slane %v3551_v15, %v24681_v38  ;;  %v3574_v41 = vrot.slane %v3566_v61, %v24681_v38  ;;  %v3581_v4 = vrot.slane %v3567_v7, %v24681_v38  ;;  %v24052_v55 = vpop.eup %24051 }
 0x55c   : > { %v6913_v13 = vmul.f32 %v24052_v55, %v29761_v8 }
 0x55d   : > { %v4062_v18 = vcombine.low %v3558_v0, %v3565_v14  ;;  %v22136_v54 = vcombine.high %v3558_v0, %v3565_v14  ;;  %v4078_v57 = vcombine.low %v3574_v41, %v3581_v4  ;;  %v22137_v52 = vcombine.high %v3574_v41, %v3581_v4 }
 0x55f   : > { %v4069_v27 = vrot.slane %v4062_v18, %v24670_v24  ;;  %v4077_v2 = vrot.slane %v22136_v54, %v24670_v24  ;;  %v4085_v19 = vrot.slane %v4078_v57, %v24670_v24  ;;  %v4093_v31 = vrot.slane %v22137_v52, %v24670_v24 }
 0x561   : > { %v4094_v39 = vcombine.low %v4069_v27, %v4077_v2  ;;  %v4110_v28 = vcombine.low %v4085_v19, %v4093_v31  ;;  %v4095_v62 = vcombine.high %v4069_v27, %v4077_v2  ;;  %v4111_v29 = vcombine.high %v4085_v19, %v4093_v31 }
 0x563   : > { %v4102_v46 = vrot.slane %v4094_v39, %v24681_v38  ;;  %v4118_v21 = vrot.slane %v4110_v28, %v24681_v38  ;;  %v4109_v23 = vrot.slane %v4095_v62, %v24681_v38  ;;  %v4125_v42 = vrot.slane %v4111_v29, %v24681_v38 }
 0x565   : > { %v4126_v34 = vcombine.low %v4102_v46, %v4118_v21  ;;  %v4127_v30 = vcombine.high %v4102_v46, %v4118_v21  ;;  %v4128_v47 = vcombine.low %v4109_v23, %v4125_v42  ;;  %v4129_v51 = vcombine.high %v4109_v23, %v4125_v42 }
 0x567   : > { %23213 = vmatpush3.msra.mxu1 %v4126_v34  ;;  %23218 = vmatpush3.msra.mxu0 %v4127_v30 }
 0x568   : > { %23215 = vmatmul.mubr.msk.f32.vlgmr.msra.gmra.mrb[60].mxu1 %vm317_vm0, %v6910_v10  ;;  %23220 = vmatmul.mubr.msk.f32.vlgmr.msra.gmra.mrb[76].mxu0 %vm317_vm0, %v6911_v60 }
 0x569   : > { %23222 = vmatprep.subr.mxu1 %v29741_v32  ;;  %23227 = vmatprep.subr.mxu0 %v29741_v32 }
 0x56a   : > { %23223 = vmatpush3.msra.mxu1 %v4128_v47  ;;  %23228 = vmatpush3.msra.mxu0 %v4129_v51 }
 0x56b   : > { %23224 = vmatprep.mubr.msk.f32.mxu1 %vm24316_vm2, %v29741_v32  ;;  %23229 = vmatprep.mubr.msk.f32.mxu0 %vm24316_vm2, %v29741_v32 }
 0x56c   : > { %23225 = vmatmul.mubr.msk.f32.vlgmr.msra.gmra.mrb[62].mxu1 %vm317_vm0, %v6912_v50  ;;  %23230 = vmatmul.mubr.msk.f32.vlgmr.msra.gmra.mrb[78].mxu0 %vm317_vm0, %v6913_v13 }
 0x5b6   : > { %v7056_v5 = vpop.f32.mrb[48].mxu0 }
 0x5b7   : > { %v23081_v3 = vpop.f32.mrb[49].mxu0 }
 0x5c0   : > { %v6983_v17 = vpop.f32.mrb[32].mxu1 }
 0x5c1   : > { %v23076_v1 = vpop.f32.mrb[33].mxu1 }
 0x5c6   : > { %v7202_v33 = vpop.f32.mrb[50].mxu0 }
 0x5c7   : > { %v9266_v25 = vcombine.low %v7056_v5, %v7202_v33  ;;  %v9267_v35 = vcombine.high %v7056_v5, %v7202_v33  ;;  %v23091_v56 = vpop.f32.mrb[51].mxu0  ;;  %v7129_v26 = vpop.f32.mrb[34].mxu1 }
 0x5c8   : > { %v9250_v45 = vcombine.low %v6983_v17, %v7129_v26  ;;  %v9251_v11 = vcombine.high %v6983_v17, %v7129_v26  ;;  %v23086_v9 = vpop.f32.mrb[35].mxu1 }
 0x5c9   : > { %v9274_v6 = vrot.slane %v9266_v25, %v24670_v24  ;;  %v9281_v43 = vrot.slane %v9267_v35, %v24670_v24 }
 0x5ca   : > { %v9258_v40 = vrot.slane %v9250_v45, %v24670_v24  ;;  %v9265_v53 = vrot.slane %v9251_v11, %v24670_v24  ;;  %v7348_v49 = vpop.f32.mrb[52].mxu0 }
 0x5cb   : > { %v7275_v37 = vpop.f32.mrb[36].mxu1  ;;  %v23101_v61 = vpop.f32.mrb[53].mxu0 }
 0x5cc   : > { %v9282_v20 = vcombine.low %v9258_v40, %v9274_v6  ;;  %v9283_v44 = vcombine.high %v9258_v40, %v9274_v6  ;;  %v9298_v63 = vcombine.low %v9265_v53, %v9281_v43  ;;  %v9299_v48 = vcombine.high %v9265_v53, %v9281_v43  ;;  %v23096_v15 = vpop.f32.mrb[37].mxu1  ;;  %v10460_v43 = vld [vmem:[%s29493_s5] sm:$0xff]  ;;  %v10461_v40 = vld [vmem:[%s29493_s5 + $0x8] sm:$0xff] }
 0x5ce   : > { %v9290_v7 = vrot.slane %v9282_v20, %v24681_v38  ;;  %v9297_v0 = vrot.slane %v9283_v44, %v24681_v38  ;;  %v9306_v14 = vrot.slane %v9298_v63, %v24681_v38  ;;  %v9313_v41 = vrot.slane %v9299_v48, %v24681_v38 }
 0x5cf   : > { %v7421_v4 = vpop.f32.mrb[38].mxu1 }
 0x5d0   : > { %v9794_v18 = vcombine.low %v9290_v7, %v9297_v0  ;;  %v22234_v54 = vcombine.high %v9290_v7, %v9297_v0  ;;  %v9810_v57 = vcombine.low %v9306_v14, %v9313_v41  ;;  %v22235_v52 = vcombine.high %v9306_v14, %v9313_v41  ;;  %v23106_v27 = vpop.f32.mrb[39].mxu1 }
 0x5d1   : > { %v9318_v2 = vcombine.low %v7275_v37, %v7421_v4  ;;  %v9319_v19 = vcombine.high %v7275_v37, %v7421_v4  ;;  %v10462_v4 = vld [vmem:[%s29493_s5 + $0x10] sm:$0xff] }
 0x5d2   : > { %v9801_v31 = vrot.slane %v9794_v18, %v24670_v24  ;;  %v9809_v22 = vrot.slane %v22234_v54, %v24670_v24  ;;  %v9817_v39 = vrot.slane %v9810_v57, %v24670_v24  ;;  %v9825_v28 = vrot.slane %v22235_v52, %v24670_v24  ;;  %v7494_v62 = vpop.f32.mrb[54].mxu0  ;;  %v10463_v18 = vld [vmem:[%s29493_s5 + $0x18] sm:$0xff] }
 0x5d3   : > { %v9326_v29 = vrot.slane %v9318_v2, %v24670_v24  ;;  %v9333_v16 = vrot.slane %v9319_v19, %v24670_v24  ;;  %v9334_v46 = vcombine.low %v7348_v49, %v7494_v62  ;;  %v9335_v21 = vcombine.high %v7348_v49, %v7494_v62  ;;  %v23111_v12 = vpop.f32.mrb[55].mxu0 }
 0x5d4   : > { %v7567_v23 = vpop.f32.mrb[40].mxu1  ;;  %v9826_v42 = vcombine.low %v9801_v31, %v9809_v22  ;;  %v9842_v34 = vcombine.low %v9817_v39, %v9825_v28  ;;  %v9827_v30 = vcombine.high %v9801_v31, %v9809_v22  ;;  %v9843_v55 = vcombine.high %v9817_v39, %v9825_v28 }
 0x5d5   : > { %v9342_v59 = vrot.slane %v9334_v46, %v24670_v24  ;;  %v9349_v10 = vrot.slane %v9335_v21, %v24670_v24  ;;  %v23116_v36 = vpop.f32.mrb[41].mxu1  ;;  %v23759_v49 = vpack.c.bf16 %v10461_v40, %v10460_v43  ;;  %v23763_v57 = vpack.c.bf16 %v10463_v18, %v10462_v4 }
 0x5d6   : > { %v7640_v60 = vpop.f32.mrb[56].mxu0  ;;  %v26422_v47 = vrot.slane %v9826_v42, %v24681_v38  ;;  %v26425_v51 = vrot.slane %v9842_v34, %v24681_v38  ;;  %v9841_v58 = vrot.slane %v9827_v30, %v24681_v38  ;;  %v9857_v50 = vrot.slane %v9843_v55, %v24681_v38 }
 0x5d7   : > { %v9350_v8 = vcombine.low %v9326_v29, %v9342_v59  ;;  %v9351_v13 = vcombine.high %v9326_v29, %v9342_v59  ;;  %v9366_v5 = vcombine.low %v9333_v16, %v9349_v10  ;;  %v9367_v3 = vcombine.high %v9333_v16, %v9349_v10  ;;  %v23121_v17 = vpop.f32.mrb[57].mxu0  ;;  %23760 = vmatprep.subr.bf16.mxu1 %v23759_v49 }
 0x5d8   : > { %v7713_v1 = vpop.f32.mrb[42].mxu1  ;;  %v9859_v33 = vcombine.high %v26422_v47, %v26425_v51  ;;  %v9860_v25 = vcombine.low %v9841_v58, %v9857_v50  ;;  %v9861_v35 = vcombine.high %v9841_v58, %v9857_v50  ;;  %v9858_v56 = vcombine.low %v26422_v47, %v26425_v51  ;;  %23762 = vmatpush3.bf16.msra.mxu1 %v23759_v49 }
 0x5d9   : > { %v9358_v26 = vrot.slane %v9350_v8, %v24681_v38  ;;  %v9365_v45 = vrot.slane %v9351_v13, %v24681_v38  ;;  %v9374_v11 = vrot.slane %v9366_v5, %v24681_v38  ;;  %v9381_v9 = vrot.slane %v9367_v3, %v24681_v38  ;;  %v23126_v6 = vpop.f32.mrb[43].mxu1  ;;  %23764 = vmatprep.subr.bf16.mxu1 %v23763_v57 }
 0x5da   : > { %v9386_v53 = vcombine.low %v7567_v23, %v7713_v1  ;;  %v9387_v37 = vcombine.high %v7567_v23, %v7713_v1  ;;  %10346 = vrot.lane.b32.xlu0 %v9859_v33, %s29569_s19 }
 0x5db   : > { %v9862_v20 = vcombine.low %v9358_v26, %v9365_v45  ;;  %v22236_v44 = vcombine.high %v9358_v26, %v9365_v45  ;;  %v9878_v63 = vcombine.low %v9374_v11, %v9381_v9  ;;  %v22237_v48 = vcombine.high %v9374_v11, %v9381_v9 }
 0x5dc   : > { %v26444_v15 = vpop.f32.mrb[44].mxu1  ;;  %v9394_v22 = vrot.slane %v9386_v53, %v24670_v24  ;;  %v9401_v39 = vrot.slane %v9387_v37, %v24670_v24  ;;  %23766 = vmatpush3.bf16.msra.mxu1 %v23763_v57 }
 0x5dd   : > { %v9869_v61 = vrot.slane %v9862_v20, %v24670_v24  ;;  %v9877_v7 = vrot.slane %v22236_v44, %v24670_v24  ;;  %v9885_v0 = vrot.slane %v9878_v63, %v24670_v24  ;;  %v9893_v14 = vrot.slane %v22237_v48, %v24670_v24  ;;  %v23136_v41 = vpop.f32.mrb[45].mxu1 }
 0x5de   : > { %v7786_v54 = vpop.f32.mrb[58].mxu0  ;;  %10378 = vrot.lane.b32.xlu0 %v9860_v25, %s29567_s13 }
 0x5df   : > { %v9402_v52 = vcombine.low %v7640_v60, %v7786_v54  ;;  %v9403_v27 = vcombine.high %v7640_v60, %v7786_v54  ;;  %v23131_v2 = vpop.f32.mrb[59].mxu0  ;;  %v9894_v19 = vcombine.low %v9869_v61, %v9877_v7  ;;  %v9910_v31 = vcombine.low %v9885_v0, %v9893_v14 }
 0x5e0   : > { %v9895_v28 = vcombine.high %v9869_v61, %v9877_v7  ;;  %v9911_v62 = vcombine.high %v9885_v0, %v9893_v14 }
 0x5e1   : > { %v9410_v29 = vrot.slane %v9402_v52, %v24670_v24  ;;  %v9417_v16 = vrot.slane %v9403_v27, %v24670_v24  ;;  %v26462_v46 = vrot.slane %v9894_v19, %v24681_v38  ;;  %v26465_v21 = vrot.slane %v9910_v31, %v24681_v38 }
 0x5e2   : > { %v7932_v12 = vpop.f32.mrb[60].mxu0  ;;  %v8005_v23 = vpop.f32.mrb[46].mxu1  ;;  %10410 = vrot.lane.b32.xlu0 %v9861_v35, %s29565_s17  ;;  %v9909_v42 = vrot.slane %v9895_v28, %v24681_v38  ;;  %v9925_v34 = vrot.slane %v9911_v62, %v24681_v38 }
 0x5e3   : > { %v9418_v30 = vcombine.low %v9394_v22, %v9410_v29  ;;  %v9419_v55 = vcombine.high %v9394_v22, %v9410_v29  ;;  %v9434_v59 = vcombine.low %v9401_v39, %v9417_v16  ;;  %v9435_v10 = vcombine.high %v9401_v39, %v9417_v16  ;;  %v23141_v36 = vpop.f32.mrb[61].mxu0  ;;  %v23146_v60 = vpop.f32.mrb[47].mxu1 }
 0x5e4   : > { %v9454_v58 = vcombine.low %v26444_v15, %v8005_v23  ;;  %v9455_v50 = vcombine.high %v26444_v15, %v8005_v23  ;;  %v9927_v8 = vcombine.high %v26462_v46, %v26465_v21  ;;  %v9928_v13 = vcombine.low %v9909_v42, %v9925_v34 }
 0x5e5   : > { %v9426_v5 = vrot.slane %v9418_v30, %v24681_v38  ;;  %v9433_v3 = vrot.slane %v9419_v55, %v24681_v38  ;;  %v9442_v17 = vrot.slane %v9434_v59, %v24681_v38  ;;  %v9449_v1 = vrot.slane %v9435_v10, %v24681_v38 }
 0x5e6   : > { %10348 = vrot.lane.b32.xlu1 %v9927_v8, %s29569_s19  ;;  %v26479_v33 = vpop.f32.mrb[48].mxu1  ;;  %v9929_v25 = vcombine.high %v9909_v42, %v9925_v34  ;;  %v9926_v35 = vcombine.low %v26462_v46, %v26465_v21  ;;  %v9462_v61 = vrot.slane %v9454_v58, %v24670_v24  ;;  %v9469_v7 = vrot.slane %v9455_v50, %v24670_v24 }
 0x5e7   : > { %v9930_v26 = vcombine.low %v9426_v5, %v9433_v3  ;;  %v22238_v45 = vcombine.high %v9426_v5, %v9433_v3  ;;  %v9946_v11 = vcombine.low %v9442_v17, %v9449_v1  ;;  %v22239_v9 = vcombine.high %v9442_v17, %v9449_v1  ;;  %v23156_v6 = vpop.f32.mrb[49].mxu1 }
 0x5e9   : > { %v9937_v43 = vrot.slane %v9930_v26, %v24670_v24  ;;  %v9945_v40 = vrot.slane %v22238_v45, %v24670_v24  ;;  %v9953_v53 = vrot.slane %v9946_v11, %v24670_v24  ;;  %v9961_v37 = vrot.slane %v22239_v9, %v24670_v24 }
 0x5ea   : > { %v8078_v49 = vpop.f32.mrb[62].mxu0  ;;  %10380 = vrot.lane.b32.xlu1 %v9928_v13, %s29567_s13 }
 0x5eb   : > { %v9470_v20 = vcombine.low %v7932_v12, %v8078_v49  ;;  %v9471_v44 = vcombine.high %v7932_v12, %v8078_v49  ;;  %v23151_v63 = vpop.f32.mrb[63].mxu0  ;;  %v9962_v48 = vcombine.low %v9937_v43, %v9945_v40  ;;  %v9978_v15 = vcombine.low %v9953_v53, %v9961_v37 }
 0x5ec   : > { %v9963_v0 = vcombine.high %v9937_v43, %v9945_v40  ;;  %v9979_v14 = vcombine.high %v9953_v53, %v9961_v37 }
 0x5ed   : > { %v9478_v41 = vrot.slane %v9470_v20, %v24670_v24  ;;  %v9485_v4 = vrot.slane %v9471_v44, %v24670_v24  ;;  %v26493_v18 = vrot.slane %v9962_v48, %v24681_v38  ;;  %v26496_v54 = vrot.slane %v9978_v15, %v24681_v38 }
 0x5ee   : > { %v8224_v57 = vpop.f32.mrb[64].mxu0  ;;  %10412 = vrot.lane.b32.xlu1 %v9929_v25, %s29565_s17  ;;  %v9977_v52 = vrot.slane %v9963_v0, %v24681_v38  ;;  %v9993_v27 = vrot.slane %v9979_v14, %v24681_v38  ;;  %v8297_v39 = vpop.f32.mrb[50].mxu1 }
 0x5ef   : > { %v9486_v2 = vcombine.low %v9462_v61, %v9478_v41  ;;  %v9487_v19 = vcombine.high %v9462_v61, %v9478_v41  ;;  %v9502_v31 = vcombine.low %v9469_v7, %v9485_v4  ;;  %v9503_v22 = vcombine.high %v9469_v7, %v9485_v4  ;;  %v23161_v28 = vpop.f32.mrb[65].mxu0  ;;  %v23166_v16 = vpop.f32.mrb[51].mxu1 }
 0x5f0   : > { %v9522_v62 = vcombine.low %v26479_v33, %v8297_v39  ;;  %v9523_v29 = vcombine.high %v26479_v33, %v8297_v39  ;;  %v9995_v12 = vcombine.high %v26493_v18, %v26496_v54  ;;  %v9996_v23 = vcombine.low %v9977_v52, %v9993_v27 }
 0x5f1   : > { %v9494_v42 = vrot.slane %v9486_v2, %v24681_v38  ;;  %v9501_v34 = vrot.slane %v9487_v19, %v24681_v38  ;;  %v9510_v30 = vrot.slane %v9502_v31, %v24681_v38  ;;  %v9517_v55 = vrot.slane %v9503_v22, %v24681_v38 }
 0x5f2   : > { %10350 = vrot.lane.b32.xlu0 %v9995_v12, %s29569_s19  ;;  %v9997_v59 = vcombine.high %v9977_v52, %v9993_v27  ;;  %v9994_v10 = vcombine.low %v26493_v18, %v26496_v54  ;;  %v8443_v8 = vpop.f32.mrb[52].mxu1  ;;  %v9530_v6 = vrot.slane %v9522_v62, %v24670_v24  ;;  %v9537_v43 = vrot.slane %v9523_v29, %v24670_v24 }
 0x5f3   : > { %v9998_v36 = vcombine.low %v9494_v42, %v9501_v34  ;;  %v22240_v60 = vcombine.high %v9494_v42, %v9501_v34  ;;  %v10014_v58 = vcombine.low %v9510_v30, %v9517_v55  ;;  %v22241_v50 = vcombine.high %v9510_v30, %v9517_v55  ;;  %v23176_v13 = vpop.f32.mrb[53].mxu1 }
 0x5f5   : > { %v10005_v5 = vrot.slane %v9998_v36, %v24670_v24  ;;  %v10013_v3 = vrot.slane %v22240_v60, %v24670_v24  ;;  %v10021_v17 = vrot.slane %v10014_v58, %v24670_v24  ;;  %v10029_v1 = vrot.slane %v22241_v50, %v24670_v24 }
 0x5f6   : > { %10382 = vrot.lane.b32.xlu0 %v9996_v23, %s29567_s13  ;;  %v8370_v33 = vpop.f32.mrb[66].mxu0 }
 0x5f7   : > { %v9538_v25 = vcombine.low %v8224_v57, %v8370_v33  ;;  %v9539_v26 = vcombine.high %v8224_v57, %v8370_v33  ;;  %v23171_v45 = vpop.f32.mrb[67].mxu0  ;;  %v10030_v11 = vcombine.low %v10005_v5, %v10013_v3  ;;  %v10046_v9 = vcombine.low %v10021_v17, %v10029_v1 }
 0x5f8   : > { %v10031_v40 = vcombine.high %v10005_v5, %v10013_v3  ;;  %v10047_v53 = vcombine.high %v10021_v17, %v10029_v1 }
 0x5f9   : > { %v9546_v37 = vrot.slane %v9538_v25, %v24670_v24  ;;  %v9553_v49 = vrot.slane %v9539_v26, %v24670_v24  ;;  %v26522_v20 = vrot.slane %v10030_v11, %v24681_v38  ;;  %v26525_v44 = vrot.slane %v10046_v9, %v24681_v38 }
 0x5fa   : > { %10414 = vrot.lane.b32.xlu0 %v9997_v59, %s29565_s17  ;;  %v8516_v63 = vpop.f32.mrb[68].mxu0  ;;  %v8589_v48 = vpop.f32.mrb[54].mxu1  ;;  %v10045_v15 = vrot.slane %v10031_v40, %v24681_v38  ;;  %v10061_v61 = vrot.slane %v10047_v53, %v24681_v38 }
 0x5fb   : > { %v9554_v7 = vcombine.low %v9530_v6, %v9546_v37  ;;  %v9555_v0 = vcombine.high %v9530_v6, %v9546_v37  ;;  %v9570_v14 = vcombine.low %v9537_v43, %v9553_v49  ;;  %v9571_v41 = vcombine.high %v9537_v43, %v9553_v49  ;;  %v23181_v4 = vpop.f32.mrb[69].mxu0  ;;  %v23186_v57 = vpop.f32.mrb[55].mxu1 }
 0x5fc   : > { %v9590_v52 = vcombine.low %v8443_v8, %v8589_v48  ;;  %v9591_v27 = vcombine.high %v8443_v8, %v8589_v48  ;;  %v10063_v2 = vcombine.high %v26522_v20, %v26525_v44  ;;  %v10064_v19 = vcombine.low %v10045_v15, %v10061_v61 }
 0x5fd   : > { %v9562_v31 = vrot.slane %v9554_v7, %v24681_v38  ;;  %v9569_v22 = vrot.slane %v9555_v0, %v24681_v38  ;;  %v9578_v39 = vrot.slane %v9570_v14, %v24681_v38  ;;  %v9585_v28 = vrot.slane %v9571_v41, %v24681_v38 }
 0x5fe   : > { %10352 = vrot.lane.b32.xlu1 %v10063_v2, %s29569_s19  ;;  %v26537_v62 = vpop.f32.mrb[56].mxu1  ;;  %v10065_v29 = vcombine.high %v10045_v15, %v10061_v61  ;;  %v10062_v16 = vcombine.low %v26522_v20, %v26525_v44  ;;  %v9598_v17 = vrot.slane %v9590_v52, %v24670_v24  ;;  %v9605_v1 = vrot.slane %v9591_v27, %v24670_v24 }
 0x5ff   : > { %v10066_v12 = vcombine.low %v9562_v31, %v9569_v22  ;;  %v22242_v23 = vcombine.high %v9562_v31, %v9569_v22  ;;  %v10082_v42 = vcombine.low %v9578_v39, %v9585_v28  ;;  %v22243_v34 = vcombine.high %v9578_v39, %v9585_v28  ;;  %v23196_v30 = vpop.f32.mrb[57].mxu1 }
 0x601   : > { %v10073_v55 = vrot.slane %v10066_v12, %v24670_v24  ;;  %v10081_v59 = vrot.slane %v22242_v23, %v24670_v24  ;;  %v10089_v36 = vrot.slane %v10082_v42, %v24670_v24  ;;  %v10097_v60 = vrot.slane %v22243_v34, %v24670_v24 }
 0x602   : > { %10384 = vrot.lane.b32.xlu1 %v10064_v19, %s29567_s13  ;;  %v8662_v58 = vpop.f32.mrb[70].mxu0 }
 0x603   : > { %v9606_v50 = vcombine.low %v8516_v63, %v8662_v58  ;;  %v9607_v8 = vcombine.high %v8516_v63, %v8662_v58  ;;  %v23191_v13 = vpop.f32.mrb[71].mxu0  ;;  %v10098_v5 = vcombine.low %v10073_v55, %v10081_v59  ;;  %v10114_v3 = vcombine.low %v10089_v36, %v10097_v60 }
 0x604   : > { %v10099_v33 = vcombine.high %v10073_v55, %v10081_v59  ;;  %v10115_v25 = vcombine.high %v10089_v36, %v10097_v60 }
 0x605   : > { %v9614_v26 = vrot.slane %v9606_v50, %v24670_v24  ;;  %v9621_v45 = vrot.slane %v9607_v8, %v24670_v24  ;;  %v26551_v11 = vrot.slane %v10098_v5, %v24681_v38  ;;  %v26554_v9 = vrot.slane %v10114_v3, %v24681_v38 }
 0x606   : > { %10416 = vrot.lane.b32.xlu1 %v10065_v29, %s29565_s17  ;;  %v8808_v6 = vpop.f32.mrb[72].mxu0  ;;  %v8881_v43 = vpop.f32.mrb[58].mxu1  ;;  %v10113_v40 = vrot.slane %v10099_v33, %v24681_v38  ;;  %v10129_v53 = vrot.slane %v10115_v25, %v24681_v38 }
 0x607   : > { %v9622_v37 = vcombine.low %v9598_v17, %v9614_v26  ;;  %v9623_v49 = vcombine.high %v9598_v17, %v9614_v26  ;;  %v9638_v63 = vcombine.low %v9605_v1, %v9621_v45  ;;  %v9639_v48 = vcombine.high %v9605_v1, %v9621_v45  ;;  %v23201_v15 = vpop.f32.mrb[73].mxu0  ;;  %v23206_v61 = vpop.f32.mrb[59].mxu1 }
 0x608   : > { %v9658_v7 = vcombine.low %v26537_v62, %v8881_v43  ;;  %v9659_v0 = vcombine.high %v26537_v62, %v8881_v43  ;;  %v10131_v14 = vcombine.high %v26551_v11, %v26554_v9  ;;  %v10132_v41 = vcombine.low %v10113_v40, %v10129_v53 }
 0x609   : > { %v9630_v4 = vrot.slane %v9622_v37, %v24681_v38  ;;  %v9637_v57 = vrot.slane %v9623_v49, %v24681_v38  ;;  %v9646_v52 = vrot.slane %v9638_v63, %v24681_v38  ;;  %v9653_v27 = vrot.slane %v9639_v48, %v24681_v38 }
 0x60a   : > { %10354 = vrot.lane.b32.xlu0 %v10131_v14, %s29569_s19  ;;  %v10133_v2 = vcombine.high %v10113_v40, %v10129_v53  ;;  %v10130_v19 = vcombine.low %v26551_v11, %v26554_v9  ;;  %v9666_v25 = vrot.slane %v9658_v7, %v24670_v24  ;;  %v9673_v26 = vrot.slane %v9659_v0, %v24670_v24 }
 0x60b   : > { %v10134_v31 = vcombine.low %v9630_v4, %v9637_v57  ;;  %v22244_v22 = vcombine.high %v9630_v4, %v9637_v57  ;;  %v10150_v39 = vcombine.low %v9646_v52, %v9653_v27  ;;  %v22245_v28 = vcombine.high %v9646_v52, %v9653_v27 }
 0x60d   : > { %v10141_v62 = vrot.slane %v10134_v31, %v24670_v24  ;;  %v10149_v29 = vrot.slane %v22244_v22, %v24670_v24  ;;  %v10157_v12 = vrot.slane %v10150_v39, %v24670_v24  ;;  %v10165_v23 = vrot.slane %v22245_v28, %v24670_v24 }
 0x60e   : > { %10386 = vrot.lane.b32.xlu0 %v10132_v41, %s29567_s13 }
 0x60f   : > { %v10166_v42 = vcombine.low %v10141_v62, %v10149_v29  ;;  %v10182_v34 = vcombine.low %v10157_v12, %v10165_v23  ;;  %v10167_v30 = vcombine.high %v10141_v62, %v10149_v29  ;;  %v10183_v55 = vcombine.high %v10157_v12, %v10165_v23 }
 0x611   : > { %v26576_v59 = vrot.slane %v10166_v42, %v24681_v38  ;;  %v26579_v36 = vrot.slane %v10182_v34, %v24681_v38  ;;  %v10181_v60 = vrot.slane %v10167_v30, %v24681_v38  ;;  %v10197_v58 = vrot.slane %v10183_v55, %v24681_v38 }
 0x612   : > { %10418 = vrot.lane.b32.xlu0 %v10133_v2, %s29565_s17 }
 0x613   : > { %v10199_v50 = vcombine.high %v26576_v59, %v26579_v36  ;;  %v10200_v8 = vcombine.low %v10181_v60, %v10197_v58  ;;  %v10201_v13 = vcombine.high %v10181_v60, %v10197_v58  ;;  %v10198_v5 = vcombine.low %v26576_v59, %v26579_v36 }
 0x615   : > { %10356 = vrot.lane.b32.xlu1 %v10199_v50, %s29569_s19 }
 0x619   : > { %10388 = vrot.lane.b32.xlu1 %v10200_v8, %s29567_s13 }
 0x61d   : > { %10420 = vrot.lane.b32.xlu1 %v10201_v13, %s29565_s17 }
 0x629   : > { %v8954_v3 = vpop.f32.mrb[74].mxu0 }
 0x62a   : > { %v9674_v17 = vcombine.low %v8808_v6, %v8954_v3  ;;  %v9675_v1 = vcombine.high %v8808_v6, %v8954_v3  ;;  %v23211_v33 = vpop.f32.mrb[75].mxu0 }
 0x62c   : > { %v9682_v45 = vrot.slane %v9674_v17, %v24670_v24  ;;  %v9689_v43 = vrot.slane %v9675_v1, %v24670_v24 }
 0x62e   : > { %v9690_v40 = vcombine.low %v9666_v25, %v9682_v45  ;;  %v9691_v53 = vcombine.high %v9666_v25, %v9682_v45  ;;  %v9706_v37 = vcombine.low %v9673_v26, %v9689_v43  ;;  %v9707_v49 = vcombine.high %v9673_v26, %v9689_v43 }
 0x630   : > { %v9698_v63 = vrot.slane %v9690_v40, %v24681_v38  ;;  %v9705_v48 = vrot.slane %v9691_v53, %v24681_v38  ;;  %v9714_v15 = vrot.slane %v9706_v37, %v24681_v38  ;;  %v9721_v6 = vrot.slane %v9707_v49, %v24681_v38 }
 0x632   : > { %v10202_v61 = vcombine.low %v9698_v63, %v9705_v48  ;;  %v22246_v7 = vcombine.high %v9698_v63, %v9705_v48  ;;  %v10218_v14 = vcombine.low %v9714_v15, %v9721_v6  ;;  %v22247_v0 = vcombine.high %v9714_v15, %v9721_v6 }
 0x634   : > { %v10209_v41 = vrot.slane %v10202_v61, %v24670_v24  ;;  %v10217_v4 = vrot.slane %v22246_v7, %v24670_v24  ;;  %v10225_v57 = vrot.slane %v10218_v14, %v24670_v24  ;;  %v10233_v52 = vrot.slane %v22247_v0, %v24670_v24 }
 0x636   : > { %v10234_v27 = vcombine.low %v10209_v41, %v10217_v4  ;;  %v10250_v2 = vcombine.low %v10225_v57, %v10233_v52  ;;  %v10235_v31 = vcombine.high %v10209_v41, %v10217_v4  ;;  %v10251_v22 = vcombine.high %v10225_v57, %v10233_v52 }
 0x638   : > { %v26604_v39 = vrot.slane %v10234_v27, %v24681_v38  ;;  %v26607_v28 = vrot.slane %v10250_v2, %v24681_v38  ;;  %v10249_v62 = vrot.slane %v10235_v31, %v24681_v38  ;;  %v10265_v29 = vrot.slane %v10251_v22, %v24681_v38 }
 0x63a   : > { %v10267_v12 = vcombine.high %v26604_v39, %v26607_v28  ;;  %v10268_v23 = vcombine.low %v10249_v62, %v10265_v29  ;;  %v10269_v42 = vcombine.high %v10249_v62, %v10265_v29  ;;  %v10266_v34 = vcombine.low %v26604_v39, %v26607_v28  ;;  %v26701_v39 = vld [vmem:[%s29491_s3] sm:$0xff]  ;;  %v29762_v28 = vld [vmem:[#allocation14_spill] sm:$0xff] }
 0x63b   : > { %v9027_v30 = vpop.f32.mrb[60].mxu1  ;;  %v9100_v55 = vpop.f32.mrb[76].mxu0 }
 0x63c   : > { %10358 = vrot.lane.b32.xlu0 %v10267_v12, %s29569_s19  ;;  %v23216_v60 = vpop.f32.mrb[61].mxu1  ;;  %v23221_v58 = vpop.f32.mrb[77].mxu0 }
 0x63f   : > { %v9173_v50 = vpop.f32.mrb[62].mxu1  ;;  %v9246_v8 = vpop.f32.mrb[78].mxu0 }
 0x640   : > { %v9726_v13 = vcombine.low %v9027_v30, %v9173_v50  ;;  %v9727_v3 = vcombine.high %v9027_v30, %v9173_v50  ;;  %v9742_v17 = vcombine.low %v9100_v55, %v9246_v8  ;;  %v9743_v1 = vcombine.high %v9100_v55, %v9246_v8  ;;  %10390 = vrot.lane.b32.xlu0 %v10268_v23, %s29567_s13  ;;  %v23226_v33 = vpop.f32.mrb[63].mxu1  ;;  %v23231_v25 = vpop.f32.mrb[79].mxu0 }
 0x642   : > { %v9734_v26 = vrot.slane %v9726_v13, %v24670_v24  ;;  %v9741_v45 = vrot.slane %v9727_v3, %v24670_v24  ;;  %v9750_v43 = vrot.slane %v9742_v17, %v24670_v24  ;;  %v9757_v40 = vrot.slane %v9743_v1, %v24670_v24 }
 0x644   : > { %v9758_v53 = vcombine.low %v9734_v26, %v9750_v43  ;;  %v9759_v37 = vcombine.high %v9734_v26, %v9750_v43  ;;  %v9774_v49 = vcombine.low %v9741_v45, %v9757_v40  ;;  %v9775_v63 = vcombine.high %v9741_v45, %v9757_v40  ;;  %10422 = vrot.lane.b32.xlu0 %v10269_v42, %s29565_s17 }
 0x646   : > { %v9766_v48 = vrot.slane %v9758_v53, %v24681_v38  ;;  %v9773_v15 = vrot.slane %v9759_v37, %v24681_v38  ;;  %v9782_v6 = vrot.slane %v9774_v49, %v24681_v38  ;;  %v9789_v61 = vrot.slane %v9775_v63, %v24681_v38 }
 0x648   : > { %v10270_v7 = vcombine.low %v9766_v48, %v9773_v15  ;;  %v22248_v14 = vcombine.high %v9766_v48, %v9773_v15  ;;  %v10286_v0 = vcombine.low %v9782_v6, %v9789_v61  ;;  %v22249_v41 = vcombine.high %v9782_v6, %v9789_v61 }
 0x64a   : > { %v10277_v4 = vrot.slane %v10270_v7, %v24670_v24  ;;  %v10285_v57 = vrot.slane %v22248_v14, %v24670_v24  ;;  %v10293_v52 = vrot.slane %v10286_v0, %v24670_v24  ;;  %v10301_v27 = vrot.slane %v22249_v41, %v24670_v24 }
 0x64c   : > { %v10347_v2 = vpop.permute.xlu0 %10346  ;;  %v10302_v31 = vcombine.low %v10277_v4, %v10285_v57  ;;  %v10318_v22 = vcombine.low %v10293_v52, %v10301_v27  ;;  %v10303_v62 = vcombine.high %v10277_v4, %v10285_v57  ;;  %v10319_v29 = vcombine.high %v10293_v52, %v10301_v27 }
 0x64d   : > { %v10434_v13 = vsel %vm317_vm0, %v9858_v56, %v10347_v2 }
 0x64e   : > { %v26631_v23 = vrot.slane %v10302_v31, %v24681_v38  ;;  %v26634_v42 = vrot.slane %v10318_v22, %v24681_v38  ;;  %v10317_v30 = vrot.slane %v10303_v62, %v24681_v38  ;;  %v10333_v55 = vrot.slane %v10319_v29, %v24681_v38 }
 0x650   : > { %v10379_v12 = vpop.permute.xlu0 %10378  ;;  %v10335_v60 = vcombine.high %v26631_v23, %v26634_v42  ;;  %v10336_v58 = vcombine.low %v10317_v30, %v10333_v55  ;;  %v10337_v50 = vcombine.high %v10317_v30, %v10333_v55  ;;  %v10334_v8 = vcombine.low %v26631_v23, %v26634_v42  ;;  %v29763_v23 = vld [vmem:[#allocation6_spill] sm:$0xff]  ;;  %v29764_v30 = vld [vmem:[#allocation5_spill] sm:$0xff] }
 0x651   : > { %v10443_v3 = vsel %vm10442_vm3, %v10434_v13, %v10379_v12 }
 0x652   : > { %10360 = vrot.lane.b32.xlu1 %v10335_v60, %s29569_s19  ;;  %s29871_s19 = smov 16  }
 0x654   : > { %v10411_v17 = vpop.permute.xlu0 %10410 }
 0x655   : > { %v10452_v1 = vsel %vm10451_vm4, %v10443_v3, %v10411_v17  ;;  %v29765_v17 = vld [vmem:[#allocation8_spill] sm:$0xff] }
 0x656   : > { %23240 = vmatprep.mubr.msk.f32.mxu1 %vm464_vm1, %v10452_v1  ;;  %10392 = vrot.lane.b32.xlu1 %v10336_v58, %s29567_s13  ;;  %s29872_s13 = smov 24  }
 0x658   : > { %v10349_v33 = vpop.permute.xlu1 %10348 }
 0x659   : > { %v10435_v47 = vsel %vm317_vm0, %v9926_v35, %v10349_v33  ;;  %v29766_v33 = vld [vmem:[#allocation7_spill] sm:$0xff] }
 0x65a   : > { %10424 = vrot.lane.b32.xlu1 %v10337_v50, %s29565_s17  ;;  %s29785_s17 = smov 96  }
 0x65c   : > { %v10381_v25 = vpop.permute.xlu1 %10380 }
 0x65d   : > { %v10444_v51 = vsel %vm10442_vm3, %v10435_v47, %v10381_v25 }
 0x660   : > { %v10413_v56 = vpop.permute.xlu1 %10412 }
 0x661   : > { %v10453_v26 = vsel %vm10451_vm4, %v10444_v51, %v10413_v56 }
 0x662   : > { %23241 = vmatmul.mubr.msk.f32.vlgmr.msra.gmra.mrb[64].mxu1 %vm464_vm1, %v10453_v26 }
 0x664   : > { %v10351_v45 = vpop.permute.xlu0 %10350 }
 0x665   : > { %v10436_v40 = vsel %vm317_vm0, %v9994_v10, %v10351_v45 }
 0x668   : > { %v10383_v43 = vpop.permute.xlu0 %10382 }
 0x669   : > { %v10445_v53 = vsel %vm10442_vm3, %v10436_v40, %v10383_v43  ;;  %v29767_v40 = vld [vmem:[#allocation9_spill] sm:$0xff] }
 0x66c   : > { %v10415_v37 = vpop.permute.xlu0 %10414 }
 0x66d   : > { %v10454_v46 = vsel %vm10451_vm4, %v10445_v53, %v10415_v37  ;;  %v29768_v37 = vld [vmem:[#allocation10_spill] sm:$0xff] }
 0x66e   : > { %23243 = vmatprep.mubr.msk.f32.mxu1 %vm464_vm1, %v10454_v46 }
 0x670   : > { %v10353_v21 = vpop.permute.xlu1 %10352 }
 0x671   : > { %v10437_v49 = vsel %vm317_vm0, %v10062_v16, %v10353_v21 }
 0x674   : > { %v10385_v35 = vpop.permute.xlu1 %10384 }
 0x675   : > { %v10446_v63 = vsel %vm10442_vm3, %v10437_v49, %v10385_v35 }
 0x678   : > { %v10417_v48 = vpop.permute.xlu1 %10416 }
 0x679   : > { %v10455_v18 = vsel %vm10451_vm4, %v10446_v63, %v10417_v48 }
 0x67a   : > { %23244 = vmatmul.mubr.msk.f32.gmra.mrb[66].mxu1 %vm464_vm1, %v10455_v18 }
 0x67c   : > { %v10355_v54 = vpop.permute.xlu0 %10354 }
 0x67d   : > { %v10438_v15 = vsel %vm317_vm0, %v10130_v19, %v10355_v54  ;;  %v29769_v54 = vld [vmem:[#allocation11_spill] sm:$0xff] }
 0x680   : > { %v10387_v10 = vpop.permute.xlu0 %10386 }
 0x681   : > { %v10447_v6 = vsel %vm10442_vm3, %v10438_v15, %v10387_v10  ;;  %v29770_v15 = vld [vmem:[#allocation12_spill] sm:$0xff] }
 0x684   : > { %v10419_v61 = vpop.permute.xlu0 %10418 }
 0x685   : > { %v10456_v20 = vsel %vm10451_vm4, %v10447_v6, %v10419_v61 }
 0x686   : > { %23246 = vmatprep.mubr.msk.f32.mxu1 %vm464_vm1, %v10456_v20 }
 0x687   : > { %v10357_v44 = vpop.permute.xlu1 %10356 }
 0x688   : > { %v10439_v7 = vsel %vm317_vm0, %v10198_v5, %v10357_v44 }
 0x68b   : > { %v10389_v16 = vpop.permute.xlu1 %10388 }
 0x68c   : > { %v10448_v14 = vsel %vm10442_vm3, %v10439_v7, %v10389_v16 }
 0x68f   : > { %v10421_v0 = vpop.permute.xlu1 %10420 }
 0x690   : > { %v10457_v11 = vsel %vm10451_vm4, %v10448_v14, %v10421_v0 }
 0x691   : > { %23247 = vmatmul.mubr.msk.f32.gmra.mrb[68].mxu1 %vm464_vm1, %v10457_v11 }
 0x6ae   : > { %v10359_v9 = vpop.permute.xlu0 %10358 }
 0x6af   : > { %v10440_v41 = vsel %vm317_vm0, %v10266_v34, %v10359_v9  ;;  %v10467_v34 = vrot.slane %v26701_v39, %v29762_v28 }
 0x6b2   : > { %v10391_v19 = vpop.permute.xlu0 %10390 }
 0x6b3   : > { %v10449_v4 = vsel %vm10442_vm3, %v10440_v41, %v10391_v19 }
 0x6b6   : > { %v10423_v57 = vpop.permute.xlu0 %10422 }
 0x6b7   : > { %v10458_v59 = vsel %vm10451_vm4, %v10449_v4, %v10423_v57 }
 0x6b8   : > { %23249 = vmatprep.mubr.msk.f32.mxu1 %vm464_vm1, %v10458_v59 }
 0x6c4   : > { %v10361_v36 = vpop.permute.xlu1 %10360 }
 0x6c5   : > { %v10441_v52 = vsel %vm317_vm0, %v10334_v8, %v10361_v36 }
 0x6c8   : > { %v10393_v5 = vpop.permute.xlu1 %10392 }
 0x6c9   : > { %v10450_v27 = vsel %vm10442_vm3, %v10441_v52, %v10393_v5 }
 0x6cc   : > { %v10425_v2 = vpop.permute.xlu1 %10424 }
 0x6cd   : > { %v10459_v31 = vsel %vm10451_vm4, %v10450_v27, %v10425_v2 }
 0x6ce   : > { %23250 = vmatmul.mubr.msk.f32.gmra.mrb[70].mxu1 %vm464_vm1, %v10459_v31 }
 0x735   : > { %v23242_v22 = vpop.f32.mrb[64].mxu1 }
 0x736   : > { %v10564_v62 = vadd.f32 %v23242_v22, %v10467_v34  ;;  %v10558_v29 = vpop.f32.mrb[65].mxu1 }
 0x737   : > { %v10559_v12 = vadd.f32 %v10558_v29, %v10467_v34  ;;  %v10735_v29 = vld [vmem:[%s29494_s6 + $0x8] sm:$0xff] }
 0x738   : > { %v10598_v42 = vadd.f32 %v10564_v62, %v29763_v23  ;;  %v10734_v62 = vld [vmem:[%s29494_s6] sm:$0xff] }
 0x739   : > { %v10597_v55 = vadd.f32 %v10559_v12, %v29764_v30  ;;  %v10736_v12 = vld [vmem:[%s29494_s6 + $0x10] sm:$0xff]  ;;  %v23767_v23 = vpack.c.bf16 %v10735_v29, %v10734_v62 }
 0x73a   : > { %v10608_v60 = vsel %vm464_vm1, %v10598_v42, 0.0 }
 0x73b   : > { %10609 = vadd.xlane.f32.xlu1 %v10608_v60  ;;  %v10605_v58 = vsel %vm464_vm1, %v10597_v55, 0.0  ;;  %23768 = vmatprep.subr.bf16.mxu0 %v23767_v23 }
 0x73c   : > { %10606 = vadd.xlane.f32.xlu0 %v10605_v58  ;;  %23770 = vmatpush3.bf16.msra.mxu0 %v23767_v23  ;;  %v10890_v23 = vld [vmem:[%s29495_s7 + $0x58] sm:$0xff] }
 0x74d   : > { %v23245_v50 = vpop.f32.mrb[66].mxu1 }
 0x74e   : > { %v10568_v8 = vpop.f32.mrb[67].mxu1  ;;  %v10574_v13 = vadd.f32 %v23245_v50, %v10467_v34 }
 0x74f   : > { %v10569_v3 = vadd.f32 %v10568_v8, %v10467_v34 }
 0x750   : > { %v10600_v25 = vadd.f32 %v10574_v13, %v29766_v33 }
 0x751   : > { %v10599_v1 = vadd.f32 %v10569_v3, %v29765_v17 }
 0x752   : > { %v10614_v51 = vsel %vm464_vm1, %v10600_v25, 0.0 }
 0x753   : > { %v10611_v47 = vsel %vm464_vm1, %v10599_v1, 0.0 }
 0x754   : > { %10612 = vadd.xlane.f32.xlu0 %v10611_v47 }
 0x758   : > { %10615 = vadd.xlane.f32.xlu0 %v10614_v51 }
 0x764   : > { %v23248_v56 = vpop.f32.mrb[68].mxu1 }
 0x765   : > { %v10584_v26 = vadd.f32 %v23248_v56, %v10467_v34  ;;  %v10578_v45 = vpop.f32.mrb[69].mxu1 }
 0x766   : > { %v10579_v43 = vadd.f32 %v10578_v45, %v10467_v34 }
 0x767   : > { %v10602_v53 = vadd.f32 %v10584_v26, %v29767_v40 }
 0x768   : > { %v10601_v46 = vadd.f32 %v10579_v43, %v29768_v37 }
 0x769   : > { %v10620_v21 = vsel %vm464_vm1, %v10602_v53, 0.0 }
 0x76a   : > { %10621 = vadd.xlane.f32.xlu0 %v10620_v21  ;;  %v10617_v35 = vsel %vm464_vm1, %v10601_v46, 0.0 }
 0x76b   : > { %10618 = vadd.xlane.f32.xlu1 %v10617_v35 }
 0x7a1   : > { %v23251_v49 = vpop.f32.mrb[70].mxu1 }
 0x7a2   : > { %v10594_v63 = vadd.f32 %v23251_v49, %v10467_v34  ;;  %v10588_v48 = vpop.f32.mrb[71].mxu1 }
 0x7a3   : > { %v10589_v18 = vadd.f32 %v10588_v48, %v10467_v34 }
 0x7a4   : > { %v10604_v10 = vadd.f32 %v10594_v63, %v29769_v54  ;;  %v10880_v54 = vld [vmem:[%s29495_s7 + $0x8] sm:$0xff] }
 0x7a5   : > { %v10603_v6 = vadd.f32 %v10589_v18, %v29770_v15  ;;  %v10879_v18 = vld [vmem:[%s29495_s7] sm:$0xff] }
 0x7a6   : > { %v10626_v61 = vsel %vm464_vm1, %v10604_v10, 0.0  ;;  %v23775_v15 = vpack.c.bf16 %v10880_v54, %v10879_v18 }
 0x7a7   : > { %10627 = vadd.xlane.f32.xlu0 %v10626_v61  ;;  %v10623_v20 = vsel %vm464_vm1, %v10603_v6, 0.0 }
 0x7a8   : > { %10624 = vadd.xlane.f32.xlu1 %v10623_v20  ;;  %v10883_v20 = vld [vmem:[%s29495_s7 + $0x20] sm:$0xff]  ;;  %23776 = vmatprep.subr.bf16.mxu1 %v23775_v15 }
 0x7a9   : > { %23778 = vmatpush3.bf16.msra.mxu1 %v23775_v15 }
 0x7c8   : > { %v10610_v44 = vpop.xlane.xlu1 %10609 }
 0x7c9   : > { %v10631_v16 = vmul.f32 0.03125, %v10610_v44  ;;  %v10607_v7 = vpop.xlane.xlu0 %10606  ;;  %v10884_v44 = vld [vmem:[%s29495_s7 + $0x28] sm:$0xff] }
 0x7ca   : > { %v10630_v14 = vmul.f32 0.03125, %v10607_v7 }
 0x7cb   : > { %v26721_v0 = vsub.f32 %v10598_v42, %v10631_v16  ;;  %v10737_v42 = vld [vmem:[%s29494_s6 + $0x18] sm:$0xff]  ;;  %v29771_v16 = vld [vmem:[#allocation13_spill] sm:$0xff] }
 0x7cc   : > { %v26723_v11 = vsub.f32 %v10597_v55, %v10630_v14  ;;  %v23771_v30 = vpack.c.bf16 %v10737_v42, %v10736_v12  ;;  %v26792_v7 = vsub.s32 1, %v29771_v16  ;;  %v23783_v14 = vpack.c.bf16 %v10884_v44, %v10883_v20  ;;  %v10889_v12 = vld [vmem:[%s29495_s7 + $0x50] sm:$0xff] }
 0x7cd   : > { %v10647_v9 = vmul.f32 %v26721_v0, %v26721_v0 }
 0x7ce   : > { %v10646_v19 = vmul.f32 %v26723_v11, %v26723_v11  ;;  %23772 = vmatprep.subr.bf16.mxu0 %v23771_v30  ;;  %29772 = vst [vmem:[#allocation20_spill] sm:$0xff] %v26792_v7 }
 0x7cf   : > { %v10657_v41 = vsel %vm464_vm1, %v10647_v9, 0.0  ;;  %23774 = vmatpush3.bf16.msra.mxu0 %v23771_v30  ;;  %v10885_v9 = vld [vmem:[%s29495_s7 + $0x30] sm:$0xff]  ;;  %v23795_v30 = vpack.c.bf16 %v10890_v23, %v10889_v12 }
 0x7d0   : > { %10658 = vadd.xlane.f32.xlu0 %v10657_v41  ;;  %v10654_v4 = vsel %vm464_vm1, %v10646_v19, 0.0  ;;  %v10886_v19 = vld [vmem:[%s29495_s7 + $0x38] sm:$0xff]  ;;  %v26801_v41 = vsub.s32 2, %v29771_v16 }
 0x7d1   : > { %10655 = vadd.xlane.f32.xlu1 %v10654_v4  ;;  %v26805_v4 = vrot.slane %v26701_v39, %v26792_v7 }
 0x7d2   : > { %29773 = vst [vmem:[#allocation32_spill] sm:$0xff] %v26801_v41 }
 0x7e1   : > { %v10613_v57 = vpop.xlane.xlu0 %10612 }
 0x7e2   : > { %v10632_v59 = vmul.f32 0.03125, %v10613_v57 }
 0x7e4   : > { %v26731_v36 = vsub.f32 %v10599_v1, %v10632_v59  ;;  %v23787_v59 = vpack.c.bf16 %v10886_v19, %v10885_v9  ;;  %v10894_v9 = vld [vmem:[%s29495_s7 + $0x78] sm:$0xff] }
 0x7e5   : > { %v10616_v5 = vpop.xlane.xlu0 %10615 }
 0x7e6   : > { %v10633_v52 = vmul.f32 0.03125, %v10616_v5  ;;  %v10648_v27 = vmul.f32 %v26731_v36, %v26731_v36 }
 0x7e8   : > { %v26735_v2 = vsub.f32 %v10600_v25, %v10633_v52  ;;  %v10660_v31 = vsel %vm464_vm1, %v10648_v27, 0.0  ;;  %v10887_v27 = vld [vmem:[%s29495_s7 + $0x40] sm:$0xff] }
 0x7e9   : > { %10661 = vadd.xlane.f32.xlu1 %v10660_v31  ;;  %v10888_v31 = vld [vmem:[%s29495_s7 + $0x48] sm:$0xff] }
 0x7ea   : > { %v10649_v34 = vmul.f32 %v26735_v2, %v26735_v2 }
 0x7ec   : > { %v10663_v22 = vsel %vm464_vm1, %v10649_v34, 0.0 }
 0x7ed   : > { %10664 = vadd.xlane.f32.xlu0 %v10663_v22  ;;  %v26817_v22 = vrot.slane %v26701_v39, %v26801_v41 }
 0x7f7   : > { %v10622_v55 = vpop.xlane.xlu0 %10621 }
 0x7f8   : > { %v10635_v60 = vmul.f32 0.03125, %v10622_v55  ;;  %v10619_v58 = vpop.xlane.xlu1 %10618  ;;  %v10891_v55 = vld [vmem:[%s29495_s7 + $0x60] sm:$0xff] }
 0x7f9   : > { %v10634_v50 = vmul.f32 0.03125, %v10619_v58 }
 0x7fa   : > { %v26753_v8 = vsub.f32 %v10602_v53, %v10635_v60  ;;  %v10892_v60 = vld [vmem:[%s29495_s7 + $0x68] sm:$0xff] }
 0x7fb   : > { %v26755_v13 = vsub.f32 %v10601_v46, %v10634_v50 }
 0x7fc   : > { %v10651_v3 = vmul.f32 %v26753_v8, %v26753_v8 }
 0x7fd   : > { %v10650_v17 = vmul.f32 %v26755_v13, %v26755_v13 }
 0x7fe   : > { %v10669_v1 = vsel %vm464_vm1, %v10651_v3, 0.0  ;;  %v23799_v3 = vpack.c.bf16 %v10892_v60, %v10891_v55 }
 0x7ff   : > { %10670 = vadd.xlane.f32.xlu0 %v10669_v1  ;;  %v10666_v33 = vsel %vm464_vm1, %v10650_v17, 0.0 }
 0x800   : > { %10667 = vadd.xlane.f32.xlu1 %v10666_v33 }
 0x834   : > { %v10628_v25 = vpop.xlane.xlu0 %10627 }
 0x835   : > { %v10637_v47 = vmul.f32 0.03125, %v10628_v25  ;;  %v10625_v51 = vpop.xlane.xlu1 %10624 }
 0x836   : > { %v10636_v56 = vmul.f32 0.03125, %v10625_v51 }
 0x837   : > { %v26763_v26 = vsub.f32 %v10604_v10, %v10637_v47  ;;  %v10881_v10 = vld [vmem:[%s29495_s7 + $0x10] sm:$0xff] }
 0x838   : > { %v26765_v45 = vsub.f32 %v10603_v6, %v10636_v56  ;;  %v10882_v6 = vld [vmem:[%s29495_s7 + $0x18] sm:$0xff] }
 0x839   : > { %v10653_v43 = vmul.f32 %v26763_v26, %v26763_v26  ;;  %v23779_v61 = vpack.c.bf16 %v10882_v6, %v10881_v10 }
 0x83a   : > { %v10652_v40 = vmul.f32 %v26765_v45, %v26765_v45 }
 0x83b   : > { %v10675_v53 = vsel %vm464_vm1, %v10653_v43, 0.0  ;;  %23780 = vmatprep.subr.bf16.mxu1 %v23779_v61 }
 0x83c   : > { %10676 = vadd.xlane.f32.xlu0 %v10675_v53  ;;  %v10672_v37 = vsel %vm464_vm1, %v10652_v40, 0.0  ;;  %23782 = vmatpush3.bf16.msra.mxu1 %v23779_v61 }
 0x83d   : > { %10673 = vadd.xlane.f32.xlu1 %v10672_v37  ;;  %23784 = vmatprep.subr.bf16.mxu1 %v23783_v14 }
 0x840   : > { %23786 = vmatpush3.bf16.msra.mxu1 %v23783_v14 }
 0x841   : > { %23788 = vmatprep.subr.bf16.mxu1 %v23787_v59 }
 0x844   : > { %23790 = vmatpush3.bf16.msra.mxu1 %v23787_v59 }
 0x85d   : > { %v10659_v46 = vpop.xlane.xlu0 %10658 }
 0x85e   : > { %v10679_v21 = vmul.f32 0.03125, %v10659_v46  ;;  %v10656_v35 = vpop.xlane.xlu1 %10655 }
 0x85f   : > { %v10678_v49 = vmul.f32 0.03125, %v10656_v35 }
 0x860   : > { %v10687_v63 = vadd.f32 1e-05, %v10679_v21 }
 0x861   : > { %v10686_v48 = vadd.f32 1e-05, %v10678_v49 }
 0x862   : > { %24053 = vrsqrt.f32 %v10687_v63 }
 0x863   : > { %24055 = vrsqrt.f32 %v10686_v48 }
 0x86c   : > { %v24054_v57 = vpop.eup %24053 }
 0x86d   : > { %v24056_v5 = vpop.eup %24055  ;;  %v10703_v52 = vmul.f32 %v24054_v57, %v26721_v0  ;;  %v23791_v0 = vpack.c.bf16 %v10888_v31, %v10887_v27 }
 0x86e   : > { %v10702_v34 = vmul.f32 %v24056_v5, %v26723_v11 }
 0x86f   : > { %v10715_v62 = vmul.f32 %v26805_v4, %v10703_v52  ;;  %23792 = vmatprep.subr.bf16.mxu1 %v23791_v0 }
 0x870   : > { %v10714_v29 = vmul.f32 %v26805_v4, %v10702_v34  ;;  %23794 = vmatpush3.bf16.msra.mxu1 %v23791_v0 }
 0x871   : > { %v26831_v42 = vadd.f32 %v26817_v22, %v10715_v62  ;;  %23796 = vmatprep.subr.bf16.mxu1 %v23795_v30 }
 0x872   : > { %v26828_v11 = vadd.f32 %v26817_v22, %v10714_v29 }
 0x874   : > { %23260 = vmatprep.mubr.msk.f32.mxu0 %vm464_vm1, %v26828_v11  ;;  %23798 = vmatpush3.bf16.msra.mxu1 %v23795_v30 }
 0x875   : > { %23261 = vmatmul.mubr.msk.f32.vlgmr.msra.gmra.mrb[80].mxu0 %vm464_vm1, %v26831_v42  ;;  %23800 = vmatprep.subr.bf16.mxu1 %v23799_v3 }
 0x876   : > { %v10662_v58 = vpop.xlane.xlu1 %10661 }
 0x877   : > { %v10680_v50 = vmul.f32 0.03125, %v10662_v58 }
 0x878   : > { %23802 = vmatpush3.bf16.msra.mxu1 %v23799_v3 }
 0x879   : > { %v10688_v17 = vadd.f32 1e-05, %v10680_v50 }
 0x87a   : > { %v10665_v1 = vpop.xlane.xlu0 %10664 }
 0x87b   : > { %24057 = vrsqrt.f32 %v10688_v17  ;;  %v10681_v33 = vmul.f32 0.03125, %v10665_v1 }
 0x87d   : > { %v10689_v25 = vadd.f32 1e-05, %v10681_v33 }
 0x87f   : > { %24059 = vrsqrt.f32 %v10689_v25 }
 0x885   : > { %v24058_v47 = vpop.eup %24057 }
 0x886   : > { %v10704_v51 = vmul.f32 %v24058_v47, %v26731_v36 }
 0x888   : > { %v10716_v56 = vmul.f32 %v26805_v4, %v10704_v51 }
 0x889   : > { %v24060_v43 = vpop.eup %24059 }
 0x88a   : > { %v26846_v40 = vadd.f32 %v26817_v22, %v10716_v56  ;;  %v10705_v53 = vmul.f32 %v24060_v43, %v26735_v2 }
 0x88c   : > { %23263 = vmatprep.mubr.msk.f32.mxu0 %vm464_vm1, %v26846_v40  ;;  %v10671_v37 = vpop.xlane.xlu0 %10670  ;;  %v10717_v46 = vmul.f32 %v26805_v4, %v10705_v53 }
 0x88d   : > { %v10683_v21 = vmul.f32 0.03125, %v10671_v37  ;;  %v10668_v35 = vpop.xlane.xlu1 %10667 }
 0x88e   : > { %v10682_v49 = vmul.f32 0.03125, %v10668_v35  ;;  %v26853_v63 = vadd.f32 %v26817_v22, %v10717_v46 }
 0x88f   : > { %v10691_v36 = vadd.f32 1e-05, %v10683_v21 }
 0x890   : > { %v10690_v48 = vadd.f32 1e-05, %v10682_v49  ;;  %23264 = vmatmul.mubr.msk.f32.gmra.mrb[82].mxu0 %vm464_vm1, %v26853_v63 }
 0x891   : > { %24061 = vrsqrt.f32 %v10691_v36 }
 0x892   : > { %24063 = vrsqrt.f32 %v10690_v48  ;;  %v29575_v48 = vsub.s32 5, %v29771_v16 }
 0x89b   : > { %v24062_v2 = vpop.eup %24061 }
 0x89c   : > { %v24064_v18 = vpop.eup %24063  ;;  %v10707_v54 = vmul.f32 %v24062_v2, %v26753_v8  ;;  %v10898_v2 = vrot.slane %v26701_v39, %v29575_v48 }
 0x89d   : > { %v10706_v10 = vmul.f32 %v24064_v18, %v26755_v13  ;;  %v10893_v13 = vld [vmem:[%s29495_s7 + $0x70] sm:$0xff] }
 0x89e   : > { %v10719_v15 = vmul.f32 %v26805_v4, %v10707_v54  ;;  %v23803_v57 = vpack.c.bf16 %v10894_v9, %v10893_v13 }
 0x89f   : > { %v10718_v6 = vmul.f32 %v26805_v4, %v10706_v10 }
 0x8a0   : > { %v26865_v20 = vadd.f32 %v26817_v22, %v10719_v15  ;;  %23804 = vmatprep.subr.bf16.mxu1 %v23803_v57 }
 0x8a1   : > { %v26862_v61 = vadd.f32 %v26817_v22, %v10718_v6  ;;  %23806 = vmatpush3.bf16.msra.mxu1 %v23803_v57 }
 0x8a2   : > { %23356 = vmatprep.subr.mxu1 %v29741_v32 }
 0x8a3   : > { %23266 = vmatprep.mubr.msk.f32.mxu0 %vm464_vm1, %v26862_v61 }
 0x8a4   : > { %23267 = vmatmul.mubr.msk.f32.gmra.mrb[84].mxu0 %vm464_vm1, %v26865_v20 }
 0x8c9   : > { %v10677_v44 = vpop.xlane.xlu0 %10676 }
 0x8ca   : > { %v10685_v8 = vmul.f32 0.03125, %v10677_v44  ;;  %v10674_v14 = vpop.xlane.xlu1 %10673 }
 0x8cb   : > { %v10684_v19 = vmul.f32 0.03125, %v10674_v14 }
 0x8cc   : > { %v10693_v59 = vadd.f32 1e-05, %v10685_v8 }
 0x8cd   : > { %v10692_v5 = vadd.f32 1e-05, %v10684_v19 }
 0x8ce   : > { %24065 = vrsqrt.f32 %v10693_v59 }
 0x8cf   : > { %24067 = vrsqrt.f32 %v10692_v5 }
 0x8d8   : > { %v24066_v52 = vpop.eup %24065 }
 0x8d9   : > { %v24068_v27 = vpop.eup %24067  ;;  %v10709_v31 = vmul.f32 %v24066_v52, %v26763_v26  ;;  %v26895_v26 = vld [vmem:[%s29490_s2] sm:$0xff] }
 0x8da   : > { %v10708_v34 = vmul.f32 %v24068_v27, %v26765_v45  ;;  %v10741_v45 = vrot.slane %v26895_v26, %v26792_v7 }
 0x8db   : > { %v10721_v62 = vmul.f32 %v26805_v4, %v10709_v31 }
 0x8dc   : > { %v10720_v29 = vmul.f32 %v26805_v4, %v10708_v34 }
 0x8dd   : > { %v26886_v12 = vadd.f32 %v26817_v22, %v10721_v62 }
 0x8de   : > { %v26883_v0 = vadd.f32 %v26817_v22, %v10720_v29 }
 0x8e0   : > { %23269 = vmatprep.mubr.msk.f32.mxu0 %vm464_vm1, %v26883_v0 }
 0x8e1   : > { %23270 = vmatmul.mubr.msk.f32.gmra.mrb[86].mxu0 %vm464_vm1, %v26886_v12 }
 0x948   : > { %v23262_v4 = vpop.f32.mrb[80].mxu0 }
 0x949   : > { %v10838_v23 = vadd.f32 %v23262_v4, %v10741_v45  ;;  %v10832_v30 = vpop.f32.mrb[81].mxu0 }
 0x94a   : > { %v10833_v55 = vadd.f32 %v10832_v30, %v10741_v45 }
 0x94b   : > { %v10872_v60 = vmax.f32 %v10838_v23, 0.0 }
 0x94c   : > { %v10871_v22 = vmax.f32 %v10833_v55, 0.0 }
 0x94e   : > { %23304 = vmatprep.mubr.f32.mxu1 %v10871_v22 }
 0x94f   : > { %23305 = vmatmul.mubr.f32.vlgmr.msra.gmra.mrb[72].mxu1 %v10872_v60 }
 0x963   : > { %v23265_v58 = vpop.f32.mrb[82].mxu0 }
 0x964   : > { %v10848_v50 = vadd.f32 %v23265_v58, %v10741_v45  ;;  %v10842_v3 = vpop.f32.mrb[83].mxu0 }
 0x965   : > { %v10843_v17 = vadd.f32 %v10842_v3, %v10741_v45 }
 0x966   : > { %v10874_v33 = vmax.f32 %v10848_v50, 0.0 }
 0x967   : > { %v10873_v1 = vmax.f32 %v10843_v17, 0.0 }
 0x969   : > { %23307 = vmatprep.mubr.f32.mxu1 %v10873_v1 }
 0x96a   : > { %23308 = vmatmul.mubr.f32.gmra.mrb[74].mxu1 %v10874_v33 }
 0x977   : > { %v23268_v25 = vpop.f32.mrb[84].mxu0 }
 0x978   : > { %v10858_v47 = vadd.f32 %v23268_v25, %v10741_v45  ;;  %v10852_v51 = vpop.f32.mrb[85].mxu0 }
 0x979   : > { %v10853_v56 = vadd.f32 %v10852_v51, %v10741_v45 }
 0x97a   : > { %v10876_v53 = vmax.f32 %v10858_v47, 0.0 }
 0x97b   : > { %v10875_v43 = vmax.f32 %v10853_v56, 0.0 }
 0x97d   : > { %23310 = vmatprep.mubr.f32.mxu1 %v10875_v43 }
 0x97e   : > { %23311 = vmatmul.mubr.f32.gmra.mrb[76].mxu1 %v10876_v53 }
 0x9b4   : > { %v23271_v37 = vpop.f32.mrb[86].mxu0 }
 0x9b5   : > { %v10868_v46 = vadd.f32 %v23271_v37, %v10741_v45  ;;  %v10862_v21 = vpop.f32.mrb[87].mxu0 }
 0x9b6   : > { %v10863_v35 = vadd.f32 %v10862_v21, %v10741_v45 }
 0x9b7   : > { %v10878_v36 = vmax.f32 %v10868_v46, 0.0 }
 0x9b8   : > { %v10877_v49 = vmax.f32 %v10863_v35, 0.0 }
 0x9ba   : > { %23313 = vmatprep.mubr.f32.mxu1 %v10877_v49 }
 0x9bb   : > { %23314 = vmatmul.mubr.f32.gmra.mrb[78].mxu1 %v10878_v36  ;;  %v22267_v36 = vld [vmem:[%s29492_s4 + $0x20] sm:$0xff] }
 0x9bc   : > { %23358 = vmatprep.mubr.msk.f32.mxu1 %vm24316_vm2, %v29741_v32 }
 0xa22   : > { %v23306_v18 = vpop.f32.mrb[72].mxu1 }
 0xa23   : > { %v10971_v54 = vadd.f32 %v23306_v18, %v10898_v2  ;;  %v10965_v10 = vpop.f32.mrb[73].mxu1  ;;  %v22269_v18 = vld [vmem:[%s29492_s4 + $0x30] sm:$0xff] }
 0xa24   : > { %v10966_v15 = vadd.f32 %v10965_v10, %v10898_v2  ;;  %v22270_v10 = vld [vmem:[%s29492_s4 + $0x38] sm:$0xff] }
 0xa25   : > { %v11005_v6 = vadd.f32 %v10971_v54, %v26831_v42 }
 0xa26   : > { %v11004_v44 = vadd.f32 %v10966_v15, %v26828_v11  ;;  %v23811_v15 = vpack.c.bf16 %v22270_v10, %v22269_v18 }
 0xa27   : > { %v11015_v8 = vsel %vm464_vm1, %v11005_v6, 0.0 }
 0xa28   : > { %11016 = vadd.xlane.f32.xlu0 %v11015_v8  ;;  %v11012_v14 = vsel %vm464_vm1, %v11004_v44, 0.0 }
 0xa29   : > { %11013 = vadd.xlane.f32.xlu1 %v11012_v14 }
 0xa3d   : > { %v23309_v13 = vpop.f32.mrb[74].mxu1 }
 0xa3e   : > { %v10981_v9 = vadd.f32 %v23309_v13, %v10898_v2  ;;  %v10975_v19 = vpop.f32.mrb[75].mxu1 }
 0xa3f   : > { %v10976_v57 = vadd.f32 %v10975_v19, %v10898_v2 }
 0xa40   : > { %v11007_v59 = vadd.f32 %v10981_v9, %v26853_v63 }
 0xa41   : > { %v11006_v5 = vadd.f32 %v10976_v57, %v26846_v40 }
 0xa42   : > { %v11021_v52 = vsel %vm464_vm1, %v11007_v59, 0.0 }
 0xa43   : > { %11022 = vadd.xlane.f32.xlu0 %v11021_v52  ;;  %v11018_v42 = vsel %vm464_vm1, %v11006_v5, 0.0 }
 0xa44   : > { %11019 = vadd.xlane.f32.xlu1 %v11018_v42 }
 0xa51   : > { %v23312_v11 = vpop.f32.mrb[76].mxu1 }
 0xa52   : > { %v10991_v27 = vadd.f32 %v23312_v11, %v10898_v2  ;;  %v10985_v31 = vpop.f32.mrb[77].mxu1 }
 0xa53   : > { %v10986_v34 = vadd.f32 %v10985_v31, %v10898_v2 }
 0xa54   : > { %v11009_v62 = vadd.f32 %v10991_v27, %v26865_v20 }
 0xa55   : > { %v11008_v29 = vadd.f32 %v10986_v34, %v26862_v61 }
 0xa56   : > { %v11027_v45 = vsel %vm464_vm1, %v11009_v62, 0.0 }
 0xa57   : > { %11028 = vadd.xlane.f32.xlu0 %v11027_v45  ;;  %v11024_v63 = vsel %vm464_vm1, %v11008_v29, 0.0 }
 0xa58   : > { %11025 = vadd.xlane.f32.xlu1 %v11024_v63 }
 0xa8e   : > { %v23315_v40 = vpop.f32.mrb[78].mxu1 }
 0xa8f   : > { %v11001_v4 = vadd.f32 %v23315_v40, %v10898_v2  ;;  %v10995_v23 = vpop.f32.mrb[79].mxu1 }
 0xa90   : > { %v10996_v30 = vadd.f32 %v10995_v23, %v10898_v2  ;;  %v22268_v2 = vld [vmem:[%s29492_s4 + $0x28] sm:$0xff] }
 0xa91   : > { %v11011_v55 = vadd.f32 %v11001_v4, %v26886_v12  ;;  %v23807_v54 = vpack.c.bf16 %v22268_v2, %v22267_v36 }
 0xa92   : > { %v11010_v22 = vadd.f32 %v10996_v30, %v26883_v0 }
 0xa93   : > { %v11033_v60 = vsel %vm464_vm1, %v11011_v55, 0.0  ;;  %23808 = vmatprep.subr.bf16.mxu0 %v23807_v54 }
 0xa94   : > { %11034 = vadd.xlane.f32.xlu0 %v11033_v60  ;;  %v11030_v20 = vsel %vm464_vm1, %v11010_v22, 0.0  ;;  %23810 = vmatpush3.bf16.msra.mxu0 %v23807_v54 }
 0xa95   : > { %11031 = vadd.xlane.f32.xlu1 %v11030_v20  ;;  %23812 = vmatprep.subr.bf16.mxu0 %v23811_v15  ;;  %v26978_v20 = vsub.s32 4, %v29771_v16 }
 0xa97   : > { %29775 = vst [vmem:[#allocation16_spill] sm:$0xff] %v26978_v20 }
 0xa98   : > { %23814 = vmatpush3.bf16.msra.mxu0 %v23811_v15 }
 0xa99   : > { %23336 = vmatprep.subr.mxu0 %v29741_v32 }
 0xab5   : > { %v11017_v61 = vpop.xlane.xlu0 %11016 }
 0xab6   : > { %v11037_v58 = vmul.f32 0.03125, %v11017_v61  ;;  %v11014_v50 = vpop.xlane.xlu1 %11013 }
 0xab7   : > { %v11036_v3 = vmul.f32 0.03125, %v11014_v50 }
 0xab8   : > { %v26921_v17 = vsub.f32 %v11005_v6, %v11037_v58 }
 0xab9   : > { %v26923_v1 = vsub.f32 %v11004_v44, %v11036_v3 }
 0xaba   : > { %v11053_v33 = vmul.f32 %v26921_v17, %v26921_v17 }
 0xabb   : > { %v11052_v0 = vmul.f32 %v26923_v1, %v26923_v1 }
 0xabc   : > { %v11063_v12 = vsel %vm464_vm1, %v11053_v33, 0.0 }
 0xabd   : > { %11064 = vadd.xlane.f32.xlu0 %v11063_v12  ;;  %v11060_v25 = vsel %vm464_vm1, %v11052_v0, 0.0  ;;  %v11131_v0 = vrot.slane %v26701_v39, %v26978_v20 }
 0xabe   : > { %11061 = vadd.xlane.f32.xlu1 %v11060_v25 }
 0xad0   : > { %v11023_v47 = vpop.xlane.xlu0 %11022 }
 0xad1   : > { %v11039_v51 = vmul.f32 0.03125, %v11023_v47  ;;  %v11020_v56 = vpop.xlane.xlu1 %11019 }
 0xad2   : > { %v11038_v43 = vmul.f32 0.03125, %v11020_v56 }
 0xad3   : > { %v26931_v53 = vsub.f32 %v11007_v59, %v11039_v51 }
 0xad4   : > { %v26933_v37 = vsub.f32 %v11006_v5, %v11038_v43 }
 0xad5   : > { %v11055_v46 = vmul.f32 %v26931_v53, %v26931_v53 }
 0xad6   : > { %v11054_v21 = vmul.f32 %v26933_v37, %v26933_v37 }
 0xad7   : > { %v11069_v35 = vsel %vm464_vm1, %v11055_v46, 0.0 }
 0xad8   : > { %11070 = vadd.xlane.f32.xlu0 %v11069_v35  ;;  %v11066_v49 = vsel %vm464_vm1, %v11054_v21, 0.0 }
 0xad9   : > { %11067 = vadd.xlane.f32.xlu1 %v11066_v49 }
 0xae4   : > { %v11029_v6 = vpop.xlane.xlu0 %11028 }
 0xae5   : > { %v11041_v44 = vmul.f32 0.03125, %v11029_v6  ;;  %v11026_v8 = vpop.xlane.xlu1 %11025 }
 0xae6   : > { %v11040_v14 = vmul.f32 0.03125, %v11026_v8 }
 0xae7   : > { %v26954_v13 = vsub.f32 %v11009_v62, %v11041_v44 }
 0xae8   : > { %v26956_v9 = vsub.f32 %v11008_v29, %v11040_v14 }
 0xae9   : > { %v11057_v19 = vmul.f32 %v26954_v13, %v26954_v13 }
 0xaea   : > { %v11056_v57 = vmul.f32 %v26956_v9, %v26956_v9 }
 0xaeb   : > { %v11075_v59 = vsel %vm464_vm1, %v11057_v19, 0.0 }
 0xaec   : > { %11076 = vadd.xlane.f32.xlu0 %v11075_v59  ;;  %v11072_v5 = vsel %vm464_vm1, %v11056_v57, 0.0 }
 0xaed   : > { %11073 = vadd.xlane.f32.xlu1 %v11072_v5 }
 0xb21   : > { %v11035_v52 = vpop.xlane.xlu0 %11034 }
 0xb22   : > { %v11043_v42 = vmul.f32 0.03125, %v11035_v52  ;;  %v11032_v11 = vpop.xlane.xlu1 %11031 }
 0xb23   : > { %v11042_v27 = vmul.f32 0.03125, %v11032_v11 }
 0xb24   : > { %v26964_v31 = vsub.f32 %v11011_v55, %v11043_v42 }
 0xb25   : > { %v26966_v34 = vsub.f32 %v11010_v22, %v11042_v27  ;;  %v26975_v22 = vsub.s32 3, %v29771_v16 }
 0xb26   : > { %v11059_v62 = vmul.f32 %v26964_v31, %v26964_v31 }
 0xb27   : > { %v11058_v29 = vmul.f32 %v26966_v34, %v26966_v34  ;;  %29774 = vst [vmem:[#allocation19_spill] sm:$0xff] %v26975_v22  ;;  %v11119_v61 = vrot.slane %v26701_v39, %v26975_v22 }
 0xb28   : > { %v11081_v45 = vsel %vm464_vm1, %v11059_v62, 0.0 }
 0xb29   : > { %11082 = vadd.xlane.f32.xlu0 %v11081_v45  ;;  %v11078_v63 = vsel %vm464_vm1, %v11058_v29, 0.0 }
 0xb2a   : > { %11079 = vadd.xlane.f32.xlu1 %v11078_v63 }
 0xb4a   : > { %v11065_v40 = vpop.xlane.xlu0 %11064 }
 0xb4b   : > { %v11085_v4 = vmul.f32 0.03125, %v11065_v40  ;;  %v11062_v23 = vpop.xlane.xlu1 %11061 }
 0xb4c   : > { %v11084_v30 = vmul.f32 0.03125, %v11062_v23 }
 0xb4d   : > { %v11093_v55 = vadd.f32 1e-05, %v11085_v4 }
 0xb4e   : > { %v11092_v60 = vadd.f32 1e-05, %v11084_v30 }
 0xb4f   : > { %24069 = vrsqrt.f32 %v11093_v55 }
 0xb50   : > { %24071 = vrsqrt.f32 %v11092_v60 }
 0xb59   : > { %v24070_v58 = vpop.eup %24069 }
 0xb5a   : > { %v24072_v50 = vpop.eup %24071  ;;  %v11109_v3 = vmul.f32 %v24070_v58, %v26921_v17 }
 0xb5b   : > { %v11108_v33 = vmul.f32 %v24072_v50, %v26923_v1 }
 0xb5c   : > { %v11121_v12 = vmul.f32 %v11119_v61, %v11109_v3 }
 0xb5d   : > { %v11120_v25 = vmul.f32 %v11119_v61, %v11108_v33 }
 0xb5e   : > { %v26988_v51 = vadd.f32 %v11131_v0, %v11121_v12 }
 0xb5f   : > { %v26986_v47 = vadd.f32 %v11131_v0, %v11120_v25 }
 0xb60   : > { %29777 = vst [vmem:[#allocation29_spill] sm:$0xff] %v26988_v51 }
 0xb61   : > { %29776 = vst [vmem:[#allocation23_spill] sm:$0xff] %v26986_v47  ;;  %23324 = vmatprep.mubr.msk.f32.mxu0 %vm464_vm1, %v26986_v47 }
 0xb62   : > { %23325 = vmatmul.mubr.msk.f32.vlgmr.msra.gmra.mrb[88].mxu0 %vm464_vm1, %v26988_v51 }
 0xb65   : > { %v11071_v56 = vpop.xlane.xlu0 %11070 }
 0xb66   : > { %v11087_v43 = vmul.f32 0.03125, %v11071_v56  ;;  %v11068_v17 = vpop.xlane.xlu1 %11067 }
 0xb67   : > { %v11086_v46 = vmul.f32 0.03125, %v11068_v17 }
 0xb68   : > { %v11095_v1 = vadd.f32 1e-05, %v11087_v43 }
 0xb69   : > { %v11094_v21 = vadd.f32 1e-05, %v11086_v46 }
 0xb6a   : > { %24073 = vrsqrt.f32 %v11095_v1 }
 0xb6b   : > { %24075 = vrsqrt.f32 %v11094_v21 }
 0xb74   : > { %v24074_v39 = vpop.eup %24073 }
 0xb75   : > { %v24076_v35 = vpop.eup %24075  ;;  %v11111_v49 = vmul.f32 %v24074_v39, %v26931_v53 }
 0xb76   : > { %v11110_v36 = vmul.f32 %v24076_v35, %v26933_v37 }
 0xb77   : > { %v11123_v2 = vmul.f32 %v11119_v61, %v11111_v49 }
 0xb78   : > { %v11122_v18 = vmul.f32 %v11119_v61, %v11110_v36 }
 0xb79   : > { %v11077_v54 = vpop.xlane.xlu0 %11076  ;;  %v26998_v8 = vadd.f32 %v11131_v0, %v11123_v2 }
 0xb7a   : > { %v11089_v10 = vmul.f32 0.03125, %v11077_v54  ;;  %v11074_v15 = vpop.xlane.xlu1 %11073  ;;  %v26996_v6 = vadd.f32 %v11131_v0, %v11122_v18 }
 0xb7b   : > { %v11088_v44 = vmul.f32 0.03125, %v11074_v15  ;;  %29779 = vst [vmem:[#allocation24_spill] sm:$0xff] %v26998_v8 }
 0xb7c   : > { %29778 = vst [vmem:[#allocation28_spill] sm:$0xff] %v26996_v6  ;;  %v11097_v14 = vadd.f32 1e-05, %v11089_v10  ;;  %23327 = vmatprep.mubr.msk.f32.mxu0 %vm464_vm1, %v26996_v6 }
 0xb7d   : > { %v11096_v19 = vadd.f32 1e-05, %v11088_v44  ;;  %23328 = vmatmul.mubr.msk.f32.gmra.mrb[90].mxu0 %vm464_vm1, %v26998_v8 }
 0xb7e   : > { %24077 = vrsqrt.f32 %v11097_v14 }
 0xb7f   : > { %24079 = vrsqrt.f32 %v11096_v19 }
 0xb88   : > { %v24078_v53 = vpop.eup %24077 }
 0xb89   : > { %v24080_v37 = vpop.eup %24079  ;;  %v11113_v57 = vmul.f32 %v24078_v53, %v26954_v13 }
 0xb8a   : > { %v11112_v59 = vmul.f32 %v24080_v37, %v26956_v9 }
 0xb8b   : > { %v11125_v5 = vmul.f32 %v11119_v61, %v11113_v57 }
 0xb8c   : > { %v11124_v52 = vmul.f32 %v11119_v61, %v11112_v59 }
 0xb8d   : > { %v27008_v11 = vadd.f32 %v11131_v0, %v11125_v5 }
 0xb8e   : > { %v27006_v42 = vadd.f32 %v11131_v0, %v11124_v52 }
 0xb8f   : > { %29781 = vst [vmem:[#allocation31_spill] sm:$0xff] %v27008_v11 }
 0xb90   : > { %29780 = vst [vmem:[#allocation21_spill] sm:$0xff] %v27006_v42  ;;  %23330 = vmatprep.mubr.msk.f32.mxu0 %vm464_vm1, %v27006_v42 }
 0xb91   : > { %23331 = vmatmul.mubr.msk.f32.gmra.mrb[92].mxu0 %vm464_vm1, %v27008_v11 }
 0xbb6   : > { %v11083_v27 = vpop.xlane.xlu0 %11082 }
 0xbb7   : > { %v11091_v62 = vmul.f32 0.03125, %v11083_v27  ;;  %v11080_v29 = vpop.xlane.xlu1 %11079 }
 0xbb8   : > { %v11090_v45 = vmul.f32 0.03125, %v11080_v29 }
 0xbb9   : > { %v11099_v63 = vadd.f32 1e-05, %v11091_v62 }
 0xbba   : > { %v11098_v13 = vadd.f32 1e-05, %v11090_v45 }
 0xbbb   : > { %24081 = vrsqrt.f32 %v11099_v63 }
 0xbbc   : > { %24083 = vrsqrt.f32 %v11098_v13 }
 0xbc5   : > { %v24082_v9 = vpop.eup %24081 }
 0xbc6   : > { %v24084_v40 = vpop.eup %24083  ;;  %v11115_v4 = vmul.f32 %v24082_v9, %v26964_v31  ;;  %v11150_v31 = vrot.slane %v26895_v26, %v26801_v41 }
 0xbc7   : > { %v11114_v23 = vmul.f32 %v24084_v40, %v26966_v34 }
 0xbc8   : > { %v11127_v30 = vmul.f32 %v11119_v61, %v11115_v4 }
 0xbc9   : > { %v11126_v55 = vmul.f32 %v11119_v61, %v11114_v23 }
 0xbca   : > { %v27018_v58 = vadd.f32 %v11131_v0, %v11127_v30 }
 0xbcb   : > { %v27016_v60 = vadd.f32 %v11131_v0, %v11126_v55 }
 0xbcc   : > { %29783 = vst [vmem:[#allocation33_spill] sm:$0xff] %v27018_v58 }
 0xbcd   : > { %29782 = vst [vmem:[#allocation30_spill] sm:$0xff] %v27016_v60  ;;  %23333 = vmatprep.mubr.msk.f32.mxu0 %vm464_vm1, %v27016_v60 }
 0xbce   : > { %23334 = vmatmul.mubr.msk.f32.gmra.mrb[94].mxu0 %vm464_vm1, %v27018_v58 }
 0xbcf   : > { %23338 = vmatprep.mubr.msk.f32.mxu0 %vm24316_vm2, %v29741_v32 }
 0xc35   : > { %v23326_v50 = vpop.f32.mrb[88].mxu0 }
 0xc36   : > { %v11241_v34 = vpop.f32.mrb[89].mxu0  ;;  %v27034_v61 = vadd.f32 %v23326_v50, %v11150_v31 }
 0xc37   : > { %v27028_v3 = vadd.f32 %v11241_v34, %v11150_v31 }
 0xc39   : > { %11312 = vrot.lane.b32.xlu0 %v27028_v3, %s24313_s25  ;;  %11288 = vrot.lane.b32.xlu1 %v27028_v3, %s24312_s24 }
 0xc3d   : > { %11314 = vrot.lane.b32.xlu0 %v27034_v61, %s24313_s25  ;;  %11336 = vrot.lane.b32.xlu1 %v27028_v3, %s24311_s23 }
 0xc41   : > { %11290 = vrot.lane.b32.xlu1 %v27034_v61, %s24312_s24 }
 0xc45   : > { %11338 = vrot.lane.b32.xlu1 %v27034_v61, %s24311_s23 }
 0xc50   : > { %v23329_v26 = vpop.f32.mrb[90].mxu0 }
 0xc51   : > { %v11251_v33 = vpop.f32.mrb[91].mxu0  ;;  %v27050_v12 = vadd.f32 %v23329_v26, %v11150_v31 }
 0xc52   : > { %v27044_v0 = vadd.f32 %v11251_v33, %v11150_v31 }
 0xc54   : > { %11316 = vrot.lane.b32.xlu1 %v27044_v0, %s24313_s25  ;;  %11292 = vrot.lane.b32.xlu0 %v27044_v0, %s24312_s24 }
 0xc58   : > { %11294 = vrot.lane.b32.xlu1 %v27050_v12, %s24312_s24  ;;  %11340 = vrot.lane.b32.xlu0 %v27044_v0, %s24311_s23 }
 0xc5c   : > { %11342 = vrot.lane.b32.xlu1 %v27050_v12, %s24311_s23  ;;  %11318 = vrot.lane.b32.xlu0 %v27050_v12, %s24313_s25 }
 0xc64   : > { %v23332_v25 = vpop.f32.mrb[92].mxu0 }
 0xc65   : > { %v27060_v56 = vadd.f32 %v23332_v25, %v11150_v31  ;;  %v11261_v43 = vpop.f32.mrb[93].mxu0 }
 0xc66   : > { %v27062_v17 = vadd.f32 %v11261_v43, %v11150_v31 }
 0xc67   : > { %29784 = vst [vmem:[#allocation18_spill] sm:$0xff] %v27060_v56  ;;  %11298 = vrot.lane.b32.xlu1 %v27060_v56, %s24312_s24 }
 0xc68   : > { %11296 = vrot.lane.b32.xlu0 %v27062_v17, %s24312_s24 }
 0xc6b   : > { %11320 = vrot.lane.b32.xlu1 %v27062_v17, %s24313_s25 }
 0xc6c   : > { %11344 = vrot.lane.b32.xlu0 %v27062_v17, %s24311_s23 }
 0xc6f   : > { %11346 = vrot.lane.b32.xlu1 %v27060_v56, %s24311_s23 }
 0xc70   : > { %11322 = vrot.lane.b32.xlu0 %v27060_v56, %s24313_s25 }
 0xc73   : > { %12448 = vrot.lane.b32.xlu1 %v27028_v3, %s29785_s17 }
 0xca1   : > { %v23335_v46 = vpop.f32.mrb[94].mxu0 }
 0xca2   : > { %v11271_v1 = vpop.f32.mrb[95].mxu0  ;;  %v27092_v49 = vadd.f32 %v23335_v46, %v11150_v31 }
 0xca3   : > { %v27078_v21 = vadd.f32 %v11271_v1, %v11150_v31 }
 0xca4   : > { %29787 = vst [vmem:[#allocation15_spill] sm:$0xff] %v27092_v49 }
 0xca5   : > { %29786 = vst [vmem:[#allocation22_spill] sm:$0xff] %v27078_v21  ;;  %11324 = vrot.lane.b32.xlu1 %v27078_v21, %s24313_s25  ;;  %11300 = vrot.lane.b32.xlu0 %v27078_v21, %s24312_s24 }
 0xca9   : > { %11348 = vrot.lane.b32.xlu0 %v27078_v21, %s24311_s23 }
 0xcab   : > { %v27084_v39 = vpop.permute.xlu1 %11288  ;;  %v27086_v35 = vpop.permute.xlu0 %11312 }
 0xcac   : > { %12480 = vrot.lane.b32.xlu1 %v27086_v35, %s29785_s17  ;;  %v11360_v29 = vcombine.low %v27028_v3, %v27086_v35  ;;  %v11361_v63 = vcombine.high %v27028_v3, %v27086_v35 }
 0xcad   : > { %12464 = vrot.lane.b32.xlu0 %v27084_v39, %s29785_s17 }
 0xcae   : > { %v11368_v9 = vrot.slane %v11360_v29, %v24670_v24  ;;  %v11375_v30 = vrot.slane %v11361_v63, %v24670_v24 }
 0xcaf   : > { %v27094_v36 = vpop.permute.xlu1 %11336  ;;  %v27116_v54 = vpop.permute.xlu0 %11314 }
 0xcb0   : > { %11302 = vrot.lane.b32.xlu1 %v27092_v49, %s24312_s24  ;;  %v11376_v62 = vcombine.low %v27084_v39, %v27094_v36  ;;  %v11377_v45 = vcombine.high %v27084_v39, %v27094_v36  ;;  %v11428_v50 = vcombine.low %v27034_v61, %v27116_v54  ;;  %v11429_v34 = vcombine.high %v27034_v61, %v27116_v54  ;;  %s22485_s24 = sshll.u32 %s24391_s9, 7  ;;  %s24324_s9 = smov [#allocation2]  }
 0xcb1   : > { %12496 = vrot.lane.b32.xlu0 %v27094_v36, %s29785_s17  ;;  %s29446_s26 = scalar_lea.hbm %s29496_s8, %s22485_s24  ;;  %s24251_s20 = sshll.u32 %s24324_s9, 4  ;;  %s24252_s20 = int_to_ptr.vmem [resolvable:$false] %s24251_s20 }
 0xcb2   : > { %v11384_v13 = vrot.slane %v11376_v62, %v24670_v24  ;;  %v11391_v40 = vrot.slane %v11377_v45, %v24670_v24  ;;  %v11436_v45 = vrot.slane %v11428_v50, %v24670_v24  ;;  %v11443_v63 = vrot.slane %v11429_v34, %v24670_v24 }
 0xcb3   : > { %v27104_v2 = vpop.permute.xlu1 %11290 }
 0xcb4   : > { %11350 = vrot.lane.b32.xlu1 %v27092_v49, %s24311_s23  ;;  %v11392_v55 = vcombine.low %v11368_v9, %v11384_v13  ;;  %v11393_v31 = vcombine.high %v11368_v9, %v11384_v13  ;;  %v11408_v26 = vcombine.low %v11375_v30, %v11391_v40  ;;  %v11409_v33 = vcombine.high %v11375_v30, %v11391_v40  ;;  %s29799_s23 = smov 64  }
 0xcb5   : > { %11326 = vrot.lane.b32.xlu0 %v27092_v49, %s24313_s25 }
 0xcb6   : > { %v11400_v46 = vrot.slane %v11392_v55, %v24681_v38  ;;  %v11407_v1 = vrot.slane %v11393_v31, %v24681_v38  ;;  %v11416_v13 = vrot.slane %v11408_v26, %v24681_v38  ;;  %v11423_v9 = vrot.slane %v11409_v33, %v24681_v38 }
 0xcb7   : > { %v27110_v18 = vpop.permute.xlu1 %11338 }
 0xcb8   : > { %12466 = vrot.lane.b32.xlu1 %v27104_v2, %s29785_s17  ;;  %v11444_v4 = vcombine.low %v27104_v2, %v27110_v18  ;;  %v11445_v23 = vcombine.high %v27104_v2, %v27110_v18  ;;  %v11904_v48 = vcombine.low %v11400_v46, %v11407_v1  ;;  %v22279_v20 = vcombine.high %v11400_v46, %v11407_v1 }
 0xcb9   : > { %12450 = vrot.lane.b32.xlu0 %v27034_v61, %s29785_s17 }
 0xcba   : > { %v11452_v25 = vrot.slane %v11444_v4, %v24670_v24  ;;  %v11459_v43 = vrot.slane %v11445_v23, %v24670_v24 }
 0xcbc   : > { %12498 = vrot.lane.b32.xlu1 %v27110_v18, %s29785_s17  ;;  %v11460_v23 = vcombine.low %v11436_v45, %v11452_v25  ;;  %v11461_v30 = vcombine.high %v11436_v45, %v11452_v25  ;;  %v11476_v55 = vcombine.low %v11443_v63, %v11459_v43  ;;  %v11477_v31 = vcombine.high %v11443_v63, %v11459_v43 }
 0xcbd   : > { %12482 = vrot.lane.b32.xlu0 %v27116_v54, %s29785_s17  ;;  %v11920_v45 = vcombine.low %v11416_v13, %v11423_v9  ;;  %v22280_v43 = vcombine.high %v11416_v13, %v11423_v9 }
 0xcbe   : > { %v11484_v63 = vrot.slane %v11476_v55, %v24681_v38  ;;  %v11491_v22 = vrot.slane %v11477_v31, %v24681_v38 }
 0xcbf   : > { %v11935_v55 = vrot.slane %v22280_v43, %v24670_v24 }
 0xcc1   : > { %12452 = vrot.lane.b32.xlu0 %v27044_v0, %s29785_s17 }
 0xcc6   : > { %v27122_v10 = vpop.permute.xlu1 %11316  ;;  %v27124_v15 = vpop.permute.xlu0 %11292 }
 0xcc7   : > { %12468 = vrot.lane.b32.xlu1 %v27124_v15, %s29785_s17  ;;  %12484 = vrot.lane.b32.xlu0 %v27122_v10, %s29785_s17  ;;  %v11496_v40 = vcombine.low %v27044_v0, %v27122_v10  ;;  %v11497_v4 = vcombine.high %v27044_v0, %v27122_v10 }
 0xcc9   : > { %v11504_v46 = vrot.slane %v11496_v40, %v24670_v24  ;;  %v11511_v1 = vrot.slane %v11497_v4, %v24670_v24  ;;  %v11911_v4 = vrot.slane %v11904_v48, %v24670_v24 }
 0xcca   : > { %v27130_v44 = vpop.permute.xlu0 %11340  ;;  %v27136_v14 = vpop.permute.xlu1 %11294 }
 0xccb   : > { %12500 = vrot.lane.b32.xlu1 %v27130_v44, %s29785_s17  ;;  %12454 = vrot.lane.b32.xlu0 %v27050_v12, %s29785_s17  ;;  %v11512_v62 = vcombine.low %v27124_v15, %v27130_v44  ;;  %v11513_v29 = vcombine.high %v27124_v15, %v27130_v44 }
 0xccd   : > { %v11520_v50 = vrot.slane %v11512_v62, %v24670_v24  ;;  %v11527_v34 = vrot.slane %v11513_v29, %v24670_v24  ;;  %v11468_v62 = vrot.slane %v11460_v23, %v24681_v38  ;;  %v11475_v29 = vrot.slane %v11461_v30, %v24681_v38 }
 0xcce   : > { %v27138_v19 = vpop.permute.xlu0 %11318  ;;  %v27144_v53 = vpop.permute.xlu1 %11342  ;;  %v11919_v23 = vrot.slane %v22279_v20, %v24670_v24  ;;  %v11927_v30 = vrot.slane %v11920_v45, %v24670_v24 }
 0xccf   : > { %12470 = vrot.lane.b32.xlu1 %v27136_v14, %s29785_s17  ;;  %12486 = vrot.lane.b32.xlu0 %v27138_v19, %s29785_s17  ;;  %v11580_v26 = vcombine.low %v27136_v14, %v27144_v53  ;;  %v11581_v33 = vcombine.high %v27136_v14, %v27144_v53  ;;  %v11564_v16 = vcombine.low %v27050_v12, %v27138_v19 }
 0xcd0   : > { %v11565_v25 = vcombine.high %v27050_v12, %v27138_v19  ;;  %v11528_v41 = vcombine.low %v11504_v46, %v11520_v50  ;;  %v11529_v7 = vcombine.high %v11504_v46, %v11520_v50  ;;  %v11544_v60 = vcombine.low %v11511_v1, %v11527_v34 }
 0xcd1   : > { %v11545_v58 = vcombine.high %v11511_v1, %v11527_v34  ;;  %v11588_v42 = vrot.slane %v11580_v26, %v24670_v24  ;;  %v11595_v13 = vrot.slane %v11581_v33, %v24670_v24  ;;  %v11572_v9 = vrot.slane %v11564_v16, %v24670_v24 }
 0xcd2   : > { %v11579_v40 = vrot.slane %v11565_v25, %v24670_v24  ;;  %v11972_v31 = vcombine.low %v11468_v62, %v11475_v29  ;;  %v22281_v50 = vcombine.high %v11468_v62, %v11475_v29  ;;  %v11988_v46 = vcombine.low %v11484_v63, %v11491_v22 }
 0xcd3   : > { %12502 = vrot.lane.b32.xlu1 %v27144_v53, %s29785_s17  ;;  %12456 = vrot.lane.b32.xlu0 %v27062_v17, %s29785_s17  ;;  %v22282_v34 = vcombine.high %v11484_v63, %v11491_v22  ;;  %v11536_v26 = vrot.slane %v11528_v41, %v24681_v38  ;;  %v11543_v33 = vrot.slane %v11529_v7, %v24681_v38 }
 0xcd4   : > { %v11552_v16 = vrot.slane %v11544_v60, %v24681_v38  ;;  %v11559_v25 = vrot.slane %v11545_v58, %v24681_v38  ;;  %v11596_v1 = vcombine.low %v11572_v9, %v11588_v42  ;;  %v11597_v48 = vcombine.high %v11572_v9, %v11588_v42 }
 0xcd5   : > { %v11612_v11 = vcombine.low %v11579_v40, %v11595_v13  ;;  %v11613_v20 = vcombine.high %v11579_v40, %v11595_v13  ;;  %v11936_v8 = vcombine.low %v11911_v4, %v11919_v23  ;;  %v11952_v45 = vcombine.low %v11927_v30, %v11935_v55 }
 0xcd6   : > { %v11937_v6 = vcombine.high %v11911_v4, %v11919_v23  ;;  %v11979_v43 = vrot.slane %v11972_v31, %v24670_v24  ;;  %v11987_v62 = vrot.slane %v22281_v50, %v24670_v24  ;;  %v11995_v22 = vrot.slane %v11988_v46, %v24670_v24 }
 0xcd7   : > { %v12003_v41 = vrot.slane %v22282_v34, %v24670_v24  ;;  %v12040_v7 = vcombine.low %v11536_v26, %v11543_v33  ;;  %v22283_v29 = vcombine.high %v11536_v26, %v11543_v33  ;;  %v12056_v60 = vcombine.low %v11552_v16, %v11559_v25 }
 0xcd8   : > { %v22284_v63 = vcombine.high %v11552_v16, %v11559_v25  ;;  %v11604_v58 = vrot.slane %v11596_v1, %v24681_v38  ;;  %v11611_v42 = vrot.slane %v11597_v48, %v24681_v38  ;;  %v11620_v13 = vrot.slane %v11612_v11, %v24681_v38 }
 0xcd9   : > { %v27150_v37 = vpop.permute.xlu1 %11298  ;;  %v11627_v9 = vrot.slane %v11613_v20, %v24681_v38  ;;  %v27253_v4 = vrot.slane %v11936_v8, %v24681_v38  ;;  %v27256_v23 = vrot.slane %v11952_v45, %v24681_v38  ;;  %v11953_v31 = vcombine.high %v11927_v30, %v11935_v55 }
 0xcda   : > { %v27152_v57 = vpop.permute.xlu0 %11296  ;;  %v12004_v50 = vcombine.low %v11979_v43, %v11987_v62  ;;  %v12020_v46 = vcombine.low %v11995_v22, %v12003_v41  ;;  %v12047_v34 = vrot.slane %v12040_v7, %v24670_v24  ;;  %v12055_v26 = vrot.slane %v22283_v29, %v24670_v24 }
 0xcdb   : > { %12472 = vrot.lane.b32.xlu1 %v27152_v57, %s29785_s17  ;;  %v12063_v33 = vrot.slane %v12056_v60, %v24670_v24  ;;  %v12071_v11 = vrot.slane %v22284_v63, %v24670_v24  ;;  %v12108_v16 = vcombine.low %v11604_v58, %v11611_v42  ;;  %v22285_v25 = vcombine.high %v11604_v58, %v11611_v42 }
 0xcdc   : > { %v12124_v1 = vcombine.low %v11620_v13, %v11627_v9  ;;  %v27267_v20 = vrot.slane %v11937_v6, %v24681_v38  ;;  %v22286_v30 = vcombine.high %v11620_v13, %v11627_v9  ;;  %v27276_v45 = vrot.slane %v11953_v31, %v24681_v38 }
 0xcdd   : > { %v27156_v59 = vpop.permute.xlu1 %11320  ;;  %v27281_v29 = vrot.slane %v12004_v50, %v24681_v38  ;;  %v12005_v6 = vcombine.high %v11979_v43, %v11987_v62  ;;  %v12021_v60 = vcombine.high %v11995_v22, %v12003_v41  ;;  %v27284_v63 = vrot.slane %v12020_v46, %v24681_v38 }
 0xcde   : > { %29788 = vst [vmem:[#allocation25_spill] sm:$0xff] %v27156_v59  ;;  %12488 = vrot.lane.b32.xlu0 %v27156_v59, %s29785_s17  ;;  %v27160_v5 = vpop.permute.xlu0 %11344  ;;  %v12072_v58 = vcombine.low %v12047_v34, %v12055_v26  ;;  %v12088_v42 = vcombine.low %v12063_v33, %v12071_v11  ;;  %v12073_v13 = vcombine.high %v12047_v34, %v12055_v26 }
 0xcdf   : > { %29789 = vst [vmem:[#allocation36_spill] sm:$0xff] %v27160_v5  ;;  %12504 = vrot.lane.b32.xlu1 %v27160_v5, %s29785_s17  ;;  %v12089_v55 = vcombine.high %v12063_v33, %v12071_v11  ;;  %v12115_v31 = vrot.slane %v12108_v16, %v24670_v24  ;;  %v12123_v47 = vrot.slane %v22285_v25, %v24670_v24 }
 0xce0   : > { %v12131_v7 = vrot.slane %v12124_v1, %v24670_v24  ;;  %v11632_v50 = vcombine.low %v27062_v17, %v27156_v59  ;;  %v11648_v43 = vcombine.low %v27152_v57, %v27160_v5  ;;  %v12139_v22 = vrot.slane %v22286_v30, %v24670_v24 }
 0xce1   : > { %v27170_v27 = vpop.permute.xlu1 %11346  ;;  %v27305_v34 = vrot.slane %v12005_v6, %v24681_v38  ;;  %v27308_v26 = vrot.slane %v12021_v60, %v24681_v38  ;;  %v11633_v33 = vcombine.high %v27062_v17, %v27156_v59  ;;  %v11649_v11 = vcombine.high %v27152_v57, %v27160_v5 }
 0xce2   : > { %12458 = vrot.lane.b32.xlu0 %v27060_v56, %s29785_s17  ;;  %v27168_v52 = vpop.permute.xlu0 %11322  ;;  %29791 = vst [vmem:[#allocation34_spill] sm:$0xff] %v27170_v27  ;;  %v27315_v16 = vrot.slane %v12072_v58, %v24681_v38  ;;  %v27318_v25 = vrot.slane %v12088_v42, %v24681_v38  ;;  %v27325_v60 = vrot.slane %v12073_v13, %v24681_v38 }
 0xce3   : > { %12474 = vrot.lane.b32.xlu1 %v27150_v37, %s29785_s17  ;;  %29790 = vst [vmem:[#allocation27_spill] sm:$0xff] %v27168_v52  ;;  %v27328_v46 = vrot.slane %v12089_v55, %v24681_v38  ;;  %v11640_v41 = vrot.slane %v11632_v50, %v24670_v24  ;;  %v11656_v58 = vrot.slane %v11648_v43, %v24670_v24 }
 0xce4   : > { %v12140_v42 = vcombine.low %v12115_v31, %v12123_v47  ;;  %v12156_v28 = vcombine.low %v12131_v7, %v12139_v22  ;;  %v12141_v30 = vcombine.high %v12115_v31, %v12123_v47  ;;  %v12157_v55 = vcombine.high %v12131_v7, %v12139_v22 }
 0xce5   : > { %v27250_v40 = vpop.permute.xlu1 %12448  ;;  %v11663_v50 = vrot.slane %v11649_v11, %v24670_v24  ;;  %v11664_v7 = vcombine.low %v11640_v41, %v11656_v58  ;;  %v11665_v31 = vcombine.high %v11640_v41, %v11656_v58 }
 0xce6   : > { %12490 = vrot.lane.b32.xlu0 %v27168_v52, %s29785_s17  ;;  %v27358_v11 = vrot.slane %v12156_v28, %v24681_v38  ;;  %v11717_v28 = vcombine.high %v27150_v37, %v27170_v27 }
 0xce7   : > { %12506 = vrot.lane.b32.xlu1 %v27170_v27, %s29785_s17 }
 0xcea   : > { %12460 = vrot.lane.b32.xlu0 %v27078_v21, %s29785_s17 }
 0xd17   : > { %v27262_v48 = vpop.permute.xlu1 %11324  ;;  %v27264_v8 = vpop.permute.xlu0 %11300 }
 0xd18   : > { %29792 = vst [vmem:[#allocation17_spill] sm:$0xff] %v27262_v48  ;;  %12492 = vrot.lane.b32.xlu0 %v27262_v48, %s29785_s17  ;;  %12476 = vrot.lane.b32.xlu1 %v27264_v8, %s29785_s17 }
 0xd1b   : > { %v27286_v9 = vpop.permute.xlu0 %11348 }
 0xd1c   : > { %29793 = vst [vmem:[#allocation26_spill] sm:$0xff] %v27286_v9  ;;  %12462 = vrot.lane.b32.xlu0 %v27092_v49, %s29785_s17  ;;  %12508 = vrot.lane.b32.xlu1 %v27286_v9, %s29785_s17  ;;  %v11647_v49 = vrot.slane %v11633_v33, %v24670_v24  ;;  %v27355_v33 = vrot.slane %v12140_v42, %v24681_v38 }
 0xd1d   : > { %v11716_v42 = vcombine.low %v27150_v37, %v27170_v27 }
 0xd1e   : > { %v12481_v62 = vpop.permute.xlu1 %12480  ;;  %v11680_v41 = vcombine.low %v11647_v49, %v11663_v50  ;;  %v11681_v58 = vcombine.high %v11647_v49, %v11663_v50  ;;  %v27382_v49 = vrot.slane %v11665_v31, %v24681_v38  ;;  %v11700_v50 = vcombine.low %v27060_v56, %v27168_v52 }
 0xd1f   : > { %v12465_v1 = vpop.permute.xlu0 %12464  ;;  %v12545_v48 = vcombine.high %v27250_v40, %v12481_v62  ;;  %v11724_v9 = vrot.slane %v11716_v42, %v24670_v24 }
 0xd20   : > { %v11695_v31 = vrot.slane %v11681_v58, %v24681_v38  ;;  %v11708_v58 = vrot.slane %v11700_v50, %v24670_v24 }
 0xd22   : > { %v27332_v51 = vpop.permute.xlu1 %11302  ;;  %v11732_v5 = vcombine.low %v11708_v58, %v11724_v9 }
 0xd23   : > { %29794 = vst [vmem:[#allocation35_spill] sm:$0xff] %v27332_v51  ;;  %12478 = vrot.lane.b32.xlu1 %v27332_v51, %s29785_s17  ;;  %v12544_v51 = vcombine.low %v27250_v40, %v12481_v62  ;;  %v12497_v6 = vpop.permute.xlu0 %12496  ;;  %v27363_v40 = vrot.slane %v12141_v30, %v24681_v38  ;;  %v27366_v62 = vrot.slane %v12157_v55, %v24681_v38 }
 0xd24   : > { %v12560_v21 = vcombine.low %v12465_v1, %v12497_v6  ;;  %v12561_v43 = vcombine.high %v12465_v1, %v12497_v6  ;;  %v12559_v1 = vrot.slane %v12545_v48, %v24670_v24  ;;  %v27379_v55 = vrot.slane %v11664_v7, %v24681_v38 }
 0xd25   : > { %29796 = vst [vmem:[#allocation5_spill] sm:$0xff] %v27363_v40  ;;  %29797 = vst [vmem:[#allocation8_spill] sm:$0xff] %v27366_v62  ;;  %v12552_v47 = vrot.slane %v12544_v51, %v24670_v24  ;;  %v11701_v51 = vcombine.high %v27060_v56, %v27168_v52  ;;  %v11688_v7 = vrot.slane %v11680_v41, %v24681_v38 }
 0xd26   : > { %v27352_v22 = vpop.permute.xlu1 %11350  ;;  %v12568_v6 = vrot.slane %v12560_v21, %v24670_v24  ;;  %v12575_v30 = vrot.slane %v12561_v43, %v24670_v24  ;;  %v27404_v41 = vrot.slane %v11717_v28, %v24670_v24 }
 0xd27   : > { %29795 = vst [vmem:[#allocation6_spill] sm:$0xff] %v27352_v22  ;;  %12510 = vrot.lane.b32.xlu1 %v27352_v22, %s29785_s17  ;;  %v27376_v13 = vpop.permute.xlu0 %11326  ;;  %v27408_v42 = vrot.slane %v11701_v51, %v24670_v24  ;;  %v12192_v28 = vcombine.low %v11688_v7, %v11695_v31 }
 0xd28   : > { %29798 = vst [vmem:[#allocation7_spill] sm:$0xff] %v27376_v13  ;;  %12494 = vrot.lane.b32.xlu0 %v27376_v13, %s29785_s17  ;;  %v12576_v21 = vcombine.low %v12552_v47, %v12568_v6  ;;  %v12577_v48 = vcombine.high %v12552_v47, %v12568_v6  ;;  %v12592_v43 = vcombine.low %v12559_v1, %v12575_v30  ;;  %s297_s17 = sand.u32 1, %s24301_s28  }
 0xd29   : > { %v12593_v22 = vcombine.high %v12559_v1, %v12575_v30  ;;  %s21995_s10 = scalar_lea.sflag [#allocation3], %s297_s17 }
 0xd2a   : > { %v12467_v27 = vpop.permute.xlu1 %12466  ;;  %v12584_v56 = vrot.slane %v12576_v21, %v24681_v38  ;;  %v12591_v13 = vrot.slane %v12577_v48, %v24681_v38  ;;  %v12600_v47 = vrot.slane %v12592_v43, %v24681_v38 }
 0xd2b   : > { %13632 = vrot.lane.b32.xlu1 %v27028_v3, %s29799_s23  ;;  %v12607_v1 = vrot.slane %v12593_v22, %v24681_v38  ;;  %v12451_v6 = vpop.permute.xlu0 %12450  ;;  %v12176_v3 = vcombine.low %v27379_v55, %v27382_v49  ;;  %v22287_v22 = vcombine.high %v27379_v55, %v27382_v49  ;;  %v11733_v55 = vcombine.high %v11708_v58, %v11724_v9 }
 0xd2c   : > { %13648 = vrot.lane.b32.xlu0 %v27084_v39, %s29799_s23  ;;  %v13088_v30 = vcombine.low %v12584_v56, %v12591_v13  ;;  %v22295_v21 = vcombine.high %v12584_v56, %v12591_v13  ;;  %v11748_v49 = vcombine.low %v27408_v42, %v27404_v41 }
 0xd2d   : > { %v13104_v48 = vcombine.low %v12600_v47, %v12607_v1  ;;  %v22296_v43 = vcombine.high %v12600_v47, %v12607_v1  ;;  %v22288_v1 = vcombine.high %v11688_v7, %v11695_v31 }
 0xd2e   : > { %v13095_v52 = vrot.slane %v13088_v30, %v24670_v24  ;;  %v13103_v39 = vrot.slane %v22295_v21, %v24670_v24  ;;  %v12499_v47 = vpop.permute.xlu1 %12498 }
 0xd2f   : > { %13664 = vrot.lane.b32.xlu1 %v27086_v35, %s29799_s23  ;;  %v13111_v56 = vrot.slane %v13104_v48, %v24670_v24  ;;  %v13119_v13 = vrot.slane %v22296_v43, %v24670_v24  ;;  %v12483_v35 = vpop.permute.xlu0 %12482  ;;  %v27433_v48 = vrot.slane %v12176_v3, %v24670_v24  ;;  %v12628_v7 = vcombine.low %v12467_v27, %v12499_v47 }
 0xd30   : > { %13650 = vrot.lane.b32.xlu0 %v27104_v2, %s29799_s23  ;;  %v13120_v51 = vcombine.low %v13095_v52, %v13103_v39  ;;  %v12629_v31 = vcombine.high %v12467_v27, %v12499_v47  ;;  %v12612_v9 = vcombine.low %v12451_v6, %v12483_v35  ;;  %v12613_v58 = vcombine.high %v12451_v6, %v12483_v35 }
 0xd31   : > { %v13136_v21 = vcombine.low %v13111_v56, %v13119_v13  ;;  %v13121_v43 = vcombine.high %v13095_v52, %v13103_v39  ;;  %v13137_v50 = vcombine.high %v13111_v56, %v13119_v13  ;;  %v12636_v30 = vrot.slane %v12628_v7, %v24670_v24 }
 0xd32   : > { %v13128_v2 = vrot.slane %v13120_v51, %v24681_v38  ;;  %v12643_v40 = vrot.slane %v12629_v31, %v24670_v24  ;;  %v12627_v3 = vrot.slane %v12613_v58, %v24670_v24  ;;  %v27446_v27 = vrot.slane %v22287_v22, %v24670_v24 }
 0xd33   : > { %13680 = vrot.lane.b32.xlu1 %v27094_v36, %s29799_s23  ;;  %v12453_v59 = vpop.permute.xlu0 %12452  ;;  %v13144_v62 = vrot.slane %v13136_v21, %v24681_v38  ;;  %v12620_v36 = vrot.slane %v12612_v9, %v24670_v24  ;;  %v27449_v6 = vrot.slane %v12192_v28, %v24670_v24  ;;  %v27452_v51 = vrot.slane %v22288_v1, %v24670_v24 }
 0xd34   : > { %13652 = vrot.lane.b32.xlu0 %v27124_v15, %s29799_s23  ;;  %v12660_v13 = vcombine.low %v12627_v3, %v12643_v40  ;;  %v12661_v47 = vcombine.high %v12627_v3, %v12643_v40  ;;  %v27455_v35 = vrot.slane %v11732_v5, %v24681_v38  ;;  %v27458_v15 = vrot.slane %v11733_v55, %v24681_v38 }
 0xd35   : > { %v13152_v52 = vcombine.low %v13128_v2, %v13144_v62  ;;  %v12644_v39 = vcombine.low %v12620_v36, %v12636_v30  ;;  %v12645_v56 = vcombine.high %v12620_v36, %v12636_v30  ;;  %v27462_v28 = vrot.slane %v13121_v43, %v24681_v38 }
 0xd36   : > { %v27465_v1 = vrot.slane %v13137_v50, %v24681_v38  ;;  %v12668_v5 = vrot.slane %v12660_v13, %v24681_v38  ;;  %v12675_v21 = vrot.slane %v12661_v47, %v24681_v38  ;;  %v13153_v50 = vcombine.high %v13128_v2, %v13144_v62 }
 0xd37   : > { %13634 = vrot.lane.b32.xlu1 %v27034_v61, %s29799_s23  ;;  %23337 = vmatpush3.xpose.msk.msra.mxu0 %vm317_vm0, %v13152_v52  ;;  %v12652_v30 = vrot.slane %v12644_v39, %v24681_v38  ;;  %v12659_v40 = vrot.slane %v12645_v56, %v24681_v38  ;;  %v29800_v36 = vcombine.low %v27253_v4, %v27256_v23 }
 0xd38   : > { %13654 = vrot.lane.b32.xlu0 %v27136_v14, %s29799_s23  ;;  %23341 = vmatprep.subr.mxu0 %v29741_v32  ;;  %v13172_v58 = vcombine.low %v12668_v5, %v12675_v21  ;;  %v22298_v43 = vcombine.high %v12668_v5, %v12675_v21  ;;  %v27481_v3 = vrot.slane %v11748_v49, %v24681_v38 }
 0xd39   : > { %v12469_v61 = vpop.permute.xlu1 %12468  ;;  %v12485_v22 = vpop.permute.xlu0 %12484  ;;  %v13156_v31 = vcombine.low %v12652_v30, %v12659_v40  ;;  %v22297_v9 = vcombine.high %v12652_v30, %v12659_v40  ;;  %v13154_v62 = vcombine.low %v27462_v28, %v27465_v1 }
 0xd3a   : > { %v12680_v55 = vcombine.low %v12453_v59, %v12485_v22  ;;  %v12681_v7 = vcombine.high %v12453_v59, %v12485_v22  ;;  %23339 = vmatmul.mubr.msk.f32.vlgmr.msra.gmra.mrb[96].mxu0 %vm317_vm0, %v29800_v36  ;;  %v13179_v39 = vrot.slane %v13172_v58, %v24670_v24  ;;  %v13187_v49 = vrot.slane %v22298_v43, %v24670_v24 }
 0xd3b   : > { %13666 = vrot.lane.b32.xlu1 %v27116_v54, %s29799_s23  ;;  %23342 = vmatpush3.xpose.msk.msra.mxu0 %vm317_vm0, %v13153_v50  ;;  %v13163_v2 = vrot.slane %v13156_v31, %v24670_v24  ;;  %v13171_v52 = vrot.slane %v22297_v9, %v24670_v24  ;;  %v29801_v22 = vcombine.high %v27408_v42, %v27404_v41 }
 0xd3c   : > { %v12688_v59 = vrot.slane %v12680_v55, %v24670_v24  ;;  %23343 = vmatprep.mubr.msk.f32.mxu0 %vm24316_vm2, %v29741_v32  ;;  %13656 = vrot.lane.b32.xlu0 %v27152_v57, %s29799_s23  ;;  %v12695_v47 = vrot.slane %v12681_v7, %v24670_v24  ;;  %v13204_v21 = vcombine.low %v13179_v39, %v13187_v49 }
 0xd3d   : > { %v12501_v14 = vpop.permute.xlu1 %12500  ;;  %v12455_v54 = vpop.permute.xlu0 %12454  ;;  %23346 = vmatprep.subr.mxu0 %v29741_v32  ;;  %v27503_v30 = vrot.slane %v29801_v22, %v24681_v38  ;;  %v13188_v40 = vcombine.low %v13163_v2, %v13171_v52  ;;  %v13189_v5 = vcombine.high %v13163_v2, %v13171_v52  ;;  %v29802_v57 = vcombine.high %v27253_v4, %v27256_v23 }
 0xd3e   : > { %v12696_v56 = vcombine.low %v12469_v61, %v12501_v14  ;;  %v12697_v13 = vcombine.high %v12469_v61, %v12501_v14  ;;  %v13155_v41 = vcombine.high %v27462_v28, %v27465_v1  ;;  %v13205_v42 = vcombine.high %v13179_v39, %v13187_v49 }
 0xd3f   : > { %13682 = vrot.lane.b32.xlu1 %v27110_v18, %s29799_s23  ;;  %23344 = vmatmul.mubr.msk.f32.vlgmr.msra.gmra.mrb[98].mxu0 %vm317_vm0, %v29802_v57  ;;  %v13196_v4 = vrot.slane %v13188_v40, %v24681_v38  ;;  %v13212_v23 = vrot.slane %v13204_v21, %v24681_v38  ;;  %v29803_v1 = vcombine.low %v27267_v20, %v27276_v45 }
 0xd40   : > { %v12704_v61 = vrot.slane %v12696_v56, %v24670_v24  ;;  %v12711_v18 = vrot.slane %v12697_v13, %v24670_v24  ;;  %23347 = vmatpush3.xpose.msk.msra.mxu0 %vm317_vm0, %v13154_v62  ;;  %23348 = vmatprep.mubr.msk.f32.mxu0 %vm24316_vm2, %v29741_v32  ;;  %v27528_v36 = vrot.slane %v13189_v5, %v24681_v38 }
 0xd41   : > { %v12471_v55 = vpop.permute.xlu1 %12470  ;;  %v12487_v7 = vpop.permute.xlu0 %12486  ;;  %13658 = vrot.lane.b32.xlu0 %v27150_v37, %s29799_s23  ;;  %23351 = vmatprep.subr.mxu0 %v29741_v32  ;;  %v13220_v37 = vcombine.low %v13196_v4, %v13212_v23  ;;  %v13219_v21 = vrot.slane %v13205_v42, %v24681_v38  ;;  %v29805_v42 = vcombine.low %v27281_v29, %v27284_v63 }
 0xd42   : > { %v12712_v50 = vcombine.low %v12688_v59, %v12704_v61  ;;  %v12713_v31 = vcombine.high %v12688_v59, %v12704_v61  ;;  %v12728_v9 = vcombine.low %v12695_v47, %v12711_v18  ;;  %v12729_v58 = vcombine.high %v12695_v47, %v12711_v18 }
 0xd43   : > { %13636 = vrot.lane.b32.xlu1 %v27044_v0, %s29799_s23  ;;  %v12748_v43 = vcombine.low %v12455_v54, %v12487_v7  ;;  %v12749_v28 = vcombine.high %v12455_v54, %v12487_v7  ;;  %23349 = vmatmul.mubr.msk.f32.vlgmr.msra.gmra.mrb[100].mxu0 %vm317_vm0, %v29803_v1  ;;  %v13221_v1 = vcombine.high %v13196_v4, %v13212_v23 }
 0xd44   : > { %v12720_v14 = vrot.slane %v12712_v50, %v24681_v38  ;;  %v12727_v59 = vrot.slane %v12713_v31, %v24681_v38  ;;  %v12736_v62 = vrot.slane %v12728_v9, %v24681_v38  ;;  %v12743_v2 = vrot.slane %v12729_v58, %v24681_v38  ;;  %23352 = vmatpush3.xpose.msk.msra.mxu0 %vm317_vm0, %v13155_v41 }
 0xd45   : > { %v12503_v0 = vpop.permute.xlu1 %12502  ;;  %v12756_v39 = vrot.slane %v12748_v43, %v24670_v24  ;;  %v12763_v49 = vrot.slane %v12749_v28, %v24670_v24  ;;  %23357 = vmatpush3.xpose.msk.msra.mxu1 %vm317_vm0, %v13220_v37  ;;  %23353 = vmatprep.mubr.msk.f32.mxu0 %vm24316_vm2, %v29741_v32  ;;  %v12457_v9 = vpop.permute.xlu0 %12456 }
 0xd46   : > { %v12764_v54 = vcombine.low %v12471_v55, %v12503_v0  ;;  %v12765_v52 = vcombine.high %v12471_v55, %v12503_v0  ;;  %v13224_v56 = vcombine.low %v12720_v14, %v12727_v59  ;;  %v22299_v13 = vcombine.high %v12720_v14, %v12727_v59  ;;  %13660 = vrot.lane.b32.xlu0 %v27264_v8, %s29799_s23 }
 0xd47   : > { %v13240_v47 = vcombine.low %v12736_v62, %v12743_v2  ;;  %v22300_v22 = vcombine.high %v12736_v62, %v12743_v2  ;;  %13668 = vrot.lane.b32.xlu1 %v27122_v10, %s29799_s23  ;;  %v29804_v55 = vcombine.high %v27267_v20, %v27276_v45  ;;  %23361 = vmatprep.subr.mxu0 %v29741_v32 }
 0xd48   : > { %v12772_v40 = vrot.slane %v12764_v54, %v24670_v24  ;;  %v12779_v5 = vrot.slane %v12765_v52, %v24670_v24  ;;  %v13231_v57 = vrot.slane %v13224_v56, %v24670_v24  ;;  %v13239_v61 = vrot.slane %v22299_v13, %v24670_v24  ;;  %23359 = vmatmul.mubr.msk.f32.vlgmr.msra.gmra.mrb[80].mxu1 %vm317_vm0, %v29805_v42 }
 0xd49   : > { %v13247_v18 = vrot.slane %v13240_v47, %v24670_v24  ;;  %v13255_v10 = vrot.slane %v22300_v22, %v24670_v24  ;;  %23354 = vmatmul.mubr.msk.f32.vlgmr.msra.gmra.mrb[102].mxu0 %vm317_vm0, %v29804_v55  ;;  %23366 = vmatprep.subr.mxu1 %v29741_v32  ;;  %v13222_v2 = vcombine.low %v27528_v36, %v13219_v21 }
 0xd4a   : > { %v12780_v41 = vcombine.low %v12756_v39, %v12772_v40  ;;  %v12781_v7 = vcombine.high %v12756_v39, %v12772_v40  ;;  %v12796_v50 = vcombine.low %v12763_v49, %v12779_v5  ;;  %v12797_v31 = vcombine.high %v12763_v49, %v12779_v5  ;;  %23362 = vmatpush3.xpose.msk.msra.mxu0 %vm317_vm0, %v13221_v1 }
 0xd4b   : > { %v13256_v58 = vcombine.low %v13231_v57, %v13239_v61  ;;  %v13257_v43 = vcombine.high %v13231_v57, %v13239_v61  ;;  %v13272_v28 = vcombine.low %v13247_v18, %v13255_v10  ;;  %v13273_v59 = vcombine.high %v13247_v18, %v13255_v10  ;;  %13684 = vrot.lane.b32.xlu1 %v27130_v44, %s29799_s23 }
 0xd4c   : > { %v12788_v20 = vrot.slane %v12780_v41, %v24681_v38  ;;  %v12795_v45 = vrot.slane %v12781_v7, %v24681_v38  ;;  %v12804_v37 = vrot.slane %v12796_v50, %v24681_v38  ;;  %v12811_v14 = vrot.slane %v12797_v31, %v24681_v38  ;;  %23363 = vmatprep.mubr.msk.f32.mxu0 %vm24316_vm2, %v29741_v32 }
 0xd4d   : > { %v12473_v62 = vpop.permute.xlu1 %12472  ;;  %v13264_v4 = vrot.slane %v13256_v58, %v24681_v38  ;;  %23367 = vmatpush3.xpose.msk.msra.mxu1 %vm317_vm0, %v13222_v2  ;;  %23368 = vmatprep.mubr.msk.f32.mxu1 %vm24316_vm2, %v29741_v32  ;;  %v13223_v39 = vcombine.high %v27528_v36, %v13219_v21  ;;  %v13280_v49 = vrot.slane %v13272_v28, %v24681_v38 }
 0xd4e   : > { %v13292_v23 = vcombine.low %v12788_v20, %v12795_v45  ;;  %v22301_v0 = vcombine.high %v12788_v20, %v12795_v45  ;;  %v13308_v54 = vcombine.low %v12804_v37, %v12811_v14  ;;  %v22302_v52 = vcombine.high %v12804_v37, %v12811_v14  ;;  %23371 = vmatprep.subr.mxu0 %v29741_v32 }
 0xd4f   : > { %v12208_v44 = vcombine.low %v27433_v48, %v27446_v27  ;;  %v29806_v36 = vcombine.high %v27281_v29, %v27284_v63  ;;  %23376 = vmatprep.subr.mxu1 %v29741_v32  ;;  %v13288_v61 = vcombine.low %v13264_v4, %v13280_v49  ;;  %v29807_v55 = vcombine.low %v27305_v34, %v27308_v26 }
 0xd50   : > { %v27580_v56 = vrot.slane %v13292_v23, %v24670_v24  ;;  %v27583_v13 = vrot.slane %v22301_v0, %v24670_v24  ;;  %v27586_v47 = vrot.slane %v13308_v54, %v24670_v24  ;;  %v27589_v22 = vrot.slane %v22302_v52, %v24670_v24  ;;  %v12489_v40 = vpop.permute.xlu0 %12488  ;;  %13638 = vrot.lane.b32.xlu1 %v27050_v12, %s29799_s23 }
 0xd51   : > { %23364 = vmatmul.mubr.msk.f32.vlgmr.msra.gmra.mrb[104].mxu0 %vm317_vm0, %v29806_v36  ;;  %v12816_v5 = vcombine.low %v12457_v9, %v12489_v40  ;;  %v12817_v21 = vcombine.high %v12457_v9, %v12489_v40  ;;  %v12505_v57 = vpop.permute.xlu1 %12504  ;;  %23369 = vmatmul.mubr.msk.f32.vlgmr.msra.gmra.mrb[82].mxu1 %vm317_vm0, %v29807_v55  ;;  %v27606_v29 = vrot.slane %v13257_v43, %v24681_v38 }
 0xd52   : > { %v13324_v18 = vcombine.low %v27580_v56, %v27583_v13  ;;  %v13340_v10 = vcombine.low %v27586_v47, %v27589_v22  ;;  %v27609_v63 = vrot.slane %v13273_v59, %v24681_v38  ;;  %v12832_v50 = vcombine.low %v12473_v62, %v12505_v57  ;;  %23372 = vmatpush3.xpose.msk.msra.mxu0 %vm317_vm0, %v13223_v39 }
 0xd53   : > { %v12824_v41 = vrot.slane %v12816_v5, %v24670_v24  ;;  %v12831_v7 = vrot.slane %v12817_v21, %v24670_v24  ;;  %v12833_v31 = vcombine.high %v12473_v62, %v12505_v57  ;;  %v13325_v9 = vcombine.high %v27580_v56, %v27583_v13  ;;  %23377 = vmatpush3.xpose.msk.msra.mxu1 %vm317_vm0, %v13288_v61 }
 0xd54   : > { %v12459_v42 = vpop.permute.xlu0 %12458  ;;  %v12224_v58 = vcombine.low %v27449_v6, %v27452_v51  ;;  %v12209_v43 = vcombine.high %v27433_v48, %v27446_v27  ;;  %v12840_v28 = vrot.slane %v12832_v50, %v24670_v24  ;;  %23373 = vmatprep.mubr.msk.f32.mxu0 %vm24316_vm2, %v29741_v32  ;;  %23378 = vmatprep.mubr.msk.f32.mxu1 %vm24316_vm2, %v29741_v32 }
 0xd55   : > { %v12847_v1 = vrot.slane %v12833_v31, %v24670_v24  ;;  %v12475_v20 = vpop.permute.xlu1 %12474  ;;  %v27630_v12 = vrot.slane %v13324_v18, %v24681_v38  ;;  %v29808_v45 = vcombine.high %v27305_v34, %v27308_v26  ;;  %23381 = vmatprep.subr.mxu0 %v29741_v32  ;;  %v13289_v37 = vcombine.high %v13264_v4, %v13280_v49 }
 0xd56   : > { %v13290_v14 = vcombine.low %v27606_v29, %v27609_v63  ;;  %v27640_v59 = vrot.slane %v13340_v10, %v24681_v38  ;;  %v12848_v62 = vcombine.low %v12824_v41, %v12840_v28  ;;  %v12849_v2 = vcombine.high %v12824_v41, %v12840_v28  ;;  %23386 = vmatprep.subr.mxu1 %v29741_v32 }
 0xd57   : > { %23374 = vmatmul.mubr.msk.f32.vlgmr.msra.gmra.mrb[106].mxu0 %vm317_vm0, %v29808_v45  ;;  %v12864_v23 = vcombine.low %v12831_v7, %v12847_v1  ;;  %v12865_v0 = vcombine.high %v12831_v7, %v12847_v1  ;;  %v29809_v54 = vcombine.low %v27315_v16, %v27318_v25  ;;  %v13341_v34 = vcombine.high %v27586_v47, %v27589_v22 }
 0xd58   : > { %23382 = vmatpush3.xpose.msk.msra.mxu0 %vm317_vm0, %v13289_v37  ;;  %v12491_v26 = vpop.permute.xlu0 %12490  ;;  %v13291_v4 = vcombine.high %v27606_v29, %v27609_v63  ;;  %v13356_v52 = vcombine.low %v27630_v12, %v27640_v59  ;;  %v12856_v39 = vrot.slane %v12848_v62, %v24681_v38  ;;  %v12863_v49 = vrot.slane %v12849_v2, %v24681_v38 }
 0xd59   : > { %23379 = vmatmul.mubr.msk.f32.vlgmr.msra.gmra.mrb[84].mxu1 %vm317_vm0, %v29809_v54  ;;  %v12872_v56 = vrot.slane %v12864_v23, %v24681_v38  ;;  %v12879_v13 = vrot.slane %v12865_v0, %v24681_v38  ;;  %v12507_v47 = vpop.permute.xlu1 %12506  ;;  %13670 = vrot.lane.b32.xlu1 %v27138_v19, %s29799_s23  ;;  %v12884_v22 = vcombine.low %v12459_v42, %v12491_v26 }
 0xd5a   : > { %23387 = vmatpush3.xpose.msk.msra.mxu1 %vm317_vm0, %v13290_v14  ;;  %23383 = vmatprep.mubr.msk.f32.mxu0 %vm24316_vm2, %v29741_v32  ;;  %v12885_v40 = vcombine.high %v12459_v42, %v12491_v26  ;;  %v12900_v36 = vcombine.low %v12475_v20, %v12507_v47  ;;  %v13360_v5 = vcombine.low %v12856_v39, %v12863_v49 }
 0xd5b   : > { %v22303_v21 = vcombine.high %v12856_v39, %v12863_v49  ;;  %v13376_v57 = vcombine.low %v12872_v56, %v12879_v13  ;;  %v22304_v61 = vcombine.high %v12872_v56, %v12879_v13  ;;  %23388 = vmatprep.mubr.msk.f32.mxu1 %vm24316_vm2, %v29741_v32  ;;  %v12892_v18 = vrot.slane %v12884_v22, %v24670_v24 }
 0xd5c   : > { %v12899_v10 = vrot.slane %v12885_v40, %v24670_v24  ;;  %v12901_v55 = vcombine.high %v12475_v20, %v12507_v47  ;;  %v12908_v19 = vrot.slane %v12900_v36, %v24670_v24  ;;  %v29810_v29 = vcombine.high %v27315_v16, %v27318_v25  ;;  %23391 = vmatprep.subr.mxu0 %v29741_v32 }
 0xd5d   : > { %v27673_v63 = vrot.slane %v13360_v5, %v24670_v24  ;;  %v27676_v41 = vrot.slane %v22303_v21, %v24670_v24  ;;  %v27679_v7 = vrot.slane %v13376_v57, %v24670_v24  ;;  %v27682_v50 = vrot.slane %v22304_v61, %v24670_v24  ;;  %23396 = vmatprep.subr.mxu1 %v29741_v32 }
 0xd5e   : > { %23384 = vmatmul.mubr.msk.f32.vlgmr.msra.gmra.mrb[108].mxu0 %vm317_vm0, %v29810_v29  ;;  %v29811_v31 = vcombine.low %v27325_v60, %v27328_v46  ;;  %v12915_v16 = vrot.slane %v12901_v55, %v24670_v24  ;;  %v12916_v25 = vcombine.low %v12892_v18, %v12908_v19  ;;  %v12917_v42 = vcombine.high %v12892_v18, %v12908_v19  ;;  %v29818_v19 = vld [vmem:[#allocation25_spill] sm:$0xff] }
 0xd5f   : > { %v13392_v28 = vcombine.low %v27673_v63, %v27676_v41  ;;  %v13408_v1 = vcombine.low %v27679_v7, %v27682_v50  ;;  %23392 = vmatpush3.xpose.msk.msra.mxu0 %vm317_vm0, %v13291_v4  ;;  %v13339_v20 = vrot.slane %v13325_v9, %v24681_v38  ;;  %v13355_v45 = vrot.slane %v13341_v34, %v24681_v38 }
 0xd60   : > { %23389 = vmatmul.mubr.msk.f32.vlgmr.msra.gmra.mrb[86].mxu1 %vm317_vm0, %v29811_v31  ;;  %v12924_v37 = vrot.slane %v12916_v25, %v24681_v38  ;;  %v12931_v14 = vrot.slane %v12917_v42, %v24681_v38  ;;  %v12932_v62 = vcombine.low %v12899_v10, %v12915_v16  ;;  %v12933_v2 = vcombine.high %v12899_v10, %v12915_v16 }
 0xd61   : > { %23397 = vmatpush3.xpose.msk.msra.mxu1 %vm317_vm0, %v13356_v52  ;;  %v12244_v23 = vcombine.low %v27455_v35, %v27458_v15  ;;  %v22289_v0 = vcombine.high %v27455_v35, %v27458_v15  ;;  %13686 = vrot.lane.b32.xlu1 %v27144_v53, %s29799_s23  ;;  %v12225_v9 = vcombine.high %v27449_v6, %v27452_v51  ;;  %v29815_v51 = vld [vmem:[#allocation5_spill] sm:$0xff] }
 0xd62   : > { %23393 = vmatprep.mubr.msk.f32.mxu0 %vm24316_vm2, %v29741_v32  ;;  %v12940_v54 = vrot.slane %v12932_v62, %v24681_v38  ;;  %v12947_v34 = vrot.slane %v12933_v2, %v24681_v38  ;;  %v13428_v26 = vcombine.low %v12924_v37, %v12931_v14  ;;  %v22305_v4 = vcombine.high %v12924_v37, %v12931_v14 }
 0xd63   : > { %23398 = vmatprep.mubr.msk.f32.mxu1 %vm24316_vm2, %v29741_v32  ;;  %v12260_v35 = vcombine.low %v27481_v3, %v27503_v30  ;;  %v29812_v53 = vcombine.high %v27325_v60, %v27328_v46  ;;  %v29813_v15 = vcombine.low %v27355_v33, %v27358_v11  ;;  %v13357_v52 = vcombine.high %v27630_v12, %v27640_v59 }
 0xd64   : > { %v13358_v39 = vcombine.low %v13339_v20, %v13355_v45  ;;  %v13444_v49 = vcombine.low %v12940_v54, %v12947_v34  ;;  %v22306_v56 = vcombine.high %v12940_v54, %v12947_v34  ;;  %23401 = vmatprep.subr.mxu0 %v29741_v32  ;;  %v13400_v13 = vrot.slane %v13392_v28, %v24681_v38  ;;  %v29819_v28 = vld [vmem:[#allocation36_spill] sm:$0xff]  ;;  %v29820_v34 = vld [vmem:[#allocation18_spill] sm:$0xff] }
 0xd65   : > { %23394 = vmatmul.mubr.msk.f32.vlgmr.msra.gmra.mrb[110].mxu0 %vm317_vm0, %v29812_v53  ;;  %23399 = vmatmul.mubr.msk.f32.vlgmr.msra.gmra.mrb[88].mxu1 %vm317_vm0, %v29813_v15  ;;  %v13416_v47 = vrot.slane %v13408_v1, %v24681_v38  ;;  %v22290_v46 = vcombine.high %v27481_v3, %v27503_v30  ;;  %v27733_v60 = vrot.slane %v13428_v26, %v24670_v24  ;;  %v29821_v15 = vld [vmem:[#allocation26_spill] sm:$0xff] }
 0xd66   : > { %v27736_v22 = vrot.slane %v22305_v4, %v24670_v24  ;;  %23406 = vmatprep.subr.mxu1 %v29741_v32  ;;  %23402 = vmatpush3.xpose.msk.msra.mxu0 %vm317_vm0, %v13357_v52  ;;  %v13393_v12 = vcombine.high %v27673_v63, %v27676_v41  ;;  %v13409_v59 = vcombine.high %v27679_v7, %v27682_v50 }
 0xd67   : > { %v27745_v40 = vrot.slane %v13444_v49, %v24670_v24  ;;  %v27748_v3 = vrot.slane %v22306_v56, %v24670_v24  ;;  %23407 = vmatpush3.xpose.msk.msra.mxu1 %vm317_vm0, %v13358_v39  ;;  %13640 = vrot.lane.b32.xlu1 %v27062_v17, %s29799_s23  ;;  %v12216_v30 = vrot.slane %v12208_v44, %v24681_v38  ;;  %v29822_v56 = vld [vmem:[#allocation27_spill] sm:$0xff] }
 0xd68   : > { %23403 = vmatprep.mubr.msk.f32.mxu0 %vm24316_vm2, %v29741_v32  ;;  %v12232_v36 = vrot.slane %v12224_v58, %v24681_v38  ;;  %v27764_v5 = vrot.slane %v12244_v23, %v24670_v24  ;;  %23408 = vmatprep.mubr.msk.f32.mxu1 %vm24316_vm2, %v29741_v32  ;;  %v29814_v17 = vcombine.high %v27355_v33, %v27358_v11  ;;  %v29816_v58 = vld [vmem:[#allocation8_spill] sm:$0xff] }
 0xd69   : > { %v13359_v21 = vcombine.high %v13339_v20, %v13355_v45  ;;  %v13424_v57 = vcombine.low %v13400_v13, %v13416_v47  ;;  %v12259_v44 = vrot.slane %v22289_v0, %v24670_v24  ;;  %v13460_v61 = vcombine.low %v27733_v60, %v27736_v22  ;;  %23411 = vmatprep.subr.mxu0 %v29741_v32 }
 0xd6a   : > { %23404 = vmatmul.mubr.msk.f32.vlgmr.msra.gmra.mrb[112].mxu0 %vm317_vm0, %v29814_v17  ;;  %v13476_v6 = vcombine.low %v27745_v40, %v27748_v3  ;;  %v29817_v18 = vcombine.low %v29815_v51, %v29816_v58  ;;  %v12267_v33 = vrot.slane %v12260_v35, %v24670_v24  ;;  %23416 = vmatprep.subr.mxu1 %v29741_v32 }
 0xd6b   : > { %23412 = vmatpush3.xpose.msk.msra.mxu0 %vm317_vm0, %v13359_v21  ;;  %v13407_v11 = vrot.slane %v13393_v12, %v24681_v38  ;;  %v13423_v10 = vrot.slane %v13409_v59, %v24681_v38  ;;  %v12275_v55 = vrot.slane %v22290_v46, %v24670_v24  ;;  %13672 = vrot.lane.b32.xlu1 %v29818_v19, %s29799_s23  ;;  %v29824_v46 = vld [vmem:[#allocation22_spill] sm:$0xff] }
 0xd6c   : > { %23409 = vmatmul.mubr.msk.f32.vlgmr.msra.gmra.mrb[90].mxu1 %vm317_vm0, %v29817_v18  ;;  %23413 = vmatprep.mubr.msk.f32.mxu0 %vm24316_vm2, %v29741_v32  ;;  %v12175_v29 = vcombine.high %v29815_v51, %v29816_v58  ;;  %v13425_v63 = vcombine.high %v13400_v13, %v13416_v47  ;;  %v12223_v41 = vrot.slane %v12209_v43, %v24681_v38  ;;  %v29823_v47 = vld [vmem:[#allocation17_spill] sm:$0xff]  ;;  %v29826_v18 = vld [vmem:[#allocation7_spill] sm:$0xff] }
 0xd6d   : > { %23417 = vmatpush3.xpose.msk.msra.mxu1 %vm317_vm0, %v13424_v57  ;;  %23421 = vmatprep.subr.mxu0 %v29741_v32  ;;  %v12239_v7 = vrot.slane %v12225_v9, %v24681_v38  ;;  %v12240_v50 = vcombine.low %v12216_v30, %v12232_v36  ;;  %v13468_v31 = vrot.slane %v13460_v61, %v24681_v38 }
 0xd6e   : > { %23414 = vmatmul.mubr.msk.f32.vlgmr.msra.gmra.mrb[114].mxu0 %vm317_vm0, %v12175_v29  ;;  %23418 = vmatprep.mubr.msk.f32.mxu1 %vm24316_vm2, %v29741_v32  ;;  %v13484_v16 = vrot.slane %v13476_v6, %v24681_v38  ;;  %v13426_v25 = vcombine.low %v13407_v11, %v13423_v10  ;;  %v12276_v48 = vcombine.low %v27764_v5, %v12259_v44 }
 0xd6f   : > { %23422 = vmatpush3.xpose.msk.msra.mxu0 %vm317_vm0, %v13425_v63  ;;  %23426 = vmatprep.subr.mxu1 %v29741_v32  ;;  %v12292_v27 = vcombine.low %v12267_v33, %v12275_v55  ;;  %v13461_v43 = vcombine.high %v27733_v60, %v27736_v22  ;;  %v13477_v42 = vcombine.high %v27745_v40, %v27748_v3  ;;  %v29825_v3 = vld [vmem:[#allocation34_spill] sm:$0xff] }
 0xd70   : > { %23419 = vmatmul.mubr.msk.f32.vlgmr.msra.gmra.mrb[92].mxu1 %vm317_vm0, %v12240_v50  ;;  %13688 = vrot.lane.b32.xlu1 %v29819_v28, %s29799_s23  ;;  %v12241_v1 = vcombine.high %v12216_v30, %v12232_v36  ;;  %v13427_v20 = vcombine.high %v13407_v11, %v13423_v10  ;;  %v12242_v45 = vcombine.low %v12223_v41, %v12239_v7 }
 0xd71   : > { %23423 = vmatprep.mubr.msk.f32.mxu0 %vm24316_vm2, %v29741_v32  ;;  %23427 = vmatpush3.xpose.msk.msra.mxu1 %vm317_vm0, %v13426_v25  ;;  %v13492_v37 = vcombine.low %v13468_v31, %v13484_v16  ;;  %v12277_v14 = vcombine.high %v27764_v5, %v12259_v44  ;;  %v12284_v62 = vrot.slane %v12276_v48, %v24681_v38 }
 0xd72   : > { %23424 = vmatmul.mubr.msk.f32.vlgmr.msra.gmra.mrb[116].mxu0 %vm317_vm0, %v12241_v1  ;;  %23431 = vmatprep.subr.mxu0 %v29741_v32  ;;  %v12300_v2 = vrot.slane %v12292_v27, %v24681_v38  ;;  %v12293_v23 = vcombine.high %v12267_v33, %v12275_v55  ;;  %v12243_v0 = vcombine.high %v12223_v41, %v12239_v7  ;;  %v29827_v33 = vld [vmem:[#allocation15_spill] sm:$0xff]  ;;  %v29828_v41 = vld [vmem:[#allocation6_spill] sm:$0xff] }
 0xd73   : > { %23428 = vmatprep.mubr.msk.f32.mxu1 %vm24316_vm2, %v29741_v32  ;;  %23432 = vmatpush3.xpose.msk.msra.mxu0 %vm317_vm0, %v13427_v20  ;;  %v13475_v9 = vrot.slane %v13461_v43, %v24681_v38  ;;  %v13491_v54 = vrot.slane %v13477_v42, %v24681_v38  ;;  %v13493_v26 = vcombine.high %v13468_v31, %v13484_v16  ;;  %v29829_v7 = vld [vmem:[#allocation35_spill] sm:$0xff]  ;;  %v12461_v16 = vpop.permute.xlu0 %12460 }
 0xd74   : > { %23429 = vmatmul.mubr.msk.f32.vlgmr.msra.gmra.mrb[94].mxu1 %vm317_vm0, %v12242_v45  ;;  %23436 = vmatprep.subr.mxu1 %v29741_v32  ;;  %v12308_v4 = vcombine.low %v12284_v62, %v12300_v2  ;;  %v12291_v35 = vrot.slane %v12277_v14, %v24681_v38  ;;  %v12307_v53 = vrot.slane %v12293_v23, %v24681_v38 }
 0xd75   : > { %13642 = vrot.lane.b32.xlu1 %v29820_v34, %s29799_s23  ;;  %23433 = vmatprep.mubr.msk.f32.mxu0 %vm24316_vm2, %v29741_v32  ;;  %v11784_v52 = vcombine.low %v27264_v8, %v29821_v15  ;;  %v13494_v39 = vcombine.low %v13475_v9, %v13491_v54  ;;  %v11785_v49 = vcombine.high %v27264_v8, %v29821_v15 }
 0xd76   : > { %23437 = vmatpush3.xpose.msk.msra.mxu1 %vm317_vm0, %v13492_v37  ;;  %23434 = vmatmul.mubr.msk.f32.vlgmr.msra.gmra.mrb[118].mxu0 %vm317_vm0, %v12243_v0  ;;  %v12309_v13 = vcombine.high %v12284_v62, %v12300_v2  ;;  %v11768_v60 = vcombine.low %v29824_v46, %v29823_v47  ;;  %v13495_v22 = vcombine.high %v13475_v9, %v13491_v54 }
 0xd77   : > { %23441 = vmatprep.subr.mxu0 %v29741_v32  ;;  %23438 = vmatprep.mubr.msk.f32.mxu1 %vm24316_vm2, %v29741_v32  ;;  %v11769_v12 = vcombine.high %v29824_v46, %v29823_v47  ;;  %v12310_v8 = vcombine.low %v12291_v35, %v12307_v53  ;;  %v11792_v59 = vrot.slane %v11784_v52, %v24670_v24 }
 0xd78   : > { %23442 = vmatpush3.xpose.msk.msra.mxu0 %vm317_vm0, %v13493_v26  ;;  %23446 = vmatprep.subr.mxu1 %v29741_v32  ;;  %v11799_v40 = vrot.slane %v11785_v49, %v24670_v24  ;;  %v12311_v30 = vcombine.high %v12291_v35, %v12307_v53  ;;  %v11776_v36 = vrot.slane %v11768_v60, %v24670_v24 }
 0xd79   : > { %23439 = vmatmul.mubr.msk.f32.vlgmr.msra.gmra.mrb[96].mxu1 %vm317_vm0, %v12308_v4  ;;  %13674 = vrot.lane.b32.xlu1 %v29822_v56, %s29799_s23  ;;  %v11783_v5 = vrot.slane %v11769_v12, %v24670_v24  ;;  %v11836_v11 = vcombine.low %v29827_v33, %v29826_v18  ;;  %v11837_v10 = vcombine.high %v29827_v33, %v29826_v18 }
 0xd7a   : > { %23443 = vmatprep.mubr.msk.f32.mxu0 %vm24316_vm2, %v29741_v32  ;;  %23447 = vmatpush3.xpose.msk.msra.mxu1 %vm317_vm0, %v13494_v39  ;;  %v11800_v17 = vcombine.low %v11776_v36, %v11792_v59  ;;  %v11801_v21 = vcombine.high %v11776_v36, %v11792_v59  ;;  %v11852_v50 = vcombine.low %v29829_v7, %v29828_v41 }
 0xd7b   : > { %23444 = vmatmul.mubr.msk.f32.vlgmr.msra.gmra.mrb[120].mxu0 %vm317_vm0, %v12309_v13  ;;  %23451 = vmatprep.subr.mxu0 %v29741_v32  ;;  %v11816_v57 = vcombine.low %v11783_v5, %v11799_v40  ;;  %v11817_v44 = vcombine.high %v11783_v5, %v11799_v40  ;;  %v11853_v31 = vcombine.high %v29829_v7, %v29828_v41 }
 0xd7c   : > { %23448 = vmatprep.mubr.msk.f32.mxu1 %vm24316_vm2, %v29741_v32  ;;  %23452 = vmatpush3.xpose.msk.msra.mxu0 %vm317_vm0, %v13495_v22  ;;  %v11808_v61 = vrot.slane %v11800_v17, %v24681_v38  ;;  %v11815_v6 = vrot.slane %v11801_v21, %v24681_v38  ;;  %v11844_v25 = vrot.slane %v11836_v11, %v24670_v24 }
 0xd7d   : > { %23449 = vmatmul.mubr.msk.f32.vlgmr.msra.gmra.mrb[98].mxu1 %vm317_vm0, %v12310_v8  ;;  %13690 = vrot.lane.b32.xlu1 %v29825_v3, %s29799_s23  ;;  %v11824_v51 = vrot.slane %v11816_v57, %v24681_v38  ;;  %v11831_v58 = vrot.slane %v11817_v44, %v24681_v38  ;;  %v11851_v48 = vrot.slane %v11837_v10, %v24670_v24 }
 0xd7e   : > { %23453 = vmatprep.mubr.msk.f32.mxu0 %vm24316_vm2, %v29741_v32  ;;  %23456 = vmatprep.subr.mxu1 %v29741_v32  ;;  %v12312_v55 = vcombine.low %v11808_v61, %v11815_v6  ;;  %v22291_v19 = vcombine.high %v11808_v61, %v11815_v6  ;;  %v11860_v42 = vrot.slane %v11852_v50, %v24670_v24 }
 0xd7f   : > { %23454 = vmatmul.mubr.msk.f32.vlgmr.msra.gmra.mrb[122].mxu0 %vm317_vm0, %v12311_v30  ;;  %23461 = vmatprep.subr.mxu0 %v29741_v32  ;;  %v12328_v29 = vcombine.low %v11824_v51, %v11831_v58  ;;  %v22292_v63 = vcombine.high %v11824_v51, %v11831_v58  ;;  %v11867_v28 = vrot.slane %v11853_v31, %v24670_v24 }
 0xd80   : > { %23458 = vmatprep.mubr.msk.f32.mxu1 %vm24316_vm2, %v29741_v32  ;;  %23463 = vmatprep.mubr.msk.f32.mxu0 %vm24316_vm2, %v29741_v32  ;;  %v12319_v27 = vrot.slane %v12312_v55, %v24670_v24  ;;  %v12327_v43 = vrot.slane %v22291_v19, %v24670_v24  ;;  %v11868_v14 = vcombine.low %v11844_v25, %v11860_v42 }
 0xd81   : > { %13644 = vrot.lane.b32.xlu1 %v29824_v46, %s29799_s23  ;;  %v12335_v45 = vrot.slane %v12328_v29, %v24670_v24  ;;  %v12343_v37 = vrot.slane %v22292_v63, %v24670_v24  ;;  %v11869_v62 = vcombine.high %v11844_v25, %v11860_v42  ;;  %v11884_v2 = vcombine.low %v11851_v48, %v11867_v28 }
 0xd82   : > { %v11885_v23 = vcombine.high %v11851_v48, %v11867_v28  ;;  %v12344_v34 = vcombine.low %v12319_v27, %v12327_v43  ;;  %v11876_v53 = vrot.slane %v11868_v14, %v24681_v38  ;;  %v12345_v22 = vcombine.high %v12319_v27, %v12327_v43 }
 0xd83   : > { %v12360_v26 = vcombine.low %v12335_v45, %v12343_v37  ;;  %v11892_v52 = vrot.slane %v11884_v2, %v24681_v38  ;;  %v12361_v12 = vcombine.high %v12335_v45, %v12343_v37 }
 0xd84   : > { %v11899_v39 = vrot.slane %v11885_v23, %v24681_v38  ;;  %v27914_v46 = vrot.slane %v12344_v34, %v24681_v38  ;;  %v27926_v11 = vrot.slane %v12345_v22, %v24681_v38 }
 0xd85   : > { %13676 = vrot.lane.b32.xlu1 %v29823_v47, %s29799_s23  ;;  %v27917_v60 = vrot.slane %v12360_v26, %v24681_v38  ;;  %v27929_v10 = vrot.slane %v12361_v12, %v24681_v38 }
 0xd86   : > { %v12396_v17 = vcombine.low %v11892_v52, %v11899_v39  ;;  %v22294_v21 = vcombine.high %v11892_v52, %v11899_v39 }
 0xd87   : > { %v12376_v58 = vcombine.low %v27914_v46, %v27917_v60  ;;  %v12377_v37 = vcombine.high %v27914_v46, %v27917_v60  ;;  %v12378_v14 = vcombine.low %v27926_v11, %v27929_v10  ;;  %v12379_v26 = vcombine.high %v27926_v11, %v27929_v10 }
 0xd88   : > { %v27938_v25 = vrot.slane %v12396_v17, %v24670_v24  ;;  %v27941_v48 = vrot.slane %v22294_v21, %v24670_v24 }
 0xd89   : > { %13692 = vrot.lane.b32.xlu1 %v29821_v15, %s29799_s23  ;;  %v11883_v15 = vrot.slane %v11869_v62, %v24681_v38 }
 0xd8a   : > { %v12477_v1 = vpop.permute.xlu1 %12476  ;;  %v12493_v20 = vpop.permute.xlu0 %12492  ;;  %v12429_v21 = vcombine.high %v27938_v25, %v27941_v48 }
 0xd8b   : > { %v12952_v0 = vcombine.low %v12461_v16, %v12493_v20  ;;  %v12953_v9 = vcombine.high %v12461_v16, %v12493_v20  ;;  %v12380_v36 = vcombine.low %v11876_v53, %v11883_v15  ;;  %v22293_v5 = vcombine.high %v11876_v53, %v11883_v15 }
 0xd8c   : > { %v12428_v15 = vcombine.low %v27938_v25, %v27941_v48 }
 0xd8d   : > { %v12960_v49 = vrot.slane %v12952_v0, %v24670_v24  ;;  %v12967_v56 = vrot.slane %v12953_v9, %v24670_v24  ;;  %v27932_v31 = vrot.slane %v12380_v36, %v24670_v24  ;;  %v27935_v16 = vrot.slane %v22293_v5, %v24670_v24 }
 0xd8e   : > { %v12509_v54 = vpop.permute.xlu1 %12508  ;;  %v12463_v51 = vpop.permute.xlu0 %12462 }
 0xd8f   : > { %v12968_v4 = vcombine.low %v12477_v1, %v12509_v54  ;;  %v12969_v35 = vcombine.high %v12477_v1, %v12509_v54  ;;  %v12413_v52 = vcombine.high %v27932_v31, %v27935_v16 }
 0xd91   : > { %v12976_v13 = vrot.slane %v12968_v4, %v24670_v24  ;;  %v12983_v47 = vrot.slane %v12969_v35, %v24670_v24  ;;  %v12412_v4 = vcombine.low %v27932_v31, %v27935_v16 }
 0xd93   : > { %v12984_v8 = vcombine.low %v12960_v49, %v12976_v13  ;;  %v12985_v59 = vcombine.high %v12960_v49, %v12976_v13  ;;  %v13000_v40 = vcombine.low %v12967_v56, %v12983_v47  ;;  %v13001_v3 = vcombine.high %v12967_v56, %v12983_v47 }
 0xd94   : > { %v27970_v17 = vrot.slane %v12412_v4, %v24681_v38 }
 0xd95   : > { %v12479_v30 = vpop.permute.xlu1 %12478  ;;  %v12992_v57 = vrot.slane %v12984_v8, %v24681_v38  ;;  %v12999_v44 = vrot.slane %v12985_v59, %v24681_v38  ;;  %v13008_v61 = vrot.slane %v13000_v40, %v24681_v38  ;;  %v13015_v6 = vrot.slane %v13001_v3, %v24681_v38 }
 0xd97   : > { %v13496_v55 = vcombine.low %v12992_v57, %v12999_v44  ;;  %v22307_v19 = vcombine.high %v12992_v57, %v12999_v44  ;;  %v13512_v29 = vcombine.low %v13008_v61, %v13015_v6  ;;  %v22308_v63 = vcombine.high %v13008_v61, %v13015_v6 }
 0xd99   : > { %v12511_v50 = vpop.permute.xlu1 %12510  ;;  %v13503_v27 = vrot.slane %v13496_v55, %v24670_v24  ;;  %v13511_v43 = vrot.slane %v22307_v19, %v24670_v24  ;;  %v13519_v42 = vrot.slane %v13512_v29, %v24670_v24  ;;  %v13527_v28 = vrot.slane %v22308_v63, %v24670_v24 }
 0xd9a   : > { %v13036_v1 = vcombine.low %v12479_v30, %v12511_v50  ;;  %v13037_v20 = vcombine.high %v12479_v30, %v12511_v50  ;;  %v12495_v45 = vpop.permute.xlu0 %12494  ;;  %v27981_v63 = vrot.slane %v12428_v15, %v24681_v38 }
 0xd9b   : > { %v13528_v62 = vcombine.low %v13503_v27, %v13511_v43  ;;  %v13529_v2 = vcombine.high %v13503_v27, %v13511_v43  ;;  %v13544_v23 = vcombine.low %v13519_v42, %v13527_v28  ;;  %v13545_v0 = vcombine.high %v13519_v42, %v13527_v28 }
 0xd9c   : > { %v13020_v54 = vcombine.low %v12463_v51, %v12495_v45  ;;  %v13021_v34 = vcombine.high %v12463_v51, %v12495_v45  ;;  %v13044_v39 = vrot.slane %v13036_v1, %v24670_v24  ;;  %v13051_v49 = vrot.slane %v13037_v20, %v24670_v24 }
 0xd9d   : > { %v13633_v9 = vpop.permute.xlu1 %13632  ;;  %v13536_v35 = vrot.slane %v13528_v62, %v24681_v38  ;;  %v13552_v53 = vrot.slane %v13544_v23, %v24681_v38  ;;  %v13543_v8 = vrot.slane %v13529_v2, %v24681_v38  ;;  %v13559_v59 = vrot.slane %v13545_v0, %v24681_v38 }
 0xd9e   : > { %v13028_v56 = vrot.slane %v13020_v54, %v24670_v24  ;;  %v13035_v13 = vrot.slane %v13021_v34, %v24670_v24  ;;  %v13649_v48 = vpop.permute.xlu0 %13648  ;;  %v12427_v23 = vrot.slane %v12413_v52, %v24681_v38 }
 0xd9f   : > { %v13560_v22 = vcombine.low %v13536_v35, %v13552_v53  ;;  %v13561_v12 = vcombine.high %v13536_v35, %v13552_v53  ;;  %v13562_v19 = vcombine.low %v13543_v8, %v13559_v59  ;;  %v13563_v29 = vcombine.high %v13543_v8, %v13559_v59 }
 0xda0   : > { %v13052_v40 = vcombine.low %v13028_v56, %v13044_v39  ;;  %v13053_v3 = vcombine.high %v13028_v56, %v13044_v39  ;;  %v13068_v30 = vcombine.low %v13035_v13, %v13051_v49  ;;  %v13069_v36 = vcombine.high %v13035_v13, %v13051_v49 }
 0xda1   : > { %v13665_v47 = vpop.permute.xlu1 %13664  ;;  %23457 = vmatpush3.xpose.msk.msra.mxu1 %vm317_vm0, %v13560_v22  ;;  %23462 = vmatpush3.xpose.msk.msra.mxu0 %vm317_vm0, %v13561_v12  ;;  %v12443_v49 = vrot.slane %v12429_v21, %v24681_v38  ;;  %v12444_v12 = vcombine.low %v27970_v17, %v27981_v63  ;;  %v12445_v8 = vcombine.high %v27970_v17, %v27981_v63 }
 0xda2   : > { %v13728_v5 = vcombine.low %v13633_v9, %v13665_v47  ;;  %v13060_v57 = vrot.slane %v13052_v40, %v24681_v38  ;;  %v13067_v44 = vrot.slane %v13053_v3, %v24681_v38  ;;  %v13076_v61 = vrot.slane %v13068_v30, %v24681_v38  ;;  %23466 = vmatprep.subr.mxu1 %v29741_v32 }
 0xda3   : > { %v13083_v6 = vrot.slane %v13069_v36, %v24681_v38  ;;  %v13729_v51 = vcombine.high %v13633_v9, %v13665_v47  ;;  %23471 = vmatprep.subr.mxu0 %v29741_v32 }
 0xda4   : > { %v13564_v50 = vcombine.low %v13060_v57, %v13067_v44  ;;  %v22309_v31 = vcombine.high %v13060_v57, %v13067_v44  ;;  %23459 = vmatmul.mubr.msk.f32.vlgmr.msra.gmra.mrb[100].mxu1 %vm317_vm0, %v12376_v58  ;;  %v13736_v27 = vrot.slane %v13728_v5, %v24670_v24  ;;  %23464 = vmatmul.mubr.msk.f32.vlgmr.msra.gmra.mrb[124].mxu0 %vm317_vm0, %v12377_v37 }
 0xda5   : > { %v13681_v55 = vpop.permute.xlu1 %13680  ;;  %v13580_v16 = vcombine.low %v13076_v61, %v13083_v6  ;;  %v22310_v25 = vcombine.high %v13076_v61, %v13083_v6  ;;  %23467 = vmatpush3.xpose.msk.msra.mxu1 %vm317_vm0, %v13562_v19  ;;  %23472 = vmatpush3.xpose.msk.msra.mxu0 %vm317_vm0, %v13563_v29  ;;  %v13743_v46 = vrot.slane %v13729_v51, %v24670_v24 }
 0xda6   : > { %v13744_v43 = vcombine.low %v13649_v48, %v13681_v55  ;;  %v13745_v42 = vcombine.high %v13649_v48, %v13681_v55  ;;  %v13571_v28 = vrot.slane %v13564_v50, %v24670_v24  ;;  %v13579_v1 = vrot.slane %v22309_v31, %v24670_v24  ;;  %23468 = vmatprep.mubr.msk.f32.mxu1 %vm24316_vm2, %v29741_v32 }
 0xda7   : > { %v13587_v20 = vrot.slane %v13580_v16, %v24670_v24  ;;  %v13595_v45 = vrot.slane %v22310_v25, %v24670_v24  ;;  %23473 = vmatprep.mubr.msk.f32.mxu0 %vm24316_vm2, %v29741_v32  ;;  %23476 = vmatprep.subr.mxu1 %v29741_v32  ;;  %v12446_v44 = vcombine.low %v12427_v23, %v12443_v49 }
 0xda8   : > { %v13752_v60 = vrot.slane %v13744_v43, %v24670_v24  ;;  %v13759_v58 = vrot.slane %v13745_v42, %v24670_v24  ;;  %v13596_v37 = vcombine.low %v13571_v28, %v13579_v1  ;;  %v13597_v62 = vcombine.high %v13571_v28, %v13579_v1  ;;  %23469 = vmatmul.mubr.msk.f32.vlgmr.msra.gmra.mrb[102].mxu1 %vm317_vm0, %v12378_v14 }
 0xda9   : > { %v13612_v2 = vcombine.low %v13587_v20, %v13595_v45  ;;  %23474 = vmatmul.mubr.msk.f32.vlgmr.msra.gmra.mrb[126].mxu0 %vm317_vm0, %v12379_v26  ;;  %v13613_v4 = vcombine.high %v13587_v20, %v13595_v45  ;;  %23481 = vmatprep.subr.mxu0 %v29741_v32  ;;  %v12447_v61 = vcombine.high %v12427_v23, %v12443_v49 }
 0xdaa   : > { %v13760_v0 = vcombine.low %v13736_v27, %v13752_v60  ;;  %v13761_v9 = vcombine.high %v13736_v27, %v13752_v60  ;;  %v13776_v54 = vcombine.low %v13743_v46, %v13759_v58  ;;  %v13777_v34 = vcombine.high %v13743_v46, %v13759_v58  ;;  %23478 = vmatprep.mubr.msk.f32.mxu1 %vm24316_vm2, %v29741_v32 }
 0xdab   : > { %v13604_v35 = vrot.slane %v13596_v37, %v24681_v38  ;;  %v13620_v14 = vrot.slane %v13612_v2, %v24681_v38  ;;  %23483 = vmatprep.mubr.msk.f32.mxu0 %vm24316_vm2, %v29741_v32  ;;  %v13611_v26 = vrot.slane %v13597_v62, %v24681_v38  ;;  %v13627_v59 = vrot.slane %v13613_v4, %v24681_v38 }
 0xdac   : > { %v13768_v53 = vrot.slane %v13760_v0, %v24681_v38  ;;  %v13775_v15 = vrot.slane %v13761_v9, %v24681_v38  ;;  %v13784_v52 = vrot.slane %v13776_v54, %v24681_v38  ;;  %v13791_v39 = vrot.slane %v13777_v34, %v24681_v38 }
 0xdad   : > { %v13628_v11 = vcombine.low %v13604_v35, %v13620_v14  ;;  %v13629_v10 = vcombine.high %v13604_v35, %v13620_v14  ;;  %v13630_v36 = vcombine.low %v13611_v26, %v13627_v59  ;;  %v13631_v5 = vcombine.high %v13611_v26, %v13627_v59 }
 0xdae   : > { %v14272_v56 = vcombine.low %v13768_v53, %v13775_v15  ;;  %v22311_v13 = vcombine.high %v13768_v53, %v13775_v15  ;;  %v14288_v47 = vcombine.low %v13784_v52, %v13791_v39  ;;  %v22312_v22 = vcombine.high %v13784_v52, %v13791_v39 }
 0xdaf   : > { %23477 = vmatpush3.xpose.msk.msra.mxu1 %vm317_vm0, %v13628_v11  ;;  %23482 = vmatpush3.xpose.msk.msra.mxu0 %vm317_vm0, %v13629_v10 }
 0xdb0   : > { %23486 = vmatprep.subr.mxu1 %v29741_v32  ;;  %23491 = vmatprep.subr.mxu0 %v29741_v32  ;;  %v14279_v40 = vrot.slane %v14272_v56, %v24670_v24  ;;  %v14287_v3 = vrot.slane %v22311_v13, %v24670_v24  ;;  %v14295_v30 = vrot.slane %v14288_v47, %v24670_v24 }
 0xdb1   : > { %v14303_v17 = vrot.slane %v22312_v22, %v24670_v24 }
 0xdb2   : > { %23479 = vmatmul.mubr.msk.f32.vlgmr.msra.gmra.mrb[104].mxu1 %vm317_vm0, %v12444_v12  ;;  %23484 = vmatmul.mubr.msk.f32.vlgmr.msra.gmra.mrb[128].mxu0 %vm317_vm0, %v12445_v8  ;;  %v14304_v21 = vcombine.low %v14279_v40, %v14287_v3  ;;  %v14305_v57 = vcombine.high %v14279_v40, %v14287_v3 }
 0xdb3   : > { %23487 = vmatpush3.xpose.msk.msra.mxu1 %vm317_vm0, %v13630_v36  ;;  %23492 = vmatpush3.xpose.msk.msra.mxu0 %vm317_vm0, %v13631_v5  ;;  %v14320_v51 = vcombine.low %v14295_v30, %v14303_v17  ;;  %v14321_v29 = vcombine.high %v14295_v30, %v14303_v17 }
 0xdb4   : > { %23488 = vmatprep.mubr.msk.f32.mxu1 %vm24316_vm2, %v29741_v32  ;;  %23493 = vmatprep.mubr.msk.f32.mxu0 %vm24316_vm2, %v29741_v32  ;;  %v14312_v6 = vrot.slane %v14304_v21, %v24681_v38  ;;  %v28052_v19 = vrot.slane %v14305_v57, %v24681_v38 }
 0xdb5   : > { %23496 = vmatprep.subr.mxu1 %v29741_v32  ;;  %v14328_v55 = vrot.slane %v14320_v51, %v24681_v38  ;;  %23501 = vmatprep.subr.mxu0 %v29741_v32  ;;  %v28058_v31 = vrot.slane %v14321_v29, %v24681_v38 }
 0xdb6   : > { %23489 = vmatmul.mubr.msk.f32.vlgmr.msra.gmra.mrb[106].mxu1 %vm317_vm0, %v12446_v44  ;;  %23494 = vmatmul.mubr.msk.f32.vlgmr.msra.gmra.mrb[130].mxu0 %vm317_vm0, %v12447_v61  ;;  %29830 = vst [vmem:[#allocation9_spill] sm:$0xff] %v28052_v19  ;;  %v28130_v61 = vpop.permute.xlu1 %13634 }
 0xdb7   : > { %v14336_v63 = vcombine.low %v14312_v6, %v14328_v55  ;;  %v14337_v50 = vcombine.high %v14312_v6, %v14328_v55  ;;  %23498 = vmatprep.mubr.msk.f32.mxu1 %vm24316_vm2, %v29741_v32  ;;  %29831 = vst [vmem:[#allocation10_spill] sm:$0xff] %v28058_v31  ;;  %23503 = vmatprep.mubr.msk.f32.mxu0 %vm24316_vm2, %v29741_v32 }
 0xdb9   : > { %23497 = vmatpush3.msra.mxu1 %v14336_v63  ;;  %23502 = vmatpush3.msra.mxu0 %v14337_v50 }
 0xdba   : > { %23506 = vmatprep.subr.mxu1 %v29741_v32  ;;  %23511 = vmatprep.subr.mxu0 %v29741_v32 }
 0xe0d   : > { %v28068_v48 = vpop.f32.mrb[96].mxu0 }
 0xe0e   : > { %v23340_v27 = vpop.f32.mrb[97].mxu0  ;;  %v17248_v43 = vsel %vm317_vm0, %v28068_v48, -inf }
 0xe0f   : > { %17249 = vmax.xlane.f32.xlu0 %v17248_v43 }
 0xe12   : > { %v28072_v42 = vpop.f32.mrb[98].mxu0 }
 0xe13   : > { %v23345_v28 = vpop.f32.mrb[99].mxu0  ;;  %v17251_v52 = vsel %vm317_vm0, %v28072_v42, -inf }
 0xe16   : > { %v28074_v1 = vpop.f32.mrb[100].mxu0 }
 0xe17   : > { %v23350_v20 = vpop.f32.mrb[101].mxu0  ;;  %v17254_v45 = vsel %vm317_vm0, %v28074_v1, -inf }
 0xe18   : > { %17255 = vmax.xlane.f32.xlu0 %v17254_v45  ;;  %v28144_v20 = vpop.permute.xlu1 %13666 }
 0xe1b   : > { %v28080_v60 = vpop.f32.mrb[80].mxu1 }
 0xe1c   : > { %v28078_v46 = vpop.f32.mrb[102].mxu0  ;;  %v23360_v62 = vpop.f32.mrb[81].mxu1  ;;  %v17260_v2 = vsel %vm317_vm0, %v28080_v60, -inf }
 0xe1d   : > { %v23355_v58 = vpop.f32.mrb[103].mxu0  ;;  %v17257_v37 = vsel %vm317_vm0, %v28078_v46, -inf  ;;  %17261 = vmax.xlane.f32.xlu1 %v17260_v2 }
 0xe1e   : > { %17258 = vmax.xlane.f32.xlu0 %v17257_v37 }
 0xe24   : > { %v28086_v23 = vpop.f32.mrb[104].mxu0  ;;  %v28090_v54 = vpop.f32.mrb[82].mxu1 }
 0xe25   : > { %v23365_v0 = vpop.f32.mrb[105].mxu0  ;;  %v17263_v9 = vsel %vm317_vm0, %v28086_v23, -inf  ;;  %v23370_v34 = vpop.f32.mrb[83].mxu1  ;;  %v17266_v4 = vsel %vm317_vm0, %v28090_v54, -inf }
 0xe26   : > { %17264 = vmax.xlane.f32.xlu0 %v17263_v9  ;;  %17267 = vmax.xlane.f32.xlu1 %v17266_v4  ;;  %v28156_v4 = vpop.permute.xlu1 %13682 }
 0xe2a   : > { %v28094_v35 = vpop.f32.mrb[106].mxu0  ;;  %17252 = vmax.xlane.f32.xlu1 %v17251_v52 }
 0xe2b   : > { %v23375_v53 = vpop.f32.mrb[107].mxu0  ;;  %v17269_v15 = vsel %vm317_vm0, %v28094_v35, -inf }
 0xe2c   : > { %v28096_v14 = vpop.f32.mrb[84].mxu1  ;;  %17270 = vmax.xlane.f32.xlu0 %v17269_v15 }
 0xe2d   : > { %v23380_v39 = vpop.f32.mrb[85].mxu1  ;;  %v17272_v11 = vsel %vm317_vm0, %v28096_v14, -inf }
 0xe2e   : > { %17273 = vmax.xlane.f32.xlu1 %v17272_v11 }
 0xe31   : > { %v28104_v10 = vpop.f32.mrb[108].mxu0 }
 0xe32   : > { %v23385_v49 = vpop.f32.mrb[109].mxu0  ;;  %v17275_v56 = vsel %vm317_vm0, %v28104_v10, -inf }
 0xe33   : > { %v28106_v26 = vpop.f32.mrb[86].mxu1  ;;  %17276 = vmax.xlane.f32.xlu0 %v17275_v56 }
 0xe34   : > { %v23390_v13 = vpop.f32.mrb[87].mxu1  ;;  %v17278_v47 = vsel %vm317_vm0, %v28106_v26, -inf }
 0xe35   : > { %17279 = vmax.xlane.f32.xlu1 %v17278_v47 }
 0xe38   : > { %v28112_v22 = vpop.f32.mrb[110].mxu0  ;;  %v28114_v12 = vpop.f32.mrb[88].mxu1 }
 0xe39   : > { %v23395_v8 = vpop.f32.mrb[111].mxu0  ;;  %v23400_v59 = vpop.f32.mrb[89].mxu1  ;;  %v17281_v40 = vsel %vm317_vm0, %v28112_v22, -inf  ;;  %v17284_v3 = vsel %vm317_vm0, %v28114_v12, -inf }
 0xe3a   : > { %17282 = vmax.xlane.f32.xlu0 %v17281_v40  ;;  %17285 = vmax.xlane.f32.xlu1 %v17284_v3  ;;  %v28170_v8 = vpop.permute.xlu1 %13636 }
 0xe3d   : > { %v28120_v30 = vpop.f32.mrb[112].mxu0 }
 0xe3e   : > { %v23405_v5 = vpop.f32.mrb[113].mxu0  ;;  %v17287_v17 = vsel %vm317_vm0, %v28120_v30, -inf  ;;  %v28172_v59 = vpop.permute.xlu1 %13668 }
 0xe3f   : > { %v28122_v36 = vpop.f32.mrb[90].mxu1  ;;  %17288 = vmax.xlane.f32.xlu0 %v17287_v17 }
 0xe40   : > { %v23410_v21 = vpop.f32.mrb[91].mxu1  ;;  %v17290_v57 = vsel %vm317_vm0, %v28122_v36, -inf }
 0xe41   : > { %17291 = vmax.xlane.f32.xlu1 %v17290_v57  ;;  %v28128_v44 = vpop.f32.mrb[114].mxu0 }
 0xe42   : > { %v23415_v6 = vpop.f32.mrb[115].mxu0  ;;  %v17293_v51 = vsel %vm317_vm0, %v28128_v44, -inf  ;;  %v28174_v40 = vpop.permute.xlu1 %13684 }
 0xe43   : > { %17294 = vmax.xlane.f32.xlu0 %v17293_v51  ;;  %v28134_v55 = vpop.f32.mrb[92].mxu1 }
 0xe44   : > { %v23420_v29 = vpop.f32.mrb[93].mxu1  ;;  %v17296_v63 = vsel %vm317_vm0, %v28134_v55, -inf }
 0xe45   : > { %v28138_v50 = vpop.f32.mrb[116].mxu0  ;;  %17297 = vmax.xlane.f32.xlu1 %v17296_v63 }
 0xe46   : > { %v23425_v27 = vpop.f32.mrb[117].mxu0  ;;  %v17299_v43 = vsel %vm317_vm0, %v28138_v50, -inf  ;;  %v28176_v3 = vpop.permute.xlu1 %13638 }
 0xe47   : > { %17300 = vmax.xlane.f32.xlu0 %v17299_v43  ;;  %v28142_v28 = vpop.f32.mrb[94].mxu1  ;;  %29832 = vst [vmem:[#allocation11_spill] sm:$0xff] %v28176_v3 }
 0xe48   : > { %v23430_v45 = vpop.f32.mrb[95].mxu1  ;;  %v17302_v58 = vsel %vm317_vm0, %v28142_v28, -inf }
 0xe49   : > { %v28148_v37 = vpop.f32.mrb[118].mxu0  ;;  %17303 = vmax.xlane.f32.xlu1 %v17302_v58 }
 0xe4a   : > { %v23435_v62 = vpop.f32.mrb[119].mxu0  ;;  %v17305_v2 = vsel %vm317_vm0, %v28148_v37, -inf  ;;  %v28178_v5 = vpop.permute.xlu1 %13670 }
 0xe4b   : > { %17306 = vmax.xlane.f32.xlu0 %v17305_v2 }
 0xe4c   : > { %v28152_v0 = vpop.f32.mrb[96].mxu1 }
 0xe4d   : > { %v23440_v9 = vpop.f32.mrb[97].mxu1  ;;  %v17308_v34 = vsel %vm317_vm0, %v28152_v0, -inf }
 0xe4e   : > { %v28158_v53 = vpop.f32.mrb[120].mxu0  ;;  %17309 = vmax.xlane.f32.xlu1 %v17308_v34  ;;  %v28180_v17 = vpop.permute.xlu1 %13686 }
 0xe4f   : > { %v23445_v15 = vpop.f32.mrb[121].mxu0  ;;  %v17311_v52 = vsel %vm317_vm0, %v28158_v53, -inf  ;;  %v28200_v9 = vpop.permute.xlu0 %13650 }
 0xe50   : > { %17312 = vmax.xlane.f32.xlu0 %v17311_v52  ;;  %v28162_v39 = vpop.f32.mrb[98].mxu1 }
 0xe51   : > { %v23450_v11 = vpop.f32.mrb[99].mxu1  ;;  %v17314_v49 = vsel %vm317_vm0, %v28162_v39, -inf }
 0xe52   : > { %v28166_v56 = vpop.f32.mrb[122].mxu0  ;;  %17315 = vmax.xlane.f32.xlu1 %v17314_v49  ;;  %v28182_v21 = vpop.permute.xlu1 %13640 }
 0xe53   : > { %v23455_v13 = vpop.f32.mrb[123].mxu0  ;;  %v17317_v47 = vsel %vm317_vm0, %v28166_v56, -inf  ;;  %29833 = vst [vmem:[#allocation12_spill] sm:$0xff] %v28182_v21  ;;  %v28206_v11 = vpop.permute.xlu0 %13652 }
 0xe54   : > { %17318 = vmax.xlane.f32.xlu0 %v17317_v47 }
 0xe56   : > { %v28192_v43 = vpop.permute.xlu1 %13672 }
 0xe57   : > { %29834 = vst [vmem:[#allocation5_spill] sm:$0xff] %v28192_v43  ;;  %v28226_v25 = vpop.permute.xlu0 %13654 }
 0xe5a   : > { %v28204_v52 = vpop.permute.xlu1 %13688 }
 0xe5b   : > { %29835 = vst [vmem:[#allocation8_spill] sm:$0xff] %v28204_v52 }
 0xe77   : > { %v28184_v57 = vpop.f32.mrb[100].mxu1  ;;  %v28186_v6 = vpop.f32.mrb[124].mxu0 }
 0xe78   : > { %v23460_v51 = vpop.f32.mrb[101].mxu1  ;;  %v17320_v29 = vsel %vm317_vm0, %v28184_v57, -inf  ;;  %v23465_v63 = vpop.f32.mrb[125].mxu0  ;;  %v17323_v27 = vsel %vm317_vm0, %v28186_v6, -inf }
 0xe79   : > { %17321 = vmax.xlane.f32.xlu1 %v17320_v29  ;;  %17324 = vmax.xlane.f32.xlu0 %v17323_v27  ;;  %v28216_v27 = vpop.permute.xlu1 %13642 }
 0xe7a   : > { %29836 = vst [vmem:[#allocation25_spill] sm:$0xff] %v28216_v27 }
 0xe7b   : > { %v28194_v45 = vpop.f32.mrb[102].mxu1 }
 0xe7c   : > { %v28196_v58 = vpop.f32.mrb[126].mxu0  ;;  %v23470_v62 = vpop.f32.mrb[103].mxu1  ;;  %v17326_v2 = vsel %vm317_vm0, %v28194_v45, -inf }
 0xe7d   : > { %v23475_v34 = vpop.f32.mrb[127].mxu0  ;;  %v17329_v15 = vsel %vm317_vm0, %v28196_v58, -inf  ;;  %17327 = vmax.xlane.f32.xlu1 %v17326_v2 }
 0xe7e   : > { %17330 = vmax.xlane.f32.xlu0 %v17329_v15 }
 0xe85   : > { %v28208_v49 = vpop.f32.mrb[104].mxu1  ;;  %v28210_v13 = vpop.f32.mrb[128].mxu0 }
 0xe86   : > { %v23480_v47 = vpop.f32.mrb[105].mxu1  ;;  %v23485_v51 = vpop.f32.mrb[129].mxu0  ;;  %v17335_v29 = vsel %vm317_vm0, %v28210_v13, -inf  ;;  %v17332_v63 = vsel %vm317_vm0, %v28208_v49, -inf }
 0xe87   : > { %17336 = vmax.xlane.f32.xlu0 %v17335_v29  ;;  %17333 = vmax.xlane.f32.xlu1 %v17332_v63  ;;  %v28228_v29 = vpop.permute.xlu1 %13674  ;;  %v28230_v63 = vpop.permute.xlu0 %13656 }
 0xe88   : > { %29837 = vst [vmem:[#allocation36_spill] sm:$0xff] %v28228_v29  ;;  %29838 = vst [vmem:[#allocation18_spill] sm:$0xff] %v28230_v63 }
 0xe89   : > { %v28218_v62 = vpop.f32.mrb[106].mxu1  ;;  %v28220_v2 = vpop.f32.mrb[130].mxu0 }
 0xe8a   : > { %v23490_v34 = vpop.f32.mrb[107].mxu1  ;;  %v23495_v15 = vpop.f32.mrb[131].mxu0  ;;  %v17341_v47 = vsel %vm317_vm0, %v28220_v2, -inf  ;;  %v17338_v51 = vsel %vm317_vm0, %v28218_v62, -inf }
 0xe8b   : > { %17342 = vmax.xlane.f32.xlu0 %v17341_v47  ;;  %17339 = vmax.xlane.f32.xlu1 %v17338_v51  ;;  %v28232_v16 = vpop.permute.xlu1 %13690  ;;  %v28234_v27 = vpop.permute.xlu0 %13658 }
 0xe8c   : > { %29839 = vst [vmem:[#allocation26_spill] sm:$0xff] %v28232_v16  ;;  %29840 = vst [vmem:[#allocation27_spill] sm:$0xff] %v28234_v27 }
 0xe8f   : > { %v28236_v34 = vpop.permute.xlu1 %13644  ;;  %v28240_v15 = vpop.permute.xlu0 %13660 }
 0xe90   : > { %29841 = vst [vmem:[#allocation17_spill] sm:$0xff] %v28236_v34  ;;  %29842 = vst [vmem:[#allocation22_spill] sm:$0xff] %v28240_v15 }
 0xe93   : > { %v28242_v32 = vpop.permute.xlu1 %13676 }
 0xe94   : > { %29843 = vst [vmem:[#allocation34_spill] sm:$0xff] %v28242_v32 }
 0xe97   : > { %v28244_v51 = vpop.permute.xlu1 %13692 }
 0xe98   : > { %29844 = vst [vmem:[#allocation7_spill] sm:$0xff] %v28244_v51 }
 0xe9c   : > { %13646 = vrot.lane.b32.xlu1 %v29827_v33, %s29799_s23  ;;  %v17250_v31 = vpop.xlane.xlu0 %17249 }
 0xe9d   : > { %v17344_v29 = vsub.f32 %v28068_v48, %v17250_v31 }
 0xe9f   : > { %v17376_v27 = vmul.f32 1.442695, %v17344_v29 }
 0xea5   : > { %v17256_v47 = vpop.xlane.xlu0 %17255 }
 0xea6   : > { %v17346_v34 = vsub.f32 %v28074_v1, %v17256_v47 }
 0xea8   : > { %v17380_v15 = vmul.f32 1.442695, %v17346_v34 }
 0xeaa   : > { %v17262_v19 = vpop.xlane.xlu1 %17261 }
 0xeab   : > { %v17259_v21 = vpop.xlane.xlu0 %17258  ;;  %v17348_v16 = vsub.f32 %v28080_v60, %v17262_v19 }
 0xeac   : > { %v17347_v31 = vsub.f32 %v28078_v46, %v17259_v21 }
 0xead   : > { %v17384_v43 = vmul.f32 1.442695, %v17348_v16 }
 0xeae   : > { %v17382_v60 = vmul.f32 1.442695, %v17347_v31 }
 0xeaf   : > { %24085 = vpow2.f32 %v17384_v43 }
 0xeb0   : > { %24087 = vpow2.f32 %v17376_v27 }
 0xeb1   : > { %24089 = vpow2.f32 %v17380_v15 }
 0xeb3   : > { %v17265_v33 = vpop.xlane.xlu0 %17264  ;;  %v17268_v63 = vpop.xlane.xlu1 %17267 }
 0xeb4   : > { %v17349_v32 = vsub.f32 %v28086_v23, %v17265_v33  ;;  %v17350_v52 = vsub.f32 %v28090_v54, %v17268_v63 }
 0xeb6   : > { %v17388_v48 = vmul.f32 1.442695, %v17350_v52  ;;  %v17386_v51 = vmul.f32 1.442695, %v17349_v32 }
 0xeb7   : > { %v17253_v3 = vpop.xlane.xlu1 %17252 }
 0xeb8   : > { %24091 = vpow2.f32 %v17388_v48  ;;  %v17345_v1 = vsub.f32 %v28072_v42, %v17253_v3 }
 0xeb9   : > { %v17271_v19 = vpop.xlane.xlu0 %17270  ;;  %v28253_v16 = vpop.eup %24085  ;;  %24093 = vpow2.f32 %v17386_v51 }
 0xeba   : > { %v17378_v43 = vmul.f32 1.442695, %v17345_v1  ;;  %v17452_v23 = vsel %vm317_vm0, %v28253_v16, 0.0  ;;  %v28257_v54 = vpop.eup %24087  ;;  %v17351_v21 = vsub.f32 %v28094_v35, %v17271_v19 }
 0xebb   : > { %v17274_v27 = vpop.xlane.xlu1 %17273  ;;  %17453 = vadd.xlane.f32.xlu0 %v17452_v23  ;;  %v17440_v29 = vsel %vm317_vm0, %v28257_v54, 0.0  ;;  %v28264_v63 = vpop.eup %24089 }
 0xebc   : > { %24095 = vpow2.f32 %v17378_v43  ;;  %v17352_v46 = vsub.f32 %v28096_v14, %v17274_v27  ;;  %v17390_v14 = vmul.f32 1.442695, %v17351_v21 }
 0xebd   : > { %24097 = vpow2.f32 %v17382_v60 }
 0xebe   : > { %v17392_v42 = vmul.f32 1.442695, %v17352_v46 }
 0xec0   : > { %v17277_v32 = vpop.xlane.xlu0 %17276  ;;  %17441 = vadd.xlane.f32.xlu1 %v17440_v29  ;;  %24099 = vpow2.f32 %v17392_v42 }
 0xec1   : > { %v17353_v3 = vsub.f32 %v28104_v10, %v17277_v32  ;;  %v17446_v10 = vsel %vm317_vm0, %v28264_v63, 0.0 }
 0xec2   : > { %v17280_v52 = vpop.xlane.xlu1 %17279  ;;  %v28266_v15 = vpop.eup %24091 }
 0xec3   : > { %v17394_v34 = vmul.f32 1.442695, %v17353_v3  ;;  %v17354_v47 = vsub.f32 %v28106_v26, %v17280_v52  ;;  %v17458_v35 = vsel %vm317_vm0, %v28266_v15, 0.0  ;;  %v28273_v51 = vpop.eup %24093 }
 0xec4   : > { %17459 = vadd.xlane.f32.xlu0 %v17458_v35  ;;  %17447 = vadd.xlane.f32.xlu1 %v17446_v10  ;;  %v17455_v60 = vsel %vm317_vm0, %v28273_v51, 0.0 }
 0xec5   : > { %24101 = vpow2.f32 %v17394_v34  ;;  %v17396_v1 = vmul.f32 1.442695, %v17354_v47 }
 0xec6   : > { %v28276_v19 = vpop.eup %24095  ;;  %24103 = vpow2.f32 %v17390_v14 }
 0xec7   : > { %v17283_v33 = vpop.xlane.xlu0 %17282  ;;  %v17286_v31 = vpop.xlane.xlu1 %17285  ;;  %v17443_v26 = vsel %vm317_vm0, %v28276_v19, 0.0  ;;  %24105 = vpow2.f32 %v17396_v1 }
 0xec8   : > { %v17356_v48 = vsub.f32 %v28114_v12, %v17286_v31  ;;  %v28282_v43 = vpop.eup %24097  ;;  %17444 = vadd.xlane.f32.xlu0 %v17443_v26  ;;  %17456 = vadd.xlane.f32.xlu1 %v17455_v60  ;;  %v17355_v46 = vsub.f32 %v28112_v22, %v17283_v33 }
 0xec9   : > { %v17449_v42 = vsel %vm317_vm0, %v28282_v43, 0.0 }
 0xeca   : > { %v17400_v27 = vmul.f32 1.442695, %v17356_v48  ;;  %v28286_v21 = vpop.eup %24099  ;;  %v17398_v34 = vmul.f32 1.442695, %v17355_v46 }
 0xecc   : > { %v17289_v23 = vpop.xlane.xlu0 %17288  ;;  %17450 = vadd.xlane.f32.xlu0 %v17449_v42  ;;  %24107 = vpow2.f32 %v17400_v27 }
 0xecd   : > { %v17357_v12 = vsub.f32 %v28120_v30, %v17289_v23  ;;  %v17464_v30 = vsel %vm317_vm0, %v28286_v21, 0.0 }
 0xece   : > { %v17292_v32 = vpop.xlane.xlu1 %17291 }
 0xecf   : > { %v28290_v3 = vpop.eup %24101  ;;  %v17402_v52 = vmul.f32 1.442695, %v17357_v12  ;;  %v17358_v22 = vsub.f32 %v28122_v36, %v17292_v32 }
 0xed0   : > { %v17467_v29 = vsel %vm317_vm0, %v28290_v3, 0.0  ;;  %v17295_v14 = vpop.xlane.xlu0 %17294  ;;  %v28297_v47 = vpop.eup %24103  ;;  %17465 = vadd.xlane.f32.xlu0 %v17464_v30 }
 0xed1   : > { %24109 = vpow2.f32 %v17402_v52  ;;  %17468 = vadd.xlane.f32.xlu1 %v17467_v29  ;;  %v17404_v10 = vmul.f32 1.442695, %v17358_v22  ;;  %v17461_v1 = vsel %vm317_vm0, %v28297_v47, 0.0  ;;  %v28303_v36 = vpop.eup %24105  ;;  %v17359_v27 = vsub.f32 %v28128_v44, %v17295_v14 }
 0xed2   : > { %v17298_v35 = vpop.xlane.xlu1 %17297  ;;  %24111 = vpow2.f32 %v17398_v34 }
 0xed3   : > { %v17360_v33 = vsub.f32 %v28134_v55, %v17298_v35  ;;  %24113 = vpow2.f32 %v17404_v10  ;;  %v17470_v55 = vsel %vm317_vm0, %v28303_v36, 0.0  ;;  %v17406_v42 = vmul.f32 1.442695, %v17359_v27 }
 0xed4   : > { %v17301_v31 = vpop.xlane.xlu0 %17300  ;;  %17462 = vadd.xlane.f32.xlu0 %v17461_v1 }
 0xed5   : > { %v17361_v48 = vsub.f32 %v28138_v50, %v17301_v31  ;;  %v17408_v23 = vmul.f32 1.442695, %v17360_v33 }
 0xed6   : > { %v17304_v60 = vpop.xlane.xlu1 %17303  ;;  %v28306_v12 = vpop.eup %24107 }
 0xed7   : > { %v17410_v26 = vmul.f32 1.442695, %v17361_v48  ;;  %v17362_v52 = vsub.f32 %v28142_v28, %v17304_v60  ;;  %v17476_v34 = vsel %vm317_vm0, %v28306_v12, 0.0 }
 0xed8   : > { %v17307_v46 = vpop.xlane.xlu0 %17306  ;;  %17471 = vadd.xlane.f32.xlu0 %v17470_v55 }
 0xed9   : > { %24115 = vpow2.f32 %v17410_v26  ;;  %v17412_v30 = vmul.f32 1.442695, %v17362_v52  ;;  %v17363_v48 = vsub.f32 %v28148_v37, %v17307_v46 }
 0xeda   : > { %24117 = vpow2.f32 %v17408_v23 }
 0xedb   : > { %v28310_v50 = vpop.eup %24109  ;;  %v17310_v44 = vpop.xlane.xlu1 %17309  ;;  %24119 = vpow2.f32 %v17406_v42  ;;  %v17414_v27 = vmul.f32 1.442695, %v17363_v48 }
 0xedc   : > { %v17479_v32 = vsel %vm317_vm0, %v28310_v50, 0.0  ;;  %v28317_v22 = vpop.eup %24111  ;;  %17477 = vadd.xlane.f32.xlu0 %v17476_v34  ;;  %v17364_v35 = vsub.f32 %v28152_v0, %v17310_v44 }
 0xedd   : > { %17480 = vadd.xlane.f32.xlu1 %v17479_v32  ;;  %v17313_v29 = vpop.xlane.xlu0 %17312  ;;  %v17473_v33 = vsel %vm317_vm0, %v28317_v22, 0.0  ;;  %v28323_v28 = vpop.eup %24113 }
 0xede   : > { %v17365_v14 = vsub.f32 %v28158_v53, %v17313_v29  ;;  %v17416_v1 = vmul.f32 1.442695, %v17364_v35  ;;  %v17482_v0 = vsel %vm317_vm0, %v28323_v28, 0.0 }
 0xedf   : > { %v17316_v26 = vpop.xlane.xlu1 %17315 }
 0xee0   : > { %v17418_v10 = vmul.f32 1.442695, %v17365_v14  ;;  %17474 = vadd.xlane.f32.xlu0 %v17473_v33  ;;  %v17366_v23 = vsub.f32 %v28162_v39, %v17316_v26 }
 0xee1   : > { %v17319_v33 = vpop.xlane.xlu0 %17318 }
 0xee2   : > { %24121 = vpow2.f32 %v17418_v10  ;;  %v17420_v32 = vmul.f32 1.442695, %v17366_v23  ;;  %v17367_v48 = vsub.f32 %v28166_v56, %v17319_v33 }
 0xee3   : > { %v28325_v31 = vpop.eup %24115  ;;  %24123 = vpow2.f32 %v17412_v30 }
 0xee4   : > { %v17491_v53 = vsel %vm317_vm0, %v28325_v31, 0.0  ;;  %v28332_v60 = vpop.eup %24117  ;;  %17483 = vadd.xlane.f32.xlu0 %v17482_v0  ;;  %24125 = vpow2.f32 %v17416_v1 }
 0xee5   : > { %17492 = vadd.xlane.f32.xlu1 %v17491_v53  ;;  %v17488_v55 = vsel %vm317_vm0, %v28332_v60, 0.0  ;;  %v28337_v37 = vpop.eup %24119  ;;  %24127 = vpow2.f32 %v17414_v27  ;;  %v17422_v27 = vmul.f32 1.442695, %v17367_v48 }
 0xee6   : > { %v17485_v52 = vsel %vm317_vm0, %v28337_v37, 0.0  ;;  %24129 = vpow2.f32 %v17420_v32 }
 0xee8   : > { %17489 = vadd.xlane.f32.xlu0 %v17488_v55 }
 0xeec   : > { %v28339_v46 = vpop.eup %24121  ;;  %17486 = vadd.xlane.f32.xlu0 %v17485_v52 }
 0xeed   : > { %v17503_v42 = vsel %vm317_vm0, %v28339_v46, 0.0  ;;  %v28345_v44 = vpop.eup %24123 }
 0xeee   : > { %17504 = vadd.xlane.f32.xlu1 %v17503_v42  ;;  %v17494_v39 = vsel %vm317_vm0, %v28345_v44, 0.0  ;;  %v28349_v29 = vpop.eup %24125 }
 0xeef   : > { %v17500_v34 = vsel %vm317_vm0, %v28349_v29, 0.0  ;;  %v28353_v14 = vpop.eup %24127 }
 0xef0   : > { %17495 = vadd.xlane.f32.xlu0 %v17494_v39  ;;  %v17497_v30 = vsel %vm317_vm0, %v28353_v14, 0.0  ;;  %v28357_v35 = vpop.eup %24129 }
 0xef1   : > { %v17506_v10 = vsel %vm317_vm0, %v28357_v35, 0.0 }
 0xef4   : > { %17501 = vadd.xlane.f32.xlu0 %v17500_v34 }
 0xef8   : > { %17498 = vadd.xlane.f32.xlu0 %v17497_v30 }
 0xefc   : > { %17507 = vadd.xlane.f32.xlu0 %v17506_v10 }
 0xf06   : > { %v17322_v1 = vpop.xlane.xlu1 %17321  ;;  %v17325_v26 = vpop.xlane.xlu0 %17324 }
 0xf07   : > { %v17368_v53 = vsub.f32 %v28184_v57, %v17322_v1  ;;  %v17369_v0 = vsub.f32 %v28186_v6, %v17325_v26 }
 0xf09   : > { %v17424_v23 = vmul.f32 1.442695, %v17368_v53  ;;  %v17426_v55 = vmul.f32 1.442695, %v17369_v0 }
 0xf0a   : > { %v17328_v32 = vpop.xlane.xlu1 %17327 }
 0xf0b   : > { %24131 = vpow2.f32 %v17424_v23  ;;  %v17370_v42 = vsub.f32 %v28194_v45, %v17328_v32  ;;  %v17331_v39 = vpop.xlane.xlu0 %17330 }
 0xf0c   : > { %24133 = vpow2.f32 %v17426_v55  ;;  %v17371_v56 = vsub.f32 %v28196_v58, %v17331_v39 }
 0xf0d   : > { %24135 = vpow2.f32 %v17422_v27  ;;  %v17428_v52 = vmul.f32 1.442695, %v17370_v42 }
 0xf0e   : > { %v17430_v33 = vmul.f32 1.442695, %v17371_v56 }
 0xf0f   : > { %24137 = vpow2.f32 %v17428_v52 }
 0xf14   : > { %v17334_v34 = vpop.xlane.xlu1 %17333  ;;  %v17337_v30 = vpop.xlane.xlu0 %17336 }
 0xf15   : > { %v17372_v57 = vsub.f32 %v28208_v49, %v17334_v34  ;;  %v17373_v6 = vsub.f32 %v28210_v13, %v17337_v30  ;;  %v28368_v10 = vpop.eup %24131 }
 0xf16   : > { %v28370_v48 = vpop.eup %24133  ;;  %v17512_v53 = vsel %vm317_vm0, %v28368_v10, 0.0 }
 0xf17   : > { %v17432_v1 = vmul.f32 1.442695, %v17372_v57  ;;  %v17434_v45 = vmul.f32 1.442695, %v17373_v6  ;;  %v28374_v26 = vpop.eup %24135  ;;  %17513 = vadd.xlane.f32.xlu0 %v17512_v53  ;;  %v17515_v49 = vsel %vm317_vm0, %v28370_v48, 0.0  ;;  %v13813_v53 = vcombine.high %v28200_v9, %v28156_v4 }
 0xf18   : > { %v17340_v0 = vpop.xlane.xlu1 %17339  ;;  %v17343_v58 = vpop.xlane.xlu0 %17342  ;;  %17516 = vadd.xlane.f32.xlu1 %v17515_v49  ;;  %v17509_v55 = vsel %vm317_vm0, %v28374_v26, 0.0 }
 0xf19   : > { %24139 = vpow2.f32 %v17432_v1  ;;  %v17374_v13 = vsub.f32 %v28218_v62, %v17340_v0  ;;  %v17375_v23 = vsub.f32 %v28220_v2, %v17343_v58  ;;  %v28382_v32 = vpop.eup %24137  ;;  %v13796_v0 = vcombine.low %v28130_v61, %v28144_v20 }
 0xf1a   : > { %24141 = vpow2.f32 %v17434_v45  ;;  %v17518_v52 = vsel %vm317_vm0, %v28382_v32, 0.0  ;;  %v13812_v45 = vcombine.low %v28200_v9, %v28156_v4  ;;  %v13797_v58 = vcombine.high %v28130_v61, %v28144_v20 }
 0xf1b   : > { %24143 = vpow2.f32 %v17430_v33  ;;  %v17436_v27 = vmul.f32 1.442695, %v17374_v13  ;;  %17510 = vadd.xlane.f32.xlu0 %v17509_v55  ;;  %v17438_v42 = vmul.f32 1.442695, %v17375_v23  ;;  %v13827_v13 = vrot.slane %v13813_v53, %v24670_v24 }
 0xf1c   : > { %v13820_v49 = vrot.slane %v13812_v45, %v24670_v24  ;;  %v13880_v4 = vcombine.low %v28206_v11, %v28174_v40  ;;  %v13881_v9 = vcombine.high %v28206_v11, %v28174_v40  ;;  %v13864_v61 = vcombine.low %v28170_v8, %v28172_v59 }
 0xf1d   : > { %24145 = vpow2.f32 %v17436_v27  ;;  %v13811_v27 = vrot.slane %v13797_v58, %v24670_v24  ;;  %v13865_v20 = vcombine.high %v28170_v8, %v28172_v59  ;;  %v28440_v58 = vpop.permute.xlu1 %13646 }
 0xf1e   : > { %24147 = vpow2.f32 %v17438_v42 }
 0xf1f   : > { %17519 = vadd.xlane.f32.xlu0 %v17518_v52  ;;  %v13845_v42 = vcombine.high %v13811_v27, %v13827_v13  ;;  %v13888_v52 = vrot.slane %v13880_v4, %v24670_v24 }
 0xf21   : > { %v13859_v11 = vrot.slane %v13845_v42, %v24681_v38 }
 0xf23   : > { %v28386_v39 = vpop.eup %24139 }
 0xf24   : > { %v28388_v62 = vpop.eup %24141  ;;  %v17524_v2 = vsel %vm317_vm0, %v28386_v39, 0.0 }
 0xf25   : > { %v28392_v56 = vpop.eup %24143  ;;  %17525 = vadd.xlane.f32.xlu0 %v17524_v2  ;;  %v17527_v34 = vsel %vm317_vm0, %v28388_v62, 0.0  ;;  %v13895_v2 = vrot.slane %v13881_v9, %v24670_v24 }
 0xf26   : > { %17528 = vadd.xlane.f32.xlu1 %v17527_v34  ;;  %v17521_v30 = vsel %vm317_vm0, %v28392_v56, 0.0 }
 0xf27   : > { %v28398_v57 = vpop.eup %24145 }
 0xf28   : > { %29845 = vst [vmem:[#allocation15_spill] sm:$0xff] %v28398_v57  ;;  %v17530_v6 = vsel %vm317_vm0, %v28398_v57, 0.0  ;;  %v28402_v33 = vpop.eup %24147  ;;  %v29855_v57 = vmov 0.0  }
 0xf29   : > { %17522 = vadd.xlane.f32.xlu0 %v17521_v30  ;;  %29846 = vst [vmem:[#allocation6_spill] sm:$0xff] %v28402_v33  ;;  %v17533_v1 = vsel %vm317_vm0, %v28402_v33, 0.0  ;;  %v29853_v33 = vld [vmem:[#allocation10_spill] sm:$0xff] }
 0xf2d   : > { %17531 = vadd.xlane.f32.xlu0 %v17530_v6  ;;  %v13872_v6 = vrot.slane %v13864_v61, %v24670_v24 }
 0xf2f   : > { %v13896_v8 = vcombine.low %v13872_v6, %v13888_v52  ;;  %v13897_v59 = vcombine.high %v13872_v6, %v13888_v52 }
 0xf31   : > { %17534 = vadd.xlane.f32.xlu0 %v17533_v1  ;;  %v13879_v1 = vrot.slane %v13865_v20, %v24670_v24  ;;  %v13904_v4 = vrot.slane %v13896_v8, %v24681_v38  ;;  %v13911_v9 = vrot.slane %v13897_v59, %v24681_v38 }
 0xf33   : > { %v13912_v45 = vcombine.low %v13879_v1, %v13895_v2  ;;  %v13913_v53 = vcombine.high %v13879_v1, %v13895_v2  ;;  %v29847_v2 = vld [vmem:[#allocation11_spill] sm:$0xff] }
 0xf34   : > { %v13933_v8 = vcombine.high %v29847_v2, %v28178_v5 }
 0xf37   : > { %13678 = vrot.lane.b32.xlu1 %v29826_v18, %s29799_s23  ;;  %v13804_v18 = vrot.slane %v13796_v0, %v24670_v24 }
 0xf39   : > { %v13828_v23 = vcombine.low %v13804_v18, %v13820_v49  ;;  %v13829_v55 = vcombine.high %v13804_v18, %v13820_v49 }
 0xf3b   : > { %13694 = vrot.lane.b32.xlu1 %v29828_v41, %s29799_s23  ;;  %v13844_v41 = vcombine.low %v13811_v27, %v13827_v13  ;;  %v13836_v34 = vrot.slane %v13828_v23, %v24681_v38  ;;  %v13843_v30 = vrot.slane %v13829_v55, %v24681_v38  ;;  %v13920_v23 = vrot.slane %v13912_v45, %v24681_v38 }
 0xf3c   : > { %v13927_v55 = vrot.slane %v13913_v53, %v24681_v38 }
 0xf3d   : > { %v13852_v40 = vrot.slane %v13844_v41, %v24681_v38  ;;  %v14340_v0 = vcombine.low %v13836_v34, %v13843_v30  ;;  %v22313_v49 = vcombine.high %v13836_v34, %v13843_v30  ;;  %v13932_v34 = vcombine.low %v29847_v2, %v28178_v5 }
 0xf3e   : > { %v13949_v30 = vcombine.high %v28226_v25, %v28180_v17  ;;  %v14424_v6 = vcombine.low %v13920_v23, %v13927_v55  ;;  %v22316_v1 = vcombine.high %v13920_v23, %v13927_v55 }
 0xf3f   : > { %v14356_v13 = vcombine.low %v13852_v40, %v13859_v11  ;;  %v22314_v18 = vcombine.high %v13852_v40, %v13859_v11  ;;  %v14347_v42 = vrot.slane %v14340_v0, %v24670_v24  ;;  %v14355_v61 = vrot.slane %v22313_v49, %v24670_v24 }
 0xf40   : > { %v14408_v40 = vcombine.low %v13904_v4, %v13911_v9  ;;  %v22315_v11 = vcombine.high %v13904_v4, %v13911_v9  ;;  %v14431_v4 = vrot.slane %v14424_v6, %v24670_v24  ;;  %v14439_v5 = vrot.slane %v22316_v1, %v24670_v24 }
 0xf41   : > { %v14363_v20 = vrot.slane %v14356_v13, %v24670_v24  ;;  %v14371_v52 = vrot.slane %v22314_v18, %v24670_v24  ;;  %v14372_v0 = vcombine.low %v14347_v42, %v14355_v61  ;;  %v13940_v13 = vrot.slane %v13932_v34, %v24670_v24 }
 0xf42   : > { %v13963_v18 = vrot.slane %v13949_v30, %v24670_v24  ;;  %v13947_v9 = vrot.slane %v13933_v8, %v24670_v24  ;;  %v14456_v1 = vcombine.low %v14431_v4, %v14439_v5 }
 0xf43   : > { %v14388_v49 = vcombine.low %v14363_v20, %v14371_v52  ;;  %v28467_v2 = vrot.slane %v14372_v0, %v24681_v38 }
 0xf44   : > { %v13980_v34 = vcombine.low %v13947_v9, %v13963_v18 }
 0xf47   : > { %13662 = vrot.lane.b32.xlu0 %v29829_v7, %s29799_s23  ;;  %v13948_v7 = vcombine.low %v28226_v25, %v28180_v17  ;;  %v14415_v25 = vrot.slane %v14408_v40, %v24670_v24  ;;  %v14423_v17 = vrot.slane %v22315_v11, %v24670_v24  ;;  %v13981_v40 = vcombine.high %v13947_v9, %v13963_v18  ;;  %s22071_s23 = sshll.u32 %s297_s17, 3 }
 0xf48   : > { %v17454_v27 = vpop.xlane.xlu0 %17453  ;;  %v14457_v9 = vcombine.high %v14431_v4, %v14439_v5  ;;  %v28506_v5 = vrot.slane %v14456_v1, %v24681_v38  ;;  %s299_s25 = scalar_lea.vmem [#allocation2], %s22071_s23 }
 0xf49   : > { %v13956_v59 = vrot.slane %v13948_v7, %v24670_v24  ;;  %v14440_v6 = vcombine.low %v14415_v25, %v14423_v17  ;;  %s22008_s21 = sshll.u32 %s299_s25, 4  ;;  %s29448_s21 = int_to_ptr.vmem [resolvable:$true] %s22008_s21 }
 0xf4a   : > { %v28520_v1 = vrot.slane %v14457_v9, %v24681_v38  ;;  %s24247_s18 = scalar_lea.vmem %s29448_s21, 128  ;;  %p24254_p0 = scmp.lt.s32.totalorder %s29448_s21, %s24252_s20 }
 0xf4b   : > { %v13964_v23 = vcombine.low %v13940_v13, %v13956_v59  ;;  %v13965_v55 = vcombine.high %v13940_v13, %v13956_v59  ;;  %v29849_v13 = vld [vmem:[#allocation18_spill] sm:$0xff]  ;;  %v28503_v4 = vrot.slane %v14440_v6, %v24681_v38  ;;  %p24248_p11 = scmp.ne.s32.totalorder %s29448_s21, %s24247_s18 }
 0xf4d   : > { %v17442_v41 = vpop.xlane.xlu1 %17441  ;;  %v13972_v8 = vrot.slane %v13964_v23, %v24681_v38  ;;  %v13995_v23 = vrot.slane %v13981_v40, %v24681_v38  ;;  %p24249_p12 = pnand %p24248_p11, %p24408_p5 }
 0xf4e   : > { %24149 = vrcp.f32 %v17442_v41  ;;  %v14373_v41 = vcombine.high %v14347_v42, %v14355_v61  ;;  %v28470_v42 = vrot.slane %v14388_v49, %v24681_v38  ;;  %v14389_v61 = vcombine.high %v14363_v20, %v14371_v52  ;;  %v29848_v49 = vld [vmem:[#allocation8_spill] sm:$0xff] }
 0xf4f   : > { %v14016_v20 = vcombine.low %v29849_v13, %v29848_v49  ;;  %p24250_p13 = pneg %p24249_p12 }
 0xf50   : > { %v28473_v11 = vrot.slane %v14373_v41, %v24681_v38  ;;  %v14404_v52 = vcombine.low %v28467_v2, %v28470_v42  ;;  %v28483_v18 = vrot.slane %v14389_v61, %v24681_v38  ;;  %v28486_v41 = vrot.slane %v13980_v34, %v24681_v38  ;;  %v29852_v61 = vld [vmem:[#allocation9_spill] sm:$0xff] }
 0xf51   : > { %v17460_v45 = vpop.xlane.xlu0 %17459  ;;  %v17448_v53 = vpop.xlane.xlu1 %17447  ;;  %v29854_v34 = vcombine.low %v29852_v61, %v29853_v33 }
 0xf52   : > { %24151 = vrcp.f32 %v17448_v53 }
 0xf53   : > { %24153 = vrcp.f32 %v17454_v27  ;;  %v13979_v27 = vrot.slane %v13965_v55, %v24681_v38  ;;  %v29850_v55 = vld [vmem:[#allocation5_spill] sm:$0xff] }
 0xf55   : > { %v17445_v7 = vpop.xlane.xlu0 %17444  ;;  %v17457_v0 = vpop.xlane.xlu1 %17456 }
 0xf56   : > { %24155 = vrcp.f32 %v17445_v7  ;;  %v29851_v7 = vld [vmem:[#allocation12_spill] sm:$0xff] }
 0xf57   : > { %24157 = vrcp.f32 %v17460_v45  ;;  %v14441_v45 = vcombine.high %v14415_v25, %v14423_v17  ;;  %v22317_v25 = vcombine.high %v13972_v8, %v13979_v27  ;;  %v14001_v40 = vcombine.high %v29851_v7, %v29850_v55 }
 0xf58   : > { %v24150_v30 = vpop.eup %24149 }
 0xf59   : > { %v17568_v59 = vmul.f32 %v24150_v30, %v28257_v54  ;;  %v17451_v53 = vpop.xlane.xlu0 %17450  ;;  %v14000_v30 = vcombine.low %v29851_v7, %v29850_v55  ;;  %v14476_v54 = vcombine.low %v13972_v8, %v13979_v27  ;;  %v14406_v8 = vcombine.low %v28473_v11, %v28483_v18 }
 0xf5a   : > { %24159 = vrcp.f32 %v17451_v53  ;;  %v14017_v53 = vcombine.high %v29849_v13, %v29848_v49  ;;  %v28517_v6 = vrot.slane %v14441_v45, %v24681_v38  ;;  %v14492_v55 = vcombine.low %v28486_v41, %v13995_v23 }
 0xf5b   : > { %23499 = vmatmul.mubr.msk.f32.vlgmr.msra.gmra.mrb[108].mxu1 %vm317_vm0, %v17568_v59  ;;  %24161 = vrcp.f32 %v17457_v0  ;;  %v14024_v0 = vrot.slane %v14016_v20, %v24670_v24  ;;  %v22318_v20 = vcombine.high %v28486_v41, %v13995_v23  ;;  %v28531_v45 = vrot.slane %v14476_v54, %v24670_v24 }
 0xf5c   : > { %23507 = vmatpush3.msra.mxu1 %v29854_v34  ;;  %23508 = vmatprep.mubr.msk.f32.mxu1 %vm24316_vm2, %v29855_v57  ;;  %v24152_v59 = vpop.eup %24151  ;;  %v14031_v7 = vrot.slane %v14017_v53, %v24670_v24  ;;  %v28534_v9 = vrot.slane %v22317_v25, %v24670_v24  ;;  %v14015_v41 = vrot.slane %v14001_v40, %v24670_v24 }
 0xf5d   : > { %v17466_v17 = vpop.xlane.xlu0 %17465  ;;  %23516 = vmatprep.subr.mxu1 %v29855_v57  ;;  %v17570_v49 = vmul.f32 %v24152_v59, %v28264_v63  ;;  %v24154_v13 = vpop.eup %24153  ;;  %v14008_v63 = vrot.slane %v14000_v30, %v24670_v24  ;;  %v14472_v30 = vcombine.low %v28503_v4, %v28506_v5  ;;  %v14474_v25 = vcombine.low %v28517_v6, %v28520_v1 }
 0xf5e   : > { %24163 = vrcp.f32 %v17466_v17  ;;  %v17469_v59 = vpop.xlane.xlu1 %17468  ;;  %v17572_v53 = vmul.f32 %v24154_v13, %v28253_v16 }
 0xf5f   : > { %23509 = vmatmul.mubr.msk.f32.vlgmr.msra.gmra.mrb[110].mxu1 %vm317_vm0, %v17570_v49  ;;  %v14032_v23 = vcombine.low %v14008_v63, %v14024_v0  ;;  %v14048_v49 = vcombine.low %v14015_v41, %v14031_v7 }
 0xf60   : > { %v24156_v34 = vpop.eup %24155  ;;  %23517 = vmatpush3.msra.mxu1 %v14404_v52  ;;  %23518 = vmatprep.mubr.msk.f32.mxu1 %vm24316_vm2, %v29855_v57  ;;  %v14033_v52 = vcombine.high %v14008_v63, %v14024_v0  ;;  %v28552_v0 = vrot.slane %v14492_v55, %v24670_v24  ;;  %v29858_v55 = vld [vmem:[#allocation27_spill] sm:$0xff] }
 0xf61   : > { %v17463_v17 = vpop.xlane.xlu0 %17462  ;;  %v17569_v27 = vmul.f32 %v24156_v34, %v28276_v19  ;;  %23526 = vmatprep.subr.mxu1 %v29855_v57  ;;  %v24158_v19 = vpop.eup %24157  ;;  %v14049_v34 = vcombine.high %v14015_v41, %v14031_v7  ;;  %v28563_v63 = vrot.slane %v14032_v23, %v24681_v38  ;;  %v29857_v7 = vld [vmem:[#allocation26_spill] sm:$0xff] }
 0xf62   : > { %24165 = vrcp.f32 %v17463_v17  ;;  %v29856_v17 = vcombine.high %v29852_v61, %v29853_v33  ;;  %v14508_v33 = vcombine.low %v28531_v45, %v28534_v9  ;;  %v14085_v41 = vcombine.high %v29858_v55, %v29857_v7 }
 0xf63   : > { %23504 = vmatmul.mubr.msk.f32.vlgmr.msra.gmra.mrb[132].mxu0 %vm317_vm0, %v17569_v27  ;;  %24167 = vrcp.f32 %v17469_v59  ;;  %23519 = vmatmul.mubr.msk.f32.vlgmr.msra.gmra.mrb[112].mxu1 %vm317_vm0, %v17572_v53  ;;  %v28558_v27 = vrot.slane %v22318_v20, %v24670_v24  ;;  %v14084_v59 = vcombine.low %v29858_v55, %v29857_v7  ;;  %v14047_v20 = vrot.slane %v14033_v52, %v24681_v38 }
 0xf64   : > { %v24160_v40 = vpop.eup %24159  ;;  %23512 = vmatpush3.msra.mxu0 %v29856_v17  ;;  %23513 = vmatprep.mubr.msk.f32.mxu0 %vm24316_vm2, %v29855_v57  ;;  %v17574_v23 = vmul.f32 %v24158_v19, %v28266_v15  ;;  %v29859_v17 = vld [vmem:[#allocation36_spill] sm:$0xff]  ;;  %v29862_v55 = vcombine.high %v28473_v11, %v28483_v18 }
 0xf65   : > { %v17472_v16 = vpop.xlane.xlu0 %17471  ;;  %23521 = vmatprep.subr.mxu0 %v29855_v57  ;;  %v17571_v13 = vmul.f32 %v24160_v40, %v28282_v43  ;;  %v24162_v61 = vpop.eup %24161  ;;  %23527 = vmatpush3.msra.mxu1 %v14406_v8  ;;  %v14509_v43 = vcombine.high %v28531_v45, %v28534_v9  ;;  %v14056_v8 = vrot.slane %v14048_v49, %v24681_v38 }
 0xf66   : > { %24169 = vrcp.f32 %v17472_v16  ;;  %23528 = vmatprep.mubr.msk.f32.mxu1 %vm24316_vm2, %v29855_v57  ;;  %23536 = vmatprep.subr.mxu1 %v29855_v57  ;;  %v14063_v40 = vrot.slane %v14049_v34, %v24681_v38  ;;  %v29860_v16 = vld [vmem:[#allocation25_spill] sm:$0xff]  ;;  %v29861_v45 = vcombine.high %v28467_v2, %v28470_v42  ;;  %v17573_v15 = vmul.f32 %v24162_v61, %v28273_v51 }
 0xf67   : > { %23514 = vmatmul.mubr.msk.f32.vlgmr.msra.gmra.mrb[134].mxu0 %vm317_vm0, %v17571_v13  ;;  %v14068_v54 = vcombine.low %v29860_v16, %v29859_v17  ;;  %v14069_v9 = vcombine.high %v29860_v16, %v29859_v17  ;;  %23529 = vmatmul.mubr.msk.f32.vlgmr.msra.gmra.mrb[114].mxu1 %vm317_vm0, %v17574_v23  ;;  %v14524_v52 = vcombine.low %v28552_v0, %v28558_v27 }
 0xf68   : > { %v24164_v53 = vpop.eup %24163  ;;  %23522 = vmatpush3.msra.mxu0 %v29861_v45  ;;  %23523 = vmatprep.mubr.msk.f32.mxu0 %vm24316_vm2, %v29855_v57  ;;  %v14092_v49 = vrot.slane %v14084_v59, %v24670_v24  ;;  %v28597_v2 = vrot.slane %v14508_v33, %v24681_v38  ;;  %v14525_v51 = vcombine.high %v28552_v0, %v28558_v27 }
 0xf69   : > { %v17478_v19 = vpop.xlane.xlu0 %17477  ;;  %23531 = vmatprep.subr.mxu0 %v29855_v57  ;;  %23537 = vmatpush3.msra.mxu1 %v14472_v30  ;;  %v14544_v42 = vcombine.low %v28563_v63, %v14047_v20  ;;  %v14099_v34 = vrot.slane %v14085_v41, %v24670_v24  ;;  %v17576_v13 = vmul.f32 %v24164_v53, %v28286_v21 }
 0xf6a   : > { %24171 = vrcp.f32 %v17478_v19  ;;  %23538 = vmatprep.mubr.msk.f32.mxu1 %vm24316_vm2, %v29855_v57  ;;  %23546 = vmatprep.subr.mxu1 %v29855_v57  ;;  %v22319_v61 = vcombine.high %v28563_v63, %v14047_v20  ;;  %v14560_v7 = vcombine.low %v14056_v8, %v14063_v40  ;;  %v14076_v33 = vrot.slane %v14068_v54, %v24670_v24  ;;  %v17481_v59 = vpop.xlane.xlu1 %17480 }
 0xf6b   : > { %23524 = vmatmul.mubr.msk.f32.vlgmr.msra.gmra.mrb[136].mxu0 %vm317_vm0, %v17573_v15  ;;  %v22320_v0 = vcombine.high %v14056_v8, %v14063_v40  ;;  %v14083_v21 = vrot.slane %v14069_v9, %v24670_v24  ;;  %23539 = vmatmul.mubr.msk.f32.vlgmr.msra.gmra.mrb[116].mxu1 %vm317_vm0, %v17576_v13  ;;  %v28623_v11 = vrot.slane %v14524_v52, %v24681_v38 }
 0xf6c   : > { %v24166_v30 = vpop.eup %24165  ;;  %23532 = vmatpush3.msra.mxu0 %v29862_v55  ;;  %23533 = vmatprep.mubr.msk.f32.mxu0 %vm24316_vm2, %v29855_v57  ;;  %v14100_v54 = vcombine.low %v14076_v33, %v14092_v49  ;;  %v14101_v18 = vcombine.high %v14076_v33, %v14092_v49  ;;  %v28636_v8 = vrot.slane %v14525_v51, %v24681_v38  ;;  %v29864_v51 = vld [vmem:[#allocation7_spill] sm:$0xff]  ;;  %v29866_v33 = vld [vmem:[#allocation34_spill] sm:$0xff]  ;;  %v29867_v55 = vld [vmem:[#allocation17_spill] sm:$0xff] }
 0xf6d   : > { %v17575_v27 = vmul.f32 %v24166_v30, %v28297_v47  ;;  %v17475_v41 = vpop.xlane.xlu0 %17474  ;;  %23541 = vmatprep.subr.mxu0 %v29855_v57  ;;  %v24168_v63 = vpop.eup %24167  ;;  %23547 = vmatpush3.msra.mxu1 %v14474_v25  ;;  %v28626_v47 = vrot.slane %v14509_v43, %v24681_v38  ;;  %v14116_v20 = vcombine.low %v14083_v21, %v14099_v34 }
 0xf6e   : > { %24173 = vrcp.f32 %v17475_v41  ;;  %23548 = vmatprep.mubr.msk.f32.mxu1 %vm24316_vm2, %v29855_v57  ;;  %v14117_v23 = vcombine.high %v14083_v21, %v14099_v34  ;;  %23556 = vmatprep.subr.mxu1 %v29855_v57  ;;  %v29863_v25 = vcombine.high %v28503_v4, %v28506_v5  ;;  %v14551_v43 = vrot.slane %v14544_v42, %v24670_v24  ;;  %v29865_v42 = vld [vmem:[#allocation22_spill] sm:$0xff] }
 0xf6f   : > { %23534 = vmatmul.mubr.msk.f32.vlgmr.msra.gmra.mrb[138].mxu0 %vm317_vm0, %v17575_v27  ;;  %24175 = vrcp.f32 %v17481_v59  ;;  %v14559_v40 = vrot.slane %v22319_v61, %v24670_v24  ;;  %v17577_v17 = vmul.f32 %v24168_v63, %v28290_v3  ;;  %v14567_v4 = vrot.slane %v14560_v7, %v24670_v24 }
 0xf70   : > { %v24170_v53 = vpop.eup %24169  ;;  %23542 = vmatpush3.msra.mxu0 %v29863_v25  ;;  %23543 = vmatprep.mubr.msk.f32.mxu0 %vm24316_vm2, %v29855_v57  ;;  %v14575_v5 = vrot.slane %v22320_v0, %v24670_v24  ;;  %v14108_v9 = vrot.slane %v14100_v54, %v24681_v38  ;;  %v14475_v15 = vcombine.high %v28517_v6, %v28520_v1 }
 0xf71   : > { %v17578_v16 = vmul.f32 %v24170_v53, %v28303_v36  ;;  %v17484_v45 = vpop.xlane.xlu0 %17483  ;;  %23551 = vmatprep.subr.mxu0 %v29855_v57  ;;  %v14540_v19 = vcombine.low %v28597_v2, %v28623_v11  ;;  %v14115_v3 = vrot.slane %v14101_v18, %v24681_v38  ;;  %v14124_v36 = vrot.slane %v14116_v20, %v24681_v38 }
 0xf72   : > { %24177 = vrcp.f32 %v17484_v45  ;;  %v14131_v52 = vrot.slane %v14117_v23, %v24681_v38  ;;  %v14152_v34 = vcombine.low %v29865_v42, %v29864_v51  ;;  %v14542_v6 = vcombine.low %v28626_v47, %v28636_v8  ;;  %v17493_v45 = vpop.xlane.xlu1 %17492 }
 0xf73   : > { %23544 = vmatmul.mubr.msk.f32.vlgmr.msra.gmra.mrb[140].mxu0 %vm317_vm0, %v17577_v17  ;;  %23549 = vmatmul.mubr.msk.f32.vlgmr.msra.gmra.mrb[118].mxu1 %vm317_vm0, %v17578_v16  ;;  %v14576_v1 = vcombine.low %v14551_v43, %v14559_v40  ;;  %v14592_v61 = vcombine.low %v14567_v4, %v14575_v5  ;;  %v14577_v7 = vcombine.high %v14551_v43, %v14559_v40 }
 0xf74   : > { %v24172_v49 = vpop.eup %24171  ;;  %23552 = vmatpush3.msra.mxu0 %v14475_v15  ;;  %23557 = vmatpush3.msra.mxu1 %v14540_v19  ;;  %v14136_v0 = vcombine.low %v29867_v55, %v29866_v33  ;;  %v14153_v21 = vcombine.high %v29865_v42, %v29864_v51  ;;  %v14612_v27 = vcombine.low %v14108_v9, %v14115_v3 }
 0xf75   : > { %v17580_v13 = vmul.f32 %v24172_v49, %v28306_v12  ;;  %v17490_v30 = vpop.xlane.xlu0 %17489  ;;  %23558 = vmatprep.mubr.msk.f32.mxu1 %vm24316_vm2, %v29855_v57  ;;  %23566 = vmatprep.subr.mxu1 %v29855_v57  ;;  %v14593_v12 = vcombine.high %v14567_v4, %v14575_v5  ;;  %v22321_v59 = vcombine.high %v14108_v9, %v14115_v3 }
 0xf76   : > { %24179 = vrcp.f32 %v17490_v30  ;;  %23553 = vmatprep.mubr.msk.f32.mxu0 %vm24316_vm2, %v29855_v57  ;;  %23561 = vmatprep.subr.mxu0 %v29855_v57  ;;  %v14628_v41 = vcombine.low %v14124_v36, %v14131_v52  ;;  %v14541_v63 = vcombine.high %v28597_v2, %v28623_v11  ;;  %v22322_v18 = vcombine.high %v14124_v36, %v14131_v52 }
 0xf77   : > { %23559 = vmatmul.mubr.msk.f32.vlgmr.msra.gmra.mrb[120].mxu1 %vm317_vm0, %v17580_v13  ;;  %v14137_v20 = vcombine.high %v29867_v55, %v29866_v33  ;;  %v14160_v23 = vrot.slane %v14152_v34, %v24670_v24  ;;  %v14543_v43 = vcombine.high %v28626_v47, %v28636_v8  ;;  %v28683_v2 = vrot.slane %v14576_v1, %v24681_v38 }
 0xf78   : > { %v24174_v54 = vpop.eup %24173  ;;  %23567 = vmatpush3.msra.mxu1 %v14542_v6  ;;  %23568 = vmatprep.mubr.msk.f32.mxu1 %vm24316_vm2, %v29855_v57  ;;  %v28686_v11 = vrot.slane %v14592_v61, %v24681_v38  ;;  %v14144_v17 = vrot.slane %v14136_v0, %v24670_v24  ;;  %v14167_v16 = vrot.slane %v14153_v21, %v24670_v24 }
 0xf79   : > { %v17579_v53 = vmul.f32 %v24174_v54, %v28317_v22  ;;  %v17487_v25 = vpop.xlane.xlu0 %17486  ;;  %23576 = vmatprep.subr.mxu1 %v29855_v57  ;;  %v24176_v40 = vpop.eup %24175  ;;  %v28691_v22 = vrot.slane %v14577_v7, %v24681_v38  ;;  %v28694_v4 = vrot.slane %v14593_v12, %v24681_v38  ;;  %v14619_v47 = vrot.slane %v14612_v27, %v24670_v24 }
 0xf7a   : > { %24181 = vrcp.f32 %v17487_v25  ;;  %v14627_v8 = vrot.slane %v22321_v59, %v24670_v24  ;;  %v14635_v5 = vrot.slane %v14628_v41, %v24670_v24  ;;  %v14151_v15 = vrot.slane %v14137_v20, %v24670_v24 }
 0xf7b   : > { %23554 = vmatmul.mubr.msk.f32.vlgmr.msra.gmra.mrb[142].mxu0 %vm317_vm0, %v17579_v53  ;;  %v14168_v19 = vcombine.low %v14144_v17, %v14160_v23  ;;  %v14643_v3 = vrot.slane %v22322_v18, %v24670_v24  ;;  %v14169_v36 = vcombine.high %v14144_v17, %v14160_v23  ;;  %v17581_v52 = vmul.f32 %v24176_v40, %v28310_v50  ;;  %v17505_v54 = vpop.xlane.xlu1 %17504 }
 0xf7c   : > { %v24178_v9 = vpop.eup %24177  ;;  %23562 = vmatpush3.msra.mxu0 %v14541_v63  ;;  %23563 = vmatprep.mubr.msk.f32.mxu0 %vm24316_vm2, %v29855_v57  ;;  %24183 = vrcp.f32 %v17493_v45  ;;  %v14184_v42 = vcombine.low %v14151_v15, %v14167_v16  ;;  %v14185_v34 = vcombine.high %v14151_v15, %v14167_v16  ;;  %v14608_v6 = vcombine.low %v28683_v2, %v28686_v11 }
 0xf7d   : > { %v17582_v49 = vmul.f32 %v24178_v9, %v28323_v28  ;;  %v17496_v51 = vpop.xlane.xlu0 %17495  ;;  %23571 = vmatprep.subr.mxu0 %v29855_v57  ;;  %v14644_v50 = vcombine.low %v14619_v47, %v14627_v8  ;;  %v14660_v13 = vcombine.low %v14635_v5, %v14643_v3  ;;  %v14176_v28 = vrot.slane %v14168_v19, %v24681_v38 }
 0xf7e   : > { %24185 = vrcp.f32 %v17496_v51  ;;  %v14183_v30 = vrot.slane %v14169_v36, %v24681_v38  ;;  %v14192_v33 = vrot.slane %v14184_v42, %v24681_v38  ;;  %v14199_v55 = vrot.slane %v14185_v34, %v24681_v38 }
 0xf7f   : > { %23564 = vmatmul.mubr.msk.f32.vlgmr.msra.gmra.mrb[144].mxu0 %vm317_vm0, %v17581_v52  ;;  %23569 = vmatmul.mubr.msk.f32.vlgmr.msra.gmra.mrb[122].mxu1 %vm317_vm0, %v17582_v49  ;;  %v14610_v0 = vcombine.low %v28691_v22, %v28694_v4  ;;  %v14652_v21 = vrot.slane %v14644_v50, %v24681_v38  ;;  %v14668_v12 = vrot.slane %v14660_v13, %v24681_v38 }
 0xf80   : > { %v24180_v1 = vpop.eup %24179  ;;  %23572 = vmatpush3.msra.mxu0 %v14543_v43  ;;  %23577 = vmatpush3.msra.mxu1 %v14608_v6  ;;  %v14661_v27 = vcombine.high %v14635_v5, %v14643_v3  ;;  %v14680_v41 = vcombine.low %v14176_v28, %v14183_v30  ;;  %v22323_v63 = vcombine.high %v14176_v28, %v14183_v30 }
 0xf81   : > { %v17584_v61 = vmul.f32 %v24180_v1, %v28332_v60  ;;  %v17502_v7 = vpop.xlane.xlu0 %17501  ;;  %23578 = vmatprep.mubr.msk.f32.mxu1 %vm24316_vm2, %v29855_v57  ;;  %23586 = vmatprep.subr.mxu1 %v29855_v57  ;;  %v14645_v60 = vcombine.high %v14619_v47, %v14627_v8  ;;  %v14696_v20 = vcombine.low %v14192_v33, %v14199_v55 }
 0xf82   : > { %24187 = vrcp.f32 %v17502_v7  ;;  %23573 = vmatprep.mubr.msk.f32.mxu0 %vm24316_vm2, %v29855_v57  ;;  %23581 = vmatprep.subr.mxu0 %v29855_v57  ;;  %v22324_v23 = vcombine.high %v14192_v33, %v14199_v55  ;;  %v14609_v43 = vcombine.high %v28683_v2, %v28686_v11  ;;  %v14676_v17 = vcombine.low %v14652_v21, %v14668_v12 }
 0xf83   : > { %23579 = vmatmul.mubr.msk.f32.vlgmr.msra.gmra.mrb[124].mxu1 %vm317_vm0, %v17584_v61  ;;  %v14659_v16 = vrot.slane %v14645_v60, %v24681_v38  ;;  %v14675_v45 = vrot.slane %v14661_v27, %v24681_v38  ;;  %v14695_v2 = vrot.slane %v22323_v63, %v24670_v24  ;;  %v14703_v5 = vrot.slane %v14696_v20, %v24670_v24 }
 0xf84   : > { %23587 = vmatpush3.msra.mxu1 %v14610_v0  ;;  %23588 = vmatprep.mubr.msk.f32.mxu1 %vm24316_vm2, %v29855_v57  ;;  %v24182_v59 = vpop.eup %24181  ;;  %v14711_v9 = vrot.slane %v22324_v23, %v24670_v24  ;;  %v14677_v52 = vcombine.high %v14652_v21, %v14668_v12 }
 0xf85   : > { %v17499_v18 = vpop.xlane.xlu0 %17498  ;;  %23596 = vmatprep.subr.mxu1 %v29855_v57  ;;  %v17583_v53 = vmul.f32 %v24182_v59, %v28337_v37  ;;  %v14687_v37 = vrot.slane %v14680_v41, %v24670_v24 }
 0xf86   : > { %24189 = vrcp.f32 %v17499_v18  ;;  %v24184_v25 = vpop.eup %24183  ;;  %v14728_v36 = vcombine.low %v14703_v5, %v14711_v9  ;;  %v14729_v28 = vcombine.high %v14703_v5, %v14711_v9 }
 0xf87   : > { %24191 = vrcp.f32 %v17505_v54  ;;  %23574 = vmatmul.mubr.msk.f32.vlgmr.msra.gmra.mrb[146].mxu0 %vm317_vm0, %v17583_v53  ;;  %v17585_v11 = vmul.f32 %v24184_v25, %v28325_v31  ;;  %v14678_v31 = vcombine.low %v14659_v16, %v14675_v45  ;;  %v14712_v3 = vcombine.low %v14687_v37, %v14695_v2 }
 0xf88   : > { %v24186_v40 = vpop.eup %24185  ;;  %23582 = vmatpush3.msra.mxu0 %v14609_v43  ;;  %23583 = vmatprep.mubr.msk.f32.mxu0 %vm24316_vm2, %v29855_v57  ;;  %v14736_v51 = vrot.slane %v14728_v36, %v24681_v38  ;;  %v14713_v13 = vcombine.high %v14687_v37, %v14695_v2  ;;  %v14743_v7 = vrot.slane %v14729_v28, %v24681_v38 }
 0xf89   : > { %v17586_v47 = vmul.f32 %v24186_v40, %v28345_v44  ;;  %v17508_v8 = vpop.xlane.xlu0 %17507  ;;  %23591 = vmatprep.subr.mxu0 %v29855_v57  ;;  %v14611_v44 = vcombine.high %v28691_v22, %v28694_v4  ;;  %v14720_v49 = vrot.slane %v14712_v3, %v24681_v38 }
 0xf8a   : > { %24193 = vrcp.f32 %v17508_v8  ;;  %v14727_v61 = vrot.slane %v14713_v13, %v24681_v38 }
 0xf8b   : > { %23589 = vmatmul.mubr.msk.f32.vlgmr.msra.gmra.mrb[126].mxu1 %vm317_vm0, %v17586_v47  ;;  %23584 = vmatmul.mubr.msk.f32.vlgmr.msra.gmra.mrb[148].mxu0 %vm317_vm0, %v17585_v11  ;;  %v14744_v1 = vcombine.low %v14720_v49, %v14736_v51  ;;  %v14745_v63 = vcombine.high %v14720_v49, %v14736_v51 }
 0xf8c   : > { %v24188_v15 = vpop.eup %24187  ;;  %23597 = vmatpush3.msra.mxu1 %v14676_v17  ;;  %23592 = vmatpush3.msra.mxu0 %v14611_v44  ;;  %v14746_v60 = vcombine.low %v14727_v61, %v14743_v7  ;;  %v14747_v20 = vcombine.high %v14727_v61, %v14743_v7 }
 0xf8d   : > { %v17588_v19 = vmul.f32 %v24188_v15, %v28349_v29  ;;  %23598 = vmatprep.mubr.msk.f32.mxu1 %vm24316_vm2, %v29855_v57  ;;  %23606 = vmatprep.subr.mxu1 %v29855_v57 }
 0xf8e   : > { %23593 = vmatprep.mubr.msk.f32.mxu0 %vm24316_vm2, %v29855_v57  ;;  %23601 = vmatprep.subr.mxu0 %v29855_v57 }
 0xf8f   : > { %23599 = vmatmul.mubr.msk.f32.vlgmr.msra.gmra.mrb[128].mxu1 %vm317_vm0, %v17588_v19 }
 0xf90   : > { %v24190_v22 = vpop.eup %24189  ;;  %23607 = vmatpush3.msra.mxu1 %v14678_v31  ;;  %23608 = vmatprep.mubr.msk.f32.mxu1 %vm24316_vm2, %v29855_v57 }
 0xf91   : > { %v17587_v29 = vmul.f32 %v24190_v22, %v28353_v14  ;;  %23616 = vmatprep.subr.mxu1 %v29855_v57  ;;  %v24192_v4 = vpop.eup %24191  ;;  %v14679_v14 = vcombine.high %v14659_v16, %v14675_v45 }
 0xf92   : > { %v17589_v34 = vmul.f32 %v24192_v4, %v28339_v46 }
 0xf93   : > { %23594 = vmatmul.mubr.msk.f32.vlgmr.msra.gmra.mrb[150].mxu0 %vm317_vm0, %v17587_v29 }
 0xf94   : > { %v24194_v42 = vpop.eup %24193  ;;  %23602 = vmatpush3.msra.mxu0 %v14677_v52  ;;  %23603 = vmatprep.mubr.msk.f32.mxu0 %vm24316_vm2, %v29855_v57 }
 0xf95   : > { %v17590_v6 = vmul.f32 %v24194_v42, %v28357_v35  ;;  %23611 = vmatprep.subr.mxu0 %v29855_v57 }
 0xf97   : > { %23604 = vmatmul.mubr.msk.f32.vlgmr.msra.gmra.mrb[152].mxu0 %vm317_vm0, %v17589_v34  ;;  %23609 = vmatmul.mubr.msk.f32.vlgmr.msra.gmra.mrb[130].mxu1 %vm317_vm0, %v17590_v6 }
 0xf98   : > { %23612 = vmatpush3.msra.mxu0 %v14679_v14  ;;  %23617 = vmatpush3.msra.mxu1 %v14744_v1 }
 0xf99   : > { %23618 = vmatprep.mubr.msk.f32.mxu1 %vm24316_vm2, %v29855_v57  ;;  %23626 = vmatprep.subr.mxu1 %v29855_v57 }
 0xf9a   : > { %23613 = vmatprep.mubr.msk.f32.mxu0 %vm24316_vm2, %v29855_v57  ;;  %23621 = vmatprep.subr.mxu0 %v29855_v57 }
 0xfa4   : > { %v17514_v46 = vpop.xlane.xlu0 %17513 }
 0xfa5   : > { %24195 = vrcp.f32 %v17514_v46  ;;  %v17517_v35 = vpop.xlane.xlu1 %17516 }
 0xfa8   : > { %v17511_v50 = vpop.xlane.xlu0 %17510 }
 0xfa9   : > { %24197 = vrcp.f32 %v17511_v50 }
 0xfaa   : > { %24199 = vrcp.f32 %v17517_v35 }
 0xfac   : > { %v17520_v30 = vpop.xlane.xlu0 %17519 }
 0xfad   : > { %24201 = vrcp.f32 %v17520_v30 }
 0xfaf   : > { %v24196_v33 = vpop.eup %24195 }
 0xfb0   : > { %v17592_v55 = vmul.f32 %v24196_v33, %v28368_v10 }
 0xfb2   : > { %v17526_v0 = vpop.xlane.xlu0 %17525  ;;  %23619 = vmatmul.mubr.msk.f32.vlgmr.msra.gmra.mrb[132].mxu1 %vm317_vm0, %v17592_v55 }
 0xfb3   : > { %v24198_v21 = vpop.eup %24197  ;;  %23627 = vmatpush3.msra.mxu1 %v14746_v60  ;;  %23628 = vmatprep.mubr.msk.f32.mxu1 %vm24316_vm2, %v29855_v57  ;;  %v17529_v59 = vpop.xlane.xlu1 %17528 }
 0xfb4   : > { %v17591_v12 = vmul.f32 %v24198_v21, %v28374_v26  ;;  %23636 = vmatprep.subr.mxu1 %v29855_v57  ;;  %v24200_v27 = vpop.eup %24199  ;;  %v29868_v21 = vld [vmem:[#allocation15_spill] sm:$0xff] }
 0xfb5   : > { %v17593_v54 = vmul.f32 %v24200_v27, %v28370_v48  ;;  %v29869_v27 = vld [vmem:[#allocation6_spill] sm:$0xff] }
 0xfb6   : > { %v17523_v41 = vpop.xlane.xlu0 %17522  ;;  %23614 = vmatmul.mubr.msk.f32.vlgmr.msra.gmra.mrb[154].mxu0 %vm317_vm0, %v17591_v12 }
 0xfb7   : > { %24203 = vrcp.f32 %v17523_v41  ;;  %v24202_v10 = vpop.eup %24201  ;;  %23622 = vmatpush3.msra.mxu0 %v14745_v63  ;;  %23623 = vmatprep.mubr.msk.f32.mxu0 %vm24316_vm2, %v29855_v57  ;;  %v13679_v23 = vpop.permute.xlu1 %13678 }
 0xfb8   : > { %v17594_v18 = vmul.f32 %v24202_v10, %v28382_v32  ;;  %23631 = vmatprep.subr.mxu0 %v29855_v57  ;;  %v14204_v53 = vcombine.low %v28440_v58, %v13679_v23  ;;  %v14205_v25 = vcombine.high %v28440_v58, %v13679_v23  ;;  %24205 = vrcp.f32 %v17526_v0 }
 0xfb9   : > { %24207 = vrcp.f32 %v17529_v59 }
 0xfba   : > { %v17532_v26 = vpop.xlane.xlu0 %17531  ;;  %23624 = vmatmul.mubr.msk.f32.vlgmr.msra.gmra.mrb[156].mxu0 %vm317_vm0, %v17593_v54  ;;  %23629 = vmatmul.mubr.msk.f32.vlgmr.msra.gmra.mrb[134].mxu1 %vm317_vm0, %v17594_v18  ;;  %v14212_v47 = vrot.slane %v14204_v53, %v24670_v24  ;;  %v14219_v8 = vrot.slane %v14205_v25, %v24670_v24 }
 0xfbb   : > { %23632 = vmatpush3.msra.mxu0 %v14747_v20  ;;  %23633 = vmatprep.mubr.msk.f32.mxu0 %vm24316_vm2, %v29855_v57  ;;  %v13695_v40 = vpop.permute.xlu1 %13694  ;;  %24209 = vrcp.f32 %v17532_v26 }
 0xfbc   : > { %23641 = vmatprep.subr.mxu0 %v29855_v57  ;;  %23638 = vmatprep.mubr.msk.f32.mxu1 %vm24316_vm2, %v29855_v57 }
 0xfbe   : > { %v17535_v48 = vpop.xlane.xlu0 %17534 }
 0xfbf   : > { %24211 = vrcp.f32 %v17535_v48 }
 0xfc1   : > { %v24204_v32 = vpop.eup %24203 }
 0xfc2   : > { %v17595_v43 = vmul.f32 %v24204_v32, %v28392_v56  ;;  %v13663_v17 = vpop.permute.xlu0 %13662  ;;  %v24206_v51 = vpop.eup %24205 }
 0xfc3   : > { %v14220_v16 = vcombine.low %v13663_v17, %v13695_v40  ;;  %v14221_v45 = vcombine.high %v13663_v17, %v13695_v40  ;;  %v24208_v1 = vpop.eup %24207  ;;  %v17596_v55 = vmul.f32 %v24206_v51, %v28386_v39 }
 0xfc4   : > { %23634 = vmatmul.mubr.msk.f32.vlgmr.msra.gmra.mrb[158].mxu0 %vm317_vm0, %v17595_v43  ;;  %v17597_v33 = vmul.f32 %v24208_v1, %v28388_v62 }
 0xfc5   : > { %v14228_v37 = vrot.slane %v14220_v16, %v24670_v24  ;;  %v14235_v2 = vrot.slane %v14221_v45, %v24670_v24  ;;  %23643 = vmatprep.mubr.msk.f32.mxu0 %vm24316_vm2, %v29855_v57  ;;  %v24210_v50 = vpop.eup %24209 }
 0xfc6   : > { %v17598_v12 = vmul.f32 %v24210_v50, %v29868_v21 }
 0xfc7   : > { %v14236_v56 = vcombine.low %v14212_v47, %v14228_v37  ;;  %v14237_v58 = vcombine.high %v14212_v47, %v14228_v37  ;;  %v14252_v11 = vcombine.low %v14219_v8, %v14235_v2  ;;  %v14253_v5 = vcombine.high %v14219_v8, %v14235_v2 }
 0xfc9   : > { %v14244_v9 = vrot.slane %v14236_v56, %v24681_v38  ;;  %v14251_v44 = vrot.slane %v14237_v58, %v24681_v38  ;;  %v14260_v15 = vrot.slane %v14252_v11, %v24681_v38  ;;  %v14267_v19 = vrot.slane %v14253_v5, %v24681_v38  ;;  %v24212_v7 = vpop.eup %24211 }
 0xfca   : > { %v17599_v59 = vmul.f32 %v24212_v7, %v29869_v27 }
 0xfcb   : > { %v14748_v31 = vcombine.low %v14244_v9, %v14251_v44  ;;  %v22325_v3 = vcombine.high %v14244_v9, %v14251_v44  ;;  %v14764_v36 = vcombine.low %v14260_v15, %v14267_v19  ;;  %v22326_v22 = vcombine.high %v14260_v15, %v14267_v19 }
 0xfcd   : > { %v14755_v29 = vrot.slane %v14748_v31, %v24670_v24  ;;  %v14763_v4 = vrot.slane %v22325_v3, %v24670_v24  ;;  %v14771_v52 = vrot.slane %v14764_v36, %v24670_v24  ;;  %v14779_v49 = vrot.slane %v22326_v22, %v24670_v24 }
 0xfcf   : > { %v14780_v42 = vcombine.low %v14755_v29, %v14763_v4  ;;  %v14796_v34 = vcombine.low %v14771_v52, %v14779_v49  ;;  %v14781_v6 = vcombine.high %v14755_v29, %v14763_v4  ;;  %v14797_v14 = vcombine.high %v14771_v52, %v14779_v49 }
 0xfd1   : > { %v14788_v46 = vrot.slane %v14780_v42, %v24681_v38  ;;  %v14804_v35 = vrot.slane %v14796_v34, %v24681_v38  ;;  %v14795_v13 = vrot.slane %v14781_v6, %v24681_v38  ;;  %v14811_v28 = vrot.slane %v14797_v14, %v24681_v38 }
 0xfd3   : > { %v14812_v30 = vcombine.low %v14788_v46, %v14804_v35  ;;  %v14813_v61 = vcombine.high %v14788_v46, %v14804_v35  ;;  %v14814_v0 = vcombine.low %v14795_v13, %v14811_v28  ;;  %v14815_v60 = vcombine.high %v14795_v13, %v14811_v28 }
 0xfd5   : > { %23637 = vmatpush3.msra.mxu1 %v14812_v30  ;;  %23642 = vmatpush3.msra.mxu0 %v14813_v61 }
 0xfd6   : > { %23639 = vmatmul.mubr.msk.f32.vlgmr.msra.gmra.mrb[136].mxu1 %vm317_vm0, %v17596_v55  ;;  %23644 = vmatmul.mubr.msk.f32.vlgmr.msra.gmra.mrb[160].mxu0 %vm317_vm0, %v17597_v33 }
 0xfd7   : > { %23646 = vmatprep.subr.mxu1 %v29855_v57  ;;  %23651 = vmatprep.subr.mxu0 %v29855_v57 }
 0xfd8   : > { %23647 = vmatpush3.msra.mxu1 %v14814_v0  ;;  %23652 = vmatpush3.msra.mxu0 %v14815_v60 }
 0xfd9   : > { %23648 = vmatprep.mubr.msk.f32.mxu1 %vm24316_vm2, %v29855_v57  ;;  %23653 = vmatprep.mubr.msk.f32.mxu0 %vm24316_vm2, %v29855_v57 }
 0xfda   : > { %23649 = vmatmul.mubr.msk.f32.vlgmr.msra.gmra.mrb[138].mxu1 %vm317_vm0, %v17598_v12  ;;  %23654 = vmatmul.mubr.msk.f32.vlgmr.msra.gmra.mrb[162].mxu0 %vm317_vm0, %v17599_v59 }
0x102e   : > { %v17669_v39 = vpop.f32.mrb[108].mxu1 }
0x102f   : > { %v23500_v62 = vpop.f32.mrb[109].mxu1 }
0x1032   : > { %v17815_v41 = vpop.f32.mrb[110].mxu1 }
0x1033   : > { %v19936_v63 = vcombine.low %v17669_v39, %v17815_v41  ;;  %v19937_v10 = vcombine.high %v17669_v39, %v17815_v41  ;;  %v23510_v54 = vpop.f32.mrb[111].mxu1 }
0x1035   : > { %v19944_v43 = vrot.slane %v19936_v63, %v24670_v24  ;;  %v19951_v40 = vrot.slane %v19937_v10, %v24670_v24 }
0x1036   : > { %v17742_v18 = vpop.f32.mrb[132].mxu0  ;;  %v17961_v20 = vpop.f32.mrb[112].mxu1 }
0x1037   : > { %v23505_v26 = vpop.f32.mrb[133].mxu0  ;;  %v23520_v23 = vpop.f32.mrb[113].mxu1 }
0x1038   : > { %v22440_v23 = vld [vmem:[%s29493_s5 + $0x28] sm:$0xff] }
0x103a   : > { %v17888_v48 = vpop.f32.mrb[134].mxu0  ;;  %v18107_v17 = vpop.f32.mrb[114].mxu1 }
0x103b   : > { %v19952_v32 = vcombine.low %v17742_v18, %v17888_v48  ;;  %v19953_v53 = vcombine.high %v17742_v18, %v17888_v48  ;;  %v23515_v25 = vpop.f32.mrb[135].mxu0  ;;  %v20004_v47 = vcombine.low %v17961_v20, %v18107_v17  ;;  %v20005_v8 = vcombine.high %v17961_v20, %v18107_v17  ;;  %v23530_v37 = vpop.f32.mrb[115].mxu1  ;;  %v22439_v20 = vld [vmem:[%s29493_s5 + $0x20] sm:$0xff] }
0x103d   : > { %v19960_v16 = vrot.slane %v19952_v32, %v24670_v24  ;;  %v19967_v45 = vrot.slane %v19953_v53, %v24670_v24  ;;  %v20012_v35 = vrot.slane %v20004_v47, %v24670_v24  ;;  %v20019_v50 = vrot.slane %v20005_v8, %v24670_v24 }
0x103e   : > { %v18034_v2 = vpop.f32.mrb[136].mxu0  ;;  %v28838_v44 = vpop.f32.mrb[116].mxu1 }
0x103f   : > { %v19968_v56 = vcombine.low %v19944_v43, %v19960_v16  ;;  %v19969_v58 = vcombine.high %v19944_v43, %v19960_v16  ;;  %v19984_v11 = vcombine.low %v19951_v40, %v19967_v45  ;;  %v19985_v5 = vcombine.high %v19951_v40, %v19967_v45  ;;  %v23525_v9 = vpop.f32.mrb[137].mxu0  ;;  %v23540_v36 = vpop.f32.mrb[117].mxu1 }
0x1041   : > { %v19976_v15 = vrot.slane %v19968_v56, %v24681_v38  ;;  %v19983_v19 = vrot.slane %v19969_v58, %v24681_v38  ;;  %v19992_v31 = vrot.slane %v19984_v11, %v24681_v38  ;;  %v19999_v3 = vrot.slane %v19985_v5, %v24681_v38 }
0x1042   : > { %v18180_v22 = vpop.f32.mrb[138].mxu0 }
0x1043   : > { %v20480_v29 = vcombine.low %v19976_v15, %v19983_v19  ;;  %v22423_v4 = vcombine.high %v19976_v15, %v19983_v19  ;;  %v20496_v52 = vcombine.low %v19992_v31, %v19999_v3  ;;  %v22424_v49 = vcombine.high %v19992_v31, %v19999_v3  ;;  %v23535_v51 = vpop.f32.mrb[139].mxu0  ;;  %v22442_v15 = vld [vmem:[%s29493_s5 + $0x38] sm:$0xff] }
0x1044   : > { %v20020_v42 = vcombine.low %v18034_v2, %v18180_v22  ;;  %v20021_v34 = vcombine.high %v18034_v2, %v18180_v22  ;;  %v23815_v2 = vpack.c.bf16 %v22440_v23, %v22439_v20 }
0x1045   : > { %v20487_v6 = vrot.slane %v20480_v29, %v24670_v24  ;;  %v20495_v14 = vrot.slane %v22423_v4, %v24670_v24  ;;  %v20503_v1 = vrot.slane %v20496_v52, %v24670_v24  ;;  %v20511_v46 = vrot.slane %v22424_v49, %v24670_v24 }
0x1046   : > { %v20028_v13 = vrot.slane %v20020_v42, %v24670_v24  ;;  %v20035_v28 = vrot.slane %v20021_v34, %v24670_v24  ;;  %v18326_v30 = vpop.f32.mrb[140].mxu0  ;;  %v18399_v61 = vpop.f32.mrb[118].mxu1  ;;  %23816 = vmatprep.subr.bf16.mxu1 %v23815_v2 }
0x1047   : > { %v23545_v7 = vpop.f32.mrb[141].mxu0  ;;  %v20072_v33 = vcombine.low %v28838_v44, %v18399_v61  ;;  %v20073_v55 = vcombine.high %v28838_v44, %v18399_v61  ;;  %v23550_v0 = vpop.f32.mrb[119].mxu1  ;;  %v20512_v60 = vcombine.low %v20487_v6, %v20495_v14  ;;  %v20528_v21 = vcombine.low %v20503_v1, %v20511_v46  ;;  %v22441_v44 = vld [vmem:[%s29493_s5 + $0x30] sm:$0xff]  ;;  %23818 = vmatpush3.bf16.msra.mxu1 %v23815_v2 }
0x1048   : > { %v20036_v12 = vcombine.low %v20012_v35, %v20028_v13  ;;  %v20037_v27 = vcombine.high %v20012_v35, %v20028_v13  ;;  %v20052_v59 = vcombine.low %v20019_v50, %v20035_v28  ;;  %v20053_v39 = vcombine.high %v20019_v50, %v20035_v28 }
0x1049   : > { %v28855_v62 = vrot.slane %v20512_v60, %v24681_v38  ;;  %v28858_v41 = vrot.slane %v20528_v21, %v24681_v38  ;;  %v20513_v53 = vcombine.high %v20487_v6, %v20495_v14  ;;  %v20529_v25 = vcombine.high %v20503_v1, %v20511_v46 }
0x104a   : > { %v20044_v63 = vrot.slane %v20036_v12, %v24681_v38  ;;  %v20051_v10 = vrot.slane %v20037_v27, %v24681_v38  ;;  %v20060_v54 = vrot.slane %v20052_v59, %v24681_v38  ;;  %v20067_v18 = vrot.slane %v20053_v39, %v24681_v38  ;;  %v28864_v26 = vpop.f32.mrb[120].mxu1 }
0x104b   : > { %v20545_v48 = vcombine.high %v28855_v62, %v28858_v41  ;;  %v23560_v32 = vpop.f32.mrb[121].mxu1  ;;  %v20544_v43 = vcombine.low %v28855_v62, %v28858_v41  ;;  %v20080_v47 = vrot.slane %v20072_v33, %v24670_v24  ;;  %v20527_v8 = vrot.slane %v20513_v53, %v24681_v38 }
0x104c   : > { %v20548_v40 = vcombine.low %v20044_v63, %v20051_v10  ;;  %v22425_v17 = vcombine.high %v20044_v63, %v20051_v10  ;;  %v20564_v16 = vcombine.low %v20060_v54, %v20067_v18  ;;  %v22426_v45 = vcombine.high %v20060_v54, %v20067_v18 }
0x104d   : > { %21032 = vrot.lane.b32.xlu0 %v20545_v48, %s29870_s12  ;;  %v20543_v37 = vrot.slane %v20529_v25, %v24681_v38  ;;  %v20087_v51 = vrot.slane %v20073_v55, %v24670_v24  ;;  %v23819_v6 = vpack.c.bf16 %v22442_v15, %v22441_v44 }
0x104e   : > { %v20555_v56 = vrot.slane %v20548_v40, %v24670_v24  ;;  %v20563_v58 = vrot.slane %v22425_v17, %v24670_v24  ;;  %v20571_v11 = vrot.slane %v20564_v16, %v24670_v24  ;;  %v20579_v5 = vrot.slane %v22426_v45, %v24670_v24  ;;  %v18472_v9 = vpop.f32.mrb[142].mxu0 }
0x104f   : > { %v20088_v19 = vcombine.low %v18326_v30, %v18472_v9  ;;  %v20089_v31 = vcombine.high %v18326_v30, %v18472_v9  ;;  %v23555_v3 = vpop.f32.mrb[143].mxu0  ;;  %v20546_v36 = vcombine.low %v20527_v8, %v20543_v37  ;;  %v20547_v22 = vcombine.high %v20527_v8, %v20543_v37  ;;  %23820 = vmatprep.subr.bf16.mxu1 %v23819_v6 }
0x1050   : > { %v20580_v29 = vcombine.low %v20555_v56, %v20563_v58  ;;  %v20596_v4 = vcombine.low %v20571_v11, %v20579_v5  ;;  %v20581_v52 = vcombine.high %v20555_v56, %v20563_v58  ;;  %v20597_v49 = vcombine.high %v20571_v11, %v20579_v5  ;;  %23822 = vmatpush3.bf16.msra.mxu1 %v23819_v6 }
0x1051   : > { %v20096_v42 = vrot.slane %v20088_v19, %v24670_v24  ;;  %v20103_v34 = vrot.slane %v20089_v31, %v24670_v24  ;;  %21064 = vrot.lane.b32.xlu0 %v20546_v36, %s29871_s19 }
0x1052   : > { %v18618_v14 = vpop.f32.mrb[144].mxu0  ;;  %v18691_v1 = vpop.f32.mrb[122].mxu1  ;;  %v28895_v46 = vrot.slane %v20580_v29, %v24681_v38  ;;  %v28898_v35 = vrot.slane %v20596_v4, %v24681_v38  ;;  %v20595_v50 = vrot.slane %v20581_v52, %v24681_v38  ;;  %v20611_v13 = vrot.slane %v20597_v49, %v24681_v38 }
0x1053   : > { %v20104_v28 = vcombine.low %v20080_v47, %v20096_v42  ;;  %v20105_v30 = vcombine.high %v20080_v47, %v20096_v42  ;;  %v20120_v61 = vcombine.low %v20087_v51, %v20103_v34  ;;  %v20121_v7 = vcombine.high %v20087_v51, %v20103_v34  ;;  %v23565_v33 = vpop.f32.mrb[145].mxu0  ;;  %v23570_v55 = vpop.f32.mrb[123].mxu1 }
0x1054   : > { %v20140_v0 = vcombine.low %v28864_v26, %v18691_v1  ;;  %v20141_v60 = vcombine.high %v28864_v26, %v18691_v1  ;;  %v20613_v21 = vcombine.high %v28895_v46, %v28898_v35  ;;  %v20614_v12 = vcombine.low %v20595_v50, %v20611_v13 }
0x1055   : > { %v20112_v27 = vrot.slane %v20104_v28, %v24681_v38  ;;  %v20119_v59 = vrot.slane %v20105_v30, %v24681_v38  ;;  %v20128_v39 = vrot.slane %v20120_v61, %v24681_v38  ;;  %v20135_v63 = vrot.slane %v20121_v7, %v24681_v38  ;;  %21096 = vrot.lane.b32.xlu0 %v20547_v22, %s29872_s13 }
0x1056   : > { %21034 = vrot.lane.b32.xlu1 %v20613_v21, %s29870_s12  ;;  %v28912_v10 = vpop.f32.mrb[124].mxu1  ;;  %v20615_v54 = vcombine.high %v20595_v50, %v20611_v13  ;;  %v20612_v18 = vcombine.low %v28895_v46, %v28898_v35  ;;  %v20148_v15 = vrot.slane %v20140_v0, %v24670_v24  ;;  %v20155_v19 = vrot.slane %v20141_v60, %v24670_v24 }
0x1057   : > { %v20616_v26 = vcombine.low %v20112_v27, %v20119_v59  ;;  %v22427_v20 = vcombine.high %v20112_v27, %v20119_v59  ;;  %v20632_v23 = vcombine.low %v20128_v39, %v20135_v63  ;;  %v22428_v48 = vcombine.high %v20128_v39, %v20135_v63  ;;  %v23580_v32 = vpop.f32.mrb[125].mxu1 }
0x1059   : > { %v20623_v53 = vrot.slane %v20616_v26, %v24670_v24  ;;  %v20631_v25 = vrot.slane %v22427_v20, %v24670_v24  ;;  %v20639_v40 = vrot.slane %v20632_v23, %v24670_v24  ;;  %v20647_v17 = vrot.slane %v22428_v48, %v24670_v24 }
0x105a   : > { %21066 = vrot.lane.b32.xlu1 %v20614_v12, %s29871_s19  ;;  %v18764_v16 = vpop.f32.mrb[146].mxu0 }
0x105b   : > { %v20648_v45 = vcombine.low %v20623_v53, %v20631_v25  ;;  %v20664_v47 = vcombine.low %v20639_v40, %v20647_v17  ;;  %v20649_v8 = vcombine.high %v20623_v53, %v20631_v25  ;;  %v20665_v37 = vcombine.high %v20639_v40, %v20647_v17  ;;  %v23575_v58 = vpop.f32.mrb[147].mxu0 }
0x105c   : > { %v20156_v2 = vcombine.low %v18618_v14, %v18764_v16  ;;  %v20157_v56 = vcombine.high %v18618_v14, %v18764_v16 }
0x105d   : > { %v28922_v11 = vrot.slane %v20648_v45, %v24681_v38  ;;  %v28925_v5 = vrot.slane %v20664_v47, %v24681_v38  ;;  %v20663_v9 = vrot.slane %v20649_v8, %v24681_v38  ;;  %v20679_v44 = vrot.slane %v20665_v37, %v24681_v38 }
0x105e   : > { %v20164_v31 = vrot.slane %v20156_v2, %v24670_v24  ;;  %v20171_v3 = vrot.slane %v20157_v56, %v24670_v24  ;;  %21098 = vrot.lane.b32.xlu1 %v20615_v54, %s29872_s13  ;;  %v18983_v36 = vpop.f32.mrb[126].mxu1  ;;  %v18910_v22 = vpop.f32.mrb[148].mxu0 }
0x105f   : > { %v20208_v29 = vcombine.low %v28912_v10, %v18983_v36  ;;  %v20209_v4 = vcombine.high %v28912_v10, %v18983_v36  ;;  %v23590_v52 = vpop.f32.mrb[127].mxu1  ;;  %v20681_v49 = vcombine.high %v28922_v11, %v28925_v5  ;;  %v20682_v51 = vcombine.low %v20663_v9, %v20679_v44  ;;  %v23585_v1 = vpop.f32.mrb[149].mxu0 }
0x1060   : > { %v20172_v42 = vcombine.low %v20148_v15, %v20164_v31  ;;  %v20173_v34 = vcombine.high %v20148_v15, %v20164_v31  ;;  %v20188_v6 = vcombine.low %v20155_v19, %v20171_v3  ;;  %v20189_v14 = vcombine.high %v20155_v19, %v20171_v3 }
0x1061   : > { %21036 = vrot.lane.b32.xlu0 %v20681_v49, %s29870_s12  ;;  %v20683_v50 = vcombine.high %v20663_v9, %v20679_v44  ;;  %v20680_v13 = vcombine.low %v28922_v11, %v28925_v5  ;;  %v20216_v25 = vrot.slane %v20208_v29, %v24670_v24  ;;  %v20223_v40 = vrot.slane %v20209_v4, %v24670_v24 }
0x1062   : > { %v20180_v28 = vrot.slane %v20172_v42, %v24681_v38  ;;  %v20187_v30 = vrot.slane %v20173_v34, %v24681_v38  ;;  %v20196_v61 = vrot.slane %v20188_v6, %v24681_v38  ;;  %v20203_v7 = vrot.slane %v20189_v14, %v24681_v38  ;;  %v28945_v33 = vpop.f32.mrb[128].mxu1 }
0x1063   : > { %v23600_v55 = vpop.f32.mrb[129].mxu1 }
0x1064   : > { %v20684_v0 = vcombine.low %v20180_v28, %v20187_v30  ;;  %v22429_v60 = vcombine.high %v20180_v28, %v20187_v30  ;;  %v20700_v21 = vcombine.low %v20196_v61, %v20203_v7  ;;  %v22430_v12 = vcombine.high %v20196_v61, %v20203_v7 }
0x1065   : > { %21068 = vrot.lane.b32.xlu0 %v20682_v51, %s29871_s19 }
0x1066   : > { %v20691_v27 = vrot.slane %v20684_v0, %v24670_v24  ;;  %v20699_v59 = vrot.slane %v22429_v60, %v24670_v24  ;;  %v20707_v39 = vrot.slane %v20700_v21, %v24670_v24  ;;  %v20715_v63 = vrot.slane %v22430_v12, %v24670_v24  ;;  %v19056_v10 = vpop.f32.mrb[150].mxu0 }
0x1067   : > { %v20224_v54 = vcombine.low %v18910_v22, %v19056_v10  ;;  %v20225_v26 = vcombine.high %v18910_v22, %v19056_v10  ;;  %v23595_v20 = vpop.f32.mrb[151].mxu0 }
0x1068   : > { %v20716_v23 = vcombine.low %v20691_v27, %v20699_v59  ;;  %v20732_v48 = vcombine.low %v20707_v39, %v20715_v63  ;;  %v20717_v32 = vcombine.high %v20691_v27, %v20699_v59  ;;  %v20733_v53 = vcombine.high %v20707_v39, %v20715_v63 }
0x1069   : > { %v20232_v17 = vrot.slane %v20224_v54, %v24670_v24  ;;  %v20239_v16 = vrot.slane %v20225_v26, %v24670_v24  ;;  %21100 = vrot.lane.b32.xlu0 %v20683_v50, %s29872_s13 }
0x106a   : > { %v19202_v45 = vpop.f32.mrb[152].mxu0  ;;  %v19275_v47 = vpop.f32.mrb[130].mxu1  ;;  %v28958_v8 = vrot.slane %v20716_v23, %v24681_v38  ;;  %v28961_v37 = vrot.slane %v20732_v48, %v24681_v38  ;;  %v20731_v2 = vrot.slane %v20717_v32, %v24681_v38  ;;  %v20747_v56 = vrot.slane %v20733_v53, %v24681_v38 }
0x106b   : > { %v20240_v58 = vcombine.low %v20216_v25, %v20232_v17  ;;  %v20241_v9 = vcombine.high %v20216_v25, %v20232_v17  ;;  %v20256_v44 = vcombine.low %v20223_v40, %v20239_v16  ;;  %v20257_v15 = vcombine.high %v20223_v40, %v20239_v16  ;;  %v23605_v19 = vpop.f32.mrb[153].mxu0  ;;  %v23610_v31 = vpop.f32.mrb[131].mxu1 }
0x106c   : > { %v20276_v3 = vcombine.low %v28945_v33, %v19275_v47  ;;  %v20277_v36 = vcombine.high %v28945_v33, %v19275_v47  ;;  %v20749_v22 = vcombine.high %v28958_v8, %v28961_v37  ;;  %v20750_v29 = vcombine.low %v20731_v2, %v20747_v56 }
0x106d   : > { %v20248_v4 = vrot.slane %v20240_v58, %v24681_v38  ;;  %v20255_v52 = vrot.slane %v20241_v9, %v24681_v38  ;;  %v20264_v49 = vrot.slane %v20256_v44, %v24681_v38  ;;  %v20271_v51 = vrot.slane %v20257_v15, %v24681_v38 }
0x106e   : > { %21038 = vrot.lane.b32.xlu1 %v20749_v22, %s29870_s12  ;;  %v20751_v42 = vcombine.high %v20731_v2, %v20747_v56  ;;  %v20748_v34 = vcombine.low %v28958_v8, %v28961_v37  ;;  %v20284_v25 = vrot.slane %v20276_v3, %v24670_v24  ;;  %v20291_v40 = vrot.slane %v20277_v36, %v24670_v24 }
0x106f   : > { %v20752_v6 = vcombine.low %v20248_v4, %v20255_v52  ;;  %v22431_v14 = vcombine.high %v20248_v4, %v20255_v52  ;;  %v20768_v1 = vcombine.low %v20264_v49, %v20271_v51  ;;  %v22432_v50 = vcombine.high %v20264_v49, %v20271_v51 }
0x1071   : > { %v20759_v28 = vrot.slane %v20752_v6, %v24670_v24  ;;  %v20767_v30 = vrot.slane %v22431_v14, %v24670_v24  ;;  %v20775_v61 = vrot.slane %v20768_v1, %v24670_v24  ;;  %v20783_v7 = vrot.slane %v22432_v50, %v24670_v24 }
0x1072   : > { %21070 = vrot.lane.b32.xlu1 %v20750_v29, %s29871_s19 }
0x1073   : > { %v20784_v33 = vcombine.low %v20759_v28, %v20767_v30  ;;  %v20800_v55 = vcombine.low %v20775_v61, %v20783_v7  ;;  %v20785_v0 = vcombine.high %v20759_v28, %v20767_v30  ;;  %v20801_v60 = vcombine.high %v20775_v61, %v20783_v7 }
0x1075   : > { %v28982_v21 = vrot.slane %v20784_v33, %v24681_v38  ;;  %v28985_v12 = vrot.slane %v20800_v55, %v24681_v38  ;;  %v20799_v27 = vrot.slane %v20785_v0, %v24681_v38  ;;  %v20815_v59 = vrot.slane %v20801_v60, %v24681_v38 }
0x1076   : > { %21102 = vrot.lane.b32.xlu1 %v20751_v42, %s29872_s13 }
0x1077   : > { %v20817_v39 = vcombine.high %v28982_v21, %v28985_v12  ;;  %v20818_v63 = vcombine.low %v20799_v27, %v20815_v59  ;;  %v20819_v10 = vcombine.high %v20799_v27, %v20815_v59  ;;  %v20816_v54 = vcombine.low %v28982_v21, %v28985_v12 }
0x1079   : > { %21040 = vrot.lane.b32.xlu0 %v20817_v39, %s29870_s12 }
0x107d   : > { %21072 = vrot.lane.b32.xlu0 %v20818_v63, %s29871_s19 }
0x1081   : > { %21104 = vrot.lane.b32.xlu0 %v20819_v10, %s29872_s13 }
0x1085   : > { %v19421_v26 = vpop.f32.mrb[132].mxu1 }
0x1086   : > { %v23620_v20 = vpop.f32.mrb[133].mxu1 }
0x1089   : > { %v19348_v23 = vpop.f32.mrb[154].mxu0 }
0x108a   : > { %v20292_v48 = vcombine.low %v19202_v45, %v19348_v23  ;;  %v20293_v32 = vcombine.high %v19202_v45, %v19348_v23  ;;  %v23615_v53 = vpop.f32.mrb[155].mxu0 }
0x108c   : > { %v20300_v17 = vrot.slane %v20292_v48, %v24670_v24  ;;  %v20307_v16 = vrot.slane %v20293_v32, %v24670_v24 }
0x108d   : > { %v19494_v47 = vpop.f32.mrb[156].mxu0  ;;  %v19567_v2 = vpop.f32.mrb[134].mxu1 }
0x108e   : > { %v20308_v56 = vcombine.low %v20284_v25, %v20300_v17  ;;  %v20309_v58 = vcombine.high %v20284_v25, %v20300_v17  ;;  %v20324_v9 = vcombine.low %v20291_v40, %v20307_v16  ;;  %v20325_v44 = vcombine.high %v20291_v40, %v20307_v16  ;;  %v23625_v15 = vpop.f32.mrb[157].mxu0  ;;  %v23630_v19 = vpop.f32.mrb[135].mxu1 }
0x108f   : > { %v20344_v31 = vcombine.low %v19421_v26, %v19567_v2  ;;  %v20345_v22 = vcombine.high %v19421_v26, %v19567_v2 }
0x1090   : > { %v20316_v45 = vrot.slane %v20308_v56, %v24681_v38  ;;  %v20323_v3 = vrot.slane %v20309_v58, %v24681_v38  ;;  %v20332_v36 = vrot.slane %v20324_v9, %v24681_v38  ;;  %v20339_v29 = vrot.slane %v20325_v44, %v24681_v38 }
0x1091   : > { %v20352_v63 = vrot.slane %v20344_v31, %v24670_v24  ;;  %v20359_v10 = vrot.slane %v20345_v22, %v24670_v24 }
0x1092   : > { %v20820_v4 = vcombine.low %v20316_v45, %v20323_v3  ;;  %v22433_v52 = vcombine.high %v20316_v45, %v20323_v3  ;;  %v20836_v49 = vcombine.low %v20332_v36, %v20339_v29  ;;  %v22434_v51 = vcombine.high %v20332_v36, %v20339_v29 }
0x1094   : > { %v20827_v42 = vrot.slane %v20820_v4, %v24670_v24  ;;  %v20835_v6 = vrot.slane %v22433_v52, %v24670_v24  ;;  %v20843_v14 = vrot.slane %v20836_v49, %v24670_v24  ;;  %v20851_v1 = vrot.slane %v22434_v51, %v24670_v24 }
0x1096   : > { %v20852_v28 = vcombine.low %v20827_v42, %v20835_v6  ;;  %v20868_v30 = vcombine.low %v20843_v14, %v20851_v1  ;;  %v20853_v61 = vcombine.high %v20827_v42, %v20835_v6  ;;  %v20869_v7 = vcombine.high %v20843_v14, %v20851_v1 }
0x1097   : > { %v19640_v50 = vpop.f32.mrb[158].mxu0 }
0x1098   : > { %v20360_v33 = vcombine.low %v19494_v47, %v19640_v50  ;;  %v20361_v55 = vcombine.high %v19494_v47, %v19640_v50  ;;  %v23635_v0 = vpop.f32.mrb[159].mxu0  ;;  %v29010_v60 = vrot.slane %v20852_v28, %v24681_v38  ;;  %v29013_v27 = vrot.slane %v20868_v30, %v24681_v38 }
0x1099   : > { %v20867_v59 = vrot.slane %v20853_v61, %v24681_v38  ;;  %v20883_v39 = vrot.slane %v20869_v7, %v24681_v38 }
0x109a   : > { %v20368_v26 = vrot.slane %v20360_v33, %v24670_v24  ;;  %v20375_v20 = vrot.slane %v20361_v55, %v24670_v24  ;;  %v20885_v23 = vcombine.high %v29010_v60, %v29013_v27  ;;  %v20884_v53 = vcombine.low %v29010_v60, %v29013_v27 }
0x109b   : > { %v20886_v48 = vcombine.low %v20867_v59, %v20883_v39  ;;  %v20887_v32 = vcombine.high %v20867_v59, %v20883_v39 }
0x109c   : > { %v20376_v25 = vcombine.low %v20352_v63, %v20368_v26  ;;  %v20377_v40 = vcombine.high %v20352_v63, %v20368_v26  ;;  %v20392_v17 = vcombine.low %v20359_v10, %v20375_v20  ;;  %v20393_v16 = vcombine.high %v20359_v10, %v20375_v20  ;;  %21042 = vrot.lane.b32.xlu1 %v20885_v23, %s29870_s12 }
0x109e   : > { %v20384_v47 = vrot.slane %v20376_v25, %v24681_v38  ;;  %v20391_v2 = vrot.slane %v20377_v40, %v24681_v38  ;;  %v20400_v56 = vrot.slane %v20392_v17, %v24681_v38  ;;  %v20407_v58 = vrot.slane %v20393_v16, %v24681_v38 }
0x10a0   : > { %v20888_v9 = vcombine.low %v20384_v47, %v20391_v2  ;;  %v22435_v44 = vcombine.high %v20384_v47, %v20391_v2  ;;  %v20904_v15 = vcombine.low %v20400_v56, %v20407_v58  ;;  %v22436_v19 = vcombine.high %v20400_v56, %v20407_v58  ;;  %21074 = vrot.lane.b32.xlu1 %v20886_v48, %s29871_s19 }
0x10a2   : > { %v20895_v31 = vrot.slane %v20888_v9, %v24670_v24  ;;  %v20903_v22 = vrot.slane %v22435_v44, %v24670_v24  ;;  %v20911_v45 = vrot.slane %v20904_v15, %v24670_v24  ;;  %v20919_v3 = vrot.slane %v22436_v19, %v24670_v24 }
0x10a4   : > { %v20920_v36 = vcombine.low %v20895_v31, %v20903_v22  ;;  %v20936_v29 = vcombine.low %v20911_v45, %v20919_v3  ;;  %v20921_v4 = vcombine.high %v20895_v31, %v20903_v22  ;;  %v20937_v52 = vcombine.high %v20911_v45, %v20919_v3  ;;  %21106 = vrot.lane.b32.xlu1 %v20887_v32, %s29872_s13 }
0x10a6   : > { %v29037_v49 = vrot.slane %v20920_v36, %v24681_v38  ;;  %v29040_v51 = vrot.slane %v20936_v29, %v24681_v38  ;;  %v20935_v42 = vrot.slane %v20921_v4, %v24681_v38  ;;  %v20951_v6 = vrot.slane %v20937_v52, %v24681_v38 }
0x10a8   : > { %v20953_v14 = vcombine.high %v29037_v49, %v29040_v51  ;;  %v20954_v1 = vcombine.low %v20935_v42, %v20951_v6  ;;  %v20955_v50 = vcombine.high %v20935_v42, %v20951_v6  ;;  %v20952_v28 = vcombine.low %v29037_v49, %v29040_v51  ;;  %v29134_v49 = vld [vmem:[%s29491_s3 + $0x8] sm:$0xff]  ;;  %v29873_v51 = vld [vmem:[#allocation14_spill] sm:$0xff] }
0x10a9   : > { %v19713_v30 = vpop.f32.mrb[136].mxu1  ;;  %v19786_v61 = vpop.f32.mrb[160].mxu0 }
0x10aa   : > { %21044 = vrot.lane.b32.xlu0 %v20953_v14, %s29870_s12  ;;  %v23640_v7 = vpop.f32.mrb[137].mxu1  ;;  %v23645_v33 = vpop.f32.mrb[161].mxu0 }
0x10ad   : > { %v19859_v55 = vpop.f32.mrb[138].mxu1  ;;  %v19932_v0 = vpop.f32.mrb[162].mxu0 }
0x10ae   : > { %v20412_v59 = vcombine.low %v19713_v30, %v19859_v55  ;;  %v20413_v39 = vcombine.high %v19713_v30, %v19859_v55  ;;  %v20428_v63 = vcombine.low %v19786_v61, %v19932_v0  ;;  %v20429_v10 = vcombine.high %v19786_v61, %v19932_v0  ;;  %21076 = vrot.lane.b32.xlu0 %v20954_v1, %s29871_s19  ;;  %v23650_v26 = vpop.f32.mrb[139].mxu1  ;;  %v23655_v20 = vpop.f32.mrb[163].mxu0 }
0x10b0   : > { %v20420_v23 = vrot.slane %v20412_v59, %v24670_v24  ;;  %v20427_v48 = vrot.slane %v20413_v39, %v24670_v24  ;;  %v20436_v32 = vrot.slane %v20428_v63, %v24670_v24  ;;  %v20443_v25 = vrot.slane %v20429_v10, %v24670_v24 }
0x10b2   : > { %v20444_v40 = vcombine.low %v20420_v23, %v20436_v32  ;;  %v20445_v17 = vcombine.high %v20420_v23, %v20436_v32  ;;  %v20460_v16 = vcombine.low %v20427_v48, %v20443_v25  ;;  %v20461_v47 = vcombine.high %v20427_v48, %v20443_v25  ;;  %21108 = vrot.lane.b32.xlu0 %v20955_v50, %s29872_s13 }
0x10b4   : > { %v20452_v2 = vrot.slane %v20444_v40, %v24681_v38  ;;  %v20459_v56 = vrot.slane %v20445_v17, %v24681_v38  ;;  %v20468_v58 = vrot.slane %v20460_v16, %v24681_v38  ;;  %v20475_v9 = vrot.slane %v20461_v47, %v24681_v38 }
0x10b6   : > { %v20956_v44 = vcombine.low %v20452_v2, %v20459_v56  ;;  %v22437_v15 = vcombine.high %v20452_v2, %v20459_v56  ;;  %v20972_v19 = vcombine.low %v20468_v58, %v20475_v9  ;;  %v22438_v31 = vcombine.high %v20468_v58, %v20475_v9 }
0x10b8   : > { %v20963_v22 = vrot.slane %v20956_v44, %v24670_v24  ;;  %v20971_v45 = vrot.slane %v22437_v15, %v24670_v24  ;;  %v20979_v3 = vrot.slane %v20972_v19, %v24670_v24  ;;  %v20987_v36 = vrot.slane %v22438_v31, %v24670_v24 }
0x10ba   : > { %v20988_v29 = vcombine.low %v20963_v22, %v20971_v45  ;;  %v21004_v4 = vcombine.low %v20979_v3, %v20987_v36  ;;  %v20989_v52 = vcombine.high %v20963_v22, %v20971_v45  ;;  %v21005_v42 = vcombine.high %v20979_v3, %v20987_v36 }
0x10bc   : > { %v29064_v6 = vrot.slane %v20988_v29, %v24681_v38  ;;  %v29067_v14 = vrot.slane %v21004_v4, %v24681_v38  ;;  %v21003_v1 = vrot.slane %v20989_v52, %v24681_v38  ;;  %v21019_v50 = vrot.slane %v21005_v42, %v24681_v38 }
0x10be   : > { %v21021_v30 = vcombine.high %v29064_v6, %v29067_v14  ;;  %v21022_v61 = vcombine.low %v21003_v1, %v21019_v50  ;;  %v21023_v7 = vcombine.high %v21003_v1, %v21019_v50  ;;  %v21020_v24 = vcombine.low %v29064_v6, %v29067_v14  ;;  %v29874_v6 = vld [vmem:[#allocation29_spill] sm:$0xff]  ;;  %v29875_v1 = vld [vmem:[#allocation23_spill] sm:$0xff] }
0x10bf   : > { %v21033_v33 = vpop.permute.xlu0 %21032 }
0x10c0   : > { %21046 = vrot.lane.b32.xlu1 %v21021_v30, %s29870_s12  ;;  %v21120_v0 = vsel %vm317_vm0, %v20544_v43, %v21033_v33 }
0x10c3   : > { %v21065_v55 = vpop.permute.xlu0 %21064 }
0x10c4   : > { %21078 = vrot.lane.b32.xlu1 %v21022_v61, %s29871_s19  ;;  %v21128_v38 = vsel %vm10442_vm3, %v21120_v0, %v21065_v55  ;;  %v29876_v0 = vld [vmem:[#allocation28_spill] sm:$0xff]  ;;  %s24253_s19 = scalar_lea.vmem %s24252_s20, 256 }
0x10c5   : > { %p24255_p1 = scmp.lt.s32.totalorder %s24253_s19, %s24247_s18 }
0x10c7   : > { %v21097_v59 = vpop.permute.xlu0 %21096  ;;  %p24256_p2 = por %p24255_p1, %p24254_p0 }
0x10c8   : > { %v21035_v39 = vpop.permute.xlu1 %21034  ;;  %v21136_v63 = vsel %vm10451_vm4, %v21128_v38, %v21097_v59  ;;  %21110 = vrot.lane.b32.xlu1 %v21023_v7, %s29872_s13  ;;  %v29877_v59 = vld [vmem:[#allocation24_spill] sm:$0xff] }
0x10c9   : > { %23664 = vmatprep.mubr.msk.f32.mxu1 %vm464_vm1, %v21136_v63  ;;  %v21121_v26 = vsel %vm317_vm0, %v20612_v18, %v21035_v39  ;;  %p24257_p3 = pnand %p24256_p2, %p24250_p13 }
0x10cc   : > { %v21067_v10 = vpop.permute.xlu1 %21066 }
0x10cd   : > { %v21129_v62 = vsel %vm10442_vm3, %v21121_v26, %v21067_v10 }
0x10d0   : > { %v21099_v41 = vpop.permute.xlu1 %21098 }
0x10d1   : > { %v21137_v43 = vsel %vm10451_vm4, %v21129_v62, %v21099_v41 }
0x10d2   : > { %23665 = vmatmul.mubr.msk.f32.vlgmr.msra.gmra.mrb[140].mxu1 %vm464_vm1, %v21137_v43 }
0x10d3   : > { %v21037_v20 = vpop.permute.xlu0 %21036 }
0x10d4   : > { %v21122_v48 = vsel %vm317_vm0, %v20680_v13, %v21037_v20  ;;  %v29878_v20 = vld [vmem:[#allocation31_spill] sm:$0xff] }
0x10d7   : > { %v21069_v23 = vpop.permute.xlu0 %21068 }
0x10d8   : > { %v21130_v32 = vsel %vm10442_vm3, %v21122_v48, %v21069_v23  ;;  %v29879_v48 = vld [vmem:[#allocation21_spill] sm:$0xff] }
0x10db   : > { %v21101_v25 = vpop.permute.xlu0 %21100 }
0x10dc   : > { %v21138_v46 = vsel %vm10451_vm4, %v21130_v32, %v21101_v25 }
0x10dd   : > { %23667 = vmatprep.mubr.msk.f32.mxu1 %vm464_vm1, %v21138_v46 }
0x10e0   : > { %v21039_v35 = vpop.permute.xlu1 %21038 }
0x10e1   : > { %v21123_v40 = vsel %vm317_vm0, %v20748_v34, %v21039_v35 }
0x10e4   : > { %v21071_v18 = vpop.permute.xlu1 %21070 }
0x10e5   : > { %v21131_v17 = vsel %vm10442_vm3, %v21123_v40, %v21071_v18 }
0x10e8   : > { %v21103_v16 = vpop.permute.xlu1 %21102 }
0x10e9   : > { %v21139_v11 = vsel %vm10451_vm4, %v21131_v17, %v21103_v16  ;;  %v29880_v16 = vld [vmem:[#allocation33_spill] sm:$0xff] }
0x10ea   : > { %23668 = vmatmul.mubr.msk.f32.gmra.mrb[142].mxu1 %vm464_vm1, %v21139_v11 }
0x10eb   : > { %v21041_v5 = vpop.permute.xlu0 %21040 }
0x10ec   : > { %v21124_v47 = vsel %vm317_vm0, %v20816_v54, %v21041_v5  ;;  %v29881_v5 = vld [vmem:[#allocation30_spill] sm:$0xff] }
0x10ef   : > { %v21073_v13 = vpop.permute.xlu0 %21072 }
0x10f0   : > { %v21132_v2 = vsel %vm10442_vm3, %v21124_v47, %v21073_v13 }
0x10f3   : > { %v21105_v56 = vpop.permute.xlu0 %21104 }
0x10f4   : > { %v21140_v8 = vsel %vm10451_vm4, %v21132_v2, %v21105_v56 }
0x10f5   : > { %23670 = vmatprep.mubr.msk.f32.mxu1 %vm464_vm1, %v21140_v8 }
0x110e   : > { %v21043_v37 = vpop.permute.xlu1 %21042 }
0x110f   : > { %v21125_v58 = vsel %vm317_vm0, %v20884_v53, %v21043_v37 }
0x1112   : > { %v21075_v34 = vpop.permute.xlu1 %21074 }
0x1113   : > { %v21133_v9 = vsel %vm10442_vm3, %v21125_v58, %v21075_v34 }
0x1116   : > { %v21107_v44 = vpop.permute.xlu1 %21106 }
0x1117   : > { %v21141_v21 = vsel %vm10451_vm4, %v21133_v9, %v21107_v44 }
0x1118   : > { %23671 = vmatmul.mubr.msk.f32.gmra.mrb[144].mxu1 %vm464_vm1, %v21141_v21 }
0x111c   : > { %v21045_v12 = vpop.permute.xlu0 %21044 }
0x111d   : > { %v21126_v15 = vsel %vm317_vm0, %v20952_v28, %v21045_v12  ;;  %v21152_v28 = vrot.slane %v29134_v49, %v29873_v51  ;;  %v22451_v51 = vld [vmem:[%s29494_s6 + $0x20] sm:$0xff] }
0x1120   : > { %v21077_v54 = vpop.permute.xlu0 %21076 }
0x1121   : > { %v21134_v19 = vsel %vm10442_vm3, %v21126_v15, %v21077_v54 }
0x1124   : > { %v21109_v31 = vpop.permute.xlu0 %21108 }
0x1125   : > { %v21142_v60 = vsel %vm10451_vm4, %v21134_v19, %v21109_v31 }
0x1126   : > { %23673 = vmatprep.mubr.msk.f32.mxu1 %vm464_vm1, %v21142_v60 }
0x1132   : > { %v21047_v27 = vpop.permute.xlu1 %21046 }
0x1133   : > { %v21127_v22 = vsel %vm317_vm0, %v21020_v24, %v21047_v27 }
0x1136   : > { %v21079_v53 = vpop.permute.xlu1 %21078 }
0x1137   : > { %v21135_v45 = vsel %vm10442_vm3, %v21127_v22, %v21079_v53 }
0x113a   : > { %v21111_v3 = vpop.permute.xlu1 %21110 }
0x113b   : > { %v21143_v36 = vsel %vm10451_vm4, %v21135_v45, %v21111_v3 }
0x113c   : > { %23674 = vmatmul.mubr.msk.f32.gmra.mrb[146].mxu1 %vm464_vm1, %v21143_v36 }
0x11a5   : > { %v23666_v29 = vpop.f32.mrb[140].mxu1 }
0x11a6   : > { %v21249_v4 = vadd.f32 %v23666_v29, %v21152_v28  ;;  %v21243_v52 = vpop.f32.mrb[141].mxu1  ;;  %v22453_v29 = vld [vmem:[%s29494_s6 + $0x30] sm:$0xff] }
0x11a7   : > { %v21244_v42 = vadd.f32 %v21243_v52, %v21152_v28  ;;  %v22454_v52 = vld [vmem:[%s29494_s6 + $0x38] sm:$0xff] }
0x11a8   : > { %v21283_v14 = vadd.f32 %v21249_v4, %v29874_v6 }
0x11a9   : > { %v21282_v50 = vadd.f32 %v21244_v42, %v29875_v1  ;;  %v23827_v42 = vpack.c.bf16 %v22454_v52, %v22453_v29  ;;  %v22476_v29 = vld [vmem:[%s29495_s7 + $0xe8] sm:$0xff] }
0x11aa   : > { %v21293_v30 = vsel %vm464_vm1, %v21283_v14, 0.0 }
0x11ab   : > { %21294 = vadd.xlane.f32.xlu1 %v21293_v30  ;;  %v21290_v61 = vsel %vm464_vm1, %v21282_v50, 0.0 }
0x11ac   : > { %21291 = vadd.xlane.f32.xlu0 %v21290_v61 }
0x11bd   : > { %v23669_v7 = vpop.f32.mrb[142].mxu1 }
0x11be   : > { %v21253_v24 = vpop.f32.mrb[143].mxu1  ;;  %v21259_v33 = vadd.f32 %v23669_v7, %v21152_v28 }
0x11bf   : > { %v21254_v55 = vadd.f32 %v21253_v24, %v21152_v28 }
0x11c0   : > { %v21285_v39 = vadd.f32 %v21259_v33, %v29877_v59 }
0x11c1   : > { %v21284_v38 = vadd.f32 %v21254_v55, %v29876_v0 }
0x11c2   : > { %v21299_v10 = vsel %vm464_vm1, %v21285_v39, 0.0 }
0x11c3   : > { %v21296_v63 = vsel %vm464_vm1, %v21284_v38, 0.0 }
0x11c4   : > { %21297 = vadd.xlane.f32.xlu0 %v21296_v63 }
0x11c8   : > { %21300 = vadd.xlane.f32.xlu0 %v21299_v10 }
0x11eb   : > { %v23672_v26 = vpop.f32.mrb[144].mxu1 }
0x11ec   : > { %v21269_v62 = vadd.f32 %v23672_v26, %v21152_v28  ;;  %v21263_v41 = vpop.f32.mrb[145].mxu1 }
0x11ed   : > { %v21264_v43 = vadd.f32 %v21263_v41, %v21152_v28 }
0x11ee   : > { %v21287_v23 = vadd.f32 %v21269_v62, %v29878_v20 }
0x11ef   : > { %v21286_v32 = vadd.f32 %v21264_v43, %v29879_v48 }
0x11f0   : > { %v21305_v25 = vsel %vm464_vm1, %v21287_v23, 0.0 }
0x11f1   : > { %21306 = vadd.xlane.f32.xlu0 %v21305_v25  ;;  %v21302_v46 = vsel %vm464_vm1, %v21286_v32, 0.0  ;;  %v22463_v25 = vld [vmem:[%s29495_s7 + $0x80] sm:$0xff] }
0x11f2   : > { %21303 = vadd.xlane.f32.xlu1 %v21302_v46  ;;  %v22464_v46 = vld [vmem:[%s29495_s7 + $0x88] sm:$0xff] }
0x120f   : > { %v23675_v35 = vpop.f32.mrb[146].mxu1 }
0x1210   : > { %v21279_v18 = vadd.f32 %v23675_v35, %v21152_v28  ;;  %v21273_v40 = vpop.f32.mrb[147].mxu1  ;;  %v22465_v35 = vld [vmem:[%s29495_s7 + $0x90] sm:$0xff] }
0x1211   : > { %v21274_v17 = vadd.f32 %v21273_v40, %v21152_v28  ;;  %v22452_v28 = vld [vmem:[%s29494_s6 + $0x28] sm:$0xff]  ;;  %v23831_v40 = vpack.c.bf16 %v22464_v46, %v22463_v25 }
0x1212   : > { %v21289_v11 = vadd.f32 %v21279_v18, %v29880_v16  ;;  %v23823_v4 = vpack.c.bf16 %v22452_v28, %v22451_v51  ;;  %v22475_v28 = vld [vmem:[%s29495_s7 + $0xe0] sm:$0xff] }
0x1213   : > { %v21288_v13 = vadd.f32 %v21274_v17, %v29881_v5  ;;  %v22466_v17 = vld [vmem:[%s29495_s7 + $0x98] sm:$0xff]  ;;  %v22467_v5 = vld [vmem:[%s29495_s7 + $0xa0] sm:$0xff]  ;;  %23832 = vmatprep.subr.bf16.mxu1 %v23831_v40  ;;  %v23855_v52 = vpack.c.bf16 %v22476_v29, %v22475_v28 }
0x1214   : > { %v21311_v47 = vsel %vm464_vm1, %v21289_v11, 0.0  ;;  %23824 = vmatprep.subr.bf16.mxu0 %v23823_v4  ;;  %23834 = vmatpush3.bf16.msra.mxu1 %v23831_v40 }
0x1215   : > { %21312 = vadd.xlane.f32.xlu0 %v21311_v47  ;;  %v21308_v2 = vsel %vm464_vm1, %v21288_v13, 0.0  ;;  %23826 = vmatpush3.bf16.msra.mxu0 %v23823_v4 }
0x1216   : > { %21309 = vadd.xlane.f32.xlu1 %v21308_v2  ;;  %23828 = vmatprep.subr.bf16.mxu0 %v23827_v42  ;;  %v22469_v2 = vld [vmem:[%s29495_s7 + $0xb0] sm:$0xff] }
0x1219   : > { %23830 = vmatpush3.bf16.msra.mxu0 %v23827_v42 }
0x1238   : > { %v21295_v56 = vpop.xlane.xlu1 %21294 }
0x1239   : > { %v21315_v8 = vmul.f32 0.03125, %v21295_v56  ;;  %v21292_v37 = vpop.xlane.xlu0 %21291  ;;  %v22470_v56 = vld [vmem:[%s29495_s7 + $0xb8] sm:$0xff] }
0x123a   : > { %v21314_v34 = vmul.f32 0.03125, %v21292_v37  ;;  %v22471_v37 = vld [vmem:[%s29495_s7 + $0xc0] sm:$0xff] }
0x123b   : > { %v29154_v58 = vsub.f32 %v21283_v14, %v21315_v8  ;;  %v23843_v8 = vpack.c.bf16 %v22470_v56, %v22469_v2 }
0x123c   : > { %v29156_v9 = vsub.f32 %v21282_v50, %v21314_v34  ;;  %v22472_v34 = vld [vmem:[%s29495_s7 + $0xc8] sm:$0xff] }
0x123d   : > { %v21331_v44 = vmul.f32 %v29154_v58, %v29154_v58 }
0x123e   : > { %v21330_v21 = vmul.f32 %v29156_v9, %v29156_v9 }
0x123f   : > { %v21341_v12 = vsel %vm464_vm1, %v21331_v44, 0.0  ;;  %v29882_v44 = vld [vmem:[#allocation20_spill] sm:$0xff] }
0x1240   : > { %21342 = vadd.xlane.f32.xlu0 %v21341_v12  ;;  %v21338_v54 = vsel %vm464_vm1, %v21330_v21, 0.0  ;;  %v29238_v21 = vrot.slane %v29134_v49, %v29882_v44 }
0x1241   : > { %21339 = vadd.xlane.f32.xlu1 %v21338_v54  ;;  %v23847_v54 = vpack.c.bf16 %v22472_v34, %v22471_v37 }
0x1251   : > { %v21298_v15 = vpop.xlane.xlu0 %21297 }
0x1252   : > { %v21316_v19 = vmul.f32 0.03125, %v21298_v15 }
0x1254   : > { %v29164_v31 = vsub.f32 %v21284_v38, %v21316_v19 }
0x1255   : > { %v21301_v60 = vpop.xlane.xlu0 %21300 }
0x1256   : > { %v21317_v27 = vmul.f32 0.03125, %v21301_v60  ;;  %v21332_v53 = vmul.f32 %v29164_v31, %v29164_v31  ;;  %v22473_v60 = vld [vmem:[%s29495_s7 + $0xd0] sm:$0xff] }
0x1258   : > { %v29168_v22 = vsub.f32 %v21285_v39, %v21317_v27  ;;  %v21344_v45 = vsel %vm464_vm1, %v21332_v53, 0.0  ;;  %v22474_v27 = vld [vmem:[%s29495_s7 + $0xd8] sm:$0xff] }
0x1259   : > { %21345 = vadd.xlane.f32.xlu1 %v21344_v45  ;;  %v29883_v45 = vld [vmem:[#allocation32_spill] sm:$0xff] }
0x125a   : > { %v21333_v3 = vmul.f32 %v29168_v22, %v29168_v22 }
0x125c   : > { %v21347_v36 = vsel %vm464_vm1, %v21333_v3, 0.0  ;;  %v29250_v3 = vrot.slane %v29134_v49, %v29883_v45 }
0x125d   : > { %21348 = vadd.xlane.f32.xlu0 %v21347_v36 }
0x127e   : > { %v21307_v6 = vpop.xlane.xlu0 %21306 }
0x127f   : > { %v21319_v14 = vmul.f32 0.03125, %v21307_v6  ;;  %v21304_v1 = vpop.xlane.xlu1 %21303 }
0x1280   : > { %v21318_v50 = vmul.f32 0.03125, %v21304_v1 }
0x1281   : > { %v29186_v30 = vsub.f32 %v21287_v23, %v21319_v14 }
0x1282   : > { %v29188_v61 = vsub.f32 %v21286_v32, %v21318_v50 }
0x1283   : > { %v21335_v7 = vmul.f32 %v29186_v30, %v29186_v30 }
0x1284   : > { %v21334_v24 = vmul.f32 %v29188_v61, %v29188_v61 }
0x1285   : > { %v21353_v33 = vsel %vm464_vm1, %v21335_v7, 0.0 }
0x1286   : > { %21354 = vadd.xlane.f32.xlu0 %v21353_v33  ;;  %v21350_v55 = vsel %vm464_vm1, %v21334_v24, 0.0 }
0x1287   : > { %21351 = vadd.xlane.f32.xlu1 %v21350_v55 }
0x12a2   : > { %v21313_v0 = vpop.xlane.xlu0 %21312 }
0x12a3   : > { %v21321_v38 = vmul.f32 0.03125, %v21313_v0  ;;  %v21310_v59 = vpop.xlane.xlu1 %21309 }
0x12a4   : > { %v21320_v39 = vmul.f32 0.03125, %v21310_v59 }
0x12a5   : > { %v29196_v63 = vsub.f32 %v21289_v11, %v21321_v38  ;;  %v23835_v11 = vpack.c.bf16 %v22466_v17, %v22465_v35 }
0x12a6   : > { %v29198_v10 = vsub.f32 %v21288_v13, %v21320_v39  ;;  %v22468_v13 = vld [vmem:[%s29495_s7 + $0xa8] sm:$0xff] }
0x12a7   : > { %v21337_v26 = vmul.f32 %v29196_v63, %v29196_v63  ;;  %23836 = vmatprep.subr.bf16.mxu1 %v23835_v11  ;;  %v23839_v47 = vpack.c.bf16 %v22468_v13, %v22467_v5  ;;  %v22477_v13 = vld [vmem:[%s29495_s7 + $0xf0] sm:$0xff] }
0x12a8   : > { %v21336_v62 = vmul.f32 %v29198_v10, %v29198_v10  ;;  %23838 = vmatpush3.bf16.msra.mxu1 %v23835_v11 }
0x12a9   : > { %v21359_v41 = vsel %vm464_vm1, %v21337_v26, 0.0  ;;  %23840 = vmatprep.subr.bf16.mxu1 %v23839_v47 }
0x12aa   : > { %21360 = vadd.xlane.f32.xlu0 %v21359_v41  ;;  %v21356_v43 = vsel %vm464_vm1, %v21336_v62, 0.0 }
0x12ab   : > { %21357 = vadd.xlane.f32.xlu1 %v21356_v43 }
0x12ac   : > { %23842 = vmatpush3.bf16.msra.mxu1 %v23839_v47  ;;  %v22478_v47 = vld [vmem:[%s29495_s7 + $0xf8] sm:$0xff] }
0x12ad   : > { %23844 = vmatprep.subr.bf16.mxu1 %v23843_v8  ;;  %v23859_v2 = vpack.c.bf16 %v22478_v47, %v22477_v13 }
0x12b0   : > { %23846 = vmatpush3.bf16.msra.mxu1 %v23843_v8 }
0x12b1   : > { %23848 = vmatprep.subr.bf16.mxu1 %v23847_v54 }
0x12b4   : > { %23850 = vmatpush3.bf16.msra.mxu1 %v23847_v54 }
0x12cd   : > { %v21343_v20 = vpop.xlane.xlu0 %21342 }
0x12ce   : > { %v21363_v23 = vmul.f32 0.03125, %v21343_v20  ;;  %v21340_v48 = vpop.xlane.xlu1 %21339 }
0x12cf   : > { %v21362_v32 = vmul.f32 0.03125, %v21340_v48 }
0x12d0   : > { %v21371_v18 = vadd.f32 1e-05, %v21363_v23 }
0x12d1   : > { %v21370_v16 = vadd.f32 1e-05, %v21362_v32 }
0x12d2   : > { %24213 = vrsqrt.f32 %v21371_v18 }
0x12d3   : > { %24215 = vrsqrt.f32 %v21370_v16 }
0x12dc   : > { %v24214_v12 = vpop.eup %24213 }
0x12dd   : > { %v24216_v15 = vpop.eup %24215  ;;  %v21387_v19 = vmul.f32 %v24214_v12, %v29154_v58  ;;  %v23851_v58 = vpack.c.bf16 %v22474_v27, %v22473_v60 }
0x12de   : > { %v21386_v53 = vmul.f32 %v24216_v15, %v29156_v9 }
0x12df   : > { %v21399_v36 = vmul.f32 %v29238_v21, %v21387_v19  ;;  %23852 = vmatprep.subr.bf16.mxu1 %v23851_v58 }
0x12e0   : > { %v21398_v51 = vmul.f32 %v29238_v21, %v21386_v53  ;;  %23854 = vmatpush3.bf16.msra.mxu1 %v23851_v58 }
0x12e1   : > { %v29264_v4 = vadd.f32 %v29250_v3, %v21399_v36  ;;  %23856 = vmatprep.subr.bf16.mxu1 %v23855_v52 }
0x12e2   : > { %v29261_v9 = vadd.f32 %v29250_v3, %v21398_v51 }
0x12e4   : > { %23684 = vmatprep.mubr.msk.f32.mxu0 %vm464_vm1, %v29261_v9  ;;  %23858 = vmatpush3.bf16.msra.mxu1 %v23855_v52 }
0x12e5   : > { %23685 = vmatmul.mubr.msk.f32.vlgmr.msra.gmra.mrb[164].mxu0 %vm464_vm1, %v29264_v4  ;;  %23860 = vmatprep.subr.bf16.mxu1 %v23859_v2 }
0x12e6   : > { %v21346_v42 = vpop.xlane.xlu1 %21345 }
0x12e7   : > { %v21364_v6 = vmul.f32 0.03125, %v21346_v42 }
0x12e8   : > { %23862 = vmatpush3.bf16.msra.mxu1 %v23859_v2 }
0x12e9   : > { %v21372_v14 = vadd.f32 1e-05, %v21364_v6 }
0x12ea   : > { %v21349_v1 = vpop.xlane.xlu0 %21348 }
0x12eb   : > { %24217 = vrsqrt.f32 %v21372_v14  ;;  %v21365_v50 = vmul.f32 0.03125, %v21349_v1 }
0x12ed   : > { %v21373_v7 = vadd.f32 1e-05, %v21365_v50 }
0x12ef   : > { %24219 = vrsqrt.f32 %v21373_v7 }
0x12f5   : > { %v24218_v24 = vpop.eup %24217 }
0x12f6   : > { %v21388_v33 = vmul.f32 %v24218_v24, %v29164_v31 }
0x12f8   : > { %v21400_v55 = vmul.f32 %v29238_v21, %v21388_v33 }
0x12f9   : > { %v24220_v0 = vpop.eup %24219 }
0x12fa   : > { %v29273_v38 = vadd.f32 %v29250_v3, %v21400_v55  ;;  %v21389_v59 = vmul.f32 %v24220_v0, %v29168_v22 }
0x12fc   : > { %23687 = vmatprep.mubr.msk.f32.mxu0 %vm464_vm1, %v29273_v38  ;;  %v21401_v39 = vmul.f32 %v29238_v21, %v21389_v59 }
0x12fe   : > { %v29280_v26 = vadd.f32 %v29250_v3, %v21401_v39  ;;  %v29885_v39 = vld [vmem:[#allocation13_spill] sm:$0xff] }
0x1300   : > { %23688 = vmatmul.mubr.msk.f32.gmra.mrb[166].mxu0 %vm464_vm1, %v29280_v26 }
0x1313   : > { %v21355_v31 = vpop.xlane.xlu0 %21354 }
0x1314   : > { %v21367_v62 = vmul.f32 0.03125, %v21355_v31  ;;  %v21352_v41 = vpop.xlane.xlu1 %21351  ;;  %v29886_v31 = vsub.s32 5, %v29885_v39 }
0x1315   : > { %v21366_v43 = vmul.f32 0.03125, %v21352_v41 }
0x1316   : > { %v21375_v20 = vadd.f32 1e-05, %v21367_v62  ;;  %v21584_v62 = vrot.slane %v29134_v49, %v29886_v31 }
0x1317   : > { %v21374_v23 = vadd.f32 1e-05, %v21366_v43 }
0x1318   : > { %24221 = vrsqrt.f32 %v21375_v20 }
0x1319   : > { %24223 = vrsqrt.f32 %v21374_v23 }
0x1322   : > { %v24222_v22 = vpop.eup %24221 }
0x1323   : > { %v24224_v48 = vpop.eup %24223  ;;  %v21391_v32 = vmul.f32 %v24222_v22, %v29186_v30 }
0x1324   : > { %v21390_v25 = vmul.f32 %v24224_v48, %v29188_v61 }
0x1325   : > { %v21403_v46 = vmul.f32 %v29238_v21, %v21391_v32 }
0x1326   : > { %v21402_v35 = vmul.f32 %v29238_v21, %v21390_v25 }
0x1327   : > { %v29292_v40 = vadd.f32 %v29250_v3, %v21403_v46 }
0x1328   : > { %v29289_v18 = vadd.f32 %v29250_v3, %v21402_v35 }
0x132a   : > { %23690 = vmatprep.mubr.msk.f32.mxu0 %vm464_vm1, %v29289_v18 }
0x132b   : > { %23691 = vmatmul.mubr.msk.f32.gmra.mrb[168].mxu0 %vm464_vm1, %v29292_v40 }
0x1337   : > { %v21361_v17 = vpop.xlane.xlu0 %21360 }
0x1338   : > { %v21369_v30 = vmul.f32 0.03125, %v21361_v17  ;;  %v21358_v16 = vpop.xlane.xlu1 %21357 }
0x1339   : > { %v21368_v61 = vmul.f32 0.03125, %v21358_v16 }
0x133a   : > { %v21377_v11 = vadd.f32 1e-05, %v21369_v30 }
0x133b   : > { %v21376_v5 = vadd.f32 1e-05, %v21368_v61 }
0x133c   : > { %24225 = vrsqrt.f32 %v21377_v11 }
0x133d   : > { %24227 = vrsqrt.f32 %v21376_v5 }
0x1346   : > { %v24226_v56 = vpop.eup %24225 }
0x1347   : > { %v24228_v8 = vpop.eup %24227  ;;  %v21393_v37 = vmul.f32 %v24226_v56, %v29196_v63  ;;  %v29323_v63 = vld [vmem:[%s29490_s2] sm:$0xff] }
0x1348   : > { %v21392_v34 = vmul.f32 %v24228_v8, %v29198_v10  ;;  %v29884_v10 = vld [vmem:[#allocation19_spill] sm:$0xff] }
0x1349   : > { %v21405_v44 = vmul.f32 %v29238_v21, %v21393_v37 }
0x134a   : > { %v21404_v12 = vmul.f32 %v29238_v21, %v21392_v34  ;;  %v21426_v21 = vrot.slane %v29323_v63, %v29884_v10 }
0x134b   : > { %v29312_v15 = vadd.f32 %v29250_v3, %v21405_v44 }
0x134c   : > { %v29309_v54 = vadd.f32 %v29250_v3, %v21404_v12 }
0x134e   : > { %23693 = vmatprep.mubr.msk.f32.mxu0 %vm464_vm1, %v29309_v54 }
0x134f   : > { %23694 = vmatmul.mubr.msk.f32.gmra.mrb[170].mxu0 %vm464_vm1, %v29312_v15 }
0x1350   : > { %23748 = vmatprep.mubr.msk.f32.mxu0 %vm24316_vm2, %v29855_v57 }
0x13b8   : > { %v23686_v19 = vpop.f32.mrb[164].mxu0 }
0x13b9   : > { %v21523_v60 = vadd.f32 %v23686_v19, %v21426_v21  ;;  %v21517_v27 = vpop.f32.mrb[165].mxu0 }
0x13ba   : > { %v21518_v53 = vadd.f32 %v21517_v27, %v21426_v21 }
0x13bb   : > { %v21557_v3 = vmax.f32 %v21523_v60, 0.0 }
0x13bc   : > { %v21556_v45 = vmax.f32 %v21518_v53, 0.0 }
0x13be   : > { %23728 = vmatprep.mubr.f32.mxu1 %v21556_v45 }
0x13bf   : > { %23729 = vmatmul.mubr.f32.vlgmr.msra.gmra.mrb[148].mxu1 %v21557_v3 }
0x13d3   : > { %v23689_v36 = vpop.f32.mrb[166].mxu0 }
0x13d4   : > { %v21533_v51 = vadd.f32 %v23689_v36, %v21426_v21  ;;  %v21527_v58 = vpop.f32.mrb[167].mxu0 }
0x13d5   : > { %v21528_v57 = vadd.f32 %v21527_v58, %v21426_v21 }
0x13d6   : > { %v21559_v29 = vmax.f32 %v21533_v51, 0.0 }
0x13d7   : > { %v21558_v28 = vmax.f32 %v21528_v57, 0.0 }
0x13d9   : > { %23731 = vmatprep.mubr.f32.mxu1 %v21558_v28 }
0x13da   : > { %23732 = vmatmul.mubr.f32.gmra.mrb[150].mxu1 %v21559_v29 }
0x13fe   : > { %v23692_v52 = vpop.f32.mrb[168].mxu0 }
0x13ff   : > { %v21543_v42 = vadd.f32 %v23692_v52, %v21426_v21  ;;  %v21537_v6 = vpop.f32.mrb[169].mxu0 }
0x1400   : > { %v21538_v14 = vadd.f32 %v21537_v6, %v21426_v21 }
0x1401   : > { %v21561_v50 = vmax.f32 %v21543_v42, 0.0 }
0x1402   : > { %v21560_v1 = vmax.f32 %v21538_v14, 0.0 }
0x1404   : > { %23734 = vmatprep.mubr.f32.mxu1 %v21560_v1 }
0x1405   : > { %23735 = vmatmul.mubr.f32.gmra.mrb[152].mxu1 %v21561_v50 }
0x1422   : > { %v23695_v7 = vpop.f32.mrb[170].mxu0 }
0x1423   : > { %v21553_v24 = vadd.f32 %v23695_v7, %v21426_v21  ;;  %v21547_v33 = vpop.f32.mrb[171].mxu0 }
0x1424   : > { %v21548_v55 = vadd.f32 %v21547_v33, %v21426_v21 }
0x1425   : > { %v21563_v59 = vmax.f32 %v21553_v24, 0.0 }
0x1426   : > { %v21562_v0 = vmax.f32 %v21548_v55, 0.0 }
0x1428   : > { %23737 = vmatprep.mubr.f32.mxu1 %v21562_v0 }
0x1429   : > { %23738 = vmatmul.mubr.f32.gmra.mrb[154].mxu1 %v21563_v59 }
0x1492   : > { %v23730_v41 = vpop.f32.mrb[148].mxu1 }
0x1493   : > { %v21657_v43 = vadd.f32 %v23730_v41, %v21584_v62  ;;  %v21651_v20 = vpop.f32.mrb[149].mxu1 }
0x1494   : > { %v21652_v23 = vadd.f32 %v21651_v20, %v21584_v62 }
0x1495   : > { %v21691_v22 = vadd.f32 %v21657_v43, %v29264_v4 }
0x1496   : > { %v21690_v48 = vadd.f32 %v21652_v23, %v29261_v9 }
0x1497   : > { %v21701_v32 = vsel %vm464_vm1, %v21691_v22, 0.0 }
0x1498   : > { %21702 = vadd.xlane.f32.xlu0 %v21701_v32  ;;  %v21698_v25 = vsel %vm464_vm1, %v21690_v48, 0.0 }
0x1499   : > { %21699 = vadd.xlane.f32.xlu1 %v21698_v25 }
0x14ad   : > { %v23733_v46 = vpop.f32.mrb[150].mxu1 }
0x14ae   : > { %v21667_v35 = vadd.f32 %v23733_v46, %v21584_v62  ;;  %v21661_v17 = vpop.f32.mrb[151].mxu1 }
0x14af   : > { %v21662_v30 = vadd.f32 %v21661_v17, %v21584_v62 }
0x14b0   : > { %v21693_v16 = vadd.f32 %v21667_v35, %v29280_v26 }
0x14b1   : > { %v21692_v61 = vadd.f32 %v21662_v30, %v29273_v38  ;;  %v22479_v30 = vld [vmem:[%s29494_s6 + $0x40] sm:$0xff] }
0x14b2   : > { %v21707_v11 = vsel %vm464_vm1, %v21693_v16, 0.0 }
0x14b3   : > { %21708 = vadd.xlane.f32.xlu0 %v21707_v11  ;;  %v21704_v4 = vsel %vm464_vm1, %v21692_v61, 0.0  ;;  %v24323_v11 = vmov 0.0|0.0  }
0x14b4   : > { %21705 = vadd.xlane.f32.xlu1 %v21704_v4  ;;  %23863 = vmatprep.subr.bf16.mxu0 %v24323_v11 }
0x14d8   : > { %v23736_v9 = vpop.f32.mrb[152].mxu1 }
0x14d9   : > { %v21677_v5 = vadd.f32 %v23736_v9, %v21584_v62  ;;  %v21671_v13 = vpop.f32.mrb[153].mxu1  ;;  %v22482_v9 = vld [vmem:[%s29494_s6 + $0x58] sm:$0xff] }
0x14da   : > { %v21672_v47 = vadd.f32 %v21671_v13, %v21584_v62 }
0x14db   : > { %v21695_v2 = vadd.f32 %v21677_v5, %v29292_v40 }
0x14dc   : > { %v21694_v56 = vadd.f32 %v21672_v47, %v29289_v18 }
0x14dd   : > { %v21713_v8 = vsel %vm464_vm1, %v21695_v2, 0.0 }
0x14de   : > { %21714 = vadd.xlane.f32.xlu0 %v21713_v8  ;;  %v21710_v26 = vsel %vm464_vm1, %v21694_v56, 0.0 }
0x14df   : > { %21711 = vadd.xlane.f32.xlu1 %v21710_v26 }
0x14fc   : > { %v23739_v38 = vpop.f32.mrb[154].mxu1 }
0x14fd   : > { %v21687_v37 = vadd.f32 %v23739_v38, %v21584_v62  ;;  %v21681_v34 = vpop.f32.mrb[155].mxu1 }
0x14fe   : > { %v21682_v44 = vadd.f32 %v21681_v34, %v21584_v62 }
0x14ff   : > { %v21697_v12 = vadd.f32 %v21687_v37, %v29312_v15 }
0x1500   : > { %v21696_v21 = vadd.f32 %v21682_v44, %v29309_v54 }
0x1501   : > { %v21719_v19 = vsel %vm464_vm1, %v21697_v12, 0.0 }
0x1502   : > { %21720 = vadd.xlane.f32.xlu0 %v21719_v19  ;;  %v21716_v40 = vsel %vm464_vm1, %v21696_v21, 0.0 }
0x1503   : > { %21717 = vadd.xlane.f32.xlu1 %v21716_v40 }
0x1525   : > { %v21703_v18 = vpop.xlane.xlu0 %21702 }
0x1526   : > { %v21723_v60 = vmul.f32 0.03125, %v21703_v18  ;;  %v21700_v27 = vpop.xlane.xlu1 %21699 }
0x1527   : > { %v21722_v53 = vmul.f32 0.03125, %v21700_v27 }
0x1528   : > { %v29346_v45 = vsub.f32 %v21691_v22, %v21723_v60 }
0x1529   : > { %v29348_v3 = vsub.f32 %v21690_v48, %v21722_v53 }
0x152a   : > { %v21739_v36 = vmul.f32 %v29346_v45, %v29346_v45 }
0x152b   : > { %v21738_v54 = vmul.f32 %v29348_v3, %v29348_v3 }
0x152c   : > { %v21749_v15 = vsel %vm464_vm1, %v21739_v36, 0.0 }
0x152d   : > { %21750 = vadd.xlane.f32.xlu0 %v21749_v15  ;;  %v21746_v51 = vsel %vm464_vm1, %v21738_v54, 0.0 }
0x152e   : > { %21747 = vadd.xlane.f32.xlu1 %v21746_v51  ;;  %v29400_v51 = vrot.slane %v29134_v49, %v29884_v10 }
0x1540   : > { %v21709_v58 = vpop.xlane.xlu0 %21708 }
0x1541   : > { %v21725_v57 = vmul.f32 0.03125, %v21709_v58  ;;  %v21706_v28 = vpop.xlane.xlu1 %21705 }
0x1542   : > { %v21724_v29 = vmul.f32 0.03125, %v21706_v28 }
0x1543   : > { %v29356_v52 = vsub.f32 %v21693_v16, %v21725_v57  ;;  %v22480_v16 = vld [vmem:[%s29494_s6 + $0x48] sm:$0xff] }
0x1544   : > { %v29358_v42 = vsub.f32 %v21692_v61, %v21724_v29  ;;  %v22481_v61 = vld [vmem:[%s29494_s6 + $0x50] sm:$0xff]  ;;  %v23864_v4 = vpack.c.bf16 %v22480_v16, %v22479_v30 }
0x1545   : > { %v21741_v6 = vmul.f32 %v29356_v52, %v29356_v52  ;;  %v23867_v5 = vpack.c.bf16 %v22482_v9, %v22481_v61 }
0x1546   : > { %v21740_v14 = vmul.f32 %v29358_v42, %v29358_v42  ;;  %23865 = vmatpush3.bf16.msra.mxu0 %v23864_v4 }
0x1547   : > { %v21755_v1 = vsel %vm464_vm1, %v21741_v6, 0.0  ;;  %23866 = vmatprep.subr.bf16.mxu0 %v24323_v11 }
0x1548   : > { %21756 = vadd.xlane.f32.xlu0 %v21755_v1  ;;  %v21752_v50 = vsel %vm464_vm1, %v21740_v14, 0.0  ;;  %v29887_v14 = vld [vmem:[#allocation16_spill] sm:$0xff] }
0x1549   : > { %21753 = vadd.xlane.f32.xlu1 %v21752_v50  ;;  %v29407_v1 = vrot.slane %v29134_v49, %v29887_v14 }
0x154a   : > { %23868 = vmatpush3.bf16.msra.mxu0 %v23867_v5 }
0x156b   : > { %v21715_v7 = vpop.xlane.xlu0 %21714 }
0x156c   : > { %v21727_v24 = vmul.f32 0.03125, %v21715_v7  ;;  %v21712_v33 = vpop.xlane.xlu1 %21711 }
0x156d   : > { %v21726_v55 = vmul.f32 0.03125, %v21712_v33 }
0x156e   : > { %v29366_v0 = vsub.f32 %v21695_v2, %v21727_v24 }
0x156f   : > { %v29368_v59 = vsub.f32 %v21694_v56, %v21726_v55 }
0x1570   : > { %v21743_v39 = vmul.f32 %v29366_v0, %v29366_v0 }
0x1571   : > { %v21742_v31 = vmul.f32 %v29368_v59, %v29368_v59 }
0x1572   : > { %v21761_v62 = vsel %vm464_vm1, %v21743_v39, 0.0 }
0x1573   : > { %21762 = vadd.xlane.f32.xlu0 %v21761_v62  ;;  %v21758_v41 = vsel %vm464_vm1, %v21742_v31, 0.0 }
0x1574   : > { %21759 = vadd.xlane.f32.xlu1 %v21758_v41 }
0x158f   : > { %v21721_v43 = vpop.xlane.xlu0 %21720 }
0x1590   : > { %v21729_v20 = vmul.f32 0.03125, %v21721_v43  ;;  %v21718_v23 = vpop.xlane.xlu1 %21717 }
0x1591   : > { %v21728_v22 = vmul.f32 0.03125, %v21718_v23 }
0x1592   : > { %v29376_v48 = vsub.f32 %v21697_v12, %v21729_v20 }
0x1593   : > { %v29378_v32 = vsub.f32 %v21696_v21, %v21728_v22 }
0x1594   : > { %v21745_v25 = vmul.f32 %v29376_v48, %v29376_v48 }
0x1595   : > { %v21744_v46 = vmul.f32 %v29378_v32, %v29378_v32 }
0x1596   : > { %v21767_v35 = vsel %vm464_vm1, %v21745_v25, 0.0 }
0x1597   : > { %21768 = vadd.xlane.f32.xlu0 %v21767_v35  ;;  %v21764_v17 = vsel %vm464_vm1, %v21744_v46, 0.0 }
0x1598   : > { %21765 = vadd.xlane.f32.xlu1 %v21764_v17 }
0x15ba   : > { %v21751_v47 = vpop.xlane.xlu0 %21750 }
0x15bb   : > { %v21748_v13 = vpop.xlane.xlu1 %21747  ;;  %v21771_v56 = vmul.f32 0.03125, %v21751_v47 }
0x15bc   : > { %v21770_v8 = vmul.f32 0.03125, %v21748_v13 }
0x15bd   : > { %v21779_v37 = vadd.f32 1e-05, %v21771_v56 }
0x15be   : > { %v21778_v44 = vadd.f32 1e-05, %v21770_v8 }
0x15bf   : > { %24229 = vrsqrt.f32 %v21779_v37 }
0x15c0   : > { %24231 = vrsqrt.f32 %v21778_v44 }
0x15c9   : > { %v24230_v36 = vpop.eup %24229 }
0x15ca   : > { %v24232_v54 = vpop.eup %24231  ;;  %v21795_v58 = vmul.f32 %v24230_v36, %v29346_v45 }
0x15cb   : > { %v21794_v57 = vmul.f32 %v24232_v54, %v29348_v3 }
0x15cc   : > { %v21807_v50 = vmul.f32 %v29400_v51, %v21795_v58 }
0x15cd   : > { %v21806_v7 = vmul.f32 %v29400_v51, %v21794_v57 }
0x15ce   : > { %v21819_v3 = vadd.f32 %v29407_v1, %v21807_v50 }
0x15d0   : > { %v21833_v62 = vsel %vm464_vm1, %v21819_v3, 0.0 }
0x15d1   : > { %v21834_v22 = vrot.slane %v21833_v62, 4 }
0x15d3   : > { %v21835_v9 = vadd.f32 %v21834_v22, %v21833_v62 }
0x15d5   : > { %v21757_v34 = vpop.xlane.xlu0 %21756  ;;  %v21836_v8 = vrot.slane %v21835_v9, 2 }
0x15d6   : > { %v21754_v2 = vpop.xlane.xlu1 %21753  ;;  %v21773_v19 = vmul.f32 0.03125, %v21757_v34 }
0x15d7   : > { %v21772_v26 = vmul.f32 0.03125, %v21754_v2 }
0x15d8   : > { %v21781_v60 = vadd.f32 1e-05, %v21773_v19 }
0x15d9   : > { %v21780_v12 = vadd.f32 1e-05, %v21772_v26 }
0x15db   : > { %24233 = vrsqrt.f32 %v21780_v12  ;;  %v21837_v12 = vadd.f32 %v21836_v8, %v21835_v9 }
0x15dd   : > { %v21838_v54 = vrot.slane %v21837_v12, 1 }
0x15e5   : > { %v24234_v15 = vpop.eup %24233 }
0x15e6   : > { %v21796_v28 = vmul.f32 %v24234_v15, %v29358_v42  ;;  %v21818_v42 = vadd.f32 %v29407_v1, %v21806_v7 }
0x15e8   : > { %v21808_v24 = vmul.f32 %v29400_v51, %v21796_v28  ;;  %v21826_v41 = vsel %vm464_vm1, %v21818_v42, 0.0 }
0x15e9   : > { %v21827_v25 = vrot.slane %v21826_v41, 4 }
0x15ea   : > { %v21820_v55 = vadd.f32 %v29407_v1, %v21808_v24 }
0x15eb   : > { %v21828_v5 = vadd.f32 %v21827_v25, %v21826_v41 }
0x15ed   : > { %v21829_v26 = vrot.slane %v21828_v5, 2 }
0x1600   : > { %v21763_v40 = vpop.xlane.xlu0 %21762 }
0x1601   : > { %v21760_v38 = vpop.xlane.xlu1 %21759  ;;  %v21775_v27 = vmul.f32 0.03125, %v21763_v40 }
0x1602   : > { %v21774_v21 = vmul.f32 0.03125, %v21760_v38 }
0x1603   : > { %v21783_v53 = vadd.f32 1e-05, %v21775_v27 }
0x1604   : > { %v21782_v18 = vadd.f32 1e-05, %v21774_v21  ;;  %v21830_v21 = vadd.f32 %v21829_v26, %v21828_v5 }
0x1606   : > { %24235 = vrsqrt.f32 %v21782_v18  ;;  %v21831_v15 = vrot.slane %v21830_v21, 1 }
0x1607   : > { %24237 = vrsqrt.f32 %v21781_v60 }
0x1608   : > { %24239 = vrsqrt.f32 %v21783_v53 }
0x1610   : > { %v24236_v29 = vpop.eup %24235 }
0x1611   : > { %v24238_v6 = vpop.eup %24237  ;;  %v21798_v10 = vmul.f32 %v24236_v29, %v29368_v59  ;;  %v21840_v59 = vsel %vm464_vm1, %v21820_v55, 0.0 }
0x1612   : > { %v21797_v45 = vmul.f32 %v24238_v6, %v29356_v52  ;;  %v24240_v33 = vpop.eup %24239  ;;  %v21841_v17 = vrot.slane %v21840_v59, 4 }
0x1613   : > { %v21810_v49 = vmul.f32 %v29400_v51, %v21798_v10  ;;  %v21799_v31 = vmul.f32 %v24240_v33, %v29366_v0  ;;  %v21839_v10 = vadd.f32 %v21838_v54, %v21837_v12 }
0x1614   : > { %v21809_v39 = vmul.f32 %v29400_v51, %v21797_v45  ;;  %v21842_v13 = vadd.f32 %v21841_v17, %v21840_v59  ;;  %v21832_v45 = vadd.f32 %v21831_v15, %v21830_v21 }
0x1615   : > { %v21822_v52 = vadd.f32 %v29407_v1, %v21810_v49  ;;  %v21811_v20 = vmul.f32 %v29400_v51, %v21799_v31  ;;  %v21883_v62 = vmul.f32 0.125, %v21839_v10 }
0x1616   : > { %v21821_v43 = vadd.f32 %v29407_v1, %v21809_v39  ;;  %v21843_v38 = vrot.slane %v21842_v13, 2  ;;  %v21882_v41 = vmul.f32 0.125, %v21832_v45 }
0x1617   : > { %v21854_v0 = vsel %vm464_vm1, %v21822_v52, 0.0  ;;  %v21823_v11 = vadd.f32 %v29407_v1, %v21811_v20 }
0x1618   : > { %v21847_v61 = vsel %vm464_vm1, %v21821_v43, 0.0  ;;  %v21855_v47 = vrot.slane %v21854_v0, 4  ;;  %v21844_v19 = vadd.f32 %v21843_v38, %v21842_v13 }
0x1619   : > { %v21848_v2 = vrot.slane %v21847_v61, 4  ;;  %v21861_v56 = vsel %vm464_vm1, %v21823_v11, 0.0 }
0x161a   : > { %v21856_v37 = vadd.f32 %v21855_v47, %v21854_v0  ;;  %v21862_v44 = vrot.slane %v21861_v56, 4  ;;  %v21845_v57 = vrot.slane %v21844_v19, 1 }
0x161b   : > { %v21849_v34 = vadd.f32 %v21848_v2, %v21847_v61 }
0x161c   : > { %v21857_v40 = vrot.slane %v21856_v37, 2  ;;  %v21863_v27 = vadd.f32 %v21862_v44, %v21861_v56  ;;  %v21846_v3 = vadd.f32 %v21845_v57, %v21844_v19 }
0x161d   : > { %v21850_v60 = vrot.slane %v21849_v34, 2 }
0x161e   : > { %v21858_v28 = vadd.f32 %v21857_v40, %v21856_v37  ;;  %v21864_v50 = vrot.slane %v21863_v27, 2  ;;  %v21898_v37 = vrot.slane %v29323_v63, %v29887_v14 }
0x161f   : > { %v21851_v6 = vadd.f32 %v21850_v60, %v21849_v34 }
0x1620   : > { %v21859_v42 = vrot.slane %v21858_v28, 1  ;;  %v21865_v39 = vadd.f32 %v21864_v50, %v21863_v27 }
0x1621   : > { %v21852_v55 = vrot.slane %v21851_v6, 1 }
0x1622   : > { %v21860_v43 = vadd.f32 %v21859_v42, %v21858_v28 }
0x1623   : > { %v21853_v20 = vadd.f32 %v21852_v55, %v21851_v6 }
0x1624   : > { %v21769_v23 = vpop.xlane.xlu0 %21768  ;;  %v21886_v17 = vmul.f32 0.125, %v21860_v43 }
0x1625   : > { %v21777_v46 = vmul.f32 0.03125, %v21769_v23  ;;  %v21766_v35 = vpop.xlane.xlu1 %21765  ;;  %v21866_v23 = vrot.slane %v21865_v39, 1  ;;  %v21885_v61 = vmul.f32 0.125, %v21853_v20 }
0x1626   : > { %v21776_v30 = vmul.f32 0.03125, %v21766_v35 }
0x1627   : > { %v21785_v16 = vadd.f32 1e-05, %v21777_v46  ;;  %v21908_v46 = vsel %vm21907_vm5, %v21883_v62, %v21882_v41  ;;  %v21867_v0 = vadd.f32 %v21866_v23, %v21865_v39 }
0x1628   : > { %v21784_v4 = vadd.f32 1e-05, %v21776_v30 }
0x1629   : > { %24241 = vrsqrt.f32 %v21785_v16  ;;  %v21887_v47 = vmul.f32 0.125, %v21867_v0 }
0x162a   : > { %24243 = vrsqrt.f32 %v21784_v4 }
0x1633   : > { %v24242_v18 = vpop.eup %24241 }
0x1634   : > { %v24244_v53 = vpop.eup %24243  ;;  %v21801_v36 = vmul.f32 %v24242_v18, %v29376_v48 }
0x1635   : > { %v21800_v58 = vmul.f32 %v24244_v53, %v29378_v32 }
0x1636   : > { %v21813_v29 = vmul.f32 %v29400_v51, %v21801_v36 }
0x1637   : > { %v21812_v7 = vmul.f32 %v29400_v51, %v21800_v58  ;;  %v21884_v51 = vmul.f32 0.125, %v21846_v3 }
0x1638   : > { %v21825_v24 = vadd.f32 %v29407_v1, %v21813_v29 }
0x1639   : > { %v21824_v33 = vadd.f32 %v29407_v1, %v21812_v7  ;;  %v21910_v30 = vsel %vm21909_vm6, %v21884_v51, %v21908_v46 }
0x163a   : > { %v21875_v48 = vsel %vm464_vm1, %v21825_v24, 0.0  ;;  %v21912_v9 = vsel %vm21911_vm7, %v21885_v61, %v21910_v30 }
0x163b   : > { %v21876_v32 = vrot.slane %v21875_v48, 4  ;;  %v21868_v49 = vsel %vm464_vm1, %v21824_v33, 0.0  ;;  %v21914_v13 = vsel %vm21913_vm8, %v21886_v17, %v21912_v9 }
0x163c   : > { %v21869_v31 = vrot.slane %v21868_v49, 4  ;;  %v21916_v8 = vsel %vm21915_vm9, %v21887_v47, %v21914_v13 }
0x163d   : > { %v21877_v59 = vadd.f32 %v21876_v32, %v21875_v48 }
0x163e   : > { %v21870_v52 = vadd.f32 %v21869_v31, %v21868_v49 }
0x163f   : > { %v21878_v1 = vrot.slane %v21877_v59, 2 }
0x1640   : > { %v21871_v22 = vrot.slane %v21870_v52, 2 }
0x1641   : > { %v21879_v25 = vadd.f32 %v21878_v1, %v21877_v59 }
0x1642   : > { %v21872_v35 = vadd.f32 %v21871_v22, %v21870_v52 }
0x1643   : > { %v21880_v16 = vrot.slane %v21879_v25, 1 }
0x1644   : > { %v21873_v11 = vrot.slane %v21872_v35, 1 }
0x1645   : > { %v21881_v4 = vadd.f32 %v21880_v16, %v21879_v25 }
0x1646   : > { %v21874_v5 = vadd.f32 %v21873_v11, %v21872_v35 }
0x1647   : > { %v21889_v56 = vmul.f32 0.125, %v21881_v4 }
0x1648   : > { %v21888_v2 = vmul.f32 0.125, %v21874_v5 }
0x164a   : > { %v21918_v26 = vsel %vm21917_vm10, %v21888_v2, %v21916_v8 }
0x164b   : > { %v21920_v38 = vsel %vm21919_vm11, %v21889_v56, %v21918_v26 }
0x164c   : > { %23749 = vmatmul.mubr.msk.f32.vlgmr.msra.gmra.mrb[172].mxu0 %vm464_vm1, %v21920_v38 }
0x171f   : > { %v21989_v34 = vpop.f32.mrb[172].mxu0 }
0x1720   : > { %v21990_v44 = vadd.f32 %v21989_v34, %v21898_v37  ;;  %v23750_v12 = vpop.f32.mrb[173].mxu0 }
0x1722   : > { %21993 = vst [vmem:[%s299_s25] sm:$0xff] %v21990_v44 }
0x1723   : > { %24260 = shalt.err (!%p24257_p3)
}
0x1724   : > { %s24261_s13 = scalar_lea.hbm %s29446_s26, 128  ;;  %s24265_s24 = scalar_lea.hbm %s29496_s8, 256 }
0x1725   : > { %p24262_p4 = scmp.ne.s32.totalorder %s29446_s26, %s24261_s13  ;;  %p24266_p9 = scmp.lt.u32.totalorder %s29446_s26, %s29496_s8 }
0x1726   : > { %p24267_p10 = scmp.lt.u32.totalorder %s24265_s24, %s24261_s13  ;;  %p24269_p12 = scmp.lt.u32.totalorder %s24261_s13, %s29446_s26 }
0x1727   : > { %p24263_p7 = pnand %p24262_p4, %p24408_p5 }
0x1728   : > { %p24268_p11 = por %p24267_p10, %p24266_p9 }
0x1729   : > { %p24264_p8 = pneg %p24263_p7 }
0x172a   : > { %p24270_p13 = por %p24269_p12, %p24268_p11 }
0x172c   : > { %p24271_p0 = pnand %p24270_p13, %p24264_p8 }
0x172e   : > { %24274 = shalt.err (!%p24271_p0)
}
0x172f   : > { %23873 = dma.vmem_to_hbm [thread:$0]  (%p24408_p5), %s29448_s21, 128, %s29446_s26, %s21995_s10  }
0x1730 PF: > { %p23879_p1 = scmp.ge.s32.totalorder %s24309_s30, 2  ;;  %s22020_s12 = sand.u32 1, %s24297_s27  }
0x1731   : > { %s22021_s18 = scalar_lea.sflag [#allocation3], %s22020_s12 }
0x1732   : > { %p23876_p2 = pnand %p23879_p1, %p24412_p6 }
0x1734   : > { %24292 = dma.done.wait (!%p23876_p2), %s22021_s18, 128  }
0x1735   : > { %24294 = vsyncadd (!%p23876_p2), %s22021_s18, 4294967168  ;;  %p18_p3 = scmp.ge.s32.totalorder %s24395_s11, 4   ;;  %s29888_s27 = smov %s24301_s28 }
0x1736   : > { %s29889_s28 = smov %s24305_s29  ;;  %s29890_s29 = smov %s24406_s14 }
0x1737   : > { %s29891_s30 = smov %s24395_s11  ;;  %20 = sbr.rel (!%p18_p3) target bundleno = 3 (0x3), region = 93 }
0x173e   :  { %22026 = vsyncpa [#allocation3], 1 }
0x173f   :  { %22028 = vsyncpa [#allocation3 + $0x1], 1 }

</bundles_post_ra>
